<compile_context>
chip_gen: v6e
topology: v6e:2x2x1
jax: 0.10.0
libtpu: 0.0.40
codegen_flags: <defaults>
</compile_context>

<pallas_src>
import functools

import jax
import jax.numpy as jnp
from jax.experimental import pallas as pl
from jax.experimental.pallas import tpu as pltpu


# ----------------------------------------------------------------------------
# Pallas kernel: bilinear combine (folded into layer 1) + IMNET decoder MLP.
# Layout: features on sublanes, points on lanes.
# ----------------------------------------------------------------------------
def _decoder_kernel(corners_ref, scale_ref,
                    w1_ref, b1_ref, w2_ref, b2_ref, w3_ref, b3_ref,
                    w4_ref, b4_ref, w5_ref, b5_ref, w6_ref, b6_ref,
                    w7_ref, b7_ref, out_ref):
    c4, tp = corners_ref.shape
    c = c4 // 4

    # Bilinear combine folded into layer 1: rows [q*C, (q+1)*C) of the packed
    # corner slab hold corner q {00, 01, 10, 11}; scale_ref row q holds its
    # bilinear weight per point.  Elementwise math in f32 (v5e-safe); cast to
    # bf16 only at the MXU input.  z @-folding: W1_4x @ concat_q(s_q * c_q)
    # == W1 @ (sum_q s_q * c_q)  (bilinear then linear_1).
    z = jnp.concatenate(
        [(corners_ref[q * c:(q + 1) * c, :].astype(jnp.float32)
          * scale_ref[q:q + 1, :]).astype(jnp.bfloat16)
         for q in range(4)],
        axis=0)                                               # (4C, TP) bf16

    def lin(w_ref, b_ref, h):
        # (out, in) @ (in, TP) on the MXU, f32 accumulation, f32 bias.
        return jnp.dot(w_ref[...], h.astype(jnp.bfloat16),
                       preferred_element_type=jnp.float32) + b_ref[...]

    def lrelu(h):
        # leaky_relu(negative_slope=0.02): slope < 1 so max(h, 0.02*h) is exact.
        return jnp.maximum(h, 0.02 * h)

    h = lrelu(lin(w1_ref, b1_ref, z))
    h = lrelu(lin(w2_ref, b2_ref, h))
    h = lrelu(lin(w3_ref, b3_ref, h))
    h = lrelu(lin(w4_ref, b4_ref, h))
    h = lrelu(lin(w5_ref, b5_ref, h))
    h = lrelu(lin(w6_ref, b6_ref, h))

    # Layer 7: (1, D) @ (D, TP) done as a VPU multiply + sublane (XLU)
    # reduction (skips a 1-row MXU pass).  w7_ref is the (D, 1) f32 column.
    l7 = jnp.sum(h * w7_ref[...], axis=0, keepdims=True) + b7_ref[...]

    # torch.max(torch.min(l7, l7*0.01+0.99), l7*0.01)
    out_ref[...] = jnp.maximum(jnp.minimum(l7, l7 * 0.01 + 0.99), l7 * 0.01)


# ----------------------------------------------------------------------------
# Glue: grid_sample corner indices / weights (data-dependent; stays in XLA).
# ----------------------------------------------------------------------------
def _grid_sample_corner_data(grid, H, W, n_per_batch):
    """Flat (B*H*W) corner indices and bilinear weights matching
    F.grid_sample(padding_mode='border', align_corners=True).

    grid: (B, N, 2) in [-1, 1].  Returns idx (4, B*N) i32, scale (4, B*N) f32.
    """
    B = grid.shape[0]
    gx = grid[..., 0].reshape(-1)                  # indexes W
    gy = grid[..., 1].reshape(-1)                  # indexes H

    # NOTE: clipping the continuous coordinate into [0, W-1]/[0, H-1] *before*
    # taking the fractional part differs from torch's border-padding order of
    # operations but is equivalent: out-of-range coordinates collapse both
    # corners onto the same border texel, so the blend weight is irrelevant.
    x = jnp.clip((gx + 1.0) * 0.5 * (W - 1), 0.0, float(W - 1))
    y = jnp.clip((gy + 1.0) * 0.5 * (H - 1), 0.0, float(H - 1))

    x0f = jnp.floor(x)
    y0f = jnp.floor(y)
    wx = x - x0f
    wy = y - y0f

    x0 = jnp.clip(x0f.astype(jnp.int32), 0, W - 1)
    y0 = jnp.clip(y0f.astype(jnp.int32), 0, H - 1)
    x1 = jnp.minimum(x0 + 1, W - 1)
    y1 = jnp.minimum(y0 + 1, H - 1)

    b_off = jnp.repeat(jnp.arange(B, dtype=jnp.int32) * (H * W), n_per_batch)
    idx = jnp.stack([b_off + y0 * W + x0, b_off + y0 * W + x1,
                     b_off + y1 * W + x0, b_off + y1 * W + x1], axis=0)
    scale = jnp.stack([(1.0 - wx) * (1.0 - wy), wx * (1.0 - wy),
                       (1.0 - wx) * wy, wx * wy], axis=0).astype(jnp.float32)
    return idx, scale


# ----------------------------------------------------------------------------
# Wrapper: builds the pallas_call over point tiles (points on the lane axis).
# ----------------------------------------------------------------------------
def grid_decoder_2d(zs, points, params, *, tile_points=1024):
    """Forward pass of GridDecoder2D.

    zs:     (B, C, H, W) float32
    points: (B, N, 2)    float32  (module internally uses 2*points as grid)
    returns (B, N, 1)    float32
    """
    B, C, H, W = zs.shape
    _, N, _ = points.shape
    TP = tile_points
    assert TP % 128 == 0

    M = B * N
    M_pad = ((M + TP - 1) // TP) * TP

    # ---- corner gather: one take into the packed (4C, M_pad) bf16 slab -----
    idx, scale = _grid_sample_corner_data(2.0 * points, H, W, N)
    idx = jnp.pad(idx, ((0, 0), (0, M_pad - M)))            # pad indices (cheap)
    scale = jnp.pad(scale, ((0, 0), (0, M_pad - M)))        # zero weights on pad

    zs_flat = jnp.transpose(zs, (0, 2, 3, 1)).reshape(B * H * W, C)
    zs_flat = zs_flat.astype(jnp.bfloat16)
    corners = jnp.take(zs_flat, idx.reshape(-1), axis=0)    # (4*M_pad, C) bf16
    corners = corners.reshape(4, M_pad, C)
    corners = jnp.transpose(corners, (0, 2, 1)).reshape(4 * C, M_pad)

    # ---- MLP params: (out, in) bf16 weights, (out, 1) f32 biases ------------
    # W1 replicated 4x along its input dim to absorb the bilinear combine;
    # W7 kept as the (D, 1) f32 column (layer 7 runs on VPU + XLU).
    (w1, b1), (w2, b2), (w3, b3), (w4, b4), (w5, b5), (w6, b6), (w7, b7) = params
    w1t = jnp.transpose(w1)
    w1t4 = jnp.concatenate([w1t, w1t, w1t, w1t], axis=1)    # (out1, 4*z_dim)

    def w_arg(w):
        return jnp.transpose(w).astype(jnp.bfloat16)

    def b_arg(b):
        return jnp.transpose(b).astype(jnp.float32)

    weight_args = [
        w1t4.astype(jnp.bfloat16), b_arg(b1),
        w_arg(w2), b_arg(b2),
        w_arg(w3), b_arg(b3),
        w_arg(w4), b_arg(b4),
        w_arg(w5), b_arg(b5),
        w_arg(w6), b_arg(b6),
        w7.astype(jnp.float32), b_arg(b7),
    ]

    col_spec = lambda rows: pl.BlockSpec((rows, TP), lambda i: (0, i))
    full_spec = lambda shape: pl.BlockSpec(shape, lambda i: (0, 0))
    weight_specs = [full_spec(a.shape) for a in weight_args]

    # Advisory cost estimate (matmul flops + bilinear combine per point).
    mm_flops = sum(2 * int(w.shape[0]) * int(w.shape[1])
                   for w in weight_args[0::2][:6])
    mm_flops += 2 * int(w7.shape[0])
    flops = M_pad * (mm_flops + 3 * 4 * C)
    bytes_accessed = (corners.size * 2 + scale.size * 4 + M_pad * 4 +
                      sum(int(a.size) * a.dtype.itemsize for a in weight_args))

    out = pl.pallas_call(
        _decoder_kernel,
        out_shape=jax.ShapeDtypeStruct((1, M_pad), jnp.float32),
        grid_spec=pltpu.PrefetchScalarGridSpec(
            num_scalar_prefetch=0,
            grid=(M_pad // TP,),
            in_specs=[col_spec(4 * C), col_spec(4)] + weight_specs,
            out_specs=pl.BlockSpec((1, TP), lambda i: (0, i)),
        ),
        compiler_params=pltpu.CompilerParams(
            dimension_semantics=("parallel",),
            # ~1.4 MB of pipelined buffers + ~2 MB of in-kernel temporaries at
            # TP=1024; give ~2x headroom and scale with the tile size.
            vmem_limit_bytes=(8 * 1024 * 1024) * max(1, TP // 1024)),
        cost_estimate=pl.CostEstimate(
            flops=int(flops), transcendentals=0,
            bytes_accessed=int(bytes_accessed)),
    )(corners, scale, *weight_args)

    return out[0, :M].reshape(B, N, 1)


# ----------------------------------------------------------------------------
# Deterministic parameter init (matches IMNETDecoder.__init__ distributions).
# Weights stored as (in, out); the wrapper transposes to (out, in) for the
# transposed (features-on-sublanes) kernel layout.
# ----------------------------------------------------------------------------
def init_params(key, z_dim, df_dim):
    dims = [z_dim, df_dim * 8, df_dim * 8, df_dim * 8,
            df_dim * 4, df_dim * 2, df_dim * 1, 1]
    params = []
    for li in range(7):
        key, sub = jax.random.split(key)
        fan_in, fan_out = dims[li], dims[li + 1]
        mean = 1e-05 if li == 6 else 0.0
        w = mean + 0.02 * jax.random.normal(sub, (fan_in, fan_out), jnp.float32)
        b = jnp.zeros((1, fan_out), jnp.float32)
        params.append((w, b))
    return params


if __name__ == "__main__":
    key = jax.random.PRNGKey(0)

    # Small but module-consistent shapes.  Z_DIM=32 makes the packed corner
    # slab exactly 128 sublanes tall; N=1000 -> M=2000 pads to 2048 = 2 tiles
    # of 1024 points, so the parallel grid axis has an even >=2 step count
    # (v7x two-TensorCore sharding); the extra step is noise on v5e/v6e.
    B, Z_DIM, DF_DIM = 2, 32, 16
    H = W = 16
    N = 1000

    k_zs, k_pts, k_par = jax.random.split(key, 3)
    zs = jax.random.normal(k_zs, (B, Z_DIM, H, W), jnp.float32)
    # points in [-0.5, 0.5] so that 2*points stays inside [-1, 1]
    points = jax.random.uniform(k_pts, (B, N, 2), jnp.float32,
                                minval=-0.5, maxval=0.5)
    params = init_params(k_par, Z_DIM, DF_DIM)

    fwd = jax.jit(functools.partial(grid_decoder_2d, tile_points=1024))
    sdf = fwd(zs, points, params)
    jax.block_until_ready(sdf)

    assert sdf.shape == (B, N, 1), sdf.shape
    assert bool(jnp.all(jnp.isfinite(sdf)))
    print("KERNEL_OK")
</pallas_src>

<mosaic_0001>
module attributes {stable_mosaic.version = 11 : i64} {
  func.func @_decoder_kernel(%arg0: i32, %arg1: memref<128x1024xbf16, #tpu.memory_space<vmem>>, %arg2: memref<4x1024xf32, #tpu.memory_space<vmem>>, %arg3: memref<128x128xbf16, #tpu.memory_space<vmem>>, %arg4: memref<128x1xf32, #tpu.memory_space<vmem>>, %arg5: memref<128x128xbf16, #tpu.memory_space<vmem>>, %arg6: memref<128x1xf32, #tpu.memory_space<vmem>>, %arg7: memref<128x128xbf16, #tpu.memory_space<vmem>>, %arg8: memref<128x1xf32, #tpu.memory_space<vmem>>, %arg9: memref<64x128xbf16, #tpu.memory_space<vmem>>, %arg10: memref<64x1xf32, #tpu.memory_space<vmem>>, %arg11: memref<32x64xbf16, #tpu.memory_space<vmem>>, %arg12: memref<32x1xf32, #tpu.memory_space<vmem>>, %arg13: memref<16x32xbf16, #tpu.memory_space<vmem>>, %arg14: memref<16x1xf32, #tpu.memory_space<vmem>>, %arg15: memref<16x1xf32, #tpu.memory_space<vmem>>, %arg16: memref<1x1xf32, #tpu.memory_space<vmem>>, %arg17: memref<1x1024xf32, #tpu.memory_space<vmem>>) attributes {dimension_semantics = [#tpu.dimension_semantics<parallel>], iteration_bounds = array<i64: 2>, scalar_prefetch = 0 : i64, scratch_operands = 0 : i64, tpu.core_type = #tpu.core_type<tc>, window_params = [{transform_indices = @transform_0, window_bounds = array<i64: 128, 1024>}, {transform_indices = @transform_1, window_bounds = array<i64: 4, 1024>}, {pipeline_mode = #tpu.pipeline_mode<synchronous>, transform_indices = @transform_2, window_bounds = array<i64: 128, 128>}, {pipeline_mode = #tpu.pipeline_mode<synchronous>, transform_indices = @transform_3, window_bounds = array<i64: 128, 1>}, {pipeline_mode = #tpu.pipeline_mode<synchronous>, transform_indices = @transform_4, window_bounds = array<i64: 128, 128>}, {pipeline_mode = #tpu.pipeline_mode<synchronous>, transform_indices = @transform_5, window_bounds = array<i64: 128, 1>}, {pipeline_mode = #tpu.pipeline_mode<synchronous>, transform_indices = @transform_6, window_bounds = array<i64: 128, 128>}, {pipeline_mode = #tpu.pipeline_mode<synchronous>, transform_indices = @transform_7, window_bounds = array<i64: 128, 1>}, {pipeline_mode = #tpu.pipeline_mode<synchronous>, transform_indices = @transform_8, window_bounds = array<i64: 64, 128>}, {pipeline_mode = #tpu.pipeline_mode<synchronous>, transform_indices = @transform_9, window_bounds = array<i64: 64, 1>}, {pipeline_mode = #tpu.pipeline_mode<synchronous>, transform_indices = @transform_10, window_bounds = array<i64: 32, 64>}, {pipeline_mode = #tpu.pipeline_mode<synchronous>, transform_indices = @transform_11, window_bounds = array<i64: 32, 1>}, {pipeline_mode = #tpu.pipeline_mode<synchronous>, transform_indices = @transform_12, window_bounds = array<i64: 16, 32>}, {pipeline_mode = #tpu.pipeline_mode<synchronous>, transform_indices = @transform_13, window_bounds = array<i64: 16, 1>}, {pipeline_mode = #tpu.pipeline_mode<synchronous>, transform_indices = @transform_14, window_bounds = array<i64: 16, 1>}, {pipeline_mode = #tpu.pipeline_mode<synchronous>, transform_indices = @transform_15, window_bounds = array<i64: 1, 1>}, {transform_indices = @transform_16, window_bounds = array<i64: 1, 1024>}]} {
    %c0 = arith.constant 0 : index
    %c0_0 = arith.constant 0 : index
    %0 = vector.load %arg1[%c0, %c0_0] : memref<128x1024xbf16, #tpu.memory_space<vmem>>, vector<32x1024xbf16>
    %1 = arith.extf %0 : vector<32x1024xbf16> to vector<32x1024xf32>
    %c0_1 = arith.constant 0 : index
    %c0_2 = arith.constant 0 : index
    %2 = vector.load %arg2[%c0_1, %c0_2] : memref<4x1024xf32, #tpu.memory_space<vmem>>, vector<1x1024xf32>
    %3 = vector.broadcast %2 : vector<1x1024xf32> to vector<32x1024xf32>
    %4 = arith.mulf %1, %3 : vector<32x1024xf32>
    %5 = arith.truncf %4 : vector<32x1024xf32> to vector<32x1024xbf16>
    %c32 = arith.constant 32 : index
    %c0_3 = arith.constant 0 : index
    %6 = vector.load %arg1[%c32, %c0_3] : memref<128x1024xbf16, #tpu.memory_space<vmem>>, vector<32x1024xbf16>
    %7 = arith.extf %6 : vector<32x1024xbf16> to vector<32x1024xf32>
    %c1 = arith.constant 1 : index
    %c0_4 = arith.constant 0 : index
    %8 = vector.load %arg2[%c1, %c0_4] : memref<4x1024xf32, #tpu.memory_space<vmem>>, vector<1x1024xf32>
    %9 = vector.broadcast %8 : vector<1x1024xf32> to vector<32x1024xf32>
    %10 = arith.mulf %7, %9 : vector<32x1024xf32>
    %11 = arith.truncf %10 : vector<32x1024xf32> to vector<32x1024xbf16>
    %c64 = arith.constant 64 : index
    %c0_5 = arith.constant 0 : index
    %12 = vector.load %arg1[%c64, %c0_5] : memref<128x1024xbf16, #tpu.memory_space<vmem>>, vector<32x1024xbf16>
    %13 = arith.extf %12 : vector<32x1024xbf16> to vector<32x1024xf32>
    %c2 = arith.constant 2 : index
    %c0_6 = arith.constant 0 : index
    %14 = vector.load %arg2[%c2, %c0_6] : memref<4x1024xf32, #tpu.memory_space<vmem>>, vector<1x1024xf32>
    %15 = vector.broadcast %14 : vector<1x1024xf32> to vector<32x1024xf32>
    %16 = arith.mulf %13, %15 : vector<32x1024xf32>
    %17 = arith.truncf %16 : vector<32x1024xf32> to vector<32x1024xbf16>
    %c96 = arith.constant 96 : index
    %c0_7 = arith.constant 0 : index
    %18 = vector.load %arg1[%c96, %c0_7] : memref<128x1024xbf16, #tpu.memory_space<vmem>>, vector<32x1024xbf16>
    %19 = arith.extf %18 : vector<32x1024xbf16> to vector<32x1024xf32>
    %c3 = arith.constant 3 : index
    %c0_8 = arith.constant 0 : index
    %20 = vector.load %arg2[%c3, %c0_8] : memref<4x1024xf32, #tpu.memory_space<vmem>>, vector<1x1024xf32>
    %21 = vector.broadcast %20 : vector<1x1024xf32> to vector<32x1024xf32>
    %22 = arith.mulf %19, %21 : vector<32x1024xf32>
    %23 = arith.truncf %22 : vector<32x1024xf32> to vector<32x1024xbf16>
    %24 = tpu.concatenate %5, %11, %17, %23 in 0 : vector<32x1024xbf16>, vector<32x1024xbf16>, vector<32x1024xbf16>, vector<32x1024xbf16> -> vector<128x1024xbf16>
    %c0_9 = arith.constant 0 : index
    %c0_10 = arith.constant 0 : index
    %25 = vector.load %arg3[%c0_9, %c0_10] : memref<128x128xbf16, #tpu.memory_space<vmem>>, vector<128x128xbf16>
    %cst = arith.constant dense<0.000000e+00> : vector<128x1024xf32>
    %26 = tpu.matmul %25, %24, %cst {dimension_numbers = #tpu.dot_dimension_numbers<[1], [0], [0], [1], [0, 0, 1, 1], [], []>} : vector<128x128xbf16>, vector<128x1024xbf16>, vector<128x1024xf32> -> vector<128x1024xf32>
    %c0_11 = arith.constant 0 : index
    %c0_12 = arith.constant 0 : index
    %27 = vector.load %arg4[%c0_11, %c0_12] : memref<128x1xf32, #tpu.memory_space<vmem>>, vector<128x1xf32>
    %28 = vector.broadcast %27 : vector<128x1xf32> to vector<128x1024xf32>
    %29 = arith.addf %26, %28 : vector<128x1024xf32>
    %cst_13 = arith.constant 2.000000e-02 : f32
    %30 = vector.broadcast %cst_13 : f32 to vector<128x1024xf32>
    %31 = arith.mulf %30, %29 : vector<128x1024xf32>
    %32 = arith.maximumf %29, %31 : vector<128x1024xf32>
    %c0_14 = arith.constant 0 : index
    %c0_15 = arith.constant 0 : index
    %33 = vector.load %arg5[%c0_14, %c0_15] : memref<128x128xbf16, #tpu.memory_space<vmem>>, vector<128x128xbf16>
    %34 = arith.truncf %32 : vector<128x1024xf32> to vector<128x1024xbf16>
    %cst_16 = arith.constant dense<0.000000e+00> : vector<128x1024xf32>
    %35 = tpu.matmul %33, %34, %cst_16 {dimension_numbers = #tpu.dot_dimension_numbers<[1], [0], [0], [1], [0, 0, 1, 1], [], []>} : vector<128x128xbf16>, vector<128x1024xbf16>, vector<128x1024xf32> -> vector<128x1024xf32>
    %c0_17 = arith.constant 0 : index
    %c0_18 = arith.constant 0 : index
    %36 = vector.load %arg6[%c0_17, %c0_18] : memref<128x1xf32, #tpu.memory_space<vmem>>, vector<128x1xf32>
    %37 = vector.broadcast %36 : vector<128x1xf32> to vector<128x1024xf32>
    %38 = arith.addf %35, %37 : vector<128x1024xf32>
    %cst_19 = arith.constant 2.000000e-02 : f32
    %39 = vector.broadcast %cst_19 : f32 to vector<128x1024xf32>
    %40 = arith.mulf %39, %38 : vector<128x1024xf32>
    %41 = arith.maximumf %38, %40 : vector<128x1024xf32>
    %c0_20 = arith.constant 0 : index
    %c0_21 = arith.constant 0 : index
    %42 = vector.load %arg7[%c0_20, %c0_21] : memref<128x128xbf16, #tpu.memory_space<vmem>>, vector<128x128xbf16>
    %43 = arith.truncf %41 : vector<128x1024xf32> to vector<128x1024xbf16>
    %cst_22 = arith.constant dense<0.000000e+00> : vector<128x1024xf32>
    %44 = tpu.matmul %42, %43, %cst_22 {dimension_numbers = #tpu.dot_dimension_numbers<[1], [0], [0], [1], [0, 0, 1, 1], [], []>} : vector<128x128xbf16>, vector<128x1024xbf16>, vector<128x1024xf32> -> vector<128x1024xf32>
    %c0_23 = arith.constant 0 : index
    %c0_24 = arith.constant 0 : index
    %45 = vector.load %arg8[%c0_23, %c0_24] : memref<128x1xf32, #tpu.memory_space<vmem>>, vector<128x1xf32>
    %46 = vector.broadcast %45 : vector<128x1xf32> to vector<128x1024xf32>
    %47 = arith.addf %44, %46 : vector<128x1024xf32>
    %cst_25 = arith.constant 2.000000e-02 : f32
    %48 = vector.broadcast %cst_25 : f32 to vector<128x1024xf32>
    %49 = arith.mulf %48, %47 : vector<128x1024xf32>
    %50 = arith.maximumf %47, %49 : vector<128x1024xf32>
    %c0_26 = arith.constant 0 : index
    %c0_27 = arith.constant 0 : index
    %51 = vector.load %arg9[%c0_26, %c0_27] : memref<64x128xbf16, #tpu.memory_space<vmem>>, vector<64x128xbf16>
    %52 = arith.truncf %50 : vector<128x1024xf32> to vector<128x1024xbf16>
    %cst_28 = arith.constant dense<0.000000e+00> : vector<64x1024xf32>
    %53 = tpu.matmul %51, %52, %cst_28 {dimension_numbers = #tpu.dot_dimension_numbers<[1], [0], [0], [1], [0, 0, 1, 1], [], []>} : vector<64x128xbf16>, vector<128x1024xbf16>, vector<64x1024xf32> -> vector<64x1024xf32>
    %c0_29 = arith.constant 0 : index
    %c0_30 = arith.constant 0 : index
    %54 = vector.load %arg10[%c0_29, %c0_30] : memref<64x1xf32, #tpu.memory_space<vmem>>, vector<64x1xf32>
    %55 = vector.broadcast %54 : vector<64x1xf32> to vector<64x1024xf32>
    %56 = arith.addf %53, %55 : vector<64x1024xf32>
    %cst_31 = arith.constant 2.000000e-02 : f32
    %57 = vector.broadcast %cst_31 : f32 to vector<64x1024xf32>
    %58 = arith.mulf %57, %56 : vector<64x1024xf32>
    %59 = arith.maximumf %56, %58 : vector<64x1024xf32>
    %c0_32 = arith.constant 0 : index
    %c0_33 = arith.constant 0 : index
    %60 = vector.load %arg11[%c0_32, %c0_33] : memref<32x64xbf16, #tpu.memory_space<vmem>>, vector<32x64xbf16>
    %61 = arith.truncf %59 : vector<64x1024xf32> to vector<64x1024xbf16>
    %cst_34 = arith.constant dense<0.000000e+00> : vector<32x1024xf32>
    %62 = tpu.matmul %60, %61, %cst_34 {dimension_numbers = #tpu.dot_dimension_numbers<[1], [0], [0], [1], [0, 0, 1, 1], [], []>} : vector<32x64xbf16>, vector<64x1024xbf16>, vector<32x1024xf32> -> vector<32x1024xf32>
    %c0_35 = arith.constant 0 : index
    %c0_36 = arith.constant 0 : index
    %63 = vector.load %arg12[%c0_35, %c0_36] : memref<32x1xf32, #tpu.memory_space<vmem>>, vector<32x1xf32>
    %64 = vector.broadcast %63 : vector<32x1xf32> to vector<32x1024xf32>
    %65 = arith.addf %62, %64 : vector<32x1024xf32>
    %cst_37 = arith.constant 2.000000e-02 : f32
    %66 = vector.broadcast %cst_37 : f32 to vector<32x1024xf32>
    %67 = arith.mulf %66, %65 : vector<32x1024xf32>
    %68 = arith.maximumf %65, %67 : vector<32x1024xf32>
    %c0_38 = arith.constant 0 : index
    %c0_39 = arith.constant 0 : index
    %69 = vector.load %arg13[%c0_38, %c0_39] : memref<16x32xbf16, #tpu.memory_space<vmem>>, vector<16x32xbf16>
    %70 = arith.truncf %68 : vector<32x1024xf32> to vector<32x1024xbf16>
    %cst_40 = arith.constant dense<0.000000e+00> : vector<16x1024xf32>
    %71 = tpu.matmul %69, %70, %cst_40 {dimension_numbers = #tpu.dot_dimension_numbers<[1], [0], [0], [1], [0, 0, 1, 1], [], []>} : vector<16x32xbf16>, vector<32x1024xbf16>, vector<16x1024xf32> -> vector<16x1024xf32>
    %c0_41 = arith.constant 0 : index
    %c0_42 = arith.constant 0 : index
    %72 = vector.load %arg14[%c0_41, %c0_42] : memref<16x1xf32, #tpu.memory_space<vmem>>, vector<16x1xf32>
    %73 = vector.broadcast %72 : vector<16x1xf32> to vector<16x1024xf32>
    %74 = arith.addf %71, %73 : vector<16x1024xf32>
    %cst_43 = arith.constant 2.000000e-02 : f32
    %75 = vector.broadcast %cst_43 : f32 to vector<16x1024xf32>
    %76 = arith.mulf %75, %74 : vector<16x1024xf32>
    %77 = arith.maximumf %74, %76 : vector<16x1024xf32>
    %c0_44 = arith.constant 0 : index
    %c0_45 = arith.constant 0 : index
    %78 = vector.load %arg15[%c0_44, %c0_45] : memref<16x1xf32, #tpu.memory_space<vmem>>, vector<16x1xf32>
    %79 = vector.broadcast %78 : vector<16x1xf32> to vector<16x1024xf32>
    %80 = arith.mulf %77, %79 : vector<16x1024xf32>
    %cst_46 = arith.constant dense<0.000000e+00> : vector<1024xf32>
    %81 = vector.multi_reduction <add>, %80, %cst_46 [0] : vector<16x1024xf32> to vector<1024xf32>
    %82 = vector.shape_cast %81 : vector<1024xf32> to vector<1x1024xf32>
    %c0_47 = arith.constant 0 : index
    %c0_48 = arith.constant 0 : index
    %83 = vector.load %arg16[%c0_47, %c0_48] : memref<1x1xf32, #tpu.memory_space<vmem>>, vector<1x1xf32>
    %84 = vector.broadcast %83 : vector<1x1xf32> to vector<1x1024xf32>
    %85 = arith.addf %82, %84 : vector<1x1024xf32>
    %cst_49 = arith.constant 0.00999999977 : f32
    %86 = vector.broadcast %cst_49 : f32 to vector<1x1024xf32>
    %87 = arith.mulf %85, %86 : vector<1x1024xf32>
    %cst_50 = arith.constant 9.900000e-01 : f32
    %88 = vector.broadcast %cst_50 : f32 to vector<1x1024xf32>
    %89 = arith.addf %87, %88 : vector<1x1024xf32>
    %90 = arith.minimumf %85, %89 : vector<1x1024xf32>
    %cst_51 = arith.constant 0.00999999977 : f32
    %91 = vector.broadcast %cst_51 : f32 to vector<1x1024xf32>
    %92 = arith.mulf %85, %91 : vector<1x1024xf32>
    %93 = arith.maximumf %90, %92 : vector<1x1024xf32>
    %c0_52 = arith.constant 0 : index
    %c0_53 = arith.constant 0 : index
    %94 = vector.load %arg17[%c0_52, %c0_53] : memref<1x1024xf32, #tpu.memory_space<vmem>>, vector<1x1024xf32>
    tpu.vector_store %arg17[%c0_52, %c0_53], %93 {strides = array<i32>} : memref<1x1024xf32, #tpu.memory_space<vmem>>, vector<1x1024xf32>,
    return
  }
  func.func @transform_0(%arg0: i32) -> (i32, i32) {
    %c0_i32 = arith.constant 0 : i32
    %c0_i32_0 = arith.constant 0 : i32
    return %c0_i32, %arg0 : i32, i32
  }
  func.func @transform_1(%arg0: i32) -> (i32, i32) {
    %c0_i32 = arith.constant 0 : i32
    %c0_i32_0 = arith.constant 0 : i32
    return %c0_i32, %arg0 : i32, i32
  }
  func.func @transform_2(%arg0: i32) -> (i32, i32) {
    %c0_i32 = arith.constant 0 : i32
    %c0_i32_0 = arith.constant 0 : i32
    %c0_i32_1 = arith.constant 0 : i32
    return %c0_i32, %c0_i32_0 : i32, i32
  }
  func.func @transform_3(%arg0: i32) -> (i32, i32) {
    %c0_i32 = arith.constant 0 : i32
    %c0_i32_0 = arith.constant 0 : i32
    %c0_i32_1 = arith.constant 0 : i32
    return %c0_i32, %c0_i32_0 : i32, i32
  }
  func.func @transform_4(%arg0: i32) -> (i32, i32) {
    %c0_i32 = arith.constant 0 : i32
    %c0_i32_0 = arith.constant 0 : i32
    %c0_i32_1 = arith.constant 0 : i32
    return %c0_i32, %c0_i32_0 : i32, i32
  }
  func.func @transform_5(%arg0: i32) -> (i32, i32) {
    %c0_i32 = arith.constant 0 : i32
    %c0_i32_0 = arith.constant 0 : i32
    %c0_i32_1 = arith.constant 0 : i32
    return %c0_i32, %c0_i32_0 : i32, i32
  }
  func.func @transform_6(%arg0: i32) -> (i32, i32) {
    %c0_i32 = arith.constant 0 : i32
    %c0_i32_0 = arith.constant 0 : i32
    %c0_i32_1 = arith.constant 0 : i32
    return %c0_i32, %c0_i32_0 : i32, i32
  }
  func.func @transform_7(%arg0: i32) -> (i32, i32) {
    %c0_i32 = arith.constant 0 : i32
    %c0_i32_0 = arith.constant 0 : i32
    %c0_i32_1 = arith.constant 0 : i32
    return %c0_i32, %c0_i32_0 : i32, i32
  }
  func.func @transform_8(%arg0: i32) -> (i32, i32) {
    %c0_i32 = arith.constant 0 : i32
    %c0_i32_0 = arith.constant 0 : i32
    %c0_i32_1 = arith.constant 0 : i32
    return %c0_i32, %c0_i32_0 : i32, i32
  }
  func.func @transform_9(%arg0: i32) -> (i32, i32) {
    %c0_i32 = arith.constant 0 : i32
    %c0_i32_0 = arith.constant 0 : i32
    %c0_i32_1 = arith.constant 0 : i32
    return %c0_i32, %c0_i32_0 : i32, i32
  }
  func.func @transform_10(%arg0: i32) -> (i32, i32) {
    %c0_i32 = arith.constant 0 : i32
    %c0_i32_0 = arith.constant 0 : i32
    %c0_i32_1 = arith.constant 0 : i32
    return %c0_i32, %c0_i32_0 : i32, i32
  }
  func.func @transform_11(%arg0: i32) -> (i32, i32) {
    %c0_i32 = arith.constant 0 : i32
    %c0_i32_0 = arith.constant 0 : i32
    %c0_i32_1 = arith.constant 0 : i32
    return %c0_i32, %c0_i32_0 : i32, i32
  }
  func.func @transform_12(%arg0: i32) -> (i32, i32) {
    %c0_i32 = arith.constant 0 : i32
    %c0_i32_0 = arith.constant 0 : i32
    %c0_i32_1 = arith.constant 0 : i32
    return %c0_i32, %c0_i32_0 : i32, i32
  }
  func.func @transform_13(%arg0: i32) -> (i32, i32) {
    %c0_i32 = arith.constant 0 : i32
    %c0_i32_0 = arith.constant 0 : i32
    %c0_i32_1 = arith.constant 0 : i32
    return %c0_i32, %c0_i32_0 : i32, i32
  }
  func.func @transform_14(%arg0: i32) -> (i32, i32) {
    %c0_i32 = arith.constant 0 : i32
    %c0_i32_0 = arith.constant 0 : i32
    %c0_i32_1 = arith.constant 0 : i32
    return %c0_i32, %c0_i32_0 : i32, i32
  }
  func.func @transform_15(%arg0: i32) -> (i32, i32) {
    %c0_i32 = arith.constant 0 : i32
    %c0_i32_0 = arith.constant 0 : i32
    %c0_i32_1 = arith.constant 0 : i32
    return %c0_i32, %c0_i32_0 : i32, i32
  }
  func.func @transform_16(%arg0: i32) -> (i32, i32) {
    %c0_i32 = arith.constant 0 : i32
    %c0_i32_0 = arith.constant 0 : i32
    return %c0_i32, %arg0 : i32, i32
  }
}

</mosaic_0001>

<bundles_post_ra>
// kernel: squeeze.0
= control target key start
LH: loop header
LB: loop body
LE: loop exit
PB: predicated region body
PF: predicated region fallthrough
CT: control target
= control target key end

     0   :  { %vm5_vm0 = vcmask 850944   ;;  %s200_s12 = smov 24   ;;  %s230_s0 = inlined_call_operand.vmem [shape: f32[2000], index: 0, kind: input, shape index: {}]   ;;  %s231_s1 = inlined_call_operand.hbm [shape: f32[2,1000,1], index: 1, kind: output, shape index: {}]  }
   0x1   :  { %v173_v0 = vld [vmem:[%s230_s0 + $0x7] sm:$0xff]   ;;  %v174_v1 = vld [vmem:[%s230_s0 + $0xf] sm:$0x1]  }
   0x2   :  { %v16_v2 = vsel %vm5_vm0, %v174_v1, %v173_v0  ;;  %v172_v3 = vld [vmem:[%s230_s0 + $0x7] sm:$0x1]  }
   0x3   :  { %17 = vrot.lane.b32.xlu0 %v16_v2, %s200_s12  ;;  %7 = vst.msk [vmem:[#allocation2 + $0x38] sm:$0x1] %vm5_vm0, %v172_v3  }
   0x4   :  { %2 = vsyncpa [#allocation1], 0  ;;  %v8_v4 = vld [vmem:[%s230_s0] sm:$0x7f]   ;;  %v175_v5 = vld [vmem:[%s230_s0 + $0x8] sm:$0x7f]  }
   0x5   :  { %9 = vst [vmem:[#allocation2] ss:$8 sm:$0xf] %v8_v4   ;;  %10 = vst [vmem:[#allocation2] ss:$8 sm:$0x70] %v8_v4  }
   0x6   :  { %vm19_vm1 = vcmask 195584   ;;  %vm24_vm2 = vcmask 851136   ;;  %vm31_vm3 = vcmask 1047744   ;;  %s201_s0 = smov [#allocation0]  }
   0x7   :  { %29 = vrot.lane.b32.xlu0 %v175_v5, %s200_s12  ;;  %s152_s17 = sshll.u32 %s201_s0, 4  ;;  %s153_s17 = int_to_ptr.vmem [resolvable:$true] %s152_s17 }
   0x8   :  { %s178_s18 = scalar_lea.vmem %s153_s17, 256  ;;  %p183_p1 = scmp.lt.s32.totalorder %s153_s17, %s153_s17 }
   0x9   :  { %p179_p0 = scmp.ne.s32.totalorder %s153_s17, %s178_s18  ;;  %p184_p2 = scmp.lt.s32.totalorder %s178_s18, %s178_s18 }
   0xa   :  { %v86_v6 = vld [vmem:[#allocation2 + $0x38] sm:$0x1] }
   0xb   :  { %91 = vst [vmem:[#allocation0 + $0x7] sm:$0x1] %v86_v6  ;;  %p185_p3 = por %p184_p2, %p183_p1 }
   0xc   :  { %v40_v7 = vld [vmem:[#allocation2] sm:$0x1]  ;;  %v45_v8 = vld [vmem:[#allocation2 + $0x8] sm:$0x1]  ;;  %v51_v9 = vld [vmem:[#allocation2 + $0x10] sm:$0x1] }
   0xd   :  { %43 = vst [vmem:[#allocation0] sm:$0x1] %v40_v7  ;;  %49 = vst [vmem:[#allocation0 + $0x1] sm:$0x1] %v45_v8  ;;  %v58_v10 = vld [vmem:[#allocation2 + $0x18] sm:$0x1]  ;;  %p186_p4 = pnand %p185_p3, %p179_p0 }
   0xe   :  { %56 = vst [vmem:[#allocation0 + $0x2] sm:$0x1] %v51_v9  ;;  %v65_v11 = vld [vmem:[#allocation2 + $0x20] sm:$0x1]  ;;  %v72_v12 = vld [vmem:[#allocation2 + $0x28] sm:$0x1] }
   0xf   :  { %63 = vst [vmem:[#allocation0 + $0x3] sm:$0x1] %v58_v10  ;;  %70 = vst [vmem:[#allocation0 + $0x4] sm:$0x1] %v65_v11  ;;  %v79_v13 = vld [vmem:[#allocation2 + $0x30] sm:$0x1] }
  0x10   :  { %77 = vst [vmem:[#allocation0 + $0x5] sm:$0x1] %v72_v12  ;;  %84 = vst [vmem:[#allocation0 + $0x6] sm:$0x1] %v79_v13 }
  0x75   :  { %v18_v14 = vpop.permute.xlu0 %17  }
  0x76   :  { %21 = vst.msk [vmem:[#allocation2 + $0x40] ss:$8 sm:$0xf] %vm19_vm1, %v18_v14   ;;  %23 = vst.msk [vmem:[#allocation2 + $0x40] ss:$8 sm:$0xf0] %vm19_vm1, %v18_v14  }
  0x77   :  { %26 = vst.msk [vmem:[#allocation2 + $0x78] sm:$0x1] %vm24_vm2, %v18_v14  }
  0x79   :  { %v30_v15 = vpop.permute.xlu0 %29  }
  0x7a   :  { %33 = vst.msk [vmem:[#allocation2 + $0x40] ss:$8 sm:$0xf] %vm31_vm3, %v30_v15   ;;  %35 = vst.msk [vmem:[#allocation2 + $0x40] ss:$8 sm:$0x70] %vm31_vm3, %v30_v15  }
  0x7e   :  { %v142_v16 = vld [vmem:[#allocation2 + $0x78] sm:$0x1] }
  0x7f   :  { %147 = vst [vmem:[#allocation0 + $0xf] sm:$0x1] %v142_v16 }
  0x81   :  { %v93_v17 = vld [vmem:[#allocation2 + $0x40] sm:$0x1]  ;;  %v100_v18 = vld [vmem:[#allocation2 + $0x48] sm:$0x1]  ;;  %v107_v19 = vld [vmem:[#allocation2 + $0x50] sm:$0x1] }
  0x82   :  { %98 = vst [vmem:[#allocation0 + $0x8] sm:$0x1] %v93_v17  ;;  %105 = vst [vmem:[#allocation0 + $0x9] sm:$0x1] %v100_v18  ;;  %v114_v20 = vld [vmem:[#allocation2 + $0x58] sm:$0x1] }
  0x83   :  { %112 = vst [vmem:[#allocation0 + $0xa] sm:$0x1] %v107_v19  ;;  %v121_v21 = vld [vmem:[#allocation2 + $0x60] sm:$0x1]  ;;  %v128_v22 = vld [vmem:[#allocation2 + $0x68] sm:$0x1] }
  0x84   :  { %119 = vst [vmem:[#allocation0 + $0xb] sm:$0x1] %v114_v20  ;;  %126 = vst [vmem:[#allocation0 + $0xc] sm:$0x1] %v121_v21  ;;  %v135_v23 = vld [vmem:[#allocation2 + $0x70] sm:$0x1] }
  0x85   :  { %133 = vst [vmem:[#allocation0 + $0xd] sm:$0x1] %v128_v22  ;;  %140 = vst [vmem:[#allocation0 + $0xe] sm:$0x1] %v135_v23 }
  0x86   :  { %189 = shalt.err (!%p186_p4)
}
  0x87   :  { %155 = dma.vmem_to_hbm [thread:$0]  %s153_s17, 256, %s231_s1, [#allocation1]  }
  0x88   :  { %198 = dma.done.wait [#allocation1], 256  }
  0x89   :  { %199 = vsyncadd [#allocation1], 4294967040 }
  0x8a   :  { %157 = vsyncpa [#allocation1], 1 }

// kernel: grid_decoder_2d.1
= control target key start
LH: loop header
LB: loop body
LE: loop exit
PB: predicated region body
PF: predicated region fallthrough
CT: control target
= control target key end

     0   :  { %s9515_s0 = inlined_call_operand.vmem [shape: bf16[128,2048], index: 0, kind: input, shape index: {}]   ;;  %s9516_s1 = inlined_call_operand.vmem [shape: f32[4,2048], index: 1, kind: input, shape index: {}]   ;;  %s9517_s2 = inlined_call_operand.vmem [shape: bf16[128,128], index: 2, kind: input, shape index: {}]   ;;  %s9518_s3 = inlined_call_operand.vmem [shape: f32[128,1], index: 3, kind: input, shape index: {}]   ;;  %s9519_s4 = inlined_call_operand.vmem [shape: bf16[128,128], index: 4, kind: input, shape index: {}]   ;;  %s9520_s5 = inlined_call_operand.vmem [shape: f32[128,1], index: 5, kind: input, shape index: {}]   ;;  %s9521_s6 = inlined_call_operand.vmem [shape: bf16[128,128], index: 6, kind: input, shape index: {}]   ;;  %s9522_s7 = inlined_call_operand.vmem [shape: f32[128,1], index: 7, kind: input, shape index: {}]   ;;  %s9523_s8 = inlined_call_operand.vmem [shape: bf16[64,128], index: 8, kind: input, shape index: {}]   ;;  %s9524_s9 = inlined_call_operand.vmem [shape: f32[64,1], index: 9, kind: input, shape index: {}]   ;;  %s9525_s10 = inlined_call_operand.vmem [shape: bf16[32,64], index: 10, kind: input, shape index: {}]   ;;  %s9526_s11 = inlined_call_operand.vmem [shape: f32[32,1], index: 11, kind: input, shape index: {}]   ;;  %s9527_s12 = inlined_call_operand.vmem [shape: bf16[16,32], index: 12, kind: input, shape index: {}]   ;;  %s9528_s13 = inlined_call_operand.vmem [shape: f32[16,1], index: 13, kind: input, shape index: {}]   ;;  %s9529_s14 = inlined_call_operand.vmem [shape: f32[16,1], index: 14, kind: input, shape index: {}]   ;;  %s9530_s15 = inlined_call_operand.<no memory space> [shape: f32[1,1], index: 15, kind: input, shape index: {}]   ;;  %s9531_s16 = inlined_call_operand.vmem [shape: f32[1,2048], index: 16, kind: output, shape index: {}]  }
   0x1   :  { %9855 = sst [smem:[#allocation88_spill]] %s9515_s0  ;;  %v21_v0 = vstv %s9530_s15 }
   0x2   :  { %22 = vst [vmem:[#allocation2] sm:$0x1] %v21_v0 }
   0x3   :  { %s5635_s23 = smov 0   ;;  %s5637_s24 = smov 0  }
   0x4   :  { %s5639_s25 = smov 0  }
   0x5 LB: > { %s5401_s15 = sadd.s32 4294967295, %s5543_s25   ;;  %s5652_s26 = sadd.s32 1, %s5543_s25   ;;  %s5543_s25 = sphi %s5639_s25, %s10664_s25   ;;  %s5539_s24 = sphi %s5637_s24, %s10663_s24   ;;  %s5535_s23 = sphi %s5635_s23, %s10662_s23  }
   0x6   : > { %s32_s27 = ssub.s32 %s5543_s25, %s5652_s26  ;;  %s35_s28 = sadd.s32 1, %s5539_s24 }
   0x7   : > { %p33_p0 = scmp.eq.s32.totalorder %s32_s27, 0  ;;  %p42_p1 = scmp.ne.s32.totalorder %s5539_s24, %s5535_s23 }
   0x8   : > { %p43_p2 = scmp.eq.s32.totalorder %s5543_s25, 0  ;;  %p5404_p4 = scmp.ge.s32.totalorder %s5543_s25, 2 }
   0x9   : > { %s5661_s29 = scalar_select %p33_p0, %s5539_s24, %s35_s28  }
   0xa   : > { %p44_p3 = por %p43_p2, %p42_p1  ;;  %456 = sbr.rel (%p5404_p4) target bundleno = 57 (0x39), region = 72 }
   0xf   : > { %459 = sbr.rel (!%p44_p3) target bundleno = 57 (0x39), region = 76  ;;  %s461_s30 = sand.u32 (%p44_p3), 1, %s5539_s24  }
  0x10   : > { %s5461_s0 = sshll.u32 (%p44_p3), %s5543_s25, 5  ;;  %s5405_s17 = sshll.u32 (%p44_p3), %s461_s30, 9 }
  0x11   : > { %s9856_s20 = sld [smem:[#allocation88_spill]] (%p44_p3)  ;;  %s5674_s22 = scalar_lea.vmem (%p44_p3), [#allocation3], %s5405_s17 }
  0x17   : > { %s5669_s21 = scalar_lea.vmem %s9856_s20, %s5461_s0 }
  0x18   : > { %v479_v1 = vld [vmem:[%s5669_s21] sm:$0xff]  ;;  %v481_v2 = vld [vmem:[%s5669_s21 + $0x8] sm:$0xff]  ;;  %v483_v3 = vld [vmem:[%s5669_s21 + $0x10] sm:$0xff] }
  0x19   : > { %480 = vst [vmem:[%s5674_s22] sm:$0xff] %v479_v1  ;;  %482 = vst [vmem:[%s5674_s22 + $0x8] sm:$0xff] %v481_v2  ;;  %v485_v4 = vld [vmem:[%s5669_s21 + $0x18] sm:$0xff]  ;;  %v487_v5 = vld [vmem:[%s5669_s21 + $0x40] sm:$0xff] }
  0x1a   : > { %484 = vst [vmem:[%s5674_s22 + $0x10] sm:$0xff] %v483_v3  ;;  %v489_v6 = vld [vmem:[%s5669_s21 + $0x48] sm:$0xff]  ;;  %486 = vst [vmem:[%s5674_s22 + $0x18] sm:$0xff] %v485_v4  ;;  %v491_v7 = vld [vmem:[%s5669_s21 + $0x50] sm:$0xff] }
  0x1b   : > { %488 = vst [vmem:[%s5674_s22 + $0x20] sm:$0xff] %v487_v5  ;;  %490 = vst [vmem:[%s5674_s22 + $0x28] sm:$0xff] %v489_v6  ;;  %v493_v8 = vld [vmem:[%s5669_s21 + $0x58] sm:$0xff]  ;;  %v495_v9 = vld [vmem:[%s5669_s21 + $0x80] sm:$0xff] }
  0x1c   : > { %492 = vst [vmem:[%s5674_s22 + $0x30] sm:$0xff] %v491_v7  ;;  %494 = vst [vmem:[%s5674_s22 + $0x38] sm:$0xff] %v493_v8  ;;  %v497_v10 = vld [vmem:[%s5669_s21 + $0x88] sm:$0xff]  ;;  %v499_v11 = vld [vmem:[%s5669_s21 + $0x90] sm:$0xff] }
  0x1d   : > { %496 = vst [vmem:[%s5674_s22 + $0x40] sm:$0xff] %v495_v9  ;;  %v501_v12 = vld [vmem:[%s5669_s21 + $0x98] sm:$0xff]  ;;  %498 = vst [vmem:[%s5674_s22 + $0x48] sm:$0xff] %v497_v10  ;;  %v503_v13 = vld [vmem:[%s5669_s21 + $0xc0] sm:$0xff] }
  0x1e   : > { %500 = vst [vmem:[%s5674_s22 + $0x50] sm:$0xff] %v499_v11  ;;  %502 = vst [vmem:[%s5674_s22 + $0x58] sm:$0xff] %v501_v12  ;;  %v505_v14 = vld [vmem:[%s5669_s21 + $0xc8] sm:$0xff]  ;;  %v507_v15 = vld [vmem:[%s5669_s21 + $0xd0] sm:$0xff] }
  0x1f   : > { %504 = vst [vmem:[%s5674_s22 + $0x60] sm:$0xff] %v503_v13  ;;  %506 = vst [vmem:[%s5674_s22 + $0x68] sm:$0xff] %v505_v14  ;;  %v509_v16 = vld [vmem:[%s5669_s21 + $0xd8] sm:$0xff]  ;;  %v511_v17 = vld [vmem:[%s5669_s21 + $0x100] sm:$0xff] }
  0x20   : > { %508 = vst [vmem:[%s5674_s22 + $0x70] sm:$0xff] %v507_v15  ;;  %v513_v18 = vld [vmem:[%s5669_s21 + $0x108] sm:$0xff]  ;;  %510 = vst [vmem:[%s5674_s22 + $0x78] sm:$0xff] %v509_v16  ;;  %v515_v19 = vld [vmem:[%s5669_s21 + $0x110] sm:$0xff] }
  0x21   : > { %512 = vst [vmem:[%s5674_s22 + $0x80] sm:$0xff] %v511_v17  ;;  %514 = vst [vmem:[%s5674_s22 + $0x88] sm:$0xff] %v513_v18  ;;  %v517_v20 = vld [vmem:[%s5669_s21 + $0x118] sm:$0xff]  ;;  %v519_v21 = vld [vmem:[%s5669_s21 + $0x140] sm:$0xff] }
  0x22   : > { %516 = vst [vmem:[%s5674_s22 + $0x90] sm:$0xff] %v515_v19  ;;  %518 = vst [vmem:[%s5674_s22 + $0x98] sm:$0xff] %v517_v20  ;;  %v521_v22 = vld [vmem:[%s5669_s21 + $0x148] sm:$0xff]  ;;  %v523_v23 = vld [vmem:[%s5669_s21 + $0x150] sm:$0xff] }
  0x23   : > { %520 = vst [vmem:[%s5674_s22 + $0xa0] sm:$0xff] %v519_v21  ;;  %v525_v24 = vld [vmem:[%s5669_s21 + $0x158] sm:$0xff]  ;;  %522 = vst [vmem:[%s5674_s22 + $0xa8] sm:$0xff] %v521_v22  ;;  %v527_v25 = vld [vmem:[%s5669_s21 + $0x180] sm:$0xff] }
  0x24   : > { %524 = vst [vmem:[%s5674_s22 + $0xb0] sm:$0xff] %v523_v23  ;;  %526 = vst [vmem:[%s5674_s22 + $0xb8] sm:$0xff] %v525_v24  ;;  %v529_v26 = vld [vmem:[%s5669_s21 + $0x188] sm:$0xff]  ;;  %v531_v27 = vld [vmem:[%s5669_s21 + $0x190] sm:$0xff] }
  0x25   : > { %528 = vst [vmem:[%s5674_s22 + $0xc0] sm:$0xff] %v527_v25  ;;  %530 = vst [vmem:[%s5674_s22 + $0xc8] sm:$0xff] %v529_v26  ;;  %v533_v28 = vld [vmem:[%s5669_s21 + $0x198] sm:$0xff]  ;;  %v535_v29 = vld [vmem:[%s5669_s21 + $0x1c0] sm:$0xff] }
  0x26   : > { %532 = vst [vmem:[%s5674_s22 + $0xd0] sm:$0xff] %v531_v27  ;;  %v537_v30 = vld [vmem:[%s5669_s21 + $0x1c8] sm:$0xff]  ;;  %534 = vst [vmem:[%s5674_s22 + $0xd8] sm:$0xff] %v533_v28  ;;  %v539_v31 = vld [vmem:[%s5669_s21 + $0x1d0] sm:$0xff] }
  0x27   : > { %536 = vst [vmem:[%s5674_s22 + $0xe0] sm:$0xff] %v535_v29  ;;  %538 = vst [vmem:[%s5674_s22 + $0xe8] sm:$0xff] %v537_v30  ;;  %v541_v32 = vld [vmem:[%s5669_s21 + $0x1d8] sm:$0xff]  ;;  %v543_v33 = vld [vmem:[%s5669_s21 + $0x200] sm:$0xff] }
  0x28   : > { %540 = vst [vmem:[%s5674_s22 + $0xf0] sm:$0xff] %v539_v31  ;;  %542 = vst [vmem:[%s5674_s22 + $0xf8] sm:$0xff] %v541_v32  ;;  %v545_v34 = vld [vmem:[%s5669_s21 + $0x208] sm:$0xff]  ;;  %v547_v35 = vld [vmem:[%s5669_s21 + $0x210] sm:$0xff] }
  0x29   : > { %544 = vst [vmem:[%s5674_s22 + $0x100] sm:$0xff] %v543_v33  ;;  %v549_v36 = vld [vmem:[%s5669_s21 + $0x218] sm:$0xff]  ;;  %546 = vst [vmem:[%s5674_s22 + $0x108] sm:$0xff] %v545_v34  ;;  %v551_v37 = vld [vmem:[%s5669_s21 + $0x240] sm:$0xff] }
  0x2a   : > { %548 = vst [vmem:[%s5674_s22 + $0x110] sm:$0xff] %v547_v35  ;;  %550 = vst [vmem:[%s5674_s22 + $0x118] sm:$0xff] %v549_v36  ;;  %v553_v38 = vld [vmem:[%s5669_s21 + $0x248] sm:$0xff]  ;;  %v555_v39 = vld [vmem:[%s5669_s21 + $0x250] sm:$0xff] }
  0x2b   : > { %552 = vst [vmem:[%s5674_s22 + $0x120] sm:$0xff] %v551_v37  ;;  %554 = vst [vmem:[%s5674_s22 + $0x128] sm:$0xff] %v553_v38  ;;  %v557_v40 = vld [vmem:[%s5669_s21 + $0x258] sm:$0xff]  ;;  %v559_v41 = vld [vmem:[%s5669_s21 + $0x280] sm:$0xff] }
  0x2c   : > { %556 = vst [vmem:[%s5674_s22 + $0x130] sm:$0xff] %v555_v39  ;;  %v561_v42 = vld [vmem:[%s5669_s21 + $0x288] sm:$0xff]  ;;  %558 = vst [vmem:[%s5674_s22 + $0x138] sm:$0xff] %v557_v40  ;;  %v563_v43 = vld [vmem:[%s5669_s21 + $0x290] sm:$0xff] }
  0x2d   : > { %560 = vst [vmem:[%s5674_s22 + $0x140] sm:$0xff] %v559_v41  ;;  %562 = vst [vmem:[%s5674_s22 + $0x148] sm:$0xff] %v561_v42  ;;  %v565_v44 = vld [vmem:[%s5669_s21 + $0x298] sm:$0xff]  ;;  %v567_v45 = vld [vmem:[%s5669_s21 + $0x2c0] sm:$0xff] }
  0x2e   : > { %564 = vst [vmem:[%s5674_s22 + $0x150] sm:$0xff] %v563_v43  ;;  %566 = vst [vmem:[%s5674_s22 + $0x158] sm:$0xff] %v565_v44  ;;  %v569_v46 = vld [vmem:[%s5669_s21 + $0x2c8] sm:$0xff]  ;;  %v571_v47 = vld [vmem:[%s5669_s21 + $0x2d0] sm:$0xff] }
  0x2f   : > { %568 = vst [vmem:[%s5674_s22 + $0x160] sm:$0xff] %v567_v45  ;;  %v573_v48 = vld [vmem:[%s5669_s21 + $0x2d8] sm:$0xff]  ;;  %570 = vst [vmem:[%s5674_s22 + $0x168] sm:$0xff] %v569_v46  ;;  %v575_v49 = vld [vmem:[%s5669_s21 + $0x300] sm:$0xff] }
  0x30   : > { %572 = vst [vmem:[%s5674_s22 + $0x170] sm:$0xff] %v571_v47  ;;  %574 = vst [vmem:[%s5674_s22 + $0x178] sm:$0xff] %v573_v48  ;;  %v577_v50 = vld [vmem:[%s5669_s21 + $0x308] sm:$0xff]  ;;  %v579_v51 = vld [vmem:[%s5669_s21 + $0x310] sm:$0xff] }
  0x31   : > { %576 = vst [vmem:[%s5674_s22 + $0x180] sm:$0xff] %v575_v49  ;;  %578 = vst [vmem:[%s5674_s22 + $0x188] sm:$0xff] %v577_v50  ;;  %v581_v52 = vld [vmem:[%s5669_s21 + $0x318] sm:$0xff]  ;;  %v583_v53 = vld [vmem:[%s5669_s21 + $0x340] sm:$0xff] }
  0x32   : > { %580 = vst [vmem:[%s5674_s22 + $0x190] sm:$0xff] %v579_v51  ;;  %v585_v54 = vld [vmem:[%s5669_s21 + $0x348] sm:$0xff]  ;;  %582 = vst [vmem:[%s5674_s22 + $0x198] sm:$0xff] %v581_v52  ;;  %v587_v55 = vld [vmem:[%s5669_s21 + $0x350] sm:$0xff] }
  0x33   : > { %584 = vst [vmem:[%s5674_s22 + $0x1a0] sm:$0xff] %v583_v53  ;;  %586 = vst [vmem:[%s5674_s22 + $0x1a8] sm:$0xff] %v585_v54  ;;  %v589_v56 = vld [vmem:[%s5669_s21 + $0x358] sm:$0xff]  ;;  %v591_v57 = vld [vmem:[%s5669_s21 + $0x380] sm:$0xff] }
  0x34   : > { %588 = vst [vmem:[%s5674_s22 + $0x1b0] sm:$0xff] %v587_v55  ;;  %590 = vst [vmem:[%s5674_s22 + $0x1b8] sm:$0xff] %v589_v56  ;;  %v593_v58 = vld [vmem:[%s5669_s21 + $0x388] sm:$0xff]  ;;  %v595_v59 = vld [vmem:[%s5669_s21 + $0x390] sm:$0xff] }
  0x35   : > { %592 = vst [vmem:[%s5674_s22 + $0x1c0] sm:$0xff] %v591_v57  ;;  %v597_v60 = vld [vmem:[%s5669_s21 + $0x398] sm:$0xff]  ;;  %594 = vst [vmem:[%s5674_s22 + $0x1c8] sm:$0xff] %v593_v58  ;;  %v599_v61 = vld [vmem:[%s5669_s21 + $0x3c0] sm:$0xff] }
  0x36   : > { %596 = vst [vmem:[%s5674_s22 + $0x1d0] sm:$0xff] %v595_v59  ;;  %598 = vst [vmem:[%s5674_s22 + $0x1d8] sm:$0xff] %v597_v60  ;;  %v601_v62 = vld [vmem:[%s5669_s21 + $0x3c8] sm:$0xff]  ;;  %v603_v63 = vld [vmem:[%s5669_s21 + $0x3d0] sm:$0xff] }
  0x37   : > { %600 = vst [vmem:[%s5674_s22 + $0x1e0] sm:$0xff] %v599_v61  ;;  %602 = vst [vmem:[%s5674_s22 + $0x1e8] sm:$0xff] %v601_v62  ;;  %v605_v0 = vld [vmem:[%s5669_s21 + $0x3d8] sm:$0xff] }
  0x38   : > { %604 = vst [vmem:[%s5674_s22 + $0x1f0] sm:$0xff] %v603_v63  ;;  %606 = vst [vmem:[%s5674_s22 + $0x1f8] sm:$0xff] %v605_v0 }
  0x39 PF: > { %p5408_p5 = scmp.ge.s32.totalorder %s5543_s25, 1  ;;  %p620_p6 = scmp.lt.s32.totalorder %s5543_s25, 3 }
  0x3b   : > { %p621_p7 = pnand %p5408_p5, %p620_p6 }
  0x3d   : > { %624 = sbr.rel (%p621_p7) target bundleno = 1786 (0x6fa), region = 103 }
  0x42   : > { %s627_s27 = sand.u32 1, %s5535_s23   ;;  %s5410_s28 = sshll.u32 %s5401_s15, 3  ;;  %v743_v1 = vlaneseq  ;;  %v1278_v2 = vld [vmem:[%s9518_s3 + $0x70] sm:$0xff]  ;;  %v9532_v3 = vmov 0   ;;  %v1279_v5 = vld [vmem:[%s9518_s3 + $0x78] sm:$0xff]  ;;  %v1276_v6 = vld [vmem:[%s9518_s3 + $0x60] sm:$0xff] }
  0x43   : > { %s5409_s17 = sshll.u32 %s627_s27, 9  ;;  %p682_p8 = scmp.lt.s32.totalorder %s5410_s28, 15  ;;  %5488 = vset.pattern.permute.xlu0 %v9532_v3  ;;  %1440 = vmatprep.mubr.bf16.mxu0 %v9532_v3  ;;  %v1274_v32 = vld [vmem:[%s9518_s3 + $0x50] sm:$0xff]  ;;  %vm4614_vm0 = vcmask 523264   ;;  %vm4932_vm1 = vcmask 261120  }
  0x44   : > { %v5811_v4 = vshrl.u32 %v743_v1, 7  ;;  %1553 = vmatprep.mubr.bf16.mxu1 %v9532_v3  ;;  %1352 = vperm.xlu0 %5488, %v1278_v2   ;;  %s5822_s19 = scalar_lea.vmem [#allocation3], %s5409_s17 }
  0x45   : > { %s10666_s28 = smov (!%p682_p8, %s5410_s28), 15  ;;  %v1117_v7 = vld [vmem:[%s5822_s19 + $0x1c0] sm:$0xff]  ;;  %v1118_v9 = vld [vmem:[%s5822_s19 + $0x1c8] sm:$0xff]  ;;  %5489 = vset.pattern.permute.xlu1 %v9532_v3 }
  0x46   : > { %9857 = vst [vmem:[#allocation4_spill] sm:$0xff] %v5811_v4  ;;  %v1121_v8 = vld [vmem:[%s5822_s19 + $0x1e0] sm:$0xff]  ;;  %v5829_v10 = vsub.s32 1, %v5811_v4  ;;  %v1142_v11 = vunpack.c.h.bf16 %v1117_v7  ;;  %v5832_v13 = vsub.s32 3, %v5811_v4  ;;  %v1122_v14 = vld [vmem:[%s5822_s19 + $0x1e8] sm:$0xff]  ;;  %1342 = vperm.xlu1 %5489, %v1276_v6   ;;  %s5411_s20 = sshll.u32 %s10666_s28, 2  ;;  %v1144_v17 = vunpack.c.h.bf16 %v1118_v9  ;;  %s690_s23 = scalar_lea.vmem %s9531_s16, %s10666_s28 }
  0x47   : > { %v1150_v12 = vunpack.c.h.bf16 %v1121_v8  ;;  %v1109_v15 = vld [vmem:[%s5822_s19 + $0x180] sm:$0xff]  ;;  %v1152_v18 = vunpack.c.h.bf16 %v1122_v14  ;;  %v5839_v19 = vsub.s32 0, %v5811_v4  ;;  %v1141_v20 = vunpack.c.l.bf16 %v1117_v7  ;;  %v1110_v21 = vld [vmem:[%s5822_s19 + $0x188] sm:$0xff]  ;;  %s5846_s27 = scalar_lea.vmem %s9516_s1, %s5411_s20 }
  0x48   : > { %v1113_v16 = vld [vmem:[%s5822_s19 + $0x1a0] sm:$0xff]  ;;  %v1114_v22 = vld [vmem:[%s5822_s19 + $0x1a8] sm:$0xff]  ;;  %v1149_v23 = vunpack.c.l.bf16 %v1121_v8  ;;  %v5849_v24 = vsub.s32 2, %v5811_v4  ;;  %v1143_v25 = vunpack.c.l.bf16 %v1118_v9  ;;  %v1151_v26 = vunpack.c.l.bf16 %v1122_v14  ;;  %1357 = vperm.xlu0 %5488, %v1279_v5  }
  0x49   : > { %9858 = vst [vmem:[#allocation5_spill] sm:$0xff] %v5839_v19  ;;  %v5852_v27 = vld [vmem:[%s5846_s27 + $0x3] ss:$4 sm:$0xff]  ;;  %v1126_v28 = vunpack.c.h.bf16 %v1109_v15  ;;  %v1134_v29 = vunpack.c.h.bf16 %v1113_v16  ;;  %v1128_v30 = vunpack.c.h.bf16 %v1110_v21  ;;  %v1136_v31 = vunpack.c.h.bf16 %v1114_v22  ;;  %v5868_v59 = vld [vmem:[%s5846_s27 + $0x2] ss:$4 sm:$0xff] }
  0x4a   : > { %v1167_v33 = vrot.slane %v5852_v27, %v5829_v10  ;;  %v1175_v34 = vrot.slane %v5852_v27, %v5832_v13  ;;  %v1163_v35 = vrot.slane %v5852_v27, %v5839_v19  ;;  %v1171_v36 = vrot.slane %v5852_v27, %v5849_v24  ;;  %v978_v49 = vld [vmem:[%s5822_s19 + $0x140] sm:$0xff]  ;;  %v979_v60 = vld [vmem:[%s5822_s19 + $0x148] sm:$0xff] }
  0x4b   : > { %v1125_v37 = vunpack.c.l.bf16 %v1109_v15  ;;  %v1133_v38 = vunpack.c.l.bf16 %v1113_v16  ;;  %v1127_v39 = vunpack.c.l.bf16 %v1110_v21  ;;  %v1135_v40 = vunpack.c.l.bf16 %v1114_v22  ;;  %v982_v54 = vld [vmem:[%s5822_s19 + $0x160] sm:$0xff]  ;;  %v983_v61 = vld [vmem:[%s5822_s19 + $0x168] sm:$0xff]  ;;  %v1275_v22 = vld [vmem:[%s9518_s3 + $0x58] sm:$0xff] }
  0x4c   : > { %v1217_v41 = vmul.f32 %v1167_v33, %v1142_v11  ;;  %v1225_v42 = vmul.f32 %v1167_v33, %v1150_v12  ;;  %v1219_v43 = vmul.f32 %v1175_v34, %v1144_v17  ;;  %v1227_v44 = vmul.f32 %v1175_v34, %v1152_v18  ;;  %1332 = vperm.xlu0 %5488, %v1274_v32   ;;  %v1277_v8 = vld [vmem:[%s9518_s3 + $0x68] sm:$0xff]  ;;  %v1272_v16 = vld [vmem:[%s9518_s3 + $0x40] sm:$0xff] }
  0x4d   : > { %v1216_v45 = vmul.f32 %v1163_v35, %v1141_v20  ;;  %v1224_v46 = vmul.f32 %v1163_v35, %v1149_v23  ;;  %v1218_v47 = vmul.f32 %v1171_v36, %v1143_v25  ;;  %v1226_v48 = vmul.f32 %v1171_v36, %v1151_v26  ;;  %v970_v15 = vld [vmem:[%s5822_s19 + $0x100] sm:$0xff]  ;;  %1347 = vperm.xlu1 %5489, %v1277_v8  }
  0x4e   : > { %v1241_v50 = vpack.c.bf16 %v1225_v42, %v1217_v41  ;;  %v1243_v51 = vpack.c.bf16 %v1227_v44, %v1219_v43  ;;  %v1201_v52 = vmul.f32 %v1167_v33, %v1126_v28  ;;  %v1209_v53 = vmul.f32 %v1167_v33, %v1134_v29  ;;  %v974_v29 = vld [vmem:[%s5822_s19 + $0x120] sm:$0xff] }
  0x4f   : > { %v1240_v55 = vpack.c.bf16 %v1224_v46, %v1216_v45  ;;  %v1242_v56 = vpack.c.bf16 %v1226_v48, %v1218_v47  ;;  %v1203_v57 = vmul.f32 %v1175_v34, %v1128_v30  ;;  %v1211_v58 = vmul.f32 %v1175_v34, %v1136_v31  ;;  %v971_v30 = vld [vmem:[%s5822_s19 + $0x108] sm:$0xff] }
  0x50   : > { %1408 = vmatprep.subr.bf16.mxu0 %v1241_v50  ;;  %1521 = vmatprep.subr.bf16.mxu1 %v1243_v51  ;;  %v1233_v62 = vpack.c.bf16 %v1209_v53, %v1201_v52  ;;  %v1200_v63 = vmul.f32 %v1163_v35, %v1125_v37  ;;  %v1208_v0 = vmul.f32 %v1163_v35, %v1133_v38  ;;  %v1003_v1 = vunpack.c.h.bf16 %v978_v49  ;;  %v1270_v31 = vld [vmem:[%s9518_s3 + $0x30] sm:$0xff]  ;;  %v1273_v45 = vld [vmem:[%s9518_s3 + $0x48] sm:$0xff]  ;;  %v1268_v51 = vld [vmem:[%s9518_s3 + $0x20] sm:$0xff] }
  0x51   : > { %1409 = vmatpush1.bf16.msra.mxu0 %v1240_v55  ;;  %1522 = vmatpush1.bf16.msra.mxu1 %v1242_v56  ;;  %v1235_v2 = vpack.c.bf16 %v1211_v58, %v1203_v57  ;;  %v1202_v5 = vmul.f32 %v1171_v36, %v1127_v39  ;;  %v1210_v6 = vmul.f32 %v1171_v36, %v1135_v40  ;;  %v1011_v7 = vunpack.c.h.bf16 %v982_v54  ;;  %v975_v36 = vld [vmem:[%s5822_s19 + $0x128] sm:$0xff]  ;;  %v839_v50 = vld [vmem:[%s5822_s19 + $0xc0] sm:$0xff] }
  0x52   : > { %1410 = vmatprep.subr.bf16.mxu0 %v1233_v62  ;;  %v1232_v9 = vpack.c.bf16 %v1208_v0, %v1200_v63  ;;  %v1028_v11 = vrot.slane %v5868_v59, %v5829_v10  ;;  %v1005_v12 = vunpack.c.h.bf16 %v979_v60  ;;  %v1013_v14 = vunpack.c.h.bf16 %v983_v61  ;;  %1322 = vperm.xlu0 %5488, %v1272_v16   ;;  %v843_v56 = vld [vmem:[%s5822_s19 + $0xe0] sm:$0xff]  ;;  %v840_v63 = vld [vmem:[%s5822_s19 + $0xc8] sm:$0xff] }
  0x53   : > { %1523 = vmatprep.subr.bf16.mxu1 %v1235_v2  ;;  %v1234_v17 = vpack.c.bf16 %v1210_v6, %v1202_v5  ;;  %v1036_v18 = vrot.slane %v5868_v59, %v5832_v13  ;;  %v1002_v20 = vunpack.c.l.bf16 %v978_v49  ;;  %v1010_v21 = vunpack.c.l.bf16 %v982_v54  ;;  %1337 = vperm.xlu1 %5489, %v1275_v22   ;;  %v5905_v62 = vld [vmem:[%s5846_s27 + $0x1] ss:$4 sm:$0xff] }
  0x54   : > { %v1078_v23 = vmul.f32 %v1028_v11, %v1003_v1  ;;  %v1086_v25 = vmul.f32 %v1028_v11, %v1011_v7  ;;  %v1024_v26 = vrot.slane %v5868_v59, %v5839_v19  ;;  %v1004_v28 = vunpack.c.l.bf16 %v979_v60  ;;  %v844_v0 = vld [vmem:[%s5822_s19 + $0xe8] sm:$0xff]  ;;  %v1271_v7 = vld [vmem:[%s9518_s3 + $0x38] sm:$0xff] }
  0x55   : > { %1411 = vmatpush1.bf16.msra.mxu0 %v1232_v9  ;;  %1524 = vmatpush1.bf16.msra.mxu1 %v1234_v17  ;;  %v1080_v32 = vmul.f32 %v1036_v18, %v1005_v12  ;;  %v1088_v33 = vmul.f32 %v1036_v18, %v1013_v14  ;;  %v1012_v34 = vunpack.c.l.bf16 %v983_v61  ;;  %v1032_v35 = vrot.slane %v5868_v59, %v5849_v24  ;;  %v1266_v14 = vld [vmem:[%s9518_s3 + $0x10] sm:$0xff] }
  0x56   : > { %v1102_v37 = vpack.c.bf16 %v1086_v25, %v1078_v23  ;;  %v1077_v38 = vmul.f32 %v1024_v26, %v1002_v20  ;;  %v1085_v39 = vmul.f32 %v1024_v26, %v1010_v21  ;;  %v987_v40 = vunpack.c.h.bf16 %v970_v15  ;;  %1312 = vperm.xlu0 %5488, %v1270_v31   ;;  %v831_v25 = vld [vmem:[%s5822_s19 + $0x80] sm:$0xff] }
  0x57   : > { %v1104_v41 = vpack.c.bf16 %v1088_v33, %v1080_v32  ;;  %v1079_v42 = vmul.f32 %v1032_v35, %v1004_v28  ;;  %v1087_v43 = vmul.f32 %v1032_v35, %v1012_v34  ;;  %v995_v44 = vunpack.c.h.bf16 %v974_v29  ;;  %1327 = vperm.xlu1 %5489, %v1273_v45   ;;  %v835_v31 = vld [vmem:[%s5822_s19 + $0xa0] sm:$0xff] }
  0x58   : > { %1412 = vmatprep.subr.bf16.mxu0 %v1102_v37  ;;  %v1101_v46 = vpack.c.bf16 %v1085_v39, %v1077_v38  ;;  %v1062_v47 = vmul.f32 %v1028_v11, %v987_v40  ;;  %v989_v48 = vunpack.c.h.bf16 %v971_v30  ;;  %v997_v49 = vunpack.c.h.bf16 %v975_v36  ;;  %v1269_v32 = vld [vmem:[%s9518_s3 + $0x28] sm:$0xff]  ;;  %v1264_v39 = vld [vmem:[%s9518_s3] sm:$0xff] }
  0x59   : > { %1525 = vmatprep.subr.bf16.mxu1 %v1104_v41  ;;  %v1103_v52 = vpack.c.bf16 %v1087_v43, %v1079_v42  ;;  %v1070_v53 = vmul.f32 %v1028_v11, %v995_v44  ;;  %v986_v54 = vunpack.c.l.bf16 %v970_v15  ;;  %v994_v55 = vunpack.c.l.bf16 %v974_v29  ;;  %v832_v37 = vld [vmem:[%s5822_s19 + $0x88] sm:$0xff] }
  0x5a   : > { %1413 = vmatpush1.bf16.msra.mxu0 %v1101_v46  ;;  %v1064_v57 = vmul.f32 %v1036_v18, %v989_v48  ;;  %v1072_v58 = vmul.f32 %v1036_v18, %v997_v49  ;;  %v988_v60 = vunpack.c.l.bf16 %v971_v30  ;;  %v996_v61 = vunpack.c.l.bf16 %v975_v36  ;;  %1302 = vperm.xlu0 %5488, %v1268_v51   ;;  %v836_v38 = vld [vmem:[%s5822_s19 + $0xa8] sm:$0xff] }
  0x5b   : > { %1526 = vmatpush1.bf16.msra.mxu1 %v1103_v52  ;;  %v1094_v1 = vpack.c.bf16 %v1070_v53, %v1062_v47  ;;  %v1061_v2 = vmul.f32 %v1024_v26, %v986_v54  ;;  %v1069_v5 = vmul.f32 %v1024_v26, %v994_v55  ;;  %v864_v6 = vunpack.c.h.bf16 %v839_v50  ;;  %1317 = vperm.xlu1 %5489, %v1271_v7   ;;  %v701_v52 = vld [vmem:[%s5822_s19 + $0x40] sm:$0xff]  ;;  %v1267_v53 = vld [vmem:[%s9518_s3 + $0x18] sm:$0xff] }
  0x5c   : > { %v1096_v8 = vpack.c.bf16 %v1072_v58, %v1064_v57  ;;  %v1063_v9 = vmul.f32 %v1032_v35, %v988_v60  ;;  %v1071_v11 = vmul.f32 %v1032_v35, %v996_v61  ;;  %v872_v12 = vunpack.c.h.bf16 %v843_v56  ;;  %v705_v58 = vld [vmem:[%s5822_s19 + $0x60] sm:$0xff]  ;;  %v2210_v60 = vld [vmem:[%s9520_s5 + $0x70] sm:$0xff] }
  0x5d   : > { %1414 = vmatprep.subr.bf16.mxu0 %v1094_v1  ;;  %v1093_v15 = vpack.c.bf16 %v1069_v5, %v1061_v2  ;;  %v889_v16 = vrot.slane %v5905_v62, %v5829_v10  ;;  %v866_v17 = vunpack.c.h.bf16 %v840_v63  ;;  %v874_v18 = vunpack.c.h.bf16 %v844_v0  ;;  %v5942_v2 = vld [vmem:[%s5846_s27] ss:$4 sm:$0xff] }
  0x5e   : > { %1527 = vmatprep.subr.bf16.mxu1 %v1096_v8  ;;  %v1095_v20 = vpack.c.bf16 %v1071_v11, %v1063_v9  ;;  %v897_v21 = vrot.slane %v5905_v62, %v5832_v13  ;;  %v863_v22 = vunpack.c.l.bf16 %v839_v50  ;;  %v871_v23 = vunpack.c.l.bf16 %v843_v56  ;;  %1292 = vperm.xlu0 %5488, %v1266_v14   ;;  %v702_v5 = vld [vmem:[%s5822_s19 + $0x48] sm:$0xff] }
  0x5f   : > { %1415 = vmatpush1.bf16.msra.mxu0 %v1093_v15  ;;  %v939_v26 = vmul.f32 %v889_v16, %v864_v6  ;;  %v947_v28 = vmul.f32 %v889_v16, %v872_v12  ;;  %v885_v29 = vrot.slane %v5905_v62, %v5839_v19  ;;  %v865_v30 = vunpack.c.l.bf16 %v840_v63  ;;  %1307 = vperm.xlu1 %5489, %v1269_v32   ;;  %v706_v6 = vld [vmem:[%s5822_s19 + $0x68] sm:$0xff] }
  0x60   : > { %1528 = vmatpush1.bf16.msra.mxu1 %v1095_v20  ;;  %v941_v33 = vmul.f32 %v897_v21, %v866_v17  ;;  %v949_v34 = vmul.f32 %v897_v21, %v874_v18  ;;  %v873_v35 = vunpack.c.l.bf16 %v844_v0  ;;  %v893_v36 = vrot.slane %v5905_v62, %v5849_v24  ;;  %v1265_v17 = vld [vmem:[%s9518_s3 + $0x8] sm:$0xff] }
  0x61   : > { %v963_v40 = vpack.c.bf16 %v947_v28, %v939_v26  ;;  %v938_v41 = vmul.f32 %v885_v29, %v863_v22  ;;  %v946_v42 = vmul.f32 %v885_v29, %v871_v23  ;;  %v848_v43 = vunpack.c.h.bf16 %v831_v25  ;;  %v2208_v23 = vld [vmem:[%s9520_s5 + $0x60] sm:$0xff] }
  0x62   : > { %v965_v44 = vpack.c.bf16 %v949_v34, %v941_v33  ;;  %v940_v45 = vmul.f32 %v893_v36, %v865_v30  ;;  %v948_v46 = vmul.f32 %v893_v36, %v873_v35  ;;  %v856_v47 = vunpack.c.h.bf16 %v835_v31  ;;  %1282 = vperm.xlu0 %5488, %v1264_v39   ;;  %v693_v30 = vld [vmem:[%s5822_s19] sm:$0xff]  ;;  %v698_v39 = vld [vmem:[%s5822_s19 + $0x28] sm:$0xff] }
  0x63   : > { %1416 = vmatprep.subr.bf16.mxu0 %v963_v40  ;;  %v962_v48 = vpack.c.bf16 %v946_v42, %v938_v41  ;;  %v923_v49 = vmul.f32 %v889_v16, %v848_v43  ;;  %v850_v50 = vunpack.c.h.bf16 %v832_v37  ;;  %v858_v51 = vunpack.c.h.bf16 %v836_v38  ;;  %1297 = vperm.xlu1 %5489, %v1267_v53   ;;  %v697_v34 = vld [vmem:[%s5822_s19 + $0x20] sm:$0xff]  ;;  %v2211_v40 = vld [vmem:[%s9520_s5 + $0x78] sm:$0xff] }
  0x64   : > { %1529 = vmatprep.subr.bf16.mxu1 %v965_v44  ;;  %v964_v54 = vpack.c.bf16 %v948_v46, %v940_v45  ;;  %v931_v55 = vmul.f32 %v889_v16, %v856_v47  ;;  %v847_v56 = vunpack.c.l.bf16 %v831_v25  ;;  %v855_v57 = vunpack.c.l.bf16 %v835_v31  ;;  %v2206_v45 = vld [vmem:[%s9520_s5 + $0x50] sm:$0xff] }
  0x65   : > { %1417 = vmatpush1.bf16.msra.mxu0 %v962_v48  ;;  %v925_v61 = vmul.f32 %v897_v21, %v850_v50  ;;  %v933_v63 = vmul.f32 %v897_v21, %v858_v51  ;;  %v849_v0 = vunpack.c.l.bf16 %v832_v37  ;;  %v857_v1 = vunpack.c.l.bf16 %v836_v38  ;;  %v694_v38 = vld [vmem:[%s5822_s19 + $0x8] sm:$0xff] }
  0x66   : > { %1530 = vmatpush1.bf16.msra.mxu1 %v964_v54  ;;  %v955_v7 = vpack.c.bf16 %v931_v55, %v923_v49  ;;  %v922_v8 = vmul.f32 %v885_v29, %v847_v56  ;;  %v930_v9 = vmul.f32 %v885_v29, %v855_v57  ;;  %v726_v11 = vunpack.c.h.bf16 %v701_v52  ;;  %2284 = vperm.xlu0 %5488, %v2210_v60   ;;  %v5971_v57 = vld [vmem:[%s5822_s19 + $0x1d0] sm:$0xff] }
  0x67   : > { %v957_v12 = vpack.c.bf16 %v933_v63, %v925_v61  ;;  %v924_v14 = vmul.f32 %v893_v36, %v849_v0  ;;  %v932_v15 = vmul.f32 %v893_v36, %v857_v1  ;;  %v734_v16 = vunpack.c.h.bf16 %v705_v58  ;;  %1287 = vperm.xlu1 %5489, %v1265_v17   ;;  %v1123_v1 = vld [vmem:[%s5822_s19 + $0x1f0] sm:$0xff]  ;;  %v1124_v17 = vld [vmem:[%s5822_s19 + $0x1f8] sm:$0xff] }
  0x68   : > { %1418 = vmatprep.subr.bf16.mxu0 %v955_v7  ;;  %v954_v18 = vpack.c.bf16 %v930_v9, %v922_v8  ;;  %v750_v20 = vrot.slane %v5942_v2, %v5829_v10  ;;  %v728_v21 = vunpack.c.h.bf16 %v702_v5  ;;  %v736_v22 = vunpack.c.h.bf16 %v706_v6 }
  0x69   : > { %1531 = vmatprep.subr.bf16.mxu1 %v957_v12  ;;  %v956_v25 = vpack.c.bf16 %v932_v15, %v924_v14  ;;  %v758_v26 = vrot.slane %v5942_v2, %v5832_v13  ;;  %v725_v28 = vunpack.c.l.bf16 %v701_v52  ;;  %v733_v29 = vunpack.c.l.bf16 %v705_v58  ;;  %v2209_v58 = vld [vmem:[%s9520_s5 + $0x68] sm:$0xff] }
  0x6a   : > { %1419 = vmatpush1.bf16.msra.mxu0 %v954_v18  ;;  %v800_v31 = vmul.f32 %v750_v20, %v726_v11  ;;  %v808_v32 = vmul.f32 %v750_v20, %v734_v16  ;;  %v746_v10 = vrot.slane %v5942_v2, %v5839_v19  ;;  %v727_v33 = vunpack.c.l.bf16 %v702_v5  ;;  %2274 = vperm.xlu0 %5488, %v2208_v23   ;;  %v2204_v5 = vld [vmem:[%s9520_s5 + $0x40] sm:$0xff] }
  0x6b   : > { %1532 = vmatpush1.bf16.msra.mxu1 %v956_v25  ;;  %v802_v35 = vmul.f32 %v758_v26, %v728_v21  ;;  %v810_v36 = vmul.f32 %v758_v26, %v736_v22  ;;  %v735_v37 = vunpack.c.l.bf16 %v706_v6  ;;  %v754_v13 = vrot.slane %v5942_v2, %v5849_v24  ;;  %2289 = vperm.xlu1 %5489, %v2211_v40   ;;  %v1120_v11 = vld [vmem:[%s5822_s19 + $0x1d8] sm:$0xff] }
  0x6c   : > { %v824_v41 = vpack.c.bf16 %v808_v32, %v800_v31  ;;  %v799_v42 = vmul.f32 %v746_v10, %v725_v28  ;;  %v807_v43 = vmul.f32 %v746_v10, %v733_v29  ;;  %v710_v44 = vunpack.c.h.bf16 %v693_v30  ;;  %v2207_v25 = vld [vmem:[%s9520_s5 + $0x58] sm:$0xff] }
  0x6d   : > { %v826_v46 = vpack.c.bf16 %v810_v36, %v802_v35  ;;  %v801_v47 = vmul.f32 %v754_v13, %v727_v33  ;;  %v809_v48 = vmul.f32 %v754_v13, %v735_v37  ;;  %v718_v24 = vunpack.c.h.bf16 %v697_v34  ;;  %v1111_v31 = vld [vmem:[%s5822_s19 + $0x190] sm:$0xff]  ;;  %v1112_v37 = vld [vmem:[%s5822_s19 + $0x198] sm:$0xff] }
  0x6e   : > { %1420 = vmatprep.subr.bf16.mxu0 %v824_v41  ;;  %v823_v49 = vpack.c.bf16 %v807_v43, %v799_v42  ;;  %v784_v50 = vmul.f32 %v750_v20, %v710_v44  ;;  %v712_v51 = vunpack.c.h.bf16 %v694_v38  ;;  %v720_v52 = vunpack.c.h.bf16 %v698_v39  ;;  %2264 = vperm.xlu0 %5488, %v2206_v45   ;;  %v1115_v32 = vld [vmem:[%s5822_s19 + $0x1b0] sm:$0xff]  ;;  %v1116_v41 = vld [vmem:[%s5822_s19 + $0x1b8] sm:$0xff]  ;;  %v2205_v42 = vld [vmem:[%s9520_s5 + $0x48] sm:$0xff] }
  0x6f   : > { %1533 = vmatprep.subr.bf16.mxu1 %v826_v46  ;;  %v825_v53 = vpack.c.bf16 %v809_v48, %v801_v47  ;;  %v792_v54 = vmul.f32 %v750_v20, %v718_v24  ;;  %v709_v55 = vunpack.c.l.bf16 %v693_v30  ;;  %v717_v56 = vunpack.c.l.bf16 %v697_v34  ;;  %2279 = vperm.xlu1 %5489, %v2209_v58   ;;  %v5989_v20 = vld [vmem:[%s9517_s2] sm:$0xff]  }
  0x70   : > { %1421 = vmatpush1.bf16.msra.mxu0 %v823_v49  ;;  %v786_v60 = vmul.f32 %v758_v26, %v712_v51  ;;  %v794_v61 = vmul.f32 %v758_v26, %v720_v52  ;;  %v711_v63 = vunpack.c.l.bf16 %v694_v38  ;;  %v719_v0 = vunpack.c.l.bf16 %v698_v39  ;;  %v2200_v43 = vld [vmem:[%s9520_s5 + $0x20] sm:$0xff] }
  0x71   : > { %1534 = vmatpush1.bf16.msra.mxu1 %v825_v53  ;;  %v816_v6 = vpack.c.bf16 %v792_v54, %v784_v50  ;;  %v783_v7 = vmul.f32 %v746_v10, %v709_v55  ;;  %v791_v8 = vmul.f32 %v746_v10, %v717_v56  ;;  %v5981_v9 = vsub.s32 5, %v5811_v4  ;;  %v2202_v10 = vld [vmem:[%s9520_s5 + $0x30] sm:$0xff]  ;;  %v6035_v56 = vld [vmem:[%s9517_s2 + $0x8] sm:$0xff]  }
  0x72   : > { %v818_v12 = vpack.c.bf16 %v794_v61, %v786_v60  ;;  %v785_v14 = vmul.f32 %v754_v13, %v711_v63  ;;  %v793_v15 = vmul.f32 %v754_v13, %v719_v0  ;;  %v1145_v16 = vunpack.c.l.bf16 %v5971_v57  ;;  %2254 = vperm.xlu0 %5488, %v2204_v5   ;;  %v6029_v55 = vld [vmem:[%s5822_s19 + $0x150] sm:$0xff] }
  0x73   : > { %1422 = vmatprep.subr.bf16.mxu0 %v816_v6  ;;  %v815_v18 = vpack.c.bf16 %v791_v8, %v783_v7  ;;  %v1146_v21 = vunpack.c.h.bf16 %v5971_v57  ;;  %v1153_v22 = vunpack.c.l.bf16 %v1123_v1  ;;  %v1154_v23 = vunpack.c.h.bf16 %v1123_v1  ;;  %2269 = vperm.xlu1 %5489, %v2207_v25   ;;  %v6038_v61 = vld [vmem:[%s5822_s19 + $0x170] sm:$0xff]  ;;  %v981_v7 = vld [vmem:[%s5822_s19 + $0x158] sm:$0xff] }
  0x74   : > { %1535 = vmatprep.subr.bf16.mxu1 %v818_v12  ;;  %v817_v26 = vpack.c.bf16 %v793_v15, %v785_v14  ;;  %v1183_v28 = vrot.slane %v5852_v27, %v5981_v9  ;;  %v5998_v29 = vsub.s32 7, %v5811_v4  ;;  %v1147_v30 = vunpack.c.l.bf16 %v1120_v11  ;;  %v2203_v63 = vld [vmem:[%s9520_s5 + $0x38] sm:$0xff] }
  0x75   : > { %1423 = vmatpush1.bf16.msra.mxu0 %v815_v18  ;;  %v1148_v33 = vunpack.c.h.bf16 %v1120_v11  ;;  %v1155_v34 = vunpack.c.l.bf16 %v1124_v17  ;;  %v1156_v35 = vunpack.c.h.bf16 %v1124_v17  ;;  %v6006_v36 = vsub.s32 4, %v5811_v4  ;;  %v985_v8 = vld [vmem:[%s5822_s19 + $0x178] sm:$0xff]  ;;  %v2198_v11 = vld [vmem:[%s9520_s5 + $0x10] sm:$0xff] }
  0x76   : > { %1536 = vmatpush1.bf16.msra.mxu1 %v817_v26  ;;  %v1221_v13 = vmul.f32 %v1183_v28, %v1146_v21  ;;  %v1229_v38 = vmul.f32 %v1183_v28, %v1154_v23  ;;  %v1191_v39 = vrot.slane %v5852_v27, %v5998_v29  ;;  %v6012_v40 = vsub.s32 6, %v5811_v4  ;;  %2244 = vperm.xlu0 %5488, %v2202_v10   ;;  %v972_v23 = vld [vmem:[%s5822_s19 + $0x110] sm:$0xff] }
  0x77   : > { %v1179_v44 = vrot.slane %v5852_v27, %v6006_v36  ;;  %v1129_v45 = vunpack.c.l.bf16 %v1111_v31  ;;  %v1130_v46 = vunpack.c.h.bf16 %v1111_v31  ;;  %v1137_v47 = vunpack.c.l.bf16 %v1115_v32  ;;  %2259 = vperm.xlu1 %5489, %v2205_v42   ;;  %v976_v31 = vld [vmem:[%s5822_s19 + $0x130] sm:$0xff]  ;;  %v2196_v42 = vld [vmem:[%s9520_s5] sm:$0xff] }
  0x78   : > { %1441 = vmatmul.mubr.bf16.vlgmr.msra.gmra.mxu0 %v5989_v20  ;;  %v1245_v48 = vpack.c.bf16 %v1229_v38, %v1221_v13  ;;  %v1223_v24 = vmul.f32 %v1191_v39, %v1148_v33  ;;  %v1231_v49 = vmul.f32 %v1191_v39, %v1156_v35  ;;  %v1187_v50 = vrot.slane %v5852_v27, %v6012_v40  ;;  %v2201_v35 = vld [vmem:[%s9520_s5 + $0x28] sm:$0xff] }
  0x79   : > { %1554 = vmatmul.mubr.bf16.vlgmr.msra.gmra.mxu1 %v5989_v20  ;;  %1450 = vmatprep.mubr.bf16.mxu0 %v9532_v3  ;;  %v1220_v51 = vmul.f32 %v1179_v44, %v1145_v16  ;;  %v1228_v52 = vmul.f32 %v1179_v44, %v1153_v22  ;;  %v1138_v53 = vunpack.c.h.bf16 %v1115_v32  ;;  %v1205_v54 = vmul.f32 %v1183_v28, %v1130_v46 }
  0x7a   : > { %1563 = vmatprep.mubr.bf16.mxu1 %v9532_v3  ;;  %1634 = vmatprep.subr.bf16.mxu0 %v1245_v48  ;;  %v1247_v27 = vpack.c.bf16 %v1231_v49, %v1223_v24  ;;  %v1222_v57 = vmul.f32 %v1187_v50, %v1147_v30  ;;  %v1230_v58 = vmul.f32 %v1187_v50, %v1155_v34  ;;  %v1131_v60 = vunpack.c.l.bf16 %v1112_v37  ;;  %v6073_v48 = vld [vmem:[%s9517_s2 + $0x10] sm:$0xff]  }
  0x7b   : > { %v1244_v0 = vpack.c.bf16 %v1228_v52, %v1220_v51  ;;  %v1213_v1 = vmul.f32 %v1183_v28, %v1138_v53  ;;  %v1132_v5 = vunpack.c.h.bf16 %v1112_v37  ;;  %v1139_v6 = vunpack.c.l.bf16 %v1116_v41  ;;  %2234 = vperm.xlu0 %5488, %v2200_v43   ;;  %2249 = vperm.xlu1 %5489, %v2203_v63  }
  0x7c   : > { %1747 = vmatprep.subr.bf16.mxu1 %v1247_v27  ;;  %v1246_v12 = vpack.c.bf16 %v1230_v58, %v1222_v57  ;;  %v1140_v14 = vunpack.c.h.bf16 %v1116_v41  ;;  %v1204_v15 = vmul.f32 %v1179_v44, %v1129_v45  ;;  %v1212_v16 = vmul.f32 %v1179_v44, %v1137_v47  ;;  %v973_v41 = vld [vmem:[%s5822_s19 + $0x118] sm:$0xff]  ;;  %v6080_v27 = vld [vmem:[%s5822_s19 + $0xd0] sm:$0xff] }
  0x7d   : > { %1635 = vmatpush1.bf16.msra.mxu0 %v1244_v0  ;;  %v1237_v17 = vpack.c.bf16 %v1213_v1, %v1205_v54  ;;  %v1207_v18 = vmul.f32 %v1191_v39, %v1132_v5  ;;  %v1206_v21 = vmul.f32 %v1187_v50, %v1131_v60  ;;  %v1214_v22 = vmul.f32 %v1187_v50, %v1139_v6  ;;  %v977_v47 = vld [vmem:[%s5822_s19 + $0x138] sm:$0xff] }
  0x7e   : > { %1748 = vmatpush1.bf16.msra.mxu1 %v1246_v12  ;;  %v1215_v25 = vmul.f32 %v1191_v39, %v1140_v14  ;;  %v1236_v26 = vpack.c.bf16 %v1212_v16, %v1204_v15  ;;  %v1006_v28 = vunpack.c.l.bf16 %v6029_v55  ;;  %v1007_v30 = vunpack.c.h.bf16 %v6029_v55  ;;  %v845_v16 = vld [vmem:[%s5822_s19 + $0xf0] sm:$0xff] }
  0x7f   : > { %1636 = vmatprep.subr.bf16.mxu0 %v1237_v17  ;;  %v1238_v32 = vpack.c.bf16 %v1214_v22, %v1206_v21  ;;  %v1014_v10 = vunpack.c.l.bf16 %v6038_v61  ;;  %v1015_v33 = vunpack.c.h.bf16 %v6038_v61  ;;  %v1044_v34 = vrot.slane %v5868_v59, %v5981_v9  ;;  %2224 = vperm.xlu0 %5488, %v2198_v11  }
  0x80   : > { %1451 = vmatmul.mubr.bf16.gmra.mxu0 %v6035_v56  ;;  %v1239_v37 = vpack.c.bf16 %v1215_v25, %v1207_v18  ;;  %v1008_v13 = vunpack.c.l.bf16 %v981_v7  ;;  %v1009_v38 = vunpack.c.h.bf16 %v981_v7  ;;  %v1016_v39 = vunpack.c.l.bf16 %v985_v8  ;;  %2239 = vperm.xlu1 %5489, %v2201_v35   ;;  %v846_v25 = vld [vmem:[%s5822_s19 + $0xf8] sm:$0xff] }
  0x81   : > { %1564 = vmatmul.mubr.bf16.gmra.mxu1 %v6035_v56  ;;  %1460 = vmatprep.mubr.bf16.mxu0 %v9532_v3  ;;  %v1082_v43 = vmul.f32 %v1044_v34, %v1007_v30  ;;  %v1090_v44 = vmul.f32 %v1044_v34, %v1015_v33  ;;  %v1017_v45 = vunpack.c.h.bf16 %v985_v8  ;;  %v1052_v46 = vrot.slane %v5868_v59, %v5998_v29 }
  0x82   : > { %1573 = vmatprep.mubr.bf16.mxu1 %v9532_v3  ;;  %1749 = vmatprep.subr.bf16.mxu1 %v1239_v37  ;;  %v1040_v24 = vrot.slane %v5868_v59, %v6006_v36  ;;  %v1048_v49 = vrot.slane %v5868_v59, %v6012_v40  ;;  %v990_v50 = vunpack.c.l.bf16 %v972_v23  ;;  %v991_v51 = vunpack.c.h.bf16 %v972_v23  ;;  %v842_v23 = vld [vmem:[%s5822_s19 + $0xd8] sm:$0xff] }
  0x83   : > { %1637 = vmatpush1.bf16.msra.mxu0 %v1236_v26  ;;  %1750 = vmatpush1.bf16.msra.mxu1 %v1238_v32  ;;  %v1106_v52 = vpack.c.bf16 %v1090_v44, %v1082_v43  ;;  %v1084_v53 = vmul.f32 %v1052_v46, %v1009_v38  ;;  %v1092_v54 = vmul.f32 %v1052_v46, %v1017_v45  ;;  %v998_v55 = vunpack.c.l.bf16 %v976_v31  ;;  %v2199_v26 = vld [vmem:[%s9520_s5 + $0x18] sm:$0xff] }
  0x84   : > { %v1081_v57 = vmul.f32 %v1040_v24, %v1006_v28  ;;  %v1089_v58 = vmul.f32 %v1040_v24, %v1014_v10  ;;  %v1083_v60 = vmul.f32 %v1048_v49, %v1008_v13  ;;  %v1091_v61 = vmul.f32 %v1048_v49, %v1016_v39  ;;  %2214 = vperm.xlu0 %5488, %v2196_v42   ;;  %v3142_v10 = vld [vmem:[%s9522_s7 + $0x70] sm:$0xff]  ;;  %v6104_v44 = vld [vmem:[%s9517_s2 + $0x18] sm:$0xff]  }
  0x85   : > { %1638 = vmatprep.subr.bf16.mxu0 %v1106_v52  ;;  %v1108_v63 = vpack.c.bf16 %v1092_v54, %v1084_v53  ;;  %v999_v0 = vunpack.c.h.bf16 %v976_v31  ;;  %v1066_v59 = vmul.f32 %v1044_v34, %v991_v51  ;;  %v992_v1 = vunpack.c.l.bf16 %v973_v41  ;;  %v833_v13 = vld [vmem:[%s5822_s19 + $0x90] sm:$0xff]  ;;  %2229 = vperm.xlu1 %5489, %v2199_v26   ;;  %v834_v54 = vld [vmem:[%s5822_s19 + $0x98] sm:$0xff] }
  0x86   : > { %v1105_v5 = vpack.c.bf16 %v1089_v58, %v1081_v57  ;;  %v1107_v6 = vpack.c.bf16 %v1091_v61, %v1083_v60  ;;  %v993_v7 = vunpack.c.h.bf16 %v973_v41  ;;  %v1000_v8 = vunpack.c.l.bf16 %v977_v47  ;;  %v837_v43 = vld [vmem:[%s5822_s19 + $0xb0] sm:$0xff]  ;;  %v838_v60 = vld [vmem:[%s5822_s19 + $0xb8] sm:$0xff] }
  0x87   : > { %1751 = vmatprep.subr.bf16.mxu1 %v1108_v63  ;;  %v1074_v11 = vmul.f32 %v1044_v34, %v999_v0  ;;  %v1001_v12 = vunpack.c.h.bf16 %v977_v47  ;;  %v1065_v14 = vmul.f32 %v1040_v24, %v990_v50  ;;  %v1073_v15 = vmul.f32 %v1040_v24, %v998_v55 }
  0x88   : > { %1461 = vmatmul.mubr.bf16.gmra.mxu0 %v6073_v48  ;;  %1752 = vmatpush1.bf16.msra.mxu1 %v1107_v6  ;;  %v1068_v17 = vmul.f32 %v1052_v46, %v993_v7  ;;  %v1067_v18 = vmul.f32 %v1048_v49, %v992_v1  ;;  %v1075_v21 = vmul.f32 %v1048_v49, %v1000_v8  ;;  %v867_v22 = vunpack.c.l.bf16 %v6080_v27  ;;  %v2197_v49 = vld [vmem:[%s9520_s5 + $0x8] sm:$0xff]  ;;  %v6119_v7 = vld [vmem:[%s5822_s19 + $0x50] sm:$0xff] }
  0x89   : > { %1574 = vmatmul.mubr.bf16.gmra.mxu1 %v6073_v48  ;;  %1470 = vmatprep.mubr.bf16.mxu0 %v9532_v3  ;;  %v1098_v28 = vpack.c.bf16 %v1074_v11, %v1066_v59  ;;  %v1076_v30 = vmul.f32 %v1052_v46, %v1001_v12  ;;  %v1097_v31 = vpack.c.bf16 %v1073_v15, %v1065_v14  ;;  %v868_v32 = vunpack.c.h.bf16 %v6080_v27  ;;  %v3140_v15 = vld [vmem:[%s9522_s7 + $0x60] sm:$0xff] }
  0x8a   : > { %1583 = vmatprep.mubr.bf16.mxu1 %v9532_v3  ;;  %1639 = vmatpush1.bf16.msra.mxu0 %v1105_v5  ;;  %v1099_v33 = vpack.c.bf16 %v1075_v21, %v1067_v18  ;;  %v875_v34 = vunpack.c.l.bf16 %v845_v16  ;;  %v876_v35 = vunpack.c.h.bf16 %v845_v16  ;;  %v905_v37 = vrot.slane %v5905_v62, %v5981_v9  ;;  %v3143_v16 = vld [vmem:[%s9522_s7 + $0x78] sm:$0xff] }
  0x8b   : > { %1640 = vmatprep.subr.bf16.mxu0 %v1098_v28  ;;  %v1100_v38 = vpack.c.bf16 %v1076_v30, %v1068_v17  ;;  %v869_v39 = vunpack.c.l.bf16 %v842_v23  ;;  %v870_v41 = vunpack.c.h.bf16 %v842_v23  ;;  %v877_v42 = vunpack.c.l.bf16 %v846_v25  ;;  %3216 = vperm.xlu0 %5488, %v3142_v10   ;;  %v707_v23 = vld [vmem:[%s5822_s19 + $0x70] sm:$0xff]  ;;  %v6137_v10 = vld [vmem:[%s9517_s2 + $0x20] sm:$0xff]  }
  0x8c   : > { %v943_v45 = vmul.f32 %v905_v37, %v868_v32  ;;  %v951_v46 = vmul.f32 %v905_v37, %v876_v35  ;;  %v878_v47 = vunpack.c.h.bf16 %v846_v25  ;;  %v913_v24 = vrot.slane %v5905_v62, %v5998_v29  ;;  %2219 = vperm.xlu1 %5489, %v2197_v49   ;;  %v708_v32 = vld [vmem:[%s5822_s19 + $0x78] sm:$0xff]  ;;  %v699_v49 = vld [vmem:[%s5822_s19 + $0x30] sm:$0xff] }
  0x8d   : > { %1753 = vmatprep.subr.bf16.mxu1 %v1100_v38  ;;  %v901_v50 = vrot.slane %v5905_v62, %v6006_v36  ;;  %v909_v51 = vrot.slane %v5905_v62, %v6012_v40  ;;  %v851_v52 = vunpack.c.l.bf16 %v833_v13  ;;  %v852_v53 = vunpack.c.h.bf16 %v833_v13 }
  0x8e   : > { %1641 = vmatpush1.bf16.msra.mxu0 %v1097_v31  ;;  %1754 = vmatpush1.bf16.msra.mxu1 %v1099_v33  ;;  %v967_v55 = vpack.c.bf16 %v951_v46, %v943_v45  ;;  %v945_v27 = vmul.f32 %v913_v24, %v870_v41  ;;  %v953_v57 = vmul.f32 %v913_v24, %v878_v47  ;;  %v859_v58 = vunpack.c.l.bf16 %v837_v43  ;;  %v704_v31 = vld [vmem:[%s5822_s19 + $0x58] sm:$0xff] }
  0x8f   : > { %v942_v61 = vmul.f32 %v901_v50, %v867_v22  ;;  %v950_v63 = vmul.f32 %v901_v50, %v875_v34  ;;  %v944_v0 = vmul.f32 %v909_v51, %v869_v39  ;;  %v952_v59 = vmul.f32 %v909_v51, %v877_v42  ;;  %3206 = vperm.xlu0 %5488, %v3140_v15   ;;  %v695_v42 = vld [vmem:[%s5822_s19 + $0x10] sm:$0xff]  ;;  %v3136_v15 = vld [vmem:[%s9522_s7 + $0x40] sm:$0xff] }
  0x90   : > { %1471 = vmatmul.mubr.bf16.gmra.mxu0 %v6104_v44  ;;  %1642 = vmatprep.subr.bf16.mxu0 %v967_v55  ;;  %v969_v62 = vpack.c.bf16 %v953_v57, %v945_v27  ;;  %v860_v1 = vunpack.c.h.bf16 %v837_v43  ;;  %v927_v5 = vmul.f32 %v905_v37, %v852_v53  ;;  %v853_v6 = vunpack.c.l.bf16 %v834_v54  ;;  %v696_v27 = vld [vmem:[%s5822_s19 + $0x18] sm:$0xff]  ;;  %v3138_v57 = vld [vmem:[%s9522_s7 + $0x50] sm:$0xff] }
  0x91   : > { %1584 = vmatmul.mubr.bf16.gmra.mxu1 %v6104_v44  ;;  %1480 = vmatprep.mubr.bf16.mxu0 %v9532_v3  ;;  %v966_v8 = vpack.c.bf16 %v950_v63, %v942_v61  ;;  %v968_v11 = vpack.c.bf16 %v952_v59, %v944_v0  ;;  %v854_v12 = vunpack.c.h.bf16 %v834_v54  ;;  %v861_v14 = vunpack.c.l.bf16 %v838_v60  ;;  %v700_v63 = vld [vmem:[%s5822_s19 + $0x38] sm:$0xff] }
  0x92   : > { %1593 = vmatprep.mubr.bf16.mxu1 %v9532_v3  ;;  %1755 = vmatprep.subr.bf16.mxu1 %v969_v62  ;;  %v935_v17 = vmul.f32 %v905_v37, %v860_v1  ;;  %v862_v18 = vunpack.c.h.bf16 %v838_v60  ;;  %v926_v21 = vmul.f32 %v901_v50, %v851_v52  ;;  %v934_v22 = vmul.f32 %v901_v50, %v859_v58 }
  0x93   : > { %1643 = vmatpush1.bf16.msra.mxu0 %v966_v8  ;;  %1756 = vmatpush1.bf16.msra.mxu1 %v968_v11  ;;  %v929_v25 = vmul.f32 %v913_v24, %v854_v12  ;;  %v928_v26 = vmul.f32 %v909_v51, %v853_v6  ;;  %v936_v28 = vmul.f32 %v909_v51, %v861_v14  ;;  %v729_v30 = vunpack.c.l.bf16 %v6119_v7 }
  0x94   : > { %v959_v33 = vpack.c.bf16 %v935_v17, %v927_v5  ;;  %v937_v34 = vmul.f32 %v913_v24, %v862_v18  ;;  %v958_v35 = vpack.c.bf16 %v934_v22, %v926_v21  ;;  %v730_v37 = vunpack.c.h.bf16 %v6119_v7  ;;  %3221 = vperm.xlu1 %5489, %v3143_v16   ;;  %3196 = vperm.xlu0 %5488, %v3138_v57   ;;  %v6165_v7 = vld [vmem:[%s9517_s2 + $0x28] sm:$0xff]   ;;  %v5140_v57 = vld [vmem:[%s9529_s14] sm:$0xff] }
  0x95   : > { %v960_v13 = vpack.c.bf16 %v936_v28, %v928_v26  ;;  %v737_v38 = vunpack.c.l.bf16 %v707_v23  ;;  %v738_v39 = vunpack.c.h.bf16 %v707_v23  ;;  %v766_v41 = vrot.slane %v5942_v2, %v5981_v9 }
  0x96   : > { %1644 = vmatprep.subr.bf16.mxu0 %v959_v33  ;;  %v961_v43 = vpack.c.bf16 %v937_v34, %v929_v25  ;;  %v731_v45 = vunpack.c.l.bf16 %v704_v31  ;;  %v732_v46 = vunpack.c.h.bf16 %v704_v31  ;;  %v739_v47 = vunpack.c.l.bf16 %v708_v32  ;;  %v3134_v34 = vld [vmem:[%s9522_s7 + $0x30] sm:$0xff] }
  0x97   : > { %1645 = vmatpush1.bf16.msra.mxu0 %v958_v35  ;;  %v804_v24 = vmul.f32 %v766_v41, %v730_v37  ;;  %v812_v50 = vmul.f32 %v766_v41, %v738_v39  ;;  %v740_v51 = vunpack.c.h.bf16 %v708_v32  ;;  %v774_v52 = vrot.slane %v5942_v2, %v5998_v29  ;;  %v3139_v32 = vld [vmem:[%s9522_s7 + $0x58] sm:$0xff]  ;;  %v6183_v35 = vld [vmem:[%s9517_s2 + $0x30] sm:$0xff]   ;;  %v3137_v37 = vld [vmem:[%s9522_s7 + $0x48] sm:$0xff] }
  0x98   : > { %1481 = vmatmul.mubr.bf16.gmra.mxu0 %v6137_v10  ;;  %1757 = vmatprep.subr.bf16.mxu1 %v961_v43  ;;  %v762_v9 = vrot.slane %v5942_v2, %v6006_v36  ;;  %v770_v53 = vrot.slane %v5942_v2, %v6012_v40  ;;  %v713_v54 = vunpack.c.l.bf16 %v695_v42  ;;  %v714_v55 = vunpack.c.h.bf16 %v695_v42  ;;  %v3141_v2 = vld [vmem:[%s9522_s7 + $0x68] sm:$0xff]  ;;  %v3130_v39 = vld [vmem:[%s9522_s7 + $0x10] sm:$0xff]  ;;  %v3128_v43 = vld [vmem:[%s9522_s7] sm:$0xff] }
  0x99   : > { %1594 = vmatmul.mubr.bf16.gmra.mxu1 %v6137_v10  ;;  %1490 = vmatprep.mubr.bf16.mxu0 %v9532_v3  ;;  %v828_v29 = vpack.c.bf16 %v812_v50, %v804_v24  ;;  %v806_v58 = vmul.f32 %v774_v52, %v732_v46  ;;  %v814_v60 = vmul.f32 %v774_v52, %v740_v51  ;;  %v721_v61 = vunpack.c.l.bf16 %v699_v49  ;;  %v3133_v42 = vld [vmem:[%s9522_s7 + $0x28] sm:$0xff]  ;;  %v4058_v46 = vld [vmem:[%s9524_s9 + $0x30] sm:$0xff]  ;;  %v4059_v24 = vld [vmem:[%s9524_s9 + $0x38] sm:$0xff] }
  0x9a   : > { %1603 = vmatprep.mubr.bf16.mxu1 %v9532_v3  ;;  %1758 = vmatpush1.bf16.msra.mxu1 %v960_v13  ;;  %v803_v36 = vmul.f32 %v762_v9, %v729_v30  ;;  %v811_v40 = vmul.f32 %v762_v9, %v737_v38  ;;  %v805_v0 = vmul.f32 %v770_v53, %v731_v45  ;;  %v722_v59 = vunpack.c.h.bf16 %v699_v49  ;;  %v3132_v13 = vld [vmem:[%s9522_s7 + $0x20] sm:$0xff]  ;;  %v3135_v38 = vld [vmem:[%s9522_s7 + $0x38] sm:$0xff]  ;;  %v4054_v50 = vld [vmem:[%s9524_s9 + $0x10] sm:$0xff] }
  0x9b   : > { %1646 = vmatprep.subr.bf16.mxu0 %v828_v29  ;;  %v830_v62 = vpack.c.bf16 %v814_v60, %v806_v58  ;;  %v813_v1 = vmul.f32 %v770_v53, %v739_v47  ;;  %v788_v5 = vmul.f32 %v766_v41, %v714_v55  ;;  %v715_v6 = vunpack.c.l.bf16 %v696_v27  ;;  %3211 = vperm.xlu1 %5489, %v3141_v2   ;;  %v3131_v45 = vld [vmem:[%s9522_s7 + $0x18] sm:$0xff]  ;;  %v3129_v47 = vld [vmem:[%s9522_s7 + $0x8] sm:$0xff]  ;;  %v4056_v49 = vld [vmem:[%s9524_s9 + $0x20] sm:$0xff] }
  0x9c   : > { %v827_v8 = vpack.c.bf16 %v811_v40, %v803_v36  ;;  %v796_v11 = vmul.f32 %v766_v41, %v722_v59  ;;  %v716_v12 = vunpack.c.h.bf16 %v696_v27  ;;  %v723_v14 = vunpack.c.l.bf16 %v700_v63  ;;  %3186 = vperm.xlu0 %5488, %v3136_v15   ;;  %v6204_v41 = vld [vmem:[%s9517_s2 + $0x38] sm:$0xff]   ;;  %v4057_v51 = vld [vmem:[%s9524_s9 + $0x28] sm:$0xff]  ;;  %v4915_v55 = vld [vmem:[%s9528_s13] sm:$0xff] }
  0x9d   : > { %1759 = vmatprep.subr.bf16.mxu1 %v830_v62  ;;  %v829_v16 = vpack.c.bf16 %v813_v1, %v805_v0  ;;  %v724_v17 = vunpack.c.h.bf16 %v700_v63  ;;  %v787_v18 = vmul.f32 %v762_v9, %v713_v54  ;;  %v795_v21 = vmul.f32 %v762_v9, %v721_v61  ;;  %v4582_v9 = vld [vmem:[%s9526_s11 + $0x10] sm:$0xff]  ;;  %v4580_v54 = vld [vmem:[%s9526_s11] sm:$0xff]  ;;  %v4581_v27 = vld [vmem:[%s9526_s11 + $0x8] sm:$0xff] }
  0x9e   : > { %1647 = vmatpush1.bf16.msra.mxu0 %v827_v8  ;;  %v820_v22 = vpack.c.bf16 %v796_v11, %v788_v5  ;;  %v790_v23 = vmul.f32 %v774_v52, %v716_v12  ;;  %v789_v25 = vmul.f32 %v770_v53, %v715_v6  ;;  %v797_v26 = vmul.f32 %v770_v53, %v723_v14  ;;  %v4053_v53 = vld [vmem:[%s9524_s9 + $0x8] sm:$0xff]  ;;  %v5224_v29 = vld [vmem:[#allocation2] sm:$0x1] }
  0x9f   : > { %1760 = vmatpush1.bf16.msra.mxu1 %v829_v16  ;;  %v798_v28 = vmul.f32 %v774_v52, %v724_v17  ;;  %v819_v30 = vpack.c.bf16 %v795_v21, %v787_v18  ;;  %3201 = vperm.xlu1 %5489, %v3139_v32   ;;  %v4052_v52 = vld [vmem:[%s9524_s9] sm:$0xff]  ;;  %v5141_v58 = vld [vmem:[%s9529_s14 + $0x8] sm:$0xff] }
  0xa0   : > { %1491 = vmatmul.mubr.bf16.gmra.mxu0 %v6165_v7  ;;  %1648 = vmatprep.subr.bf16.mxu0 %v820_v22  ;;  %v821_v31 = vpack.c.bf16 %v797_v26, %v789_v25 }
  0xa1   : > { %1604 = vmatmul.mubr.bf16.gmra.mxu1 %v6165_v7  ;;  %1500 = vmatprep.mubr.bf16.mxu0 %v9532_v3  ;;  %v822_v33 = vpack.c.bf16 %v798_v28, %v790_v23 }
  0xa2   : > { %1613 = vmatprep.mubr.bf16.mxu1 %v9532_v3  ;;  %1649 = vmatpush1.bf16.msra.mxu0 %v819_v30 }
  0xa3   : > { %1761 = vmatprep.subr.bf16.mxu1 %v822_v33  ;;  %3176 = vperm.xlu0 %5488, %v3134_v34  }
  0xa4   : > { %1762 = vmatpush1.bf16.msra.mxu1 %v821_v31  ;;  %3191 = vperm.xlu1 %5489, %v3137_v37  }
  0xa7   : > { %3166 = vperm.xlu0 %5488, %v3132_v13  }
  0xa8   : > { %1501 = vmatmul.mubr.bf16.gmra.mxu0 %v6183_v35  ;;  %3181 = vperm.xlu1 %5489, %v3135_v38  }
  0xa9   : > { %1614 = vmatmul.mubr.bf16.gmra.mxu1 %v6183_v35  ;;  %1510 = vmatprep.mubr.bf16.mxu0 %v9532_v3 }
  0xaa   : > { %1623 = vmatprep.mubr.bf16.mxu1 %v9532_v3 }
  0xab   : > { %3156 = vperm.xlu0 %5488, %v3130_v39  }
  0xac   : > { %3171 = vperm.xlu1 %5489, %v3133_v42  }
  0xaf   : > { %3146 = vperm.xlu0 %5488, %v3128_v43  }
  0xb0   : > { %1511 = vmatmul.mubr.bf16.gmra.mxu0 %v6204_v41  ;;  %3161 = vperm.xlu1 %5489, %v3131_v45  }
  0xb1   : > { %1624 = vmatmul.mubr.bf16.gmra.mxu1 %v6204_v41  ;;  %1666 = vmatprep.mubr.bf16.mxu0 %v9532_v3 }
  0xb2   : > { %1779 = vmatprep.mubr.bf16.mxu1 %v9532_v3 }
  0xb3   : > { %4092 = vperm.xlu0 %5488, %v4058_v46  }
  0xb4   : > { %3151 = vperm.xlu1 %5489, %v3129_v47  }
  0xb7   : > { %4082 = vperm.xlu0 %5488, %v4056_v49  }
  0xb8   : > { %1667 = vmatmul.mubr.bf16.vlgmr.msra.gmra.mxu0 %v5989_v20  ;;  %4097 = vperm.xlu1 %5489, %v4059_v24  }
  0xb9   : > { %1780 = vmatmul.mubr.bf16.vlgmr.msra.gmra.mxu1 %v5989_v20  ;;  %1676 = vmatprep.mubr.bf16.mxu0 %v9532_v3  ;;  %v4055_v20 = vld [vmem:[%s9524_s9 + $0x18] sm:$0xff] }
  0xba   : > { %1789 = vmatprep.mubr.bf16.mxu1 %v9532_v3 }
  0xbb   : > { %4072 = vperm.xlu0 %5488, %v4054_v50  }
  0xbc   : > { %4087 = vperm.xlu1 %5489, %v4057_v51  }
  0xbf   : > { %4062 = vperm.xlu0 %5488, %v4052_v52  }
  0xc0   : > { %1677 = vmatmul.mubr.bf16.gmra.mxu0 %v6035_v56  ;;  %4077 = vperm.xlu1 %5489, %v4055_v20  }
  0xc1   : > { %1790 = vmatmul.mubr.bf16.gmra.mxu1 %v6035_v56  ;;  %1686 = vmatprep.mubr.bf16.mxu0 %v9532_v3  ;;  %v4583_v56 = vld [vmem:[%s9526_s11 + $0x18] sm:$0xff] }
  0xc2   : > { %1799 = vmatprep.mubr.bf16.mxu1 %v9532_v3 }
  0xc3   : > { %4596 = vperm.xlu0 %5488, %v4582_v9  }
  0xc4   : > { %4067 = vperm.xlu1 %5489, %v4053_v53  }
  0xc7   : > { %4586 = vperm.xlu0 %5488, %v4580_v54  }
  0xc8   : > { %1687 = vmatmul.mubr.bf16.gmra.mxu0 %v6073_v48  ;;  %4601 = vperm.xlu1 %5489, %v4583_v56  }
  0xc9   : > { %1800 = vmatmul.mubr.bf16.gmra.mxu1 %v6073_v48  ;;  %1696 = vmatprep.mubr.bf16.mxu0 %v9532_v3  ;;  %v4916_v48 = vld [vmem:[%s9528_s13 + $0x8] sm:$0xff] }
  0xca   : > { %1809 = vmatprep.mubr.bf16.mxu1 %v9532_v3 }
  0xcb   : > { %4919 = vperm.xlu0 %5488, %v4915_v55  }
  0xcc   : > { %4591 = vperm.xlu1 %5489, %v4581_v27  }
  0xcf   : > { %5144 = vperm.xlu0 %5488, %v5140_v57  }
  0xd0   : > { %1697 = vmatmul.mubr.bf16.gmra.mxu0 %v6104_v44  ;;  %4924 = vperm.xlu1 %5489, %v4916_v48  }
  0xd1   : > { %1810 = vmatmul.mubr.bf16.gmra.mxu1 %v6104_v44  ;;  %1706 = vmatprep.mubr.bf16.mxu0 %v9532_v3  ;;  %v6302_v44 = vpop.permute.xlu0 %1352 }
  0xd2   : > { %1819 = vmatprep.mubr.bf16.mxu1 %v9532_v3  ;;  %9859 = vst [vmem:[#allocation6_spill] sm:$0xff] %v6302_v44 }
  0xd3   : > { %5227 = vperm.xlu0 %5488, %v5224_v29  }
  0xd4   : > { %5149 = vperm.xlu1 %5489, %v5141_v58  }
  0xd5   : > { %v6306_v60 = vpop.permute.xlu0 %1357 }
  0xd6   : > { %9861 = vst [vmem:[#allocation8_spill] sm:$0xff] %v6306_v60 }
  0xd8   : > { %1707 = vmatmul.mubr.bf16.gmra.mxu0 %v6137_v10 }
  0xd9   : > { %1820 = vmatmul.mubr.bf16.gmra.mxu1 %v6137_v10  ;;  %1716 = vmatprep.mubr.bf16.mxu0 %v9532_v3  ;;  %v6304_v10 = vpop.permute.xlu1 %1342  ;;  %v6310_v63 = vpop.permute.xlu0 %1332 }
  0xda   : > { %1829 = vmatprep.mubr.bf16.mxu1 %v9532_v3  ;;  %9860 = vst [vmem:[#allocation7_spill] sm:$0xff] %v6304_v10  ;;  %9863 = vst [vmem:[#allocation10_spill] sm:$0xff] %v6310_v63 }
  0xdd   : > { %v6308_v61 = vpop.permute.xlu1 %1347  ;;  %v6314_v36 = vpop.permute.xlu0 %1322 }
  0xde   : > { %9862 = vst [vmem:[#allocation9_spill] sm:$0xff] %v6308_v61  ;;  %9865 = vst [vmem:[#allocation12_spill] sm:$0xff] %v6314_v36 }
  0xe0   : > { %1717 = vmatmul.mubr.bf16.gmra.mxu0 %v6165_v7 }
  0xe1   : > { %1830 = vmatmul.mubr.bf16.gmra.mxu1 %v6165_v7  ;;  %1726 = vmatprep.mubr.bf16.mxu0 %v9532_v3  ;;  %v6312_v2 = vpop.permute.xlu1 %1337  ;;  %v6318_v0 = vpop.permute.xlu0 %1312 }
  0xe2   : > { %1839 = vmatprep.mubr.bf16.mxu1 %v9532_v3  ;;  %9864 = vst [vmem:[#allocation11_spill] sm:$0xff] %v6312_v2  ;;  %9867 = vst [vmem:[#allocation14_spill] sm:$0xff] %v6318_v0 }
  0xe5   : > { %v6316_v40 = vpop.permute.xlu1 %1327  ;;  %v6322_v62 = vpop.permute.xlu0 %1302 }
  0xe6   : > { %9866 = vst [vmem:[#allocation13_spill] sm:$0xff] %v6316_v40  ;;  %9869 = vst [vmem:[#allocation16_spill] sm:$0xff] %v6322_v62 }
  0xe8   : > { %1727 = vmatmul.mubr.bf16.gmra.mxu0 %v6183_v35 }
  0xe9   : > { %1840 = vmatmul.mubr.bf16.gmra.mxu1 %v6183_v35  ;;  %1736 = vmatprep.mubr.bf16.mxu0 %v9532_v3  ;;  %v6320_v59 = vpop.permute.xlu1 %1317  ;;  %v6326_v5 = vpop.permute.xlu0 %1292 }
  0xea   : > { %1849 = vmatprep.mubr.bf16.mxu1 %v9532_v3  ;;  %9868 = vst [vmem:[#allocation15_spill] sm:$0xff] %v6320_v59 }
  0xed   : > { %v6324_v1 = vpop.permute.xlu1 %1307  ;;  %v6330_v7 = vpop.permute.xlu0 %1282 }
  0xee   : > { %9870 = vst [vmem:[#allocation17_spill] sm:$0xff] %v6324_v1  ;;  %9872 = vst [vmem:[#allocation19_spill] sm:$0xff] %v6330_v7 }
  0xf0   : > { %1737 = vmatmul.mubr.bf16.gmra.mxu0 %v6204_v41 }
  0xf1   : > { %1850 = vmatmul.mubr.bf16.gmra.mxu1 %v6204_v41  ;;  %2372 = vmatprep.mubr.bf16.mxu0 %v9532_v3  ;;  %v6328_v6 = vpop.permute.xlu1 %1297 }
  0xf2   : > { %2485 = vmatprep.mubr.bf16.mxu1 %v9532_v3  ;;  %9871 = vst [vmem:[#allocation18_spill] sm:$0xff] %v6328_v6 }
  0xf5   : > { %v6338_v17 = vpop.permute.xlu1 %1287 }
 0x138   : > { %v1442_v8 = vpop.f32.mrf.mxu0 }
 0x139   : > { %v1443_v11 = vadd.f32 %v1442_v8, %v6330_v7  ;;  %v1555_v12 = vpop.f32.mrf.mxu1 }
 0x13a   : > { %v1556_v14 = vadd.f32 %v1555_v12, %v6330_v7  ;;  %v6334_v15 = vpop.f32.mrf.mxu0 }
 0x13b   : > { %v6336_v16 = vpop.f32.mrf.mxu1  ;;  %v1860_v21 = vmul.f32 0.02, %v1443_v11 }
 0x13c   : > { %v1446_v18 = vpop.f32.mrf.mxu0  ;;  %v1862_v25 = vmul.f32 0.02, %v1556_v14 }
 0x13d   : > { %v1447_v22 = vadd.f32 %v1446_v18, %v6338_v17  ;;  %v1559_v23 = vpop.f32.mrf.mxu1  ;;  %v1988_v34 = vmax.f32 %v1443_v11, %v1860_v21 }
 0x13e   : > { %v1560_v26 = vadd.f32 %v1559_v23, %v6338_v17  ;;  %v1448_v28 = vpop.f32.mrf.mxu0  ;;  %v1990_v38 = vmax.f32 %v1556_v14, %v1862_v25 }
 0x13f   : > { %v1868_v30 = vmul.f32 0.02, %v1447_v22  ;;  %v1561_v31 = vpop.f32.mrf.mxu1 }
 0x140   : > { %v1870_v32 = vmul.f32 0.02, %v1560_v26  ;;  %v1452_v33 = vpop.f32.mrf.mxu0 }
 0x141   : > { %v1996_v35 = vmax.f32 %v1447_v22, %v1868_v30  ;;  %v1453_v37 = vadd.f32 %v1452_v33, %v6326_v5  ;;  %v1565_v13 = vpop.f32.mrf.mxu1 }
 0x142   : > { %v1998_v39 = vmax.f32 %v1560_v26, %v1870_v32  ;;  %v1566_v41 = vadd.f32 %v1565_v13, %v6326_v5  ;;  %v1454_v42 = vpop.f32.mrf.mxu0  ;;  %v6357_v13 = vadd.f32 %v1448_v28, %v6338_v17 }
 0x143   : > { %v6344_v43 = vpack.c.bf16 %v1996_v35, %v1988_v34  ;;  %v1567_v45 = vpop.f32.mrf.mxu1  ;;  %v1876_v49 = vmul.f32 0.02, %v1453_v37 }
 0x144   : > { %v6346_v46 = vpack.c.bf16 %v1998_v39, %v1990_v38  ;;  %v1456_v47 = vpop.f32.mrf.mxu0  ;;  %v1878_v51 = vmul.f32 0.02, %v1566_v41  ;;  %9877 = vst [vmem:[#allocation24_spill] sm:$0xff] %v6357_v13  ;;  %v6360_v39 = vadd.f32 %v1561_v31, %v6338_v17  ;;  %v6378_v31 = vadd.f32 %v6334_v15, %v6330_v7 }
 0x145   : > { %9873 = vst [vmem:[#allocation20_spill] sm:$0xff] %v6344_v43  ;;  %v1457_v24 = vadd.f32 %v1456_v47, %v6328_v6  ;;  %v1569_v50 = vpop.f32.mrf.mxu1  ;;  %v2004_v55 = vmax.f32 %v1453_v37, %v1876_v49  ;;  %v6366_v49 = vadd.f32 %v1567_v45, %v6326_v5  ;;  %v6385_v45 = vmul.f32 0.02, %v6357_v13 }
 0x146   : > { %9874 = vst [vmem:[#allocation21_spill] sm:$0xff] %v6346_v46  ;;  %v1570_v52 = vadd.f32 %v1569_v50, %v6328_v6  ;;  %v1458_v20 = vpop.f32.mrf.mxu0  ;;  %v2006_v48 = vmax.f32 %v1566_v41, %v1878_v51  ;;  %9878 = vst [vmem:[#allocation25_spill] sm:$0xff] %v6360_v39  ;;  %v6363_v41 = vadd.f32 %v1454_v42, %v6326_v5 }
 0x147   : > { %v1884_v9 = vmul.f32 0.02, %v1457_v24  ;;  %v1571_v53 = vpop.f32.mrf.mxu1  ;;  %9880 = vst [vmem:[#allocation27_spill] sm:$0xff] %v6366_v49  ;;  %v6369_v50 = vadd.f32 %v1458_v20, %v6328_v6  ;;  %9883 = vst [vmem:[#allocation30_spill] sm:$0xff] %v6378_v31  ;;  %v6382_v42 = vadd.f32 %v6336_v16, %v6330_v7 }
 0x148   : > { %v1886_v54 = vmul.f32 0.02, %v1570_v52  ;;  %v1462_v56 = vpop.f32.mrf.mxu0  ;;  %9879 = vst [vmem:[#allocation26_spill] sm:$0xff] %v6363_v41  ;;  %v6372_v51 = vadd.f32 %v1571_v53, %v6328_v6  ;;  %9885 = vst [vmem:[#allocation32_spill] sm:$0xff] %v6385_v45  ;;  %v6396_v53 = vmul.f32 0.02, %v6363_v41 }
 0x149   : > { %v2012_v27 = vmax.f32 %v1457_v24, %v1884_v9  ;;  %v1575_v57 = vpop.f32.mrf.mxu1  ;;  %9881 = vst [vmem:[#allocation28_spill] sm:$0xff] %v6369_v50  ;;  %9884 = vst [vmem:[#allocation31_spill] sm:$0xff] %v6382_v42  ;;  %v6393_v9 = vmul.f32 0.02, %v6360_v39 }
 0x14a   : > { %v2014_v29 = vmax.f32 %v1570_v52, %v1886_v54  ;;  %v1464_v58 = vpop.f32.mrf.mxu0  ;;  %9882 = vst [vmem:[#allocation29_spill] sm:$0xff] %v6372_v51  ;;  %v6388_v52 = vadd.f32 %v1462_v56, %v6322_v62  ;;  %9888 = vst [vmem:[#allocation35_spill] sm:$0xff] %v6396_v53  ;;  %v6399_v15 = vadd.f32 %v1575_v57, %v6322_v62  ;;  %v6417_v57 = vmul.f32 0.02, %v6369_v50 }
 0x14b   : > { %v6350_v8 = vpack.c.bf16 %v2012_v27, %v2004_v55  ;;  %v1577_v11 = vpop.f32.mrf.mxu1  ;;  %9887 = vst [vmem:[#allocation34_spill] sm:$0xff] %v6393_v9  ;;  %v6405_v55 = vmul.f32 0.02, %v6366_v49  ;;  %v6408_v56 = vadd.f32 %v1464_v58, %v6322_v62 }
 0x14c   : > { %v6352_v12 = vpack.c.bf16 %v2014_v29, %v2006_v48  ;;  %v1466_v14 = vpop.f32.mrf.mxu0  ;;  %9886 = vst [vmem:[#allocation33_spill] sm:$0xff] %v6388_v52  ;;  %9889 = vst [vmem:[#allocation36_spill] sm:$0xff] %v6399_v15  ;;  %v6411_v27 = vadd.f32 %v1577_v11, %v6322_v62  ;;  %v6429_v11 = vmul.f32 0.02, %v6388_v52 }
 0x14d   : > { %9875 = vst [vmem:[#allocation22_spill] sm:$0xff] %v6350_v8  ;;  %v1579_v18 = vpop.f32.mrf.mxu1  ;;  %9891 = vst [vmem:[#allocation38_spill] sm:$0xff] %v6405_v55  ;;  %v6423_v3 = vadd.f32 %v1466_v14, %v6324_v1  ;;  %v6443_v14 = vmul.f32 0.02, %v6399_v15 }
 0x14e   : > { %9876 = vst [vmem:[#allocation23_spill] sm:$0xff] %v6352_v12  ;;  %v1468_v21 = vpop.f32.mrf.mxu0  ;;  %9892 = vst [vmem:[#allocation39_spill] sm:$0xff] %v6408_v56 }
 0x14f   : > { %v1581_v22 = vpop.f32.mrf.mxu1  ;;  %v6402_v16 = vadd.f32 %v1468_v21, %v6324_v1  ;;  %9893 = vst [vmem:[#allocation40_spill] sm:$0xff] %v6411_v27  ;;  %9895 = vst [vmem:[#allocation42_spill] sm:$0xff] %v6417_v57  ;;  %v6420_v21 = vmul.f32 0.02, %v6372_v51 }
 0x150   : > { %v1472_v23 = vpop.f32.mrf.mxu0  ;;  %9897 = vst [vmem:[#allocation44_spill] sm:$0xff] %v6423_v3  ;;  %9899 = vst [vmem:[#allocation46_spill] sm:$0xff] %v6429_v11  ;;  %v6435_v19 = vadd.f32 %v1581_v22, %v6324_v1  ;;  %v6455_v22 = vmul.f32 0.02, %v6408_v56 }
 0x151   : > { %v6354_v25 = vpop.f32.mrf.mxu1  ;;  %9890 = vst [vmem:[#allocation37_spill] sm:$0xff] %v6402_v16  ;;  %9896 = vst [vmem:[#allocation43_spill] sm:$0xff] %v6420_v21  ;;  %v6449_v12 = vadd.f32 %v1472_v23, %v6318_v0  ;;  %v6467_v23 = vmul.f32 0.02, %v6423_v3 }
 0x152   : > { %v1474_v26 = vpop.f32.mrf.mxu0  ;;  %9901 = vst [vmem:[#allocation48_spill] sm:$0xff] %v6435_v19  ;;  %9903 = vst [vmem:[#allocation50_spill] sm:$0xff] %v6443_v14 }
 0x153   : > { %v1587_v30 = vpop.f32.mrf.mxu1  ;;  %v6414_v48 = vadd.f32 %v1474_v26, %v6318_v0  ;;  %v6432_v26 = vadd.f32 %v1579_v18, %v6324_v1  ;;  %9905 = vst [vmem:[#allocation52_spill] sm:$0xff] %v6449_v12  ;;  %9907 = vst [vmem:[#allocation54_spill] sm:$0xff] %v6455_v22 }
 0x154   : > { %v1476_v32 = vpop.f32.mrf.mxu0  ;;  %v6426_v4 = vadd.f32 %v1587_v30, %v6318_v0  ;;  %v6446_v30 = vmul.f32 0.02, %v6402_v16  ;;  %9911 = vst [vmem:[#allocation58_spill] sm:$0xff] %v6467_v23 }
 0x155   : > { %v1589_v33 = vpop.f32.mrf.mxu1  ;;  %9894 = vst [vmem:[#allocation41_spill] sm:$0xff] %v6414_v48  ;;  %9900 = vst [vmem:[#allocation47_spill] sm:$0xff] %v6432_v26  ;;  %v6461_v39 = vmul.f32 0.02, %v6414_v48  ;;  %v6464_v9 = vadd.f32 %v1476_v32, %v6320_v59  ;;  %v6479_v42 = vmul.f32 0.02, %v6432_v26 }
 0x156   : > { %v1478_v34 = vpop.f32.mrf.mxu0  ;;  %9898 = vst [vmem:[#allocation45_spill] sm:$0xff] %v6426_v4  ;;  %9904 = vst [vmem:[#allocation51_spill] sm:$0xff] %v6446_v30  ;;  %v6473_v45 = vadd.f32 %v1589_v33, %v6320_v59  ;;  %v6482_v32 = vmul.f32 0.02, %v6435_v19 }
 0x157   : > { %v1591_v35 = vpop.f32.mrf.mxu1  ;;  %v6438_v46 = vadd.f32 %v1478_v34, %v6320_v59  ;;  %v6458_v34 = vmul.f32 0.02, %v6411_v27  ;;  %9909 = vst [vmem:[#allocation56_spill] sm:$0xff] %v6461_v39  ;;  %9910 = vst [vmem:[#allocation57_spill] sm:$0xff] %v6464_v9 }
 0x158   : > { %v1482_v37 = vpop.f32.mrf.mxu0  ;;  %v6452_v18 = vadd.f32 %v1591_v35, %v6320_v59  ;;  %v6470_v35 = vmul.f32 0.02, %v6426_v4  ;;  %9913 = vst [vmem:[#allocation60_spill] sm:$0xff] %v6473_v45  ;;  %9915 = vst [vmem:[#allocation62_spill] sm:$0xff] %v6479_v42  ;;  %v6497_v59 = vadd.f32 %v6354_v25, %v6318_v0  ;;  %v6516_v0 = vmul.f32 0.02, %v6473_v45 }
 0x159   : > { %v1595_v38 = vpop.f32.mrf.mxu1  ;;  %9902 = vst [vmem:[#allocation49_spill] sm:$0xff] %v6438_v46  ;;  %9908 = vst [vmem:[#allocation55_spill] sm:$0xff] %v6458_v34  ;;  %v6485_v15 = vmul.f32 0.02, %v6438_v46  ;;  %v6488_v14 = vadd.f32 %v1482_v37, %v6314_v36  ;;  %v6505_v37 = vmul.f32 0.02, %v6464_v9 }
 0x15a   : > { %v1484_v47 = vpop.f32.mrf.mxu0  ;;  %9906 = vst [vmem:[#allocation53_spill] sm:$0xff] %v6452_v18  ;;  %9912 = vst [vmem:[#allocation59_spill] sm:$0xff] %v6470_v35  ;;  %v6500_v52 = vmul.f32 0.02, %v6452_v18  ;;  %v6508_v21 = vadd.f32 %v1595_v38, %v6314_v36 }
 0x15b   : > { %v1597_v24 = vpop.f32.mrf.mxu1  ;;  %v6476_v49 = vadd.f32 %v1484_v47, %v6314_v36  ;;  %9916 = vst [vmem:[#allocation63_spill] sm:$0xff] %v6482_v32  ;;  %9917 = vst [vmem:[#allocation64_spill] sm:$0xff] %v6485_v15  ;;  %v6493_v47 = vmul.f32 0.02, %v6449_v12 }
 0x15c   : > { %v6374_v28 = vpop.f32.mrf.mxu0  ;;  %9918 = vst [vmem:[#allocation65_spill] sm:$0xff] %v6488_v14  ;;  %9920 = vst [vmem:[#allocation67_spill] sm:$0xff] %v6497_v59  ;;  %v6511_v33 = vadd.f32 %v1597_v24, %v6314_v36  ;;  %v6527_v24 = vmul.f32 0.02, %v6488_v14  ;;  %v6549_v3 = vmul.f32 0.02, %v6508_v21 }
 0x15d   : > { %v6390_v20 = vpop.f32.mrf.mxu1  ;;  %9914 = vst [vmem:[#allocation61_spill] sm:$0xff] %v6476_v49  ;;  %9919 = vst [vmem:[#allocation66_spill] sm:$0xff] %v6493_v47  ;;  %v6519_v53 = vmul.f32 0.02, %v6476_v49 }
 0x15e   : > { %v1488_v54 = vpop.f32.mrf.mxu0  ;;  %9921 = vst [vmem:[#allocation68_spill] sm:$0xff] %v6500_v52  ;;  %9922 = vst [vmem:[#allocation69_spill] sm:$0xff] %v6505_v37  ;;  %v6543_v38 = vadd.f32 %v6390_v20, %v6316_v40 }
 0x15f   : > { %v1601_v29 = vpop.f32.mrf.mxu1  ;;  %9923 = vst [vmem:[#allocation70_spill] sm:$0xff] %v6508_v21  ;;  %9924 = vst [vmem:[#allocation71_spill] sm:$0xff] %v6511_v33  ;;  %v6522_v51 = vadd.f32 %v1488_v54, %v6316_v40  ;;  %v6539_v54 = vadd.f32 %v6374_v28, %v6316_v40 }
 0x160   : > { %v1492_v58 = vpop.f32.mrf.mxu0  ;;  %9925 = vst [vmem:[#allocation72_spill] sm:$0xff] %v6516_v0  ;;  %9926 = vst [vmem:[#allocation73_spill] sm:$0xff] %v6519_v53  ;;  %v6555_v26 = vadd.f32 %v1601_v29, %v6316_v40 }
 0x161   : > { %v6440_v43 = vpop.f32.mrf.mxu1  ;;  %9927 = vst [vmem:[#allocation74_spill] sm:$0xff] %v6522_v51  ;;  %9928 = vst [vmem:[#allocation75_spill] sm:$0xff] %v6527_v24  ;;  %v6566_v27 = vadd.f32 %v1492_v58, %v6310_v63  ;;  %v6584_v58 = vmul.f32 0.02, %v6539_v54 }
 0x162   : > { %v1494_v8 = vpop.f32.mrf.mxu0  ;;  %9929 = vst [vmem:[#allocation76_spill] sm:$0xff] %v6539_v54  ;;  %9930 = vst [vmem:[#allocation77_spill] sm:$0xff] %v6543_v38 }
 0x163   : > { %v1607_v13 = vpop.f32.mrf.mxu1  ;;  %v6530_v36 = vadd.f32 %v1494_v8, %v6310_v63  ;;  %9932 = vst [vmem:[#allocation79_spill] sm:$0xff] %v6549_v3  ;;  %9935 = vst [vmem:[#allocation82_spill] sm:$0xff] %v6584_v58 }
 0x164   : > { %v1496_v55 = vpop.f32.mrf.mxu0  ;;  %v6533_v25 = vadd.f32 %v1607_v13, %v6310_v63  ;;  %v6552_v13 = vmul.f32 0.02, %v6511_v33 }
 0x165   : > { %v1609_v31 = vpop.f32.mrf.mxu1  ;;  %v6546_v42 = vadd.f32 %v1496_v55, %v6312_v2  ;;  %v6563_v55 = vmul.f32 0.02, %v6522_v51  ;;  %v6572_v29 = vmul.f32 0.02, %v6530_v36 }
 0x166   : > { %v1498_v11 = vpop.f32.mrf.mxu0  ;;  %9933 = vst [vmem:[#allocation80_spill] sm:$0xff] %v6552_v13  ;;  %v6578_v40 = vadd.f32 %v1609_v31, %v6312_v2  ;;  %v6596_v31 = vmul.f32 0.02, %v6555_v26 }
 0x167   : > { %v1611_v41 = vpop.f32.mrf.mxu1  ;;  %9931 = vst [vmem:[#allocation78_spill] sm:$0xff] %v6546_v42  ;;  %v6558_v28 = vadd.f32 %v1498_v11, %v6312_v2  ;;  %9934 = vst [vmem:[#allocation81_spill] sm:$0xff] %v6563_v55  ;;  %v6575_v11 = vmul.f32 0.02, %v6533_v25  ;;  %v6590_v1 = vmul.f32 0.02, %v6546_v42 }
 0x168   : > { %v1502_v30 = vpop.f32.mrf.mxu0  ;;  %v6569_v34 = vadd.f32 %v1611_v41, %v6312_v2  ;;  %v6587_v41 = vmul.f32 0.02, %v6543_v38  ;;  %v6624_v47 = vmul.f32 0.02, %v6578_v40 }
 0x169   : > { %v1615_v16 = vpop.f32.mrf.mxu1  ;;  %9937 = vst [vmem:[#allocation84_spill] sm:$0xff] %v6590_v1  ;;  %v6603_v2 = vmul.f32 0.02, %v6558_v28  ;;  %v6606_v52 = vadd.f32 %v1502_v30, %v6304_v10 }
 0x16a   : > { %v1504_v8 = vpop.f32.mrf.mxu0  ;;  %9936 = vst [vmem:[#allocation83_spill] sm:$0xff] %v6587_v41  ;;  %v6614_v4 = vmul.f32 0.02, %v6569_v34  ;;  %v6617_v12 = vadd.f32 %v1615_v16, %v6304_v10 }
 0x16b   : > { %v1617_v23 = vpop.f32.mrf.mxu1  ;;  %v6581_v20 = vadd.f32 %v1504_v8, %v6304_v10  ;;  %v6600_v8 = vadd.f32 %v6440_v43, %v6310_v63  ;;  %v6643_v46 = vmul.f32 0.02, %v6606_v52 }
 0x16c   : > { %v1506_v50 = vpop.f32.mrf.mxu0  ;;  %v6593_v56 = vadd.f32 %v1617_v23, %v6304_v10  ;;  %v6611_v23 = vmul.f32 0.02, %v6566_v27  ;;  %v6652_v45 = vmul.f32 0.02, %v6617_v12 }
 0x16d   : > { %v1619_v57 = vpop.f32.mrf.mxu1  ;;  %v6627_v35 = vmul.f32 0.02, %v6581_v20  ;;  %v6635_v10 = vadd.f32 %v1506_v50, %v6308_v61 }
 0x16e   : > { %v1508_v22 = vpop.f32.mrf.mxu0  ;;  %v6632_v16 = vmul.f32 0.02, %v6593_v56 }
 0x16f   : > { %v1621_v18 = vpop.f32.mrf.mxu1  ;;  %v6638_v63 = vadd.f32 %v1508_v22, %v6308_v61  ;;  %v2085_v9 = vmax.f32 %v6581_v20, %v6627_v35  ;;  %v6666_v59 = vmul.f32 0.02, %v6635_v10 }
 0x170   : > { %v1512_v43 = vpop.f32.mrf.mxu0  ;;  %v6646_v39 = vadd.f32 %v1621_v18, %v6308_v61  ;;  %v6659_v18 = vadd.f32 %v1619_v57, %v6308_v61  ;;  %v2087_v50 = vmax.f32 %v6593_v56, %v6632_v16 }
 0x171   : > { %v1625_v19 = vpop.f32.mrf.mxu1  ;;  %v1513_v22 = vadd.f32 %v1512_v43, %v6302_v44  ;;  %v2092_v53 = vmax.f32 %v6635_v10, %v6666_v59 }
 0x172   : > { %v1514_v30 = vpop.f32.mrf.mxu0  ;;  %v1967_v35 = vmul.f32 0.02, %v6646_v39  ;;  %v1966_v14 = vmul.f32 0.02, %v6659_v18 }
 0x173   : > { %v1515_v32 = vadd.f32 %v1514_v30, %v6302_v44  ;;  %v1627_v48 = vpop.f32.mrf.mxu1  ;;  %v1626_v30 = vadd.f32 %v1625_v19, %v6302_v44 }
 0x174   : > { %v1628_v0 = vadd.f32 %v1627_v48, %v6302_v44  ;;  %v1516_v15 = vpop.f32.mrf.mxu0  ;;  %v1965_v48 = vmul.f32 0.02, %v6638_v63  ;;  %v2095_v58 = vmax.f32 %v6646_v39, %v1967_v35 }
 0x175   : > { %v1517_v37 = vadd.f32 %v1516_v15, %v6306_v60  ;;  %v1629_v62 = vpop.f32.mrf.mxu1  ;;  %v1973_v57 = vmul.f32 0.02, %v1515_v32  ;;  %v1972_v15 = vmul.f32 0.02, %v1513_v22  ;;  %v1974_v24 = vmul.f32 0.02, %v1626_v30 }
 0x176   : > { %v1630_v43 = vadd.f32 %v1629_v62, %v6306_v60  ;;  %v1518_v21 = vpop.f32.mrf.mxu0  ;;  %v1975_v61 = vmul.f32 0.02, %v1628_v0  ;;  %v2093_v1 = vmax.f32 %v6638_v63, %v1965_v48  ;;  %v2063_v48 = vmax.f32 %v6555_v26, %v6596_v31  ;;  %v9947_v31 = vld [vmem:[#allocation18_spill] sm:$0xff] }
 0x177   : > { %v1980_v20 = vmul.f32 0.02, %v1517_v37  ;;  %v1519_v19 = vadd.f32 %v1518_v21, %v6306_v60  ;;  %v1631_v44 = vpop.f32.mrf.mxu1  ;;  %v2102_v10 = vmax.f32 %v1626_v30, %v1974_v24  ;;  %v9940_v30 = vmax.f32 %v6530_v36, %v6572_v29 }
 0x178   : > { %v1982_v3 = vmul.f32 0.02, %v1630_v43  ;;  %v1632_v56 = vadd.f32 %v1631_v44, %v6306_v60  ;;  %v1668_v16 = vpop.f32.mrf.mxu0  ;;  %v2101_v44 = vmax.f32 %v1515_v32, %v1973_v57  ;;  %v2103_v6 = vmax.f32 %v1628_v0, %v1975_v61  ;;  %v9945_v57 = vld [vmem:[#allocation80_spill] sm:$0xff] }
 0x179   : > { %v1981_v55 = vmul.f32 0.02, %v1519_v19  ;;  %v1669_v62 = vadd.f32 %v1668_v16, %v6330_v7  ;;  %v1781_v51 = vpop.f32.mrf.mxu1  ;;  %v2108_v49 = vmax.f32 %v1517_v37, %v1980_v20  ;;  %v2100_v16 = vmax.f32 %v1513_v22, %v1972_v15 }
 0x17a   : > { %v1983_v38 = vmul.f32 0.02, %v1632_v56  ;;  %v1782_v21 = vadd.f32 %v1781_v51, %v6330_v7  ;;  %v6678_v41 = vpop.f32.mrf.mxu0  ;;  %v2110_v60 = vmax.f32 %v1630_v43, %v1982_v3  ;;  %v2181_v0 = vpack.c.bf16 %v2093_v1, %v2085_v9 }
 0x17b   : > { %9938 = vst [vmem:[#allocation85_spill] sm:$0xff] %v6678_v41  ;;  %v2109_v42 = vmax.f32 %v1519_v19, %v1981_v55  ;;  %v6681_v54 = vpop.f32.mrf.mxu1  ;;  %v1864_v59 = vmul.f32 0.02, %v1669_v62  ;;  %v2188_v41 = vpack.c.bf16 %v2108_v49, %v2100_v16  ;;  %v2094_v55 = vmax.f32 %v6659_v18, %v1966_v14 }
 0x17c   : > { %v2111_v33 = vmax.f32 %v1632_v56, %v1983_v38  ;;  %v1672_v13 = vpop.f32.mrf.mxu0  ;;  %v1866_v7 = vmul.f32 0.02, %v1782_v21  ;;  %v2190_v39 = vpack.c.bf16 %v2110_v60, %v2102_v10  ;;  %v2084_v38 = vmax.f32 %v6606_v52, %v6643_v46  ;;  %v9949_v56 = vld [vmem:[#allocation76_spill] sm:$0xff]  ;;  %v9954_v10 = vld [vmem:[#allocation77_spill] sm:$0xff] }
 0x17d   : > { %v1673_v37 = vadd.f32 %v1672_v13, %v6338_v17  ;;  %v1785_v51 = vpop.f32.mrf.mxu1  ;;  %v2189_v20 = vpack.c.bf16 %v2109_v42, %v2101_v44  ;;  %v2086_v49 = vmax.f32 %v6617_v12, %v6652_v45  ;;  %v2183_v13 = vpack.c.bf16 %v2095_v58, %v2087_v50 }
 0x17e   : > { %v1786_v63 = vadd.f32 %v1785_v51, %v6338_v17  ;;  %v6686_v3 = vpop.f32.mrf.mxu0  ;;  %v2191_v32 = vpack.c.bf16 %v2111_v33, %v2103_v6  ;;  %v1942_v6 = vmul.f32 0.02, %v6600_v8  ;;  %v1992_v14 = vmax.f32 %v1669_v62, %v1864_v59 }
 0x17f   : > { %v1872_v22 = vmul.f32 0.02, %v1673_v37  ;;  %v6689_v61 = vpop.f32.mrf.mxu1  ;;  %2340 = vmatprep.subr.bf16.mxu0 %v2189_v20  ;;  %v2180_v1 = vpack.c.bf16 %v2092_v53, %v2084_v38  ;;  %v1994_v9 = vmax.f32 %v1782_v21, %v1866_v7  ;;  %v2078_v45 = vmax.f32 %v6578_v40, %v6624_v47  ;;  %v9950_v21 = vld [vmem:[#allocation78_spill] sm:$0xff] }
 0x180   : > { %v1874_v42 = vmul.f32 0.02, %v1786_v63  ;;  %2453 = vmatprep.subr.bf16.mxu1 %v2191_v32  ;;  %v1678_v24 = vpop.f32.mrf.mxu0  ;;  %2341 = vmatpush1.bf16.msra.mxu0 %v2188_v41  ;;  %v2182_v58 = vpack.c.bf16 %v2094_v55, %v2086_v49  ;;  %v9941_v7 = vmax.f32 %v6558_v28, %v6603_v2  ;;  %v2068_v43 = vmax.f32 %v6566_v27, %v6611_v23  ;;  %v9946_v2 = vld [vmem:[#allocation71_spill] sm:$0xff]  ;;  %v9948_v23 = vld [vmem:[#allocation82_spill] sm:$0xff]  ;;  %v9956_v32 = vld [vmem:[#allocation73_spill] sm:$0xff] }
 0x181   : > { %v2000_v60 = vmax.f32 %v1673_v37, %v1872_v22  ;;  %v1679_v33 = vadd.f32 %v1678_v24, %v6326_v5  ;;  %v1791_v18 = vpop.f32.mrf.mxu1  ;;  %2454 = vmatpush1.bf16.msra.mxu1 %v2190_v39  ;;  %2342 = vmatprep.subr.bf16.mxu0 %v2181_v0  ;;  %v9943_v47 = vmax.f32 %v6533_v25, %v6575_v11  ;;  %v9951_v25 = vld [vmem:[#allocation84_spill] sm:$0xff]  ;;  %v9958_v39 = vld [vmem:[#allocation74_spill] sm:$0xff]  ;;  %v9959_v22 = vld [vmem:[#allocation81_spill] sm:$0xff] }
 0x182   : > { %v2002_v46 = vmax.f32 %v1786_v63, %v1874_v42  ;;  %v1792_v52 = vadd.f32 %v1791_v18, %v6326_v5  ;;  %2455 = vmatprep.subr.bf16.mxu1 %v2183_v13  ;;  %v6698_v12 = vpop.f32.mrf.mxu0  ;;  %v2173_v53 = vpack.c.bf16 %v9941_v7, %v9940_v30  ;;  %v9944_v36 = vmax.f32 %v6569_v34, %v6614_v4  ;;  %v9955_v63 = vld [vmem:[#allocation61_spill] sm:$0xff]  ;;  %v9961_v49 = vld [vmem:[#allocation75_spill] sm:$0xff]  ;;  %v9966_v30 = vld [vmem:[#allocation16_spill] sm:$0xff] }
 0x183   : > { %v6702_v41 = vpack.c.bf16 %v2000_v60, %v1992_v14  ;;  %v6704_v50 = vpop.f32.mrf.mxu1  ;;  %v2055_v28 = vmax.f32 %v9946_v2, %v9945_v57  ;;  %v2070_v19 = vmax.f32 %v6600_v8, %v1942_v6  ;;  %v1880_v26 = vmul.f32 0.02, %v1679_v33  ;;  %v9953_v8 = vld [vmem:[#allocation83_spill] sm:$0xff]  ;;  %v9962_v42 = vld [vmem:[#allocation65_spill] sm:$0xff]  ;;  %v9964_v6 = vld [vmem:[#allocation70_spill] sm:$0xff] }
 0x184   : > { %v6716_v35 = vpack.c.bf16 %v2002_v46, %v1994_v9  ;;  %v1682_v40 = vpop.f32.mrf.mxu0  ;;  %2343 = vmatpush1.bf16.msra.mxu0 %v2180_v1  ;;  %v2175_v29 = vpack.c.bf16 %v9944_v36, %v9943_v47  ;;  %v2060_v62 = vmax.f32 %v9949_v56, %v9948_v23  ;;  %v9952_v11 = vmax.f32 %v9950_v21, %v9951_v25  ;;  %v9963_v13 = vld [vmem:[#allocation79_spill] sm:$0xff]  ;;  %v9973_v23 = vld [vmem:[#allocation56_spill] sm:$0xff]  ;;  %v9975_v21 = vld [vmem:[#allocation49_spill] sm:$0xff] }
 0x185   : > { %9939 = vst [vmem:[#allocation86_spill] sm:$0xff] %v6702_v41  ;;  %v1683_v15 = vadd.f32 %v1682_v40, %v9947_v31  ;;  %v1795_v27 = vpop.f32.mrf.mxu1  ;;  %2456 = vmatpush1.bf16.msra.mxu1 %v2182_v58  ;;  %2344 = vmatprep.subr.bf16.mxu0 %v2173_v53  ;;  %v1882_v4 = vmul.f32 0.02, %v1792_v52  ;;  %v2062_v59 = vmax.f32 %v9954_v10, %v9953_v8  ;;  %v9965_v9 = vld [vmem:[#allocation67_spill] sm:$0xff]  ;;  %v9968_v40 = vld [vmem:[#allocation57_spill] sm:$0xff]  ;;  %v9976_v25 = vld [vmem:[#allocation64_spill] sm:$0xff] }
 0x186   : > { %9942 = vst [vmem:[#allocation87_spill] sm:$0xff] %v6716_v35  ;;  %v2172_v44 = vpack.c.bf16 %v9952_v11, %v2068_v43  ;;  %v1796_v34 = vadd.f32 %v1795_v27, %v9947_v31  ;;  %2457 = vmatprep.subr.bf16.mxu1 %v2175_v29  ;;  %v6734_v16 = vpop.f32.mrf.mxu0  ;;  %v2174_v37 = vpack.c.bf16 %v2078_v45, %v2070_v19  ;;  %v1910_v46 = vmul.f32 0.02, %v9965_v9  ;;  %v9967_v43 = vld [vmem:[#allocation69_spill] sm:$0xff]  ;;  %v9981_v8 = vld [vmem:[#allocation52_spill] sm:$0xff] }
 0x187   : > { %v1888_v51 = vmul.f32 0.02, %v1683_v15  ;;  %v6738_v20 = vpop.f32.mrf.mxu1  ;;  %v9957_v55 = vmax.f32 %v9955_v63, %v9956_v32  ;;  %v9960_v0 = vmax.f32 %v9958_v39, %v9959_v22  ;;  %v2052_v24 = vmax.f32 %v9962_v42, %v9961_v49  ;;  %v9972_v27 = vld [vmem:[#allocation41_spill] sm:$0xff]  ;;  %v9984_v63 = vld [vmem:[#allocation59_spill] sm:$0xff]  ;;  %v9987_v39 = vld [vmem:[#allocation68_spill] sm:$0xff] }
 0x188   : > { %v2054_v14 = vmax.f32 %v9964_v6, %v9963_v13  ;;  %v1890_v60 = vmul.f32 0.02, %v1796_v34  ;;  %v1688_v18 = vpop.f32.mrf.mxu0  ;;  %2345 = vmatpush1.bf16.msra.mxu0 %v2172_v44  ;;  %v2167_v1 = vpack.c.bf16 %v2063_v48, %v2055_v28  ;;  %v2008_v45 = vmax.f32 %v1679_v33, %v1880_v26  ;;  %v9969_v48 = vld [vmem:[#allocation72_spill] sm:$0xff]  ;;  %v9990_v49 = vld [vmem:[#allocation39_spill] sm:$0xff]  ;;  %v9991_v6 = vld [vmem:[#allocation17_spill] sm:$0xff] }
 0x189   : > { %v2165_v38 = vpack.c.bf16 %v9960_v0, %v9957_v55  ;;  %v2016_v58 = vmax.f32 %v1683_v15, %v1888_v51  ;;  %v1689_v7 = vadd.f32 %v1688_v18, %v9966_v30  ;;  %v6752_v53 = vpop.f32.mrf.mxu1  ;;  %2458 = vmatpush1.bf16.msra.mxu1 %v2174_v37  ;;  %v2044_v47 = vmax.f32 %v9968_v40, %v9967_v43  ;;  %v9970_v28 = vld [vmem:[#allocation60_spill] sm:$0xff]  ;;  %v9983_v51 = vld [vmem:[#allocation45_spill] sm:$0xff]  ;;  %v9992_v18 = vld [vmem:[#allocation42_spill] sm:$0xff] }
 0x18a   : > { %v2164_v36 = vpack.c.bf16 %v2060_v62, %v2052_v24  ;;  %v2010_v29 = vmax.f32 %v1792_v52, %v1882_v4  ;;  %v2018_v57 = vmax.f32 %v1796_v34, %v1890_v60  ;;  %2459 = vmatprep.subr.bf16.mxu1 %v2167_v1  ;;  %v6756_v2 = vpop.f32.mrf.mxu0  ;;  %v2046_v19 = vmax.f32 %v9970_v28, %v9969_v48  ;;  %v9978_v52 = vld [vmem:[#allocation63_spill] sm:$0xff]  ;;  %v9979_v44 = vld [vmem:[#allocation48_spill] sm:$0xff]  ;;  %v9980_v34 = vld [vmem:[#allocation66_spill] sm:$0xff] }
 0x18b   : > { %2346 = vmatprep.subr.bf16.mxu0 %v2165_v38  ;;  %v2166_v33 = vpack.c.bf16 %v2062_v59, %v2054_v14  ;;  %v6760_v26 = vpack.c.bf16 %v2016_v58, %v2008_v45  ;;  %v6762_v15 = vpop.f32.mrf.mxu1  ;;  %v9974_v56 = vmax.f32 %v9972_v27, %v9973_v23  ;;  %v9977_v11 = vmax.f32 %v9975_v21, %v9976_v25  ;;  %v9986_v55 = vld [vmem:[#allocation53_spill] sm:$0xff]  ;;  %v9989_v38 = vld [vmem:[#allocation54_spill] sm:$0xff]  ;;  %v9993_v1 = vld [vmem:[#allocation28_spill] sm:$0xff] }
 0x18c   : > { %v2031_v4 = vmax.f32 %v9979_v44, %v9978_v52  ;;  %v2036_v10 = vmax.f32 %v9981_v8, %v9980_v34  ;;  %v6774_v37 = vpack.c.bf16 %v2018_v57, %v2010_v29  ;;  %v1692_v59 = vpop.f32.mrf.mxu0  ;;  %2347 = vmatpush1.bf16.msra.mxu0 %v2164_v36  ;;  %v9985_v32 = vmax.f32 %v9983_v51, %v9984_v63  ;;  %v9994_v58 = vld [vmem:[#allocation55_spill] sm:$0xff]  ;;  %v9995_v43 = vld [vmem:[#allocation40_spill] sm:$0xff]  ;;  %v9996_v36 = vld [vmem:[#allocation58_spill] sm:$0xff] }
 0x18d   : > { %9971 = vst [vmem:[#allocation80_spill] sm:$0xff] %v6760_v26  ;;  %v2157_v62 = vpack.c.bf16 %v9977_v11, %v9974_v56  ;;  %v9988_v22 = vmax.f32 %v9986_v55, %v9987_v39  ;;  %v2021_v42 = vmax.f32 %v9990_v49, %v9989_v38  ;;  %v2038_v24 = vmax.f32 %v9965_v9, %v1910_v46  ;;  %v6786_v60 = vpop.f32.mrf.mxu1  ;;  %v9997_v29 = vld [vmem:[#allocation44_spill] sm:$0xff]  ;;  %v9998_v9 = vld [vmem:[#allocation62_spill] sm:$0xff]  ;;  %v9999_v46 = vld [vmem:[#allocation47_spill] sm:$0xff] }
 0x18e   : > { %9982 = vst [vmem:[#allocation71_spill] sm:$0xff] %v6774_v37  ;;  %v1896_v13 = vmul.f32 0.02, %v1689_v7  ;;  %v1693_v14 = vadd.f32 %v1692_v59, %v9991_v6  ;;  %2460 = vmatpush1.bf16.msra.mxu1 %v2166_v33  ;;  %v2013_v45 = vmax.f32 %v9993_v1, %v9992_v18  ;;  %v2023_v40 = vmax.f32 %v9995_v43, %v9994_v58  ;;  %v6794_v28 = vpop.f32.mrf.mxu0  ;;  %v10000_v21 = vld [vmem:[#allocation37_spill] sm:$0xff]  ;;  %v10001_v25 = vld [vmem:[#allocation51_spill] sm:$0xff]  ;;  %v10004_v44 = vld [vmem:[#allocation26_spill] sm:$0xff] }
 0x18f   : > { %v2159_v0 = vpack.c.bf16 %v9988_v22, %v9985_v32  ;;  %2348 = vmatprep.subr.bf16.mxu0 %v2157_v62  ;;  %v2028_v57 = vmax.f32 %v9997_v29, %v9996_v36  ;;  %v2156_v48 = vpack.c.bf16 %v2044_v47, %v2036_v10  ;;  %v2030_v27 = vmax.f32 %v9999_v46, %v9998_v9  ;;  %v6798_v33 = vpop.f32.mrf.mxu1  ;;  %v10003_v52 = vld [vmem:[#allocation35_spill] sm:$0xff]  ;;  %v10006_v59 = vld [vmem:[#allocation29_spill] sm:$0xff]  ;;  %v10007_v10 = vld [vmem:[#allocation46_spill] sm:$0xff] }
 0x190   : > { %v2158_v23 = vpack.c.bf16 %v2046_v19, %v2038_v24  ;;  %v1904_v56 = vmul.f32 0.02, %v1693_v14  ;;  %v10002_v11 = vmax.f32 %v10000_v21, %v10001_v25  ;;  %v2005_v34 = vmax.f32 %v10004_v44, %v10003_v52  ;;  %v10005_v8 = vld [vmem:[#allocation43_spill] sm:$0xff]  ;;  %v10008_v51 = vld [vmem:[#allocation33_spill] sm:$0xff]  ;;  %v6809_v32 = vpop.f32.mrf.mxu0  ;;  %v10009_v55 = vld [vmem:[#allocation30_spill] sm:$0xff] }
 0x191   : > { %2461 = vmatprep.subr.bf16.mxu1 %v2159_v0  ;;  %v2015_v47 = vmax.f32 %v10006_v59, %v10005_v8  ;;  %v2020_v63 = vmax.f32 %v10008_v51, %v10007_v10  ;;  %2349 = vmatpush1.bf16.msra.mxu0 %v2156_v48  ;;  %v2151_v19 = vpack.c.bf16 %v2031_v4, %v2023_v40  ;;  %v1861_v39 = vmul.f32 0.02, %v10009_v55  ;;  %v10010_v22 = vld [vmem:[#allocation50_spill] sm:$0xff]  ;;  %v10011_v0 = vld [vmem:[#allocation36_spill] sm:$0xff]  ;;  %v6814_v24 = vpop.f32.mrf.mxu1  ;;  %v10012_v18 = vld [vmem:[#allocation31_spill] sm:$0xff] }
 0x192   : > { %v2149_v62 = vpack.c.bf16 %v10002_v11, %v2021_v42  ;;  %v2022_v38 = vmax.f32 %v10011_v0, %v10010_v22  ;;  %v2024_v49 = vmax.f32 %v1689_v7, %v1896_v13  ;;  %v2032_v42 = vmax.f32 %v1693_v14, %v1904_v56  ;;  %2462 = vmatpush1.bf16.msra.mxu1 %v2158_v23  ;;  %v10013_v58 = vld [vmem:[#allocation38_spill] sm:$0xff]  ;;  %v10014_v43 = vld [vmem:[#allocation27_spill] sm:$0xff]  ;;  %v1700_v48 = vpop.f32.mrf.mxu0  ;;  %v10015_v4 = vld [vmem:[#allocation32_spill] sm:$0xff] }
 0x193   : > { %v1863_v1 = vmul.f32 0.02, %v10012_v18  ;;  %v2007_v36 = vmax.f32 %v10014_v43, %v10013_v58  ;;  %v2148_v29 = vpack.c.bf16 %v2028_v57, %v2020_v63  ;;  %2463 = vmatprep.subr.bf16.mxu1 %v2151_v19  ;;  %v10016_v40 = vld [vmem:[#allocation24_spill] sm:$0xff]  ;;  %v1813_v7 = vpop.f32.mrf.mxu1  ;;  %v2141_v13 = vpack.c.bf16 %v2013_v45, %v2005_v34  ;;  %v10018_v14 = vld [vmem:[#allocation34_spill] sm:$0xff]  ;;  %v10019_v56 = vld [vmem:[#allocation25_spill] sm:$0xff] }
 0x194   : > { %2350 = vmatprep.subr.bf16.mxu0 %v2149_v62  ;;  %v1997_v9 = vmax.f32 %v10016_v40, %v10015_v4  ;;  %v2150_v46 = vpack.c.bf16 %v2030_v27, %v2022_v38  ;;  %v6821_v21 = vpack.c.bf16 %v2032_v42, %v2024_v49  ;;  %v1999_v23 = vmax.f32 %v10019_v56, %v10018_v14  ;;  %v1702_v25 = vpop.f32.mrf.mxu0  ;;  %v10020_v45 = vld [vmem:[#allocation22_spill] sm:$0xff]  ;;  %v6838_v19 = vld [vmem:[%s9519_s4] sm:$0xff]   ;;  %v10024_v0 = vld [vmem:[#allocation21_spill] sm:$0xff] }
 0x195   : > { %2351 = vmatpush1.bf16.msra.mxu0 %v2148_v29  ;;  %v2143_v11 = vpack.c.bf16 %v2015_v47, %v2007_v36  ;;  %v1989_v62 = vmax.f32 %v10009_v55, %v1861_v39  ;;  %v6826_v52 = vpop.f32.mrf.mxu1  ;;  %v1991_v57 = vmax.f32 %v10012_v18, %v1863_v1  ;;  %v10021_v47 = vld [vmem:[#allocation23_spill] sm:$0xff]  ;;  %10022 = vst [vmem:[#allocation82_spill] sm:$0xff] %v6838_v19  ;;  %v10023_v39 = vld [vmem:[#allocation20_spill] sm:$0xff]  ;;  %v10025_v18 = vmov 0   ;;  %v10066_v35 = vld [vmem:[#allocation13_spill] sm:$0xff] }
 0x196   : > { %10017 = vst [vmem:[#allocation18_spill] sm:$0xff] %v6821_v21  ;;  %2464 = vmatpush1.bf16.msra.mxu1 %v2150_v46  ;;  %2352 = vmatprep.subr.bf16.mxu0 %v2141_v13  ;;  %v1704_v27 = vpop.f32.mrf.mxu0  ;;  %v6859_v36 = vld [vmem:[%s9519_s4 + $0x8] sm:$0xff]   ;;  %v6863_v29 = vadd.f32 %v6734_v16, %v9947_v31  ;;  %v6867_v4 = vadd.f32 %v6738_v20, %v9947_v31 }
 0x197   : > { %2465 = vmatprep.subr.bf16.mxu1 %v2143_v11  ;;  %v1817_v44 = vpop.f32.mrf.mxu1  ;;  %v2133_v8 = vpack.c.bf16 %v1997_v9, %v1989_v62  ;;  %v2135_v34 = vpack.c.bf16 %v1999_v23, %v1991_v57  ;;  %10026 = vst [vmem:[#allocation76_spill] sm:$0xff] %v6859_v36  ;;  %v10029_v9 = vld [vmem:[#allocation19_spill] sm:$0xff]  ;;  %v10030_v46 = vld [vmem:[#allocation85_spill] sm:$0xff]  ;;  %v6881_v23 = vadd.f32 %v6686_v3, %v6338_v17  ;;  %v10039_v62 = vld [vmem:[#allocation14_spill] sm:$0xff] }
 0x198   : > { %v6829_v59 = vpop.f32.mrf.mxu0  ;;  %10027 = vst [vmem:[#allocation78_spill] sm:$0xff] %v6863_v29  ;;  %10028 = vst [vmem:[#allocation84_spill] sm:$0xff] %v6867_v4  ;;  %v6871_v13 = vadd.f32 %v10030_v46, %v10029_v9  ;;  %v6877_v56 = vadd.f32 %v6681_v54, %v10029_v9  ;;  %v6885_v16 = vadd.f32 %v6689_v61, %v6338_v17 }
 0x199   : > { %2353 = vmatpush1.bf16.msra.mxu0 %v10020_v45  ;;  %v6832_v10 = vpop.f32.mrf.mxu1  ;;  %10033 = vst [vmem:[#allocation61_spill] sm:$0xff] %v6881_v23  ;;  %v6889_v31 = vadd.f32 %v6756_v2, %v9966_v30  ;;  %v6893_v11 = vadd.f32 %v6698_v12, %v6326_v5  ;;  %v6897_v54 = vadd.f32 %v6704_v50, %v6326_v5  ;;  %v6908_v2 = vmul.f32 0.02, %v6863_v29  ;;  %v10044_v5 = vld [vmem:[#allocation15_spill] sm:$0xff] }
 0x19a   : > { %2466 = vmatpush1.bf16.msra.mxu1 %v10021_v47  ;;  %2354 = vmatprep.subr.bf16.mxu0 %v2133_v8  ;;  %v1710_v51 = vpop.f32.mrf.mxu0  ;;  %10031 = vst [vmem:[#allocation83_spill] sm:$0xff] %v6871_v13  ;;  %10032 = vst [vmem:[#allocation77_spill] sm:$0xff] %v6877_v56  ;;  %v6901_v3 = vadd.f32 %v6794_v28, %v9991_v6  ;;  %v6904_v17 = vadd.f32 %v1700_v48, %v10039_v62  ;;  %v6911_v12 = vmul.f32 0.02, %v6867_v4 }
 0x19b   : > { %2467 = vmatprep.subr.bf16.mxu1 %v2135_v34  ;;  %v1823_v63 = vpop.f32.mrf.mxu1  ;;  %10034 = vst [vmem:[#allocation73_spill] sm:$0xff] %v6885_v16  ;;  %10035 = vst [vmem:[#allocation74_spill] sm:$0xff] %v6889_v31  ;;  %v6914_v57 = vadd.f32 %v1813_v7, %v10039_v62  ;;  %v6917_v50 = vadd.f32 %v1702_v25, %v10044_v5  ;;  %v6923_v48 = vadd.f32 %v6752_v53, %v9966_v30 }
 0x19c   : > { %v6840_v55 = vpop.f32.mrf.mxu0  ;;  %10036 = vst [vmem:[#allocation81_spill] sm:$0xff] %v6893_v11  ;;  %10037 = vst [vmem:[#allocation75_spill] sm:$0xff] %v6897_v54  ;;  %v6927_v8 = vadd.f32 %v6762_v15, %v9966_v30  ;;  %v6930_v45 = vadd.f32 %v1704_v27, %v10044_v5  ;;  %v6933_v7 = vadd.f32 %v1817_v44, %v10044_v5  ;;  %v6939_v34 = vmul.f32 0.02, %v6889_v31  ;;  %v10053_v15 = vld [vmem:[#allocation12_spill] sm:$0xff] }
 0x19d   : > { %2355 = vmatpush1.bf16.msra.mxu0 %v10023_v39  ;;  %v6843_v22 = vpop.f32.mrf.mxu1  ;;  %10038 = vst [vmem:[#allocation65_spill] sm:$0xff] %v6901_v3  ;;  %10040 = vst [vmem:[#allocation79_spill] sm:$0xff] %v6904_v17  ;;  %v6943_v53 = vadd.f32 %v6786_v60, %v9991_v6  ;;  %v6947_v30 = vadd.f32 %v6798_v33, %v9991_v6  ;;  %v6950_v27 = vadd.f32 %v1710_v51, %v10053_v15  ;;  %v6969_v33 = vld [vmem:[%s9519_s4 + $0x10] sm:$0xff]  }
 0x19e   : > { %2468 = vmatpush1.bf16.msra.mxu1 %v10024_v0  ;;  %v1714_v38 = vpop.f32.mrf.mxu0  ;;  %10041 = vst [vmem:[#allocation70_spill] sm:$0xff] %v6908_v2  ;;  %10042 = vst [vmem:[#allocation67_spill] sm:$0xff] %v6911_v12  ;;  %v6953_v47 = vmul.f32 0.02, %v6901_v3  ;;  %v6957_v39 = vadd.f32 %v6809_v32, %v10039_v62  ;;  %v6961_v0 = vadd.f32 %v6814_v24, %v10039_v62  ;;  %v6964_v60 = vmul.f32 0.02, %v6904_v17 }
 0x19f   : > { %v6846_v49 = vpop.f32.mrf.mxu1  ;;  %10043 = vst [vmem:[#allocation16_spill] sm:$0xff] %v6914_v57  ;;  %10045 = vst [vmem:[#allocation69_spill] sm:$0xff] %v6917_v50  ;;  %v6972_v51 = vmul.f32 0.02, %v6914_v57  ;;  %v6975_v9 = vmul.f32 0.02, %v6917_v50  ;;  %v6979_v32 = vadd.f32 %v6826_v52, %v10044_v5  ;;  %v6982_v24 = vadd.f32 %v1823_v63, %v10053_v15 }
 0x1a0   : > { %2373 = vmatmul.mubr.bf16.vlgmr.msra.gmra.mxu0 %v6838_v19  ;;  %v6850_v42 = vpop.f32.mrf.mxu0  ;;  %10046 = vst [vmem:[#allocation57_spill] sm:$0xff] %v6923_v48  ;;  %10047 = vst [vmem:[#allocation72_spill] sm:$0xff] %v6927_v8  ;;  %v6985_v62 = vmul.f32 0.02, %v6930_v45  ;;  %v6995_v41 = vadd.f32 %v1714_v38, %v10066_v35  ;;  %v6999_v52 = vadd.f32 %v6832_v10, %v10053_v15  ;;  %v7002_v63 = vmul.f32 0.02, %v6950_v27 }
 0x1a1   : > { %2486 = vmatmul.mubr.bf16.vlgmr.msra.gmra.mxu1 %v6838_v19  ;;  %2382 = vmatprep.mubr.bf16.mxu0 %v10025_v18  ;;  %v6853_v1 = vpop.f32.mrf.mxu1  ;;  %10048 = vst [vmem:[#allocation60_spill] sm:$0xff] %v6930_v45  ;;  %10049 = vst [vmem:[#allocation41_spill] sm:$0xff] %v6933_v7  ;;  %v6992_v19 = vadd.f32 %v6829_v59, %v10053_v15  ;;  %v10068_v5 = vld [vmem:[#allocation10_spill] sm:$0xff]  ;;  %v7012_v59 = vadd.f32 %v6840_v55, %v10066_v35  ;;  %v10069_v10 = vld [vmem:[#allocation11_spill] sm:$0xff] }
 0x1a2   : > { %2495 = vmatprep.mubr.bf16.mxu1 %v10025_v18  ;;  %v1720_v58 = vpop.f32.mrf.mxu0  ;;  %10050 = vst [vmem:[#allocation56_spill] sm:$0xff] %v6939_v34  ;;  %10051 = vst [vmem:[#allocation49_spill] sm:$0xff] %v6943_v53  ;;  %v7016_v38 = vadd.f32 %v6843_v22, %v10066_v35  ;;  %v7030_v55 = vadd.f32 %v6846_v49, %v10066_v35  ;;  %v10071_v22 = vld [vmem:[#allocation7_spill] sm:$0xff]  ;;  %v7045_v16 = vadd.f32 %v6850_v42, %v10068_v5  ;;  %v10072_v2 = vld [vmem:[#allocation9_spill] sm:$0xff] }
 0x1a3   : > { %v1833_v43 = vpop.f32.mrf.mxu1  ;;  %10052 = vst [vmem:[#allocation64_spill] sm:$0xff] %v6947_v30  ;;  %10054 = vst [vmem:[#allocation63_spill] sm:$0xff] %v6950_v27  ;;  %v7005_v26 = vadd.f32 %v1720_v58, %v10068_v5  ;;  %v7049_v35 = vadd.f32 %v6853_v1, %v10068_v5  ;;  %v10073_v34 = vld [vmem:[#allocation6_spill] sm:$0xff]  ;;  %v10075_v50 = vld [vmem:[#allocation8_spill] sm:$0xff] }
 0x1a4   : > { %v1722_v40 = vpop.f32.mrf.mxu0  ;;  %10055 = vst [vmem:[#allocation48_spill] sm:$0xff] %v6953_v47  ;;  %10056 = vst [vmem:[#allocation66_spill] sm:$0xff] %v6957_v39  ;;  %v7008_v21 = vadd.f32 %v1833_v43, %v10068_v5  ;;  %v7026_v43 = vmul.f32 0.02, %v6982_v24 }
 0x1a5   : > { %v6873_v14 = vpop.f32.mrf.mxu1  ;;  %10057 = vst [vmem:[#allocation52_spill] sm:$0xff] %v6961_v0  ;;  %10058 = vst [vmem:[#allocation45_spill] sm:$0xff] %v6964_v60  ;;  %v7019_v15 = vadd.f32 %v1722_v40, %v10069_v10 }
 0x1a6   : > { %v1724_v20 = vpop.f32.mrf.mxu0  ;;  %10059 = vst [vmem:[#allocation59_spill] sm:$0xff] %v6969_v33  ;;  %10060 = vst [vmem:[#allocation53_spill] sm:$0xff] %v6972_v51  ;;  %v7063_v42 = vadd.f32 %v6873_v14, %v10069_v10  ;;  %v7081_v14 = vld [vmem:[%s9519_s4 + $0x18] sm:$0xff]  }
 0x1a7   : > { %v1837_v61 = vpop.f32.mrf.mxu1  ;;  %10061 = vst [vmem:[#allocation68_spill] sm:$0xff] %v6975_v9  ;;  %10062 = vst [vmem:[#allocation54_spill] sm:$0xff] %v6979_v32  ;;  %v7022_v13 = vadd.f32 %v1724_v20, %v10069_v10  ;;  %v7041_v20 = vmul.f32 0.02, %v6995_v41 }
 0x1a8   : > { %2383 = vmatmul.mubr.bf16.gmra.mxu0 %v6859_v36  ;;  %v1728_v28 = vpop.f32.mrf.mxu0  ;;  %10063 = vst [vmem:[#allocation39_spill] sm:$0xff] %v6982_v24  ;;  %10064 = vst [vmem:[#allocation17_spill] sm:$0xff] %v6985_v62  ;;  %v7033_v4 = vadd.f32 %v1837_v61, %v10069_v10 }
 0x1a9   : > { %2496 = vmatmul.mubr.bf16.gmra.mxu1 %v6859_v36  ;;  %2392 = vmatprep.mubr.bf16.mxu0 %v10025_v18  ;;  %v6935_v25 = vpop.f32.mrf.mxu1  ;;  %v6988_v36 = vmul.f32 0.02, %v6933_v7  ;;  %10067 = vst [vmem:[#allocation28_spill] sm:$0xff] %v7002_v63  ;;  %10070 = vst [vmem:[#allocation55_spill] sm:$0xff] %v7026_v43  ;;  %v7036_v12 = vadd.f32 %v1728_v28, %v10071_v22  ;;  %v7056_v28 = vmul.f32 0.02, %v7005_v26 }
 0x1aa   : > { %2505 = vmatprep.mubr.bf16.mxu1 %v10025_v18  ;;  %v1730_v44 = vpop.f32.mrf.mxu0  ;;  %v7072_v5 = vmul.f32 0.02, %v7022_v13  ;;  %10074 = vst [vmem:[#allocation40_spill] sm:$0xff] %v7081_v14 }
 0x1ab   : > { %v1843_v6 = vpop.f32.mrf.mxu1  ;;  %10065 = vst [vmem:[#allocation42_spill] sm:$0xff] %v6988_v36  ;;  %v7052_v49 = vadd.f32 %v1730_v44, %v10071_v22  ;;  %v7069_v44 = vmul.f32 0.02, %v7019_v15  ;;  %v7087_v10 = vmul.f32 0.02, %v7036_v12 }
 0x1ac   : > { %v1732_v46 = vpop.f32.mrf.mxu0  ;;  %v7066_v29 = vadd.f32 %v1843_v6, %v10071_v22  ;;  %v7084_v6 = vmul.f32 0.02, %v7033_v4 }
 0x1ad   : > { %v1845_v37 = vpop.f32.mrf.mxu1  ;;  %v7099_v17 = vadd.f32 %v1732_v46, %v10072_v2 }
 0x1ae   : > { %v1734_v56 = vpop.f32.mrf.mxu0  ;;  %v1963_v51 = vmul.f32 0.02, %v7066_v29 }
 0x1af   : > { %v1847_v58 = vpop.f32.mrf.mxu1  ;;  %v7075_v31 = vadd.f32 %v1734_v56, %v10072_v2  ;;  %v1968_v36 = vmul.f32 0.02, %v7099_v17 }
 0x1b0   : > { %2393 = vmatmul.mubr.bf16.gmra.mxu0 %v6969_v33  ;;  %v1738_v40 = vpop.f32.mrf.mxu0  ;;  %v7090_v48 = vadd.f32 %v1847_v58, %v10072_v2  ;;  %v7102_v58 = vadd.f32 %v1845_v37, %v10072_v2  ;;  %v1842_v37 = vadd.f32 %v6935_v25, %v10071_v22  ;;  %v7122_v25 = vld [vmem:[%s9519_s4 + $0x20] sm:$0xff]  }
 0x1b1   : > { %2506 = vmatmul.mubr.bf16.gmra.mxu1 %v6969_v33  ;;  %2402 = vmatprep.mubr.bf16.mxu0 %v10025_v18  ;;  %v1851_v61 = vpop.f32.mrf.mxu1  ;;  %v7059_v33 = vmul.f32 0.02, %v7008_v21  ;;  %v1739_v3 = vadd.f32 %v1738_v40, %v10073_v34  ;;  %v1969_v53 = vmul.f32 0.02, %v7075_v31 }
 0x1b2   : > { %2515 = vmatprep.mubr.bf16.mxu1 %v10025_v18  ;;  %v1740_v1 = vpop.f32.mrf.mxu0  ;;  %v1852_v47 = vadd.f32 %v1851_v61, %v10073_v34  ;;  %v1970_v30 = vmul.f32 0.02, %v7102_v58 }
 0x1b3   : > { %v1741_v54 = vadd.f32 %v1740_v1, %v10073_v34  ;;  %v1853_v11 = vpop.f32.mrf.mxu1  ;;  %v1961_v1 = vmul.f32 0.02, %v7052_v49  ;;  %v1976_v2 = vmul.f32 0.02, %v1739_v3  ;;  %v2097_v22 = vmax.f32 %v7075_v31, %v1969_v53 }
 0x1b4   : > { %v1854_v56 = vadd.f32 %v1853_v11, %v10073_v34  ;;  %v1742_v23 = vpop.f32.mrf.mxu0 }
 0x1b5   : > { %v1743_v9 = vadd.f32 %v1742_v23, %v10075_v50  ;;  %v1855_v57 = vpop.f32.mrf.mxu1  ;;  %v1977_v8 = vmul.f32 0.02, %v1741_v54  ;;  %v1971_v23 = vmul.f32 0.02, %v7090_v48  ;;  %v2104_v45 = vmax.f32 %v1739_v3, %v1976_v2  ;;  %v10084_v2 = vld [vmem:[#allocation42_spill] sm:$0xff] }
 0x1b6   : > { %v1856_v11 = vadd.f32 %v1855_v57, %v10075_v50  ;;  %v1744_v60 = vpop.f32.mrf.mxu0  ;;  %v1979_v0 = vmul.f32 0.02, %v1854_v56  ;;  %v1978_v57 = vmul.f32 0.02, %v1852_v47  ;;  %v1939_v3 = vmul.f32 0.02, %v7030_v55 }
 0x1b7   : > { %v1984_v40 = vmul.f32 0.02, %v1743_v9  ;;  %v1745_v34 = vadd.f32 %v1744_v60, %v10075_v50  ;;  %v1857_v61 = vpop.f32.mrf.mxu1  ;;  %v2081_v60 = vmax.f32 %v7022_v13, %v7072_v5  ;;  %v2099_v27 = vmax.f32 %v7090_v48, %v1971_v23 }
 0x1b8   : > { %2403 = vmatmul.mubr.bf16.gmra.mxu0 %v7081_v14  ;;  %v1986_v46 = vmul.f32 0.02, %v1856_v11  ;;  %v1858_v39 = vadd.f32 %v1857_v61, %v10075_v50  ;;  %v2105_v61 = vmax.f32 %v1741_v54, %v1977_v8  ;;  %v2107_v63 = vmax.f32 %v1854_v56, %v1979_v0  ;;  %v10081_v56 = vld [vmem:[#allocation55_spill] sm:$0xff] }
 0x1b9   : > { %2516 = vmatmul.mubr.bf16.gmra.mxu1 %v7081_v14  ;;  %2412 = vmatprep.mubr.bf16.mxu0 %v10025_v18  ;;  %v1985_v7 = vmul.f32 0.02, %v1745_v34  ;;  %v2112_v14 = vmax.f32 %v1743_v9, %v1984_v40  ;;  %v1962_v5 = vmul.f32 0.02, %v1842_v37  ;;  %v2106_v62 = vmax.f32 %v1852_v47, %v1978_v57  ;;  %v10085_v57 = vld [vmem:[#allocation41_spill] sm:$0xff] }
 0x1ba   : > { %2525 = vmatprep.mubr.bf16.mxu1 %v10025_v18  ;;  %v1987_v50 = vmul.f32 0.02, %v1858_v39  ;;  %v2114_v24 = vmax.f32 %v1856_v11, %v1986_v46  ;;  %v2089_v54 = vmax.f32 %v7052_v49, %v1961_v1  ;;  %v2091_v8 = vmax.f32 %v7066_v29, %v1963_v51  ;;  %v10082_v1 = vld [vmem:[#allocation39_spill] sm:$0xff]  ;;  %v10083_v46 = vld [vmem:[#allocation64_spill] sm:$0xff] }
 0x1bb   : > { %v2113_v43 = vmax.f32 %v1745_v34, %v1985_v7  ;;  %v2096_v7 = vmax.f32 %v7099_v17, %v1968_v36  ;;  %v1954_v11 = vmul.f32 0.02, %v7063_v42  ;;  %v2098_v40 = vmax.f32 %v7102_v58, %v1970_v30 }
 0x1bc   : > { %v2115_v13 = vmax.f32 %v1858_v39, %v1987_v50  ;;  %v2192_v31 = vpack.c.bf16 %v2112_v14, %v2104_v45  ;;  %v2194_v53 = vpack.c.bf16 %v2114_v24, %v2106_v62  ;;  %v2083_v48 = vmax.f32 %v7033_v4, %v7084_v6  ;;  %v10077_v14 = vld [vmem:[#allocation17_spill] sm:$0xff]  ;;  %v10078_v6 = vld [vmem:[#allocation60_spill] sm:$0xff] }
 0x1bd   : > { %v2193_v32 = vpack.c.bf16 %v2113_v43, %v2105_v61  ;;  %v2185_v29 = vpack.c.bf16 %v2097_v22, %v2089_v54  ;;  %v2187_v36 = vpack.c.bf16 %v2099_v27, %v2091_v8  ;;  %v1944_v17 = vmul.f32 0.02, %v7045_v16  ;;  %v10086_v22 = vld [vmem:[#allocation66_spill] sm:$0xff]  ;;  %v10088_v8 = vld [vmem:[#allocation72_spill] sm:$0xff] }
 0x1be   : > { %v2195_v9 = vpack.c.bf16 %v2115_v13, %v2107_v63  ;;  %v1946_v47 = vmul.f32 0.02, %v7049_v35  ;;  %v2088_v45 = vmax.f32 %v7036_v12, %v7087_v10  ;;  %v2090_v30 = vmax.f32 %v1842_v37, %v1962_v5 }
 0x1bf   : > { %2566 = vmatprep.subr.bf16.mxu0 %v2193_v32  ;;  %v1936_v39 = vmul.f32 0.02, %v7012_v59  ;;  %v2073_v4 = vmax.f32 %v7005_v26, %v7056_v28  ;;  %v2075_v0 = vmax.f32 %v7008_v21, %v7059_v33  ;;  %v2080_v27 = vmax.f32 %v7019_v15, %v7069_v44  ;;  %v7154_v26 = vld [vmem:[%s9519_s4 + $0x28] sm:$0xff]  }
 0x1c0   : > { %2413 = vmatmul.mubr.bf16.gmra.mxu0 %v7122_v25  ;;  %2679 = vmatprep.subr.bf16.mxu1 %v2195_v9  ;;  %v1938_v51 = vmul.f32 0.02, %v7016_v38  ;;  %v2082_v12 = vmax.f32 %v7063_v42, %v1954_v11  ;;  %v2184_v32 = vpack.c.bf16 %v2096_v7, %v2088_v45  ;;  %v2186_v24 = vpack.c.bf16 %v2098_v40, %v2090_v30  ;;  %v10076_v42 = vld [vmem:[#allocation54_spill] sm:$0xff]  ;;  %v10089_v9 = vld [vmem:[#allocation49_spill] sm:$0xff] }
 0x1c1   : > { %2526 = vmatmul.mubr.bf16.gmra.mxu1 %v7122_v25  ;;  %2567 = vmatpush1.bf16.msra.mxu0 %v2192_v31  ;;  %v2065_v21 = vmax.f32 %v6995_v41, %v7041_v20  ;;  %v2067_v33 = vmax.f32 %v7030_v55, %v1939_v3  ;;  %v2177_v62 = vpack.c.bf16 %v2081_v60, %v2073_v4  ;;  %v1928_v15 = vmul.f32 0.02, %v6992_v19  ;;  %v10079_v41 = vld [vmem:[#allocation28_spill] sm:$0xff]  ;;  %v10080_v20 = vld [vmem:[#allocation63_spill] sm:$0xff]  ;;  %v10090_v40 = vld [vmem:[#allocation45_spill] sm:$0xff] }
 0x1c2   : > { %2680 = vmatpush1.bf16.msra.mxu1 %v2194_v53  ;;  %2568 = vmatprep.subr.bf16.mxu0 %v2185_v29  ;;  %v2179_v63 = vpack.c.bf16 %v2083_v48, %v2075_v0  ;;  %v1930_v43 = vmul.f32 0.02, %v6999_v52  ;;  %v2072_v49 = vmax.f32 %v7045_v16, %v1944_v17  ;;  %v2074_v28 = vmax.f32 %v7049_v35, %v1946_v47  ;;  %v10091_v31 = vld [vmem:[#allocation79_spill] sm:$0xff]  ;;  %v10092_v3 = vld [vmem:[#allocation53_spill] sm:$0xff]  ;;  %v10093_v48 = vld [vmem:[#allocation16_spill] sm:$0xff] }
 0x1c3   : > { %2681 = vmatprep.subr.bf16.mxu1 %v2187_v36  ;;  %2422 = vmatprep.mubr.bf16.mxu0 %v10025_v18  ;;  %v1922_v44 = vmul.f32 0.02, %v10076_v42  ;;  %v2049_v10 = vmax.f32 %v10078_v6, %v10077_v14  ;;  %v2057_v55 = vmax.f32 %v10080_v20, %v10079_v41  ;;  %v2059_v58 = vmax.f32 %v10082_v1, %v10081_v56  ;;  %v10094_v36 = vld [vmem:[#allocation68_spill] sm:$0xff]  ;;  %v10095_v17 = vld [vmem:[#allocation69_spill] sm:$0xff]  ;;  %v10105_v41 = vld [vmem:[#allocation78_spill] sm:$0xff] }
 0x1c4   : > { %2535 = vmatprep.mubr.bf16.mxu1 %v10025_v18  ;;  %v2064_v34 = vmax.f32 %v7012_v59, %v1936_v39  ;;  %v2066_v16 = vmax.f32 %v7016_v38, %v1938_v51  ;;  %v2176_v35 = vpack.c.bf16 %v2080_v27, %v2072_v49  ;;  %v2178_v23 = vpack.c.bf16 %v2082_v12, %v2074_v28  ;;  %v10087_v59 = vld [vmem:[#allocation52_spill] sm:$0xff]  ;;  %v7195_v30 = vld [vmem:[%s9519_s4 + $0x30] sm:$0xff]   ;;  %v10101_v49 = vld [vmem:[#allocation75_spill] sm:$0xff] }
 0x1c5   : > { %2569 = vmatpush1.bf16.msra.mxu0 %v2184_v32  ;;  %v1907_v37 = vmul.f32 0.02, %v10083_v46  ;;  %v2051_v60 = vmax.f32 %v10085_v57, %v10084_v2  ;;  %v2169_v50 = vpack.c.bf16 %v2065_v21, %v2057_v55  ;;  %v2171_v61 = vpack.c.bf16 %v2067_v33, %v2059_v58  ;;  %v10096_v39 = vld [vmem:[#allocation48_spill] sm:$0xff]  ;;  %v10097_v4 = vld [vmem:[#allocation65_spill] sm:$0xff]  ;;  %v10109_v57 = vld [vmem:[#allocation83_spill] sm:$0xff] }
 0x1c6   : > { %2682 = vmatpush1.bf16.msra.mxu1 %v2186_v24  ;;  %2570 = vmatprep.subr.bf16.mxu0 %v2177_v62  ;;  %v1912_v13 = vmul.f32 0.02, %v10086_v22  ;;  %v1914_v5 = vmul.f32 0.02, %v10087_v59  ;;  %v2056_v38 = vmax.f32 %v6992_v19, %v1928_v15  ;;  %v2058_v54 = vmax.f32 %v6999_v52, %v1930_v43  ;;  %v10098_v32 = vld [vmem:[#allocation61_spill] sm:$0xff] }
 0x1c7   : > { %2683 = vmatprep.subr.bf16.mxu1 %v2179_v63  ;;  %v1899_v7 = vmul.f32 0.02, %v10088_v8  ;;  %v1906_v11 = vmul.f32 0.02, %v10089_v9  ;;  %v2041_v53 = vmax.f32 %v10091_v31, %v10090_v40  ;;  %v2043_v29 = vmax.f32 %v10093_v48, %v10092_v3  ;;  %v10099_v21 = vld [vmem:[#allocation57_spill] sm:$0xff]  ;;  %v10112_v3 = vld [vmem:[#allocation80_spill] sm:$0xff] }
 0x1c8   : > { %2423 = vmatmul.mubr.bf16.gmra.mxu0 %v7154_v26  ;;  %v2048_v47 = vmax.f32 %v10095_v17, %v10094_v36  ;;  %v2050_v19 = vmax.f32 %v10076_v42, %v1922_v44  ;;  %v2168_v52 = vpack.c.bf16 %v2064_v34, %v2056_v38  ;;  %v2170_v45 = vpack.c.bf16 %v2066_v16, %v2058_v54  ;;  %v10100_v15 = vld [vmem:[#allocation81_spill] sm:$0xff]  ;;  %v10102_v42 = vld [vmem:[#allocation56_spill] sm:$0xff]  ;;  %v10103_v44 = vld [vmem:[#allocation74_spill] sm:$0xff] }
 0x1c9   : > { %2536 = vmatmul.mubr.bf16.gmra.mxu1 %v7154_v26  ;;  %2432 = vmatprep.mubr.bf16.mxu0 %v10025_v18  ;;  %v2033_v0 = vmax.f32 %v10097_v4, %v10096_v39  ;;  %v2035_v27 = vmax.f32 %v10083_v46, %v1907_v37  ;;  %v2161_v51 = vpack.c.bf16 %v2049_v10, %v2041_v53  ;;  %v1873_v24 = vmul.f32 0.02, %v10098_v32  ;;  %v10104_v10 = vld [vmem:[#allocation70_spill] sm:$0xff]  ;;  %v10106_v58 = vld [vmem:[#allocation73_spill] sm:$0xff]  ;;  %v10107_v16 = vld [vmem:[#allocation67_spill] sm:$0xff] }
 0x1ca   : > { %2571 = vmatpush1.bf16.msra.mxu0 %v2176_v35  ;;  %2684 = vmatpush1.bf16.msra.mxu1 %v2178_v23  ;;  %v2163_v12 = vpack.c.bf16 %v2051_v60, %v2043_v29  ;;  %v1898_v33 = vmul.f32 0.02, %v10099_v21  ;;  %v2040_v62 = vmax.f32 %v10086_v22, %v1912_v13  ;;  %v2042_v63 = vmax.f32 %v10087_v59, %v1914_v5  ;;  %v10108_v35 = vld [vmem:[#allocation84_spill] sm:$0xff]  ;;  %v5505_v5 = vld [vmem:[%s9519_s4 + $0x38] sm:$0xff]  }
 0x1cb   : > { %2572 = vmatprep.subr.bf16.mxu0 %v2169_v50  ;;  %2685 = vmatprep.subr.bf16.mxu1 %v2171_v61  ;;  %v1881_v43 = vmul.f32 0.02, %v10100_v15  ;;  %v1883_v28 = vmul.f32 0.02, %v10101_v49  ;;  %v2025_v14 = vmax.f32 %v10103_v44, %v10102_v42  ;;  %v2027_v6 = vmax.f32 %v10088_v8, %v1899_v7  ;;  %v10110_v50 = vld [vmem:[#allocation77_spill] sm:$0xff]  ;;  %v10113_v48 = vld [vmem:[#allocation71_spill] sm:$0xff] }
 0x1cc   : > { %2545 = vmatprep.mubr.bf16.mxu1 %v10025_v18  ;;  %v2017_v20 = vmax.f32 %v10105_v41, %v10104_v10  ;;  %v2034_v55 = vmax.f32 %v10089_v9, %v1906_v11  ;;  %v2160_v56 = vpack.c.bf16 %v2048_v47, %v2040_v62  ;;  %v2162_v1 = vpack.c.bf16 %v2050_v19, %v2042_v63  ;;  %v10111_v9 = vld [vmem:[#allocation18_spill] sm:$0xff]  ;;  %v10115_v36 = vld [vmem:[#allocation87_spill] sm:$0xff]  ;;  %v10117_v47 = vld [vmem:[#allocation76_spill] sm:$0xff] }
 0x1cd   : > { %v1875_v34 = vmul.f32 0.02, %v10106_v58  ;;  %v2019_v23 = vmax.f32 %v10108_v35, %v10107_v16  ;;  %v2153_v46 = vpack.c.bf16 %v2033_v0, %v2025_v14  ;;  %v2155_v37 = vpack.c.bf16 %v2035_v27, %v2027_v6  ;;  %v10114_v29 = vld [vmem:[#allocation86_spill] sm:$0xff]  ;;  %v10118_v19 = vld [vmem:[#allocation59_spill] sm:$0xff] }
 0x1ce   : > { %2573 = vmatpush1.bf16.msra.mxu0 %v2168_v52  ;;  %2686 = vmatpush1.bf16.msra.mxu1 %v2170_v45  ;;  %v2026_v2 = vmax.f32 %v10099_v21, %v1898_v33  ;;  %v1865_v60 = vmul.f32 0.02, %v10109_v57  ;;  %v1867_v61 = vmul.f32 0.02, %v10110_v50  ;;  %v2009_v22 = vmax.f32 %v10100_v15, %v1881_v43  ;;  %v10116_v17 = vld [vmem:[#allocation82_spill] sm:$0xff]  ;;  %v10119_v52 = vld [vmem:[#allocation40_spill] sm:$0xff] }
 0x1cf   : > { %2574 = vmatprep.subr.bf16.mxu0 %v2161_v51  ;;  %2687 = vmatprep.subr.bf16.mxu1 %v2163_v12  ;;  %v2011_v13 = vmax.f32 %v10101_v49, %v1883_v28  ;;  %v2001_v38 = vmax.f32 %v10098_v32, %v1873_v24  ;;  %v2003_v54 = vmax.f32 %v10106_v58, %v1875_v34 }
 0x1d0   : > { %2433 = vmatmul.mubr.bf16.gmra.mxu0 %v7195_v30  ;;  %v2154_v59 = vpack.c.bf16 %v2034_v55, %v2026_v2  ;;  %v2145_v8 = vpack.c.bf16 %v2017_v20, %v2009_v22  ;;  %v1993_v11 = vmax.f32 %v10109_v57, %v1865_v60  ;;  %v1995_v40 = vmax.f32 %v10110_v50, %v1867_v61 }
 0x1d1   : > { %2546 = vmatmul.mubr.bf16.gmra.mxu1 %v7195_v30  ;;  %2442 = vmatprep.mubr.bf16.mxu0 %v10025_v18  ;;  %v2147_v7 = vpack.c.bf16 %v2019_v23, %v2011_v13 }
 0x1d2   : > { %2575 = vmatpush1.bf16.msra.mxu0 %v2160_v56  ;;  %2688 = vmatpush1.bf16.msra.mxu1 %v2162_v1  ;;  %v2137_v31 = vpack.c.bf16 %v2001_v38, %v1993_v11  ;;  %v2139_v53 = vpack.c.bf16 %v2003_v54, %v1995_v40 }
 0x1d3   : > { %2576 = vmatprep.subr.bf16.mxu0 %v2153_v46  ;;  %2689 = vmatprep.subr.bf16.mxu1 %v2155_v37 }
 0x1d4   : > { %2555 = vmatprep.mubr.bf16.mxu1 %v10025_v18 }
 0x1d6   : > { %2577 = vmatpush1.bf16.msra.mxu0 %v10111_v9  ;;  %2690 = vmatpush1.bf16.msra.mxu1 %v2154_v59 }
 0x1d7   : > { %2578 = vmatprep.subr.bf16.mxu0 %v2145_v8  ;;  %2691 = vmatprep.subr.bf16.mxu1 %v2147_v7 }
 0x1d8   : > { %2443 = vmatmul.mubr.bf16.gmra.mxu0 %v5505_v5 }
 0x1d9   : > { %2556 = vmatmul.mubr.bf16.gmra.mxu1 %v5505_v5  ;;  %2598 = vmatprep.mubr.bf16.mxu0 %v10025_v18 }
 0x1da   : > { %2579 = vmatpush1.bf16.msra.mxu0 %v10112_v3  ;;  %2692 = vmatpush1.bf16.msra.mxu1 %v10113_v48 }
 0x1db   : > { %2580 = vmatprep.subr.bf16.mxu0 %v2137_v31  ;;  %2693 = vmatprep.subr.bf16.mxu1 %v2139_v53 }
 0x1dc   : > { %2711 = vmatprep.mubr.bf16.mxu1 %v10025_v18 }
 0x1de   : > { %2581 = vmatpush1.bf16.msra.mxu0 %v10114_v29  ;;  %2694 = vmatpush1.bf16.msra.mxu1 %v10115_v36 }
 0x1e1   : > { %2599 = vmatmul.mubr.bf16.vlgmr.msra.gmra.mxu0 %v10116_v17  ;;  %2712 = vmatmul.mubr.bf16.vlgmr.msra.gmra.mxu1 %v10116_v17 }
 0x1e2   : > { %2608 = vmatprep.mubr.bf16.mxu0 %v10025_v18  ;;  %2721 = vmatprep.mubr.bf16.mxu1 %v10025_v18 }
 0x1e9   : > { %2609 = vmatmul.mubr.bf16.gmra.mxu0 %v10117_v47  ;;  %2722 = vmatmul.mubr.bf16.gmra.mxu1 %v10117_v47 }
 0x1ea   : > { %2618 = vmatprep.mubr.bf16.mxu0 %v10025_v18  ;;  %2731 = vmatprep.mubr.bf16.mxu1 %v10025_v18 }
 0x1f1   : > { %2619 = vmatmul.mubr.bf16.gmra.mxu0 %v10118_v19  ;;  %2732 = vmatmul.mubr.bf16.gmra.mxu1 %v10118_v19 }
 0x1f2   : > { %2628 = vmatprep.mubr.bf16.mxu0 %v10025_v18  ;;  %2741 = vmatprep.mubr.bf16.mxu1 %v10025_v18 }
 0x1f9   : > { %2629 = vmatmul.mubr.bf16.gmra.mxu0 %v10119_v52  ;;  %2742 = vmatmul.mubr.bf16.gmra.mxu1 %v10119_v52 }
 0x1fa   : > { %2638 = vmatprep.mubr.bf16.mxu0 %v10025_v18  ;;  %2751 = vmatprep.mubr.bf16.mxu1 %v10025_v18 }
 0x201   : > { %2639 = vmatmul.mubr.bf16.gmra.mxu0 %v7122_v25  ;;  %2752 = vmatmul.mubr.bf16.gmra.mxu1 %v7122_v25  ;;  %v7268_v25 = vpop.permute.xlu0 %2284 }
 0x202   : > { %2648 = vmatprep.mubr.bf16.mxu0 %v10025_v18  ;;  %2761 = vmatprep.mubr.bf16.mxu1 %v10025_v18  ;;  %10120 = vst [vmem:[#allocation58_spill] sm:$0xff] %v7268_v25 }
 0x205   : > { %v7272_v45 = vpop.permute.xlu0 %2274 }
 0x206   : > { %10122 = vst [vmem:[#allocation62_spill] sm:$0xff] %v7272_v45 }
 0x209   : > { %2649 = vmatmul.mubr.bf16.gmra.mxu0 %v7154_v26  ;;  %2762 = vmatmul.mubr.bf16.gmra.mxu1 %v7154_v26  ;;  %v7270_v26 = vpop.permute.xlu1 %2289  ;;  %v7276_v4 = vpop.permute.xlu0 %2264 }
 0x20a   : > { %2658 = vmatprep.mubr.bf16.mxu0 %v10025_v18  ;;  %2771 = vmatprep.mubr.bf16.mxu1 %v10025_v18  ;;  %10121 = vst [vmem:[#allocation44_spill] sm:$0xff] %v7270_v26  ;;  %10124 = vst [vmem:[#allocation37_spill] sm:$0xff] %v7276_v4 }
 0x20d   : > { %v7274_v39 = vpop.permute.xlu1 %2279  ;;  %v7280_v0 = vpop.permute.xlu0 %2254 }
 0x20e   : > { %10123 = vst [vmem:[#allocation47_spill] sm:$0xff] %v7274_v39  ;;  %10126 = vst [vmem:[#allocation35_spill] sm:$0xff] %v7280_v0 }
 0x211   : > { %2659 = vmatmul.mubr.bf16.gmra.mxu0 %v7195_v30  ;;  %2772 = vmatmul.mubr.bf16.gmra.mxu1 %v7195_v30  ;;  %v7278_v30 = vpop.permute.xlu1 %2269  ;;  %v7284_v51 = vpop.permute.xlu0 %2244 }
 0x212   : > { %2668 = vmatprep.mubr.bf16.mxu0 %v10025_v18  ;;  %2781 = vmatprep.mubr.bf16.mxu1 %v10025_v18  ;;  %10125 = vst [vmem:[#allocation51_spill] sm:$0xff] %v7278_v30  ;;  %10128 = vst [vmem:[#allocation43_spill] sm:$0xff] %v7284_v51 }
 0x215   : > { %v7282_v27 = vpop.permute.xlu1 %2259  ;;  %v7288_v32 = vpop.permute.xlu0 %2234 }
 0x216   : > { %10127 = vst [vmem:[#allocation26_spill] sm:$0xff] %v7282_v27  ;;  %10130 = vst [vmem:[#allocation46_spill] sm:$0xff] %v7288_v32 }
 0x219   : > { %2669 = vmatmul.mubr.bf16.gmra.mxu0 %v5505_v5  ;;  %2782 = vmatmul.mubr.bf16.gmra.mxu1 %v5505_v5  ;;  %v7286_v12 = vpop.permute.xlu1 %2249  ;;  %v7292_v21 = vpop.permute.xlu0 %2224 }
 0x21a   : > { %3304 = vmatprep.mubr.bf16.mxu0 %v10025_v18  ;;  %3417 = vmatprep.mubr.bf16.mxu1 %v10025_v18  ;;  %10129 = vst [vmem:[#allocation29_spill] sm:$0xff] %v7286_v12 }
 0x21d   : > { %v7290_v24 = vpop.permute.xlu1 %2239  ;;  %v7296_v62 = vpop.permute.xlu0 %2214 }
 0x21e   : > { %10131 = vst [vmem:[#allocation33_spill] sm:$0xff] %v7290_v24  ;;  %10133 = vst [vmem:[#allocation50_spill] sm:$0xff] %v7296_v62 }
 0x221   : > { %v7294_v33 = vpop.permute.xlu1 %2229 }
 0x222   : > { %10132 = vst [vmem:[#allocation30_spill] sm:$0xff] %v7294_v33 }
 0x225   : > { %v7304_v44 = vpop.permute.xlu1 %2219 }
 0x260   : > { %v2374_v63 = vpop.f32.mrf.mxu0 }
 0x261   : > { %v2375_v15 = vadd.f32 %v2374_v63, %v7296_v62  ;;  %v2487_v43 = vpop.f32.mrf.mxu1 }
 0x262   : > { %v2488_v49 = vadd.f32 %v2487_v43, %v7296_v62  ;;  %v7300_v28 = vpop.f32.mrf.mxu0 }
 0x263   : > { %v7302_v42 = vpop.f32.mrf.mxu1  ;;  %v2792_v6 = vmul.f32 0.02, %v2375_v15 }
 0x264   : > { %v2378_v14 = vpop.f32.mrf.mxu0  ;;  %v2794_v20 = vmul.f32 0.02, %v2488_v49 }
 0x265   : > { %v2379_v10 = vadd.f32 %v2378_v14, %v7304_v44  ;;  %v2491_v41 = vpop.f32.mrf.mxu1  ;;  %v2920_v35 = vmax.f32 %v2375_v15, %v2792_v6 }
 0x266   : > { %v2492_v55 = vadd.f32 %v2491_v41, %v7304_v44  ;;  %v2380_v56 = vpop.f32.mrf.mxu0  ;;  %v2922_v2 = vmax.f32 %v2488_v49, %v2794_v20 }
 0x267   : > { %v2800_v1 = vmul.f32 0.02, %v2379_v10  ;;  %v7308_v58 = vpop.f32.mrf.mxu1 }
 0x268   : > { %v2802_v34 = vmul.f32 0.02, %v2492_v55  ;;  %v2384_v16 = vpop.f32.mrf.mxu0 }
 0x269   : > { %v2928_v23 = vmax.f32 %v2379_v10, %v2800_v1  ;;  %v2385_v46 = vadd.f32 %v2384_v16, %v7292_v21  ;;  %v2497_v37 = vpop.f32.mrf.mxu1 }
 0x26a   : > { %v2930_v57 = vmax.f32 %v2492_v55, %v2802_v34  ;;  %v2498_v60 = vadd.f32 %v2497_v37, %v7292_v21  ;;  %v2386_v50 = vpop.f32.mrf.mxu0 }
 0x26b   : > { %v7312_v61 = vpack.c.bf16 %v2928_v23, %v2920_v35  ;;  %v7314_v22 = vpop.f32.mrf.mxu1  ;;  %v2808_v5 = vmul.f32 0.02, %v2385_v46 }
 0x26c   : > { %v7316_v13 = vpack.c.bf16 %v2930_v57, %v2922_v2  ;;  %v2388_v59 = vpop.f32.mrf.mxu0  ;;  %v2810_v8 = vmul.f32 0.02, %v2498_v60 }
 0x26d   : > { %10134 = vst [vmem:[#allocation36_spill] sm:$0xff] %v7312_v61  ;;  %v2389_v38 = vadd.f32 %v2388_v59, %v7294_v33  ;;  %v2501_v54 = vpop.f32.mrf.mxu1  ;;  %v2936_v3 = vmax.f32 %v2385_v46, %v2808_v5 }
 0x26e   : > { %10135 = vst [vmem:[#allocation31_spill] sm:$0xff] %v7316_v13  ;;  %v2502_v7 = vadd.f32 %v2501_v54, %v7294_v33  ;;  %v2390_v9 = vpop.f32.mrf.mxu0  ;;  %v2938_v36 = vmax.f32 %v2498_v60, %v2810_v8  ;;  %v7329_v8 = vadd.f32 %v2380_v56, %v7304_v44 }
 0x26f   : > { %v2816_v11 = vmul.f32 0.02, %v2389_v38  ;;  %v2503_v40 = vpop.f32.mrf.mxu1  ;;  %v7348_v56 = vadd.f32 %v2390_v9, %v7294_v33 }
 0x270   : > { %v2818_v31 = vmul.f32 0.02, %v2502_v7  ;;  %v2394_v53 = vpop.f32.mrf.mxu0  ;;  %10139 = vst [vmem:[#allocation24_spill] sm:$0xff] %v7329_v8 }
 0x271   : > { %v2944_v48 = vmax.f32 %v2389_v38, %v2816_v11  ;;  %v2507_v29 = vpop.f32.mrf.mxu1  ;;  %10144 = vst [vmem:[#allocation20_spill] sm:$0xff] %v7348_v56 }
 0x272   : > { %v2946_v17 = vmax.f32 %v2502_v7, %v2818_v31  ;;  %v2508_v47 = vadd.f32 %v2507_v29, %v7288_v32  ;;  %v2396_v19 = vpop.f32.mrf.mxu0  ;;  %v7345_v29 = vadd.f32 %v2386_v50, %v7292_v21  ;;  %v7364_v50 = vmul.f32 0.02, %v7329_v8 }
 0x273   : > { %v7321_v52 = vpack.c.bf16 %v2944_v48, %v2936_v3  ;;  %v2509_v63 = vpop.f32.mrf.mxu1  ;;  %v7338_v3 = vadd.f32 %v7300_v28, %v7296_v62  ;;  %v7342_v48 = vadd.f32 %v7302_v42, %v7296_v62  ;;  %v7358_v28 = vadd.f32 %v2394_v53, %v7288_v32 }
 0x274   : > { %v7323_v15 = vpack.c.bf16 %v2946_v17, %v2938_v36  ;;  %v2398_v43 = vpop.f32.mrf.mxu0  ;;  %v2826_v14 = vmul.f32 0.02, %v2508_v47  ;;  %10143 = vst [vmem:[#allocation23_spill] sm:$0xff] %v7345_v29  ;;  %v7352_v17 = vadd.f32 %v7308_v58, %v7304_v44  ;;  %10149 = vst [vmem:[#allocation15_spill] sm:$0xff] %v7364_v50  ;;  %v7367_v9 = vadd.f32 %v2396_v19, %v7288_v32 }
 0x275   : > { %10136 = vst [vmem:[#allocation38_spill] sm:$0xff] %v7321_v52  ;;  %v2511_v49 = vpop.f32.mrf.mxu1  ;;  %10141 = vst [vmem:[#allocation25_spill] sm:$0xff] %v7338_v3  ;;  %v7373_v58 = vadd.f32 %v2398_v43, %v7290_v24  ;;  %v7377_v53 = vadd.f32 %v7314_v22, %v7292_v21  ;;  %v7394_v43 = vmul.f32 0.02, %v7348_v56 }
 0x276   : > { %10137 = vst [vmem:[#allocation27_spill] sm:$0xff] %v7323_v15  ;;  %v2512_v6 = vadd.f32 %v2511_v49, %v7290_v24  ;;  %v2400_v10 = vpop.f32.mrf.mxu0  ;;  %v2954_v34 = vmax.f32 %v2508_v47, %v2826_v14  ;;  %10142 = vst [vmem:[#allocation22_spill] sm:$0xff] %v7342_v48  ;;  %v7355_v47 = vadd.f32 %v2503_v40, %v7294_v33 }
 0x277   : > { %v2513_v41 = vpop.f32.mrf.mxu1  ;;  %v7332_v11 = vadd.f32 %v2400_v10, %v7290_v24  ;;  %10145 = vst [vmem:[#allocation21_spill] sm:$0xff] %v7352_v17  ;;  %10147 = vst [vmem:[#allocation85_spill] sm:$0xff] %v7358_v28  ;;  %v7370_v14 = vadd.f32 %v2509_v63, %v7288_v32  ;;  %v7391_v63 = vmul.f32 0.02, %v7345_v29  ;;  %v7421_v61 = vmul.f32 0.02, %v7373_v58 }
 0x278   : > { %v2834_v20 = vmul.f32 0.02, %v2512_v6  ;;  %v2404_v55 = vpop.f32.mrf.mxu0  ;;  %10146 = vst [vmem:[#allocation19_spill] sm:$0xff] %v7355_v47  ;;  %10150 = vst [vmem:[#allocation12_spill] sm:$0xff] %v7367_v9  ;;  %v7383_v10 = vadd.f32 %v2513_v41, %v7290_v24  ;;  %v7403_v41 = vmul.f32 0.02, %v7355_v47 }
 0x279   : > { %v2517_v1 = vpop.f32.mrf.mxu1  ;;  %10140 = vst [vmem:[#allocation34_spill] sm:$0xff] %v7332_v11  ;;  %10151 = vst [vmem:[#allocation13_spill] sm:$0xff] %v7370_v14  ;;  %v7397_v22 = vadd.f32 %v2404_v55, %v7284_v51  ;;  %v7415_v55 = vmul.f32 0.02, %v7367_v9 }
 0x27a   : > { %v2962_v16 = vmax.f32 %v2512_v6, %v2834_v20  ;;  %v2406_v35 = vpop.f32.mrf.mxu0  ;;  %10152 = vst [vmem:[#allocation10_spill] sm:$0xff] %v7373_v58  ;;  %10153 = vst [vmem:[#allocation11_spill] sm:$0xff] %v7377_v53  ;;  %v7380_v6 = vmul.f32 0.02, %v7332_v11 }
 0x27b   : > { %v2519_v23 = vpop.f32.mrf.mxu1  ;;  %v7361_v42 = vadd.f32 %v2406_v35, %v7284_v51  ;;  %10155 = vst [vmem:[#allocation9_spill] sm:$0xff] %v7383_v10  ;;  %10157 = vst [vmem:[#allocation8_spill] sm:$0xff] %v7391_v63  ;;  %v7406_v35 = vmul.f32 0.02, %v7358_v28  ;;  %v7438_v48 = vmul.f32 0.02, %v7397_v22 }
 0x27c   : > { %v7326_v46 = vpack.c.bf16 %v2962_v16, %v2954_v34  ;;  %v2408_v37 = vpop.f32.mrf.mxu0  ;;  %10154 = vst [vmem:[#allocation7_spill] sm:$0xff] %v7380_v6  ;;  %10158 = vst [vmem:[#allocation54_spill] sm:$0xff] %v7394_v43  ;;  %v7400_v34 = vadd.f32 %v2517_v1, %v7284_v51  ;;  %v7412_v18 = vadd.f32 %v2519_v23, %v7284_v51  ;;  %v7418_v1 = vmul.f32 0.02, %v7370_v14 }
 0x27d   : > { %v2521_v2 = vpop.f32.mrf.mxu1  ;;  %10148 = vst [vmem:[#allocation14_spill] sm:$0xff] %v7361_v42  ;;  %v7386_v19 = vadd.f32 %v2408_v37, %v7286_v12  ;;  %10159 = vst [vmem:[#allocation17_spill] sm:$0xff] %v7397_v22  ;;  %v7409_v37 = vmul.f32 0.02, %v7361_v42  ;;  %v7429_v23 = vmul.f32 0.02, %v7383_v10 }
 0x27e   : > { %10138 = vst [vmem:[#allocation32_spill] sm:$0xff] %v7326_v46  ;;  %v2410_v57 = vpop.f32.mrf.mxu0  ;;  %10160 = vst [vmem:[#allocation60_spill] sm:$0xff] %v7400_v34  ;;  %v7424_v15 = vadd.f32 %v2521_v2, %v7286_v12  ;;  %v7441_v2 = vmul.f32 0.02, %v7400_v34 }
 0x27f   : > { %v2523_v60 = vpop.f32.mrf.mxu1  ;;  %10156 = vst [vmem:[#allocation6_spill] sm:$0xff] %v7386_v19  ;;  %10161 = vst [vmem:[#allocation28_spill] sm:$0xff] %v7403_v41  ;;  %v7432_v51 = vmul.f32 0.02, %v7386_v19  ;;  %v7444_v47 = vadd.f32 %v2410_v57, %v7286_v12 }
 0x280   : > { %v2414_v59 = vpop.f32.mrf.mxu0  ;;  %10162 = vst [vmem:[#allocation63_spill] sm:$0xff] %v7406_v35  ;;  %10163 = vst [vmem:[#allocation55_spill] sm:$0xff] %v7409_v37  ;;  %v7447_v46 = vadd.f32 %v2523_v60, %v7286_v12  ;;  %v7461_v57 = vmul.f32 0.02, %v7424_v15 }
 0x281   : > { %v2527_v5 = vpop.f32.mrf.mxu1  ;;  %10164 = vst [vmem:[#allocation39_spill] sm:$0xff] %v7412_v18  ;;  %10165 = vst [vmem:[#allocation64_spill] sm:$0xff] %v7415_v55  ;;  %v7455_v63 = vadd.f32 %v2414_v59, %v7280_v0 }
 0x282   : > { %v2416_v38 = vpop.f32.mrf.mxu0  ;;  %10166 = vst [vmem:[#allocation42_spill] sm:$0xff] %v7418_v1  ;;  %10167 = vst [vmem:[#allocation41_spill] sm:$0xff] %v7421_v61  ;;  %v7464_v60 = vadd.f32 %v2527_v5, %v7280_v0 }
 0x283   : > { %v2529_v54 = vpop.f32.mrf.mxu1  ;;  %10168 = vst [vmem:[#allocation66_spill] sm:$0xff] %v7424_v15  ;;  %10169 = vst [vmem:[#allocation52_spill] sm:$0xff] %v7429_v23  ;;  %v7435_v8 = vadd.f32 %v2416_v38, %v7280_v0  ;;  %v7452_v38 = vmul.f32 0.02, %v7412_v18 }
 0x284   : > { %v2418_v7 = vpop.f32.mrf.mxu0  ;;  %10170 = vst [vmem:[#allocation72_spill] sm:$0xff] %v7432_v51  ;;  %10172 = vst [vmem:[#allocation45_spill] sm:$0xff] %v7438_v48  ;;  %v7467_v12 = vadd.f32 %v2529_v54, %v7280_v0  ;;  %v7484_v54 = vmul.f32 0.02, %v7444_v47 }
 0x285   : > { %v7334_v31 = vpop.f32.mrf.mxu1  ;;  %10171 = vst [vmem:[#allocation49_spill] sm:$0xff] %v7435_v8  ;;  %10173 = vst [vmem:[#allocation79_spill] sm:$0xff] %v7441_v2  ;;  %v7458_v17 = vadd.f32 %v2418_v7, %v7282_v27  ;;  %v7475_v7 = vmul.f32 0.02, %v7435_v8 }
 0x286   : > { %v2420_v36 = vpop.f32.mrf.mxu0  ;;  %10174 = vst [vmem:[#allocation53_spill] sm:$0xff] %v7444_v47  ;;  %10175 = vst [vmem:[#allocation16_spill] sm:$0xff] %v7447_v46  ;;  %v7491_v0 = vadd.f32 %v7334_v31, %v7282_v27  ;;  %v7509_v31 = vmul.f32 0.02, %v7464_v60 }
 0x287   : > { %v2533_v49 = vpop.f32.mrf.mxu1  ;;  %10176 = vst [vmem:[#allocation68_spill] sm:$0xff] %v7452_v38  ;;  %10177 = vst [vmem:[#allocation69_spill] sm:$0xff] %v7455_v63  ;;  %v7470_v29 = vadd.f32 %v2420_v36, %v7282_v27  ;;  %v7487_v36 = vmul.f32 0.02, %v7447_v46 }
 0x288   : > { %v2424_v40 = vpop.f32.mrf.mxu0  ;;  %10178 = vst [vmem:[#allocation48_spill] sm:$0xff] %v7458_v17  ;;  %10179 = vst [vmem:[#allocation65_spill] sm:$0xff] %v7461_v57  ;;  %v7503_v14 = vadd.f32 %v2533_v49, %v7282_v27  ;;  %v7532_v34 = vmul.f32 0.02, %v7491_v0 }
 0x289   : > { %v7388_v20 = vpop.f32.mrf.mxu1  ;;  %10180 = vst [vmem:[#allocation61_spill] sm:$0xff] %v7464_v60  ;;  %10181 = vst [vmem:[#allocation57_spill] sm:$0xff] %v7467_v12  ;;  %v7478_v3 = vadd.f32 %v2424_v40, %v7276_v4  ;;  %v7497_v40 = vmul.f32 0.02, %v7455_v63  ;;  %v7515_v43 = vmul.f32 0.02, %v7470_v29 }
 0x28a   : > { %v2426_v16 = vpop.f32.mrf.mxu0  ;;  %10182 = vst [vmem:[#allocation81_spill] sm:$0xff] %v7470_v29  ;;  %10183 = vst [vmem:[#allocation75_spill] sm:$0xff] %v7475_v7 }
 0x28b   : > { %v2539_v13 = vpop.f32.mrf.mxu1  ;;  %v7481_v6 = vadd.f32 %v2426_v16, %v7276_v4  ;;  %10184 = vst [vmem:[#allocation56_spill] sm:$0xff] %v7484_v54  ;;  %10185 = vst [vmem:[#allocation74_spill] sm:$0xff] %v7487_v36  ;;  %v7500_v16 = vmul.f32 0.02, %v7458_v17 }
 0x28c   : > { %v2428_v52 = vpop.f32.mrf.mxu0  ;;  %10186 = vst [vmem:[#allocation70_spill] sm:$0xff] %v7491_v0  ;;  %10187 = vst [vmem:[#allocation78_spill] sm:$0xff] %v7497_v40  ;;  %v7529_v51 = vadd.f32 %v2539_v13, %v7276_v4  ;;  %v7546_v13 = vmul.f32 0.02, %v7503_v14 }
 0x28d   : > { %v2541_v50 = vpop.f32.mrf.mxu1  ;;  %v7494_v59 = vadd.f32 %v2428_v52, %v7278_v30  ;;  %10188 = vst [vmem:[#allocation73_spill] sm:$0xff] %v7500_v16  ;;  %10189 = vst [vmem:[#allocation67_spill] sm:$0xff] %v7509_v31  ;;  %v7512_v52 = vmul.f32 0.02, %v7467_v12  ;;  %v7526_v27 = vmul.f32 0.02, %v7481_v6 }
 0x28e   : > { %v2430_v41 = vpop.f32.mrf.mxu0  ;;  %10191 = vst [vmem:[#allocation83_spill] sm:$0xff] %v7515_v43  ;;  %10193 = vst [vmem:[#allocation18_spill] sm:$0xff] %v7532_v34  ;;  %v7538_v2 = vadd.f32 %v2541_v50, %v7278_v30  ;;  %v7571_v57 = vmul.f32 0.02, %v7529_v51 }
 0x28f   : > { %v2543_v28 = vpop.f32.mrf.mxu1  ;;  %v7506_v1 = vadd.f32 %v2430_v41, %v7278_v30  ;;  %10190 = vst [vmem:[#allocation84_spill] sm:$0xff] %v7512_v52  ;;  %v7523_v41 = vmul.f32 0.02, %v7478_v3 }
 0x290   : > { %v2434_v35 = vpop.f32.mrf.mxu0  ;;  %v7518_v53 = vadd.f32 %v2543_v28, %v7278_v30  ;;  %v7535_v28 = vmul.f32 0.02, %v7494_v59 }
 0x291   : > { %v2547_v5 = vpop.f32.mrf.mxu1  ;;  %v7549_v58 = vmul.f32 0.02, %v7506_v1  ;;  %v7552_v61 = vadd.f32 %v2434_v35, %v7272_v45 }
 0x292   : > { %v2436_v11 = vpop.f32.mrf.mxu0  ;;  %10192 = vst [vmem:[#allocation77_spill] sm:$0xff] %v7518_v53  ;;  %10194 = vst [vmem:[#allocation80_spill] sm:$0xff] %v7535_v28  ;;  %v7561_v30 = vmul.f32 0.02, %v7518_v53  ;;  %v7564_v23 = vadd.f32 %v2547_v5, %v7272_v45  ;;  %v7579_v5 = vmul.f32 0.02, %v7538_v2 }
 0x293   : > { %v2549_v56 = vpop.f32.mrf.mxu1  ;;  %v7541_v49 = vadd.f32 %v2436_v11, %v7272_v45  ;;  %v7558_v11 = vadd.f32 %v7388_v20, %v7276_v4 }
 0x294   : > { %v2438_v24 = vpop.f32.mrf.mxu0  ;;  %10195 = vst [vmem:[#allocation71_spill] sm:$0xff] %v7561_v30  ;;  %v7574_v50 = vadd.f32 %v2549_v56, %v7272_v45  ;;  %v7590_v56 = vmul.f32 0.02, %v7552_v61  ;;  %v7597_v38 = vmul.f32 0.02, %v7564_v23 }
 0x295   : > { %v2551_v19 = vpop.f32.mrf.mxu1  ;;  %v7582_v37 = vmul.f32 0.02, %v7541_v49 }
 0x296   : > { %v2440_v10 = vpop.f32.mrf.mxu0  ;;  %v7606_v48 = vmul.f32 0.02, %v7574_v50 }
 0x297   : > { %v2553_v9 = vpop.f32.mrf.mxu1  ;;  %v7585_v15 = vadd.f32 %v2440_v10, %v7274_v39  ;;  %v7600_v10 = vadd.f32 %v2438_v24, %v7274_v39  ;;  %v3017_v17 = vmax.f32 %v7541_v49, %v7582_v37  ;;  %v7614_v24 = vadd.f32 %v2551_v19, %v7274_v39 }
 0x298   : > { %v2444_v55 = vpop.f32.mrf.mxu0  ;;  %v7603_v22 = vadd.f32 %v2553_v9, %v7274_v39 }
 0x299   : > { %v2557_v20 = vpop.f32.mrf.mxu1  ;;  %v2445_v45 = vadd.f32 %v2444_v55, %v7268_v25  ;;  %v2897_v9 = vmul.f32 0.02, %v7585_v15  ;;  %v2898_v7 = vmul.f32 0.02, %v7614_v24 }
 0x29a   : > { %v2446_v35 = vpop.f32.mrf.mxu0  ;;  %v2558_v55 = vadd.f32 %v2557_v20, %v7268_v25 }
 0x29b   : > { %v2447_v4 = vadd.f32 %v2446_v35, %v7268_v25  ;;  %v2559_v32 = vpop.f32.mrf.mxu1  ;;  %v2904_v46 = vmul.f32 0.02, %v2445_v45  ;;  %v3025_v52 = vmax.f32 %v7585_v15, %v2897_v9 }
 0x29c   : > { %v2448_v42 = vpop.f32.mrf.mxu0  ;;  %v2560_v35 = vadd.f32 %v2559_v32, %v7268_v25  ;;  %v2899_v25 = vmul.f32 0.02, %v7603_v22  ;;  %v2906_v19 = vmul.f32 0.02, %v2558_v55 }
 0x29d   : > { %v2449_v16 = vadd.f32 %v2448_v42, %v7270_v26  ;;  %v2561_v18 = vpop.f32.mrf.mxu1  ;;  %v2905_v36 = vmul.f32 0.02, %v2447_v4  ;;  %v2896_v42 = vmul.f32 0.02, %v7600_v10  ;;  %v3032_v63 = vmax.f32 %v2445_v45, %v2904_v46 }
 0x29e   : > { %v2562_v60 = vadd.f32 %v2561_v18, %v7270_v26  ;;  %v2450_v31 = vpop.f32.mrf.mxu0  ;;  %v2907_v49 = vmul.f32 0.02, %v2560_v35  ;;  %v3034_v30 = vmax.f32 %v2558_v55, %v2906_v19  ;;  %v3010_v55 = vmax.f32 %v7538_v2, %v7579_v5  ;;  %v10204_v5 = vld [vmem:[#allocation77_spill] sm:$0xff] }
 0x29f   : > { %v2912_v0 = vmul.f32 0.02, %v2449_v16  ;;  %v2451_v20 = vadd.f32 %v2450_v31, %v7270_v26  ;;  %v2563_v32 = vpop.f32.mrf.mxu1  ;;  %v3033_v40 = vmax.f32 %v2447_v4, %v2905_v36 }
 0x2a0   : > { %v2914_v34 = vmul.f32 0.02, %v2562_v60  ;;  %v2564_v37 = vadd.f32 %v2563_v32, %v7270_v26  ;;  %v3035_v53 = vmax.f32 %v2560_v35, %v2907_v49 }
 0x2a1   : > { %v3040_v39 = vmax.f32 %v2449_v16, %v2912_v0  ;;  %v2913_v43 = vmul.f32 0.02, %v2451_v20  ;;  %v2600_v29 = vpop.f32.mrf.mxu0  ;;  %v2713_v18 = vpop.f32.mrf.mxu1  ;;  %v3024_v0 = vmax.f32 %v7600_v10, %v2896_v42  ;;  %v3027_v16 = vmax.f32 %v7603_v22, %v2899_v25  ;;  %v10205_v42 = vld [vmem:[#allocation71_spill] sm:$0xff] }
 0x2a2   : > { %v2915_v8 = vmul.f32 0.02, %v2564_v37  ;;  %v2601_v12 = vadd.f32 %v2600_v29, %v7296_v62  ;;  %v2714_v31 = vadd.f32 %v2713_v18, %v7296_v62  ;;  %v3042_v26 = vmax.f32 %v2562_v60, %v2914_v34 }
 0x2a3   : > { %v3041_v47 = vmax.f32 %v2451_v20, %v2913_v43  ;;  %v7626_v54 = vpop.f32.mrf.mxu0  ;;  %v7628_v32 = vpop.f32.mrf.mxu1  ;;  %v3120_v29 = vpack.c.bf16 %v3040_v39, %v3032_v63  ;;  %v3016_v43 = vmax.f32 %v7552_v61, %v7590_v56  ;;  %v3019_v25 = vmax.f32 %v7574_v50, %v7606_v48 }
 0x2a4   : > { %10196 = vst [vmem:[#allocation86_spill] sm:$0xff] %v7628_v32  ;;  %v3043_v33 = vmax.f32 %v2564_v37, %v2915_v8  ;;  %v2796_v15 = vmul.f32 0.02, %v2601_v12  ;;  %v2798_v45 = vmul.f32 0.02, %v2714_v31  ;;  %v3113_v63 = vpack.c.bf16 %v3025_v52, %v3017_v17 }
 0x2a5   : > { %v2604_v28 = vpop.f32.mrf.mxu0  ;;  %v2717_v18 = vpop.f32.mrf.mxu1  ;;  %v3121_v62 = vpack.c.bf16 %v3041_v47, %v3033_v40  ;;  %v3026_v47 = vmax.f32 %v7614_v24, %v2898_v7  ;;  %v3122_v34 = vpack.c.bf16 %v3042_v26, %v3034_v30  ;;  %v2874_v40 = vmul.f32 0.02, %v7558_v11 }
 0x2a6   : > { %v2605_v4 = vadd.f32 %v2604_v28, %v7304_v44  ;;  %v2718_v46 = vadd.f32 %v2717_v18, %v7304_v44  ;;  %v3123_v39 = vpack.c.bf16 %v3043_v33, %v3035_v53  ;;  %v3018_v61 = vmax.f32 %v7564_v23, %v7597_v38  ;;  %v10212_v18 = vld [vmem:[#allocation84_spill] sm:$0xff] }
 0x2a7   : > { %v7638_v22 = vpop.f32.mrf.mxu0  ;;  %v7640_v8 = vpop.f32.mrf.mxu1  ;;  %3272 = vmatprep.subr.bf16.mxu0 %v3121_v62  ;;  %v3112_v28 = vpack.c.bf16 %v3024_v0, %v3016_v43  ;;  %v3115_v56 = vpack.c.bf16 %v3027_v16, %v3019_v25  ;;  %v2924_v62 = vmax.f32 %v2601_v12, %v2796_v15  ;;  %v2926_v33 = vmax.f32 %v2714_v31, %v2798_v45  ;;  %v10207_v0 = vld [vmem:[#allocation30_spill] sm:$0xff]  ;;  %v10213_v15 = vld [vmem:[#allocation57_spill] sm:$0xff]  ;;  %v10215_v25 = vld [vmem:[#allocation75_spill] sm:$0xff] }
 0x2a8   : > { %v2804_v60 = vmul.f32 0.02, %v2605_v4  ;;  %v2806_v36 = vmul.f32 0.02, %v2718_v46  ;;  %3273 = vmatpush1.bf16.msra.mxu0 %v3120_v29  ;;  %3385 = vmatprep.subr.bf16.mxu1 %v3123_v39  ;;  %v3003_v26 = vmax.f32 %v7529_v51, %v7571_v57  ;;  %v10197_v52 = vmax.f32 %v7481_v6, %v7526_v27  ;;  %v10210_v16 = vld [vmem:[#allocation78_spill] sm:$0xff]  ;;  %v10214_v43 = vld [vmem:[#allocation49_spill] sm:$0xff] }
 0x2a9   : > { %v2610_v48 = vpop.f32.mrf.mxu0  ;;  %v2723_v50 = vpop.f32.mrf.mxu1  ;;  %3274 = vmatprep.subr.bf16.mxu0 %v3113_v63  ;;  %3386 = vmatpush1.bf16.msra.mxu1 %v3122_v34  ;;  %v10198_v12 = vmax.f32 %v7506_v1, %v7549_v58  ;;  %v3114_v51 = vpack.c.bf16 %v3026_v47, %v3018_v61  ;;  %v2995_v24 = vmax.f32 %v7503_v14, %v7546_v13  ;;  %v10202_v58 = vld [vmem:[#allocation80_spill] sm:$0xff]  ;;  %v10217_v63 = vld [vmem:[#allocation81_spill] sm:$0xff]  ;;  %v10218_v47 = vld [vmem:[#allocation83_spill] sm:$0xff] }
 0x2aa   : > { %v2932_v17 = vmax.f32 %v2605_v4, %v2804_v60  ;;  %v2934_v53 = vmax.f32 %v2718_v46, %v2806_v36  ;;  %v2611_v30 = vadd.f32 %v2610_v48, %v7292_v21  ;;  %v2724_v7 = vadd.f32 %v2723_v50, %v7292_v21  ;;  %3387 = vmatprep.subr.bf16.mxu1 %v3115_v56  ;;  %v10220_v36 = vld [vmem:[#allocation18_spill] sm:$0xff] }
 0x2ab   : > { %v7650_v23 = vpop.f32.mrf.mxu0  ;;  %v7652_v38 = vpop.f32.mrf.mxu1  ;;  %v3105_v10 = vpack.c.bf16 %v10198_v12, %v10197_v52  ;;  %v3002_v9 = vmax.f32 %v7558_v11, %v2874_v40  ;;  %v10201_v27 = vmax.f32 %v7478_v3, %v7523_v41  ;;  %v10203_v6 = vmax.f32 %v7494_v59, %v10202_v58  ;;  %v10208_v11 = vld [vmem:[#allocation56_spill] sm:$0xff]  ;;  %v10209_v3 = vld [vmem:[#allocation53_spill] sm:$0xff]  ;;  %v10221_v40 = vld [vmem:[#allocation70_spill] sm:$0xff] }
 0x2ac   : > { %v7662_v57 = vpack.c.bf16 %v2932_v17, %v2924_v62  ;;  %v7664_v35 = vpack.c.bf16 %v2934_v53, %v2926_v33  ;;  %3275 = vmatpush1.bf16.msra.mxu0 %v3112_v28  ;;  %v10206_v37 = vmax.f32 %v10204_v5, %v10205_v42  ;;  %v2812_v49 = vmul.f32 0.02, %v2611_v30  ;;  %v10211_v59 = vld [vmem:[#allocation69_spill] sm:$0xff]  ;;  %v10222_v56 = vld [vmem:[#allocation74_spill] sm:$0xff]  ;;  %v10223_v62 = vld [vmem:[#allocation16_spill] sm:$0xff] }
 0x2ad   : > { %v3104_v1 = vpack.c.bf16 %v10203_v6, %v10201_v27  ;;  %v2614_v20 = vpop.f32.mrf.mxu0  ;;  %v2727_v2 = vpop.f32.mrf.mxu1  ;;  %3276 = vmatprep.subr.bf16.mxu0 %v3105_v10  ;;  %v2814_v31 = vmul.f32 0.02, %v2724_v7  ;;  %3388 = vmatpush1.bf16.msra.mxu1 %v3114_v51  ;;  %v2977_v41 = vmax.f32 %v10209_v3, %v10208_v11  ;;  %v2984_v29 = vmax.f32 %v10211_v59, %v10210_v16  ;;  %v10224_v17 = vld [vmem:[#allocation67_spill] sm:$0xff]  ;;  %v10225_v53 = vld [vmem:[#allocation61_spill] sm:$0xff]  ;;  %v10226_v52 = vld [vmem:[#allocation48_spill] sm:$0xff] }
 0x2ae   : > { %10199 = vst [vmem:[#allocation87_spill] sm:$0xff] %v7662_v57  ;;  %10200 = vst [vmem:[#allocation82_spill] sm:$0xff] %v7664_v35  ;;  %v3107_v19 = vpack.c.bf16 %v10206_v37, %v3003_v26  ;;  %v2615_v14 = vadd.f32 %v2614_v20, %v10207_v0  ;;  %v2728_v13 = vadd.f32 %v2727_v2, %v10207_v0  ;;  %v10227_v12 = vld [vmem:[#allocation73_spill] sm:$0xff]  ;;  %v10231_v37 = vld [vmem:[#allocation68_spill] sm:$0xff] }
 0x2af   : > { %v2987_v45 = vmax.f32 %v10213_v15, %v10212_v18  ;;  %v7686_v4 = vpop.f32.mrf.mxu0  ;;  %v7688_v46 = vpop.f32.mrf.mxu1  ;;  %v10216_v39 = vmax.f32 %v10214_v43, %v10215_v25  ;;  %v10219_v34 = vmax.f32 %v10217_v63, %v10218_v47  ;;  %v2994_v61 = vmax.f32 %v10221_v40, %v10220_v36  ;;  %v10230_v5 = vld [vmem:[#allocation17_spill] sm:$0xff]  ;;  %v10233_v3 = vld [vmem:[#allocation46_spill] sm:$0xff]  ;;  %v10241_v43 = vld [vmem:[#allocation64_spill] sm:$0xff] }
 0x2b0   : > { %3389 = vmatprep.subr.bf16.mxu1 %v3107_v19  ;;  %v3106_v28 = vpack.c.bf16 %v3010_v55, %v3002_v9  ;;  %v2820_v48 = vmul.f32 0.02, %v2615_v14  ;;  %v2822_v50 = vmul.f32 0.02, %v2728_v13  ;;  %3277 = vmatpush1.bf16.msra.mxu0 %v3104_v1  ;;  %v2979_v33 = vmax.f32 %v10223_v62, %v10222_v56  ;;  %v10229_v1 = vld [vmem:[#allocation45_spill] sm:$0xff]  ;;  %v10232_v19 = vld [vmem:[#allocation39_spill] sm:$0xff] }
 0x2b1   : > { %v3097_v60 = vpack.c.bf16 %v10219_v34, %v10216_v39  ;;  %v2986_v26 = vmax.f32 %v10225_v53, %v10224_v17  ;;  %v10228_v10 = vmax.f32 %v10226_v52, %v10227_v12  ;;  %v7705_v27 = vpop.f32.mrf.mxu0  ;;  %v2733_v58 = vpop.f32.mrf.mxu1  ;;  %v3099_v6 = vpack.c.bf16 %v2995_v24, %v2987_v45  ;;  %v10234_v18 = vld [vmem:[#allocation14_spill] sm:$0xff]  ;;  %v10235_v24 = vld [vmem:[#allocation55_spill] sm:$0xff]  ;;  %v10242_v25 = vld [vmem:[#allocation12_spill] sm:$0xff] }
 0x2b2   : > { %v2940_v20 = vmax.f32 %v2611_v30, %v2812_v49  ;;  %v2942_v55 = vmax.f32 %v2724_v7, %v2814_v31  ;;  %v2948_v9 = vmax.f32 %v2615_v14, %v2820_v48  ;;  %v2950_v2 = vmax.f32 %v2728_v13, %v2822_v50  ;;  %3390 = vmatpush1.bf16.msra.mxu1 %v3106_v28  ;;  %v10237_v49 = vld [vmem:[#allocation65_spill] sm:$0xff]  ;;  %v10238_v31 = vld [vmem:[#allocation66_spill] sm:$0xff]  ;;  %v10248_v50 = vld [vmem:[#allocation60_spill] sm:$0xff] }
 0x2b3   : > { %v3096_v51 = vpack.c.bf16 %v10228_v10, %v2984_v29  ;;  %3278 = vmatprep.subr.bf16.mxu0 %v3097_v60  ;;  %v2968_v42 = vmax.f32 %v10230_v5, %v10229_v1  ;;  %v2971_v11 = vmax.f32 %v10232_v19, %v10231_v37  ;;  %v2734_v16 = vadd.f32 %v2733_v58, %v10233_v3  ;;  %v7712_v59 = vpop.f32.mrf.mxu0  ;;  %v7714_v29 = vpop.f32.mrf.mxu1  ;;  %v10243_v63 = vld [vmem:[#allocation41_spill] sm:$0xff]  ;;  %v10244_v47 = vld [vmem:[#allocation10_spill] sm:$0xff]  ;;  %v10245_v60 = vld [vmem:[#allocation52_spill] sm:$0xff] }
 0x2b4   : > { %3391 = vmatprep.subr.bf16.mxu1 %v3099_v6  ;;  %v10236_v30 = vmax.f32 %v10234_v18, %v10235_v24  ;;  %v2978_v14 = vmax.f32 %v10238_v31, %v10237_v49  ;;  %v3098_v13 = vpack.c.bf16 %v2994_v61, %v2986_v26  ;;  %v7721_v15 = vpack.c.bf16 %v2948_v9, %v2940_v20  ;;  %v10246_v36 = vld [vmem:[#allocation9_spill] sm:$0xff]  ;;  %v10247_v61 = vld [vmem:[#allocation79_spill] sm:$0xff]  ;;  %v10249_v62 = vld [vmem:[#allocation6_spill] sm:$0xff] }
 0x2b5   : > { %v7723_v45 = vpack.c.bf16 %v2950_v2, %v2942_v55  ;;  %3279 = vmatpush1.bf16.msra.mxu0 %v3096_v51  ;;  %v2953_v39 = vmax.f32 %v10242_v25, %v10241_v43  ;;  %v2960_v34 = vmax.f32 %v10244_v47, %v10243_v63  ;;  %v2963_v40 = vmax.f32 %v10246_v36, %v10245_v60  ;;  %v7731_v28 = vpop.f32.mrf.mxu0  ;;  %v10250_v17 = vld [vmem:[#allocation72_spill] sm:$0xff]  ;;  %v10252_v12 = vld [vmem:[#allocation33_spill] sm:$0xff]  ;;  %v10253_v51 = vld [vmem:[#allocation11_spill] sm:$0xff] }
 0x2b6   : > { %v3089_v7 = vpack.c.bf16 %v2977_v41, %v10236_v30  ;;  %10239 = vst [vmem:[#allocation76_spill] sm:$0xff] %v7721_v15  ;;  %v2737_v41 = vpop.f32.mrf.mxu1  ;;  %v3091_v48 = vpack.c.bf16 %v2979_v33, %v2971_v11  ;;  %v2970_v56 = vmax.f32 %v10248_v50, %v10247_v61  ;;  %v10251_v53 = vmax.f32 %v10249_v62, %v10250_v17  ;;  %v10254_v6 = vld [vmem:[#allocation54_spill] sm:$0xff]  ;;  %v10255_v20 = vld [vmem:[#allocation20_spill] sm:$0xff]  ;;  %v10257_v2 = vld [vmem:[#allocation13_spill] sm:$0xff] }
 0x2b7   : > { %10240 = vst [vmem:[#allocation59_spill] sm:$0xff] %v7723_v45  ;;  %v2830_v52 = vmul.f32 0.02, %v2734_v16  ;;  %v2738_v10 = vadd.f32 %v2737_v41, %v10252_v12  ;;  %3392 = vmatpush1.bf16.msra.mxu1 %v3098_v13  ;;  %v2811_v58 = vmul.f32 0.02, %v10253_v51  ;;  %v2945_v55 = vmax.f32 %v10255_v20, %v10254_v6  ;;  %v10256_v9 = vld [vmem:[#allocation42_spill] sm:$0xff]  ;;  %v7744_v33 = vpop.f32.mrf.mxu0 }
 0x2b8   : > { %3280 = vmatprep.subr.bf16.mxu0 %v3089_v7  ;;  %v3088_v26 = vpack.c.bf16 %v10251_v53, %v2968_v42  ;;  %v2955_v1 = vmax.f32 %v10257_v2, %v10256_v9  ;;  %3393 = vmatprep.subr.bf16.mxu1 %v3091_v48  ;;  %v7746_v5 = vpop.f32.mrf.mxu1  ;;  %v10258_v37 = vld [vmem:[#allocation34_spill] sm:$0xff]  ;;  %v10259_v19 = vld [vmem:[#allocation7_spill] sm:$0xff]  ;;  %v10261_v18 = vld [vmem:[#allocation25_spill] sm:$0xff]  ;;  %v3090_v31 = vpack.c.bf16 %v2978_v14, %v2970_v56 }
 0x2b9   : > { %v10260_v42 = vmax.f32 %v10258_v37, %v10259_v19  ;;  %v2793_v24 = vmul.f32 0.02, %v10261_v18  ;;  %v10262_v30 = vld [vmem:[#allocation63_spill] sm:$0xff]  ;;  %v10263_v7 = vld [vmem:[#allocation85_spill] sm:$0xff]  ;;  %v2838_v13 = vmul.f32 0.02, %v2738_v10  ;;  %v7759_v61 = vpop.f32.mrf.mxu0  ;;  %v2958_v17 = vmax.f32 %v2734_v16, %v2830_v52 }
 0x2ba   : > { %v2952_v49 = vmax.f32 %v10263_v7, %v10262_v30  ;;  %3281 = vmatpush1.bf16.msra.mxu0 %v3088_v26  ;;  %v10264_v43 = vld [vmem:[#allocation21_spill] sm:$0xff]  ;;  %v10265_v63 = vld [vmem:[#allocation8_spill] sm:$0xff]  ;;  %v10266_v47 = vld [vmem:[#allocation23_spill] sm:$0xff]  ;;  %v7761_v50 = vpop.f32.mrf.mxu1  ;;  %v2939_v9 = vmax.f32 %v10253_v51, %v2811_v58 }
 0x2bb   : > { %v3081_v11 = vpack.c.bf16 %v10260_v42, %v2953_v39  ;;  %v2803_v25 = vmul.f32 0.02, %v10264_v43  ;;  %v2937_v60 = vmax.f32 %v10266_v47, %v10265_v63  ;;  %v10267_v36 = vld [vmem:[#allocation28_spill] sm:$0xff]  ;;  %v10268_v41 = vld [vmem:[#allocation19_spill] sm:$0xff]  ;;  %v3083_v39 = vpack.c.bf16 %v2963_v40, %v2955_v1  ;;  %3394 = vmatpush1.bf16.msra.mxu1 %v3090_v31  ;;  %v10269_v14 = vld [vmem:[#allocation22_spill] sm:$0xff]  ;;  %v2632_v2 = vpop.f32.mrf.mxu0 }
 0x2bc   : > { %v2947_v48 = vmax.f32 %v10268_v41, %v10267_v36  ;;  %v3080_v62 = vpack.c.bf16 %v2960_v34, %v2952_v49  ;;  %v2966_v53 = vmax.f32 %v2738_v10, %v2838_v13  ;;  %v2795_v56 = vmul.f32 0.02, %v10269_v14  ;;  %v10270_v26 = vld [vmem:[#allocation15_spill] sm:$0xff]  ;;  %v10271_v6 = vld [vmem:[#allocation24_spill] sm:$0xff]  ;;  %v2745_v37 = vpop.f32.mrf.mxu1  ;;  %v10274_v30 = vld [vmem:[#allocation38_spill] sm:$0xff] }
 0x2bd   : > { %3282 = vmatprep.subr.bf16.mxu0 %v3081_v11  ;;  %v2929_v20 = vmax.f32 %v10271_v6, %v10270_v26  ;;  %3395 = vmatprep.subr.bf16.mxu1 %v3083_v39  ;;  %v3073_v19 = vpack.c.bf16 %v2945_v55, %v2937_v60  ;;  %v2921_v40 = vmax.f32 %v10261_v18, %v2793_v24  ;;  %v7771_v34 = vpop.f32.mrf.mxu0  ;;  %v10273_v1 = vld [vmem:[#allocation32_spill] sm:$0xff]  ;;  %v10275_v49 = vld [vmem:[#allocation27_spill] sm:$0xff] }
 0x2be   : > { %v7767_v42 = vpack.c.bf16 %v2966_v53, %v2958_v17  ;;  %3283 = vmatpush1.bf16.msra.mxu0 %v3080_v62  ;;  %v2931_v16 = vmax.f32 %v10264_v43, %v2803_v25  ;;  %v7773_v52 = vpop.f32.mrf.mxu1  ;;  %v3075_v10 = vpack.c.bf16 %v2947_v48, %v2939_v9  ;;  %v2923_v51 = vmax.f32 %v10269_v14, %v2795_v56  ;;  %v7786_v43 = vld [vmem:[%s9521_s6] sm:$0xff]   ;;  %v7805_v14 = vld [vmem:[%s9521_s6 + $0x8] sm:$0xff]   ;;  %v10283_v9 = vld [vmem:[#allocation50_spill] sm:$0xff] }
 0x2bf   : > { %3284 = vmatprep.subr.bf16.mxu0 %v3073_v19  ;;  %3396 = vmatpush1.bf16.msra.mxu1 %v10273_v1  ;;  %v2636_v58 = vpop.f32.mrf.mxu0  ;;  %v3065_v11 = vpack.c.bf16 %v2929_v20, %v2921_v40  ;;  %10276 = vst [vmem:[#allocation80_spill] sm:$0xff] %v7786_v43  ;;  %v10277_v25 = vld [vmem:[#allocation36_spill] sm:$0xff]  ;;  %v10278_v60 = vld [vmem:[#allocation31_spill] sm:$0xff]  ;;  %v10279_v48 = vmov 0   ;;  %10280 = vst [vmem:[#allocation77_spill] sm:$0xff] %v7805_v14  ;;  %v7809_v56 = vadd.f32 %v7686_v4, %v10207_v0 }
 0x2c0   : > { %10272 = vst [vmem:[#allocation40_spill] sm:$0xff] %v7767_v42  ;;  %3397 = vmatprep.subr.bf16.mxu1 %v3075_v10  ;;  %v2749_v55 = vpop.f32.mrf.mxu1  ;;  %v3067_v24 = vpack.c.bf16 %v2931_v16, %v2923_v51  ;;  %v7813_v26 = vadd.f32 %v7688_v46, %v10207_v0  ;;  %v7819_v19 = vadd.f32 %v7626_v54, %v10283_v9  ;;  %v10321_v42 = vld [vmem:[#allocation51_spill] sm:$0xff] }
 0x2c1   : > { %v7778_v7 = vpop.f32.mrf.mxu0  ;;  %10281 = vst [vmem:[#allocation71_spill] sm:$0xff] %v7809_v56  ;;  %v7823_v40 = vadd.f32 %v7712_v59, %v10233_v3  ;;  %v7827_v16 = vadd.f32 %v7638_v22, %v7304_v44  ;;  %v7831_v4 = vadd.f32 %v7640_v8, %v7304_v44  ;;  %v7835_v0 = vadd.f32 %v7744_v33, %v10252_v12  ;;  %v10293_v59 = vld [vmem:[#allocation43_spill] sm:$0xff] }
 0x2c2   : > { %3285 = vmatpush1.bf16.msra.mxu0 %v10274_v30  ;;  %v7780_v18 = vpop.f32.mrf.mxu1  ;;  %10282 = vst [vmem:[#allocation30_spill] sm:$0xff] %v7813_v26  ;;  %10284 = vst [vmem:[#allocation56_spill] sm:$0xff] %v7819_v19  ;;  %v7839_v54 = vadd.f32 %v7746_v5, %v10252_v12  ;;  %v7844_v22 = vadd.f32 %v7650_v23, %v7292_v21  ;;  %v7848_v44 = vadd.f32 %v7652_v38, %v7292_v21 }
 0x2c3   : > { %3286 = vmatprep.subr.bf16.mxu0 %v3065_v11  ;;  %3398 = vmatpush1.bf16.msra.mxu1 %v10275_v49  ;;  %v2642_v31 = vpop.f32.mrf.mxu0  ;;  %10285 = vst [vmem:[#allocation53_spill] sm:$0xff] %v7823_v40  ;;  %10286 = vst [vmem:[#allocation78_spill] sm:$0xff] %v7827_v16  ;;  %v7851_v8 = vmul.f32 0.02, %v7809_v56  ;;  %v7854_v33 = vadd.f32 %v2632_v2, %v10293_v59  ;;  %v7858_v5 = vmul.f32 0.02, %v7813_v26 }
 0x2c4   : > { %3399 = vmatprep.subr.bf16.mxu1 %v3067_v24  ;;  %v2755_v13 = vpop.f32.mrf.mxu1  ;;  %10287 = vst [vmem:[#allocation69_spill] sm:$0xff] %v7831_v4  ;;  %10288 = vst [vmem:[#allocation84_spill] sm:$0xff] %v7835_v0  ;;  %v7862_v1 = vadd.f32 %v7705_v27, %v10233_v3  ;;  %v7866_v23 = vadd.f32 %v7714_v29, %v10233_v3  ;;  %v7869_v21 = vadd.f32 %v2745_v37, %v10293_v59  ;;  %v10301_v27 = vld [vmem:[#allocation29_spill] sm:$0xff] }
 0x2c5   : > { %v7789_v63 = vpop.f32.mrf.mxu0  ;;  %10289 = vst [vmem:[#allocation57_spill] sm:$0xff] %v7839_v54  ;;  %10290 = vst [vmem:[#allocation49_spill] sm:$0xff] %v7844_v22  ;;  %v7875_v51 = vmul.f32 0.02, %v7823_v40  ;;  %v7879_v11 = vadd.f32 %v7731_v28, %v10252_v12  ;;  %v7882_v30 = vadd.f32 %v2636_v58, %v10301_v27  ;;  %v7885_v3 = vadd.f32 %v2749_v55, %v10301_v27  ;;  %v7905_v55 = vld [vmem:[%s9521_s6 + $0x10] sm:$0xff]  }
 0x2c6   : > { %3287 = vmatpush1.bf16.msra.mxu0 %v10277_v25  ;;  %v7791_v47 = vpop.f32.mrf.mxu1  ;;  %10291 = vst [vmem:[#allocation75_spill] sm:$0xff] %v7848_v44  ;;  %10292 = vst [vmem:[#allocation81_spill] sm:$0xff] %v7851_v8  ;;  %v7889_v29 = vmul.f32 0.02, %v7835_v0  ;;  %v7892_v37 = vmul.f32 0.02, %v7839_v54  ;;  %v7896_v24 = vadd.f32 %v7759_v61, %v10293_v59  ;;  %v7900_v28 = vadd.f32 %v7761_v50, %v10293_v59 }
 0x2c7   : > { %3400 = vmatpush1.bf16.msra.mxu1 %v10278_v60  ;;  %v2646_v36 = vpop.f32.mrf.mxu0  ;;  %10294 = vst [vmem:[#allocation83_spill] sm:$0xff] %v7854_v33  ;;  %10295 = vst [vmem:[#allocation18_spill] sm:$0xff] %v7858_v5  ;;  %v7908_v49 = vmul.f32 0.02, %v7854_v33  ;;  %v7912_v25 = vadd.f32 %v7771_v34, %v10301_v27  ;;  %v7916_v61 = vadd.f32 %v7773_v52, %v10301_v27  ;;  %v10312_v50 = vld [vmem:[#allocation35_spill] sm:$0xff]  ;;  %v10328_v33 = vld [vmem:[#allocation44_spill] sm:$0xff] }
 0x2c8   : > { %v2759_v41 = vpop.f32.mrf.mxu1  ;;  %10296 = vst [vmem:[#allocation70_spill] sm:$0xff] %v7862_v1  ;;  %10297 = vst [vmem:[#allocation74_spill] sm:$0xff] %v7866_v23  ;;  %v7919_v60 = vadd.f32 %v2642_v31, %v10312_v50  ;;  %v7922_v59 = vmul.f32 0.02, %v7869_v21  ;;  %v7934_v52 = vmul.f32 0.02, %v7882_v30  ;;  %v7941_v27 = vadd.f32 %v7778_v7, %v10312_v50 }
 0x2c9   : > { %3305 = vmatmul.mubr.bf16.vlgmr.msra.gmra.mxu0 %v7786_v43  ;;  %v7797_v39 = vpop.f32.mrf.mxu0  ;;  %10298 = vst [vmem:[#allocation16_spill] sm:$0xff] %v7869_v21  ;;  %10299 = vst [vmem:[#allocation67_spill] sm:$0xff] %v7875_v51  ;;  %v7937_v31 = vmul.f32 0.02, %v7885_v3  ;;  %v10327_v1 = vld [vmem:[#allocation58_spill] sm:$0xff] }
 0x2ca   : > { %3314 = vmatprep.mubr.bf16.mxu0 %v10279_v48  ;;  %3418 = vmatmul.mubr.bf16.vlgmr.msra.gmra.mxu1 %v7786_v43  ;;  %v7799_v62 = vpop.f32.mrf.mxu1  ;;  %10300 = vst [vmem:[#allocation61_spill] sm:$0xff] %v7879_v11  ;;  %10302 = vst [vmem:[#allocation48_spill] sm:$0xff] %v7882_v30  ;;  %v10316_v43 = vld [vmem:[#allocation26_spill] sm:$0xff]  ;;  %v7961_v7 = vmul.f32 0.02, %v7919_v60 }
 0x2cb   : > { %3427 = vmatprep.mubr.bf16.mxu1 %v10279_v48  ;;  %v2652_v17 = vpop.f32.mrf.mxu0  ;;  %10303 = vst [vmem:[#allocation73_spill] sm:$0xff] %v7885_v3  ;;  %10304 = vst [vmem:[#allocation45_spill] sm:$0xff] %v7889_v29  ;;  %v7928_v35 = vadd.f32 %v2646_v36, %v10316_v43  ;;  %v7931_v57 = vadd.f32 %v2759_v41, %v10316_v43  ;;  %v7948_v36 = vadd.f32 %v7780_v18, %v10312_v50 }
 0x2cc   : > { %v2765_v53 = vpop.f32.mrf.mxu1  ;;  %10305 = vst [vmem:[#allocation17_spill] sm:$0xff] %v7892_v37  ;;  %10306 = vst [vmem:[#allocation68_spill] sm:$0xff] %v7896_v24  ;;  %v7965_v18 = vadd.f32 %v7789_v63, %v10316_v43 }
 0x2cd   : > { %v2654_v6 = vpop.f32.mrf.mxu0  ;;  %10307 = vst [vmem:[#allocation39_spill] sm:$0xff] %v7900_v28  ;;  %10308 = vst [vmem:[#allocation46_spill] sm:$0xff] %v7905_v55  ;;  %v7982_v56 = vmul.f32 0.02, %v7928_v35  ;;  %v7985_v63 = vmul.f32 0.02, %v7931_v57 }
 0x2ce   : > { %v7815_v20 = vpop.f32.mrf.mxu1  ;;  %10309 = vst [vmem:[#allocation14_spill] sm:$0xff] %v7908_v49  ;;  %10310 = vst [vmem:[#allocation55_spill] sm:$0xff] %v7912_v25  ;;  %v7954_v19 = vadd.f32 %v2654_v6, %v10321_v42 }
 0x2cf   : > { %v2656_v46 = vpop.f32.mrf.mxu0  ;;  %10311 = vst [vmem:[#allocation65_spill] sm:$0xff] %v7916_v61  ;;  %10313 = vst [vmem:[#allocation66_spill] sm:$0xff] %v7919_v60 }
 0x2d0   : > { %v2769_v10 = vpop.f32.mrf.mxu1  ;;  %10314 = vst [vmem:[#allocation64_spill] sm:$0xff] %v7922_v59  ;;  %10317 = vst [vmem:[#allocation41_spill] sm:$0xff] %v7934_v52  ;;  %v7957_v26 = vadd.f32 %v2656_v46, %v10321_v42  ;;  %v8012_v44 = vmul.f32 0.02, %v7954_v19 }
 0x2d1   : > { %3315 = vmatmul.mubr.bf16.gmra.mxu0 %v7805_v14  ;;  %v2660_v38 = vpop.f32.mrf.mxu0  ;;  %10318 = vst [vmem:[#allocation10_spill] sm:$0xff] %v7937_v31  ;;  %10320 = vst [vmem:[#allocation52_spill] sm:$0xff] %v7948_v36 }
 0x2d2   : > { %3324 = vmatprep.mubr.bf16.mxu0 %v10279_v48  ;;  %3428 = vmatmul.mubr.bf16.gmra.mxu1 %v7805_v14  ;;  %v7872_v2 = vpop.f32.mrf.mxu1  ;;  %v7925_v14 = vadd.f32 %v2755_v13, %v10312_v50  ;;  %v10319_v13 = vld [vmem:[#allocation37_spill] sm:$0xff]  ;;  %10322 = vst [vmem:[#allocation9_spill] sm:$0xff] %v7961_v7  ;;  %v7979_v50 = vadd.f32 %v7791_v47, %v10316_v43 }
 0x2d3   : > { %3437 = vmatprep.mubr.bf16.mxu1 %v10279_v48  ;;  %v2662_v12 = vpop.f32.mrf.mxu0  ;;  %v7944_v15 = vadd.f32 %v2652_v17, %v10319_v13  ;;  %v7951_v41 = vadd.f32 %v2765_v53, %v10319_v13  ;;  %v7968_v17 = vadd.f32 %v2769_v10, %v10321_v42  ;;  %v10323_v53 = vld [vmem:[#allocation62_spill] sm:$0xff]  ;;  %v7990_v8 = vadd.f32 %v7797_v39, %v10319_v13 }
 0x2d4   : > { %v2775_v58 = vpop.f32.mrf.mxu1  ;;  %10315 = vst [vmem:[#allocation12_spill] sm:$0xff] %v7925_v14  ;;  %v7971_v6 = vadd.f32 %v2662_v12, %v10323_v53  ;;  %v7975_v46 = vmul.f32 0.02, %v7925_v14  ;;  %v7994_v16 = vadd.f32 %v7799_v62, %v10319_v13  ;;  %v8015_v62 = vmul.f32 0.02, %v7957_v26  ;;  %v10326_v13 = vld [vmem:[#allocation47_spill] sm:$0xff] }
 0x2d5   : > { %v2664_v34 = vpop.f32.mrf.mxu0  ;;  %v7997_v43 = vmul.f32 0.02, %v7944_v15  ;;  %v8000_v47 = vadd.f32 %v2775_v58, %v10323_v53  ;;  %v8009_v39 = vmul.f32 0.02, %v7951_v41  ;;  %v8021_v22 = vmul.f32 0.02, %v7968_v17 }
 0x2d6   : > { %v2777_v45 = vpop.f32.mrf.mxu1  ;;  %10324 = vst [vmem:[#allocation79_spill] sm:$0xff] %v7975_v46  ;;  %v8024_v32 = vadd.f32 %v2660_v38, %v10323_v53  ;;  %v2893_v9 = vmul.f32 0.02, %v7971_v6  ;;  %v8028_v54 = vadd.f32 %v2664_v34, %v10326_v13  ;;  %v8063_v14 = vld [vmem:[%s9521_s6 + $0x20] sm:$0xff]  }
 0x2d7   : > { %v2666_v5 = vpop.f32.mrf.mxu0  ;;  %v2895_v11 = vmul.f32 0.02, %v8000_v47  ;;  %v8041_v28 = vadd.f32 %v2777_v45, %v10326_v13  ;;  %v2774_v45 = vadd.f32 %v7872_v2, %v10323_v53 }
 0x2d8   : > { %v2779_v4 = vpop.f32.mrf.mxu1  ;;  %v8018_v40 = vadd.f32 %v2666_v5, %v10326_v13  ;;  %v2892_v61 = vmul.f32 0.02, %v8024_v32  ;;  %v3021_v25 = vmax.f32 %v7971_v6, %v2893_v9 }
 0x2d9   : > { %3325 = vmatmul.mubr.bf16.gmra.mxu0 %v7905_v55  ;;  %v2670_v10 = vpop.f32.mrf.mxu0  ;;  %v8031_v37 = vadd.f32 %v2779_v4, %v10326_v13  ;;  %v8055_v13 = vadd.f32 %v7815_v20, %v10321_v42  ;;  %v2894_v60 = vmul.f32 0.02, %v2774_v45 }
 0x2da   : > { %3334 = vmatprep.mubr.bf16.mxu0 %v10279_v48  ;;  %3438 = vmatmul.mubr.bf16.gmra.mxu1 %v7905_v55  ;;  %v2783_v12 = vpop.f32.mrf.mxu1  ;;  %v8006_v55 = vld [vmem:[%s9521_s6 + $0x18] sm:$0xff]   ;;  %v2671_v0 = vadd.f32 %v2670_v10, %v10327_v1  ;;  %v2901_v4 = vmul.f32 0.02, %v8018_v40 }
 0x2db   : > { %3447 = vmatprep.mubr.bf16.mxu1 %v10279_v48  ;;  %10325 = vst [vmem:[#allocation60_spill] sm:$0xff] %v8006_v55  ;;  %v2672_v58 = vpop.f32.mrf.mxu0  ;;  %v2784_v38 = vadd.f32 %v2783_v12, %v10327_v1 }
 0x2dc   : > { %v2785_v51 = vpop.f32.mrf.mxu1  ;;  %v2673_v5 = vadd.f32 %v2672_v58, %v10327_v1  ;;  %v2908_v12 = vmul.f32 0.02, %v2671_v0  ;;  %v3029_v2 = vmax.f32 %v8018_v40, %v2901_v4  ;;  %v3013_v4 = vmax.f32 %v7957_v26, %v8015_v62 }
 0x2dd   : > { %v2786_v29 = vadd.f32 %v2785_v51, %v10327_v1  ;;  %v2674_v21 = vpop.f32.mrf.mxu0  ;;  %v2910_v30 = vmul.f32 0.02, %v2784_v38  ;;  %v3015_v26 = vmax.f32 %v7968_v17, %v8021_v22  ;;  %v3007_v22 = vmax.f32 %v7951_v41, %v8009_v39 }
 0x2de   : > { %v2787_v59 = vpop.f32.mrf.mxu1  ;;  %v2675_v49 = vadd.f32 %v2674_v21, %v10328_v33  ;;  %v2909_v10 = vmul.f32 0.02, %v2673_v5  ;;  %v2900_v21 = vmul.f32 0.02, %v8028_v54  ;;  %v3036_v36 = vmax.f32 %v2671_v0, %v2908_v12 }
 0x2df   : > { %v2788_v34 = vadd.f32 %v2787_v59, %v10328_v33  ;;  %v2911_v23 = vmul.f32 0.02, %v2786_v29  ;;  %v2676_v58 = vpop.f32.mrf.mxu0  ;;  %v2903_v59 = vmul.f32 0.02, %v8031_v37  ;;  %v3038_v40 = vmax.f32 %v2784_v38, %v2910_v30 }
 0x2e0   : > { %v2789_v3 = vpop.f32.mrf.mxu1  ;;  %v2916_v51 = vmul.f32 0.02, %v2675_v49  ;;  %v2677_v24 = vadd.f32 %v2676_v58, %v10328_v33  ;;  %v3117_v9 = vpack.c.bf16 %v3029_v2, %v3021_v25  ;;  %v2876_v30 = vmul.f32 0.02, %v7990_v8 }
 0x2e1   : > { %3335 = vmatmul.mubr.bf16.gmra.mxu0 %v8006_v55  ;;  %v2918_v31 = vmul.f32 0.02, %v2788_v34  ;;  %v2790_v1 = vadd.f32 %v2789_v3, %v10328_v33  ;;  %v2902_v33 = vmul.f32 0.02, %v8041_v28  ;;  %v3037_v3 = vmax.f32 %v2673_v5, %v2909_v10 }
 0x2e2   : > { %3344 = vmatprep.mubr.bf16.mxu0 %v10279_v48  ;;  %3448 = vmatmul.mubr.bf16.gmra.mxu1 %v8006_v55  ;;  %v2917_v58 = vmul.f32 0.02, %v2677_v24  ;;  %v3044_v53 = vmax.f32 %v2675_v49, %v2916_v51  ;;  %v3039_v55 = vmax.f32 %v2786_v29, %v2911_v23  ;;  %v3031_v7 = vmax.f32 %v8031_v37, %v2903_v59  ;;  %v10337_v59 = vld [vmem:[#allocation48_spill] sm:$0xff] }
 0x2e3   : > { %v2919_v52 = vmul.f32 0.02, %v2790_v1  ;;  %3457 = vmatprep.mubr.bf16.mxu1 %v10279_v48  ;;  %v3046_v46 = vmax.f32 %v2788_v34, %v2918_v31  ;;  %v3023_v10 = vmax.f32 %v8000_v47, %v2895_v11  ;;  %v3028_v23 = vmax.f32 %v8028_v54, %v2900_v21  ;;  %v10330_v47 = vld [vmem:[#allocation52_spill] sm:$0xff]  ;;  %v10333_v34 = vld [vmem:[#allocation65_spill] sm:$0xff] }
 0x2e4   : > { %v3045_v42 = vmax.f32 %v2677_v24, %v2917_v58  ;;  %v3124_v29 = vpack.c.bf16 %v3044_v53, %v3036_v36  ;;  %v2886_v24 = vmul.f32 0.02, %v8055_v13  ;;  %v3030_v37 = vmax.f32 %v8041_v28, %v2902_v33  ;;  %v8093_v36 = vld [vmem:[%s9521_s6 + $0x28] sm:$0xff]  }
 0x2e5   : > { %v3047_v20 = vmax.f32 %v2790_v1, %v2919_v52  ;;  %v3126_v0 = vpack.c.bf16 %v3046_v46, %v3038_v40  ;;  %v3020_v11 = vmax.f32 %v8024_v32, %v2892_v61  ;;  %v3119_v54 = vpack.c.bf16 %v3031_v7, %v3023_v10  ;;  %v10329_v46 = vld [vmem:[#allocation55_spill] sm:$0xff]  ;;  %v10336_v21 = vld [vmem:[#allocation41_spill] sm:$0xff]  ;;  %v10338_v33 = vld [vmem:[#allocation68_spill] sm:$0xff] }
 0x2e6   : > { %v3125_v5 = vpack.c.bf16 %v3045_v42, %v3037_v3  ;;  %v2878_v52 = vmul.f32 0.02, %v7994_v16  ;;  %v3005_v28 = vmax.f32 %v7944_v15, %v7997_v43  ;;  %v3022_v31 = vmax.f32 %v2774_v45, %v2894_v60  ;;  %v10334_v1 = vld [vmem:[#allocation79_spill] sm:$0xff]  ;;  %v10335_v45 = vld [vmem:[#allocation12_spill] sm:$0xff]  ;;  %v10339_v3 = vld [vmem:[#allocation10_spill] sm:$0xff] }
 0x2e7   : > { %v3127_v49 = vpack.c.bf16 %v3047_v20, %v3039_v55  ;;  %v2868_v55 = vmul.f32 0.02, %v7965_v18  ;;  %v2870_v25 = vmul.f32 0.02, %v7979_v50  ;;  %v3012_v32 = vmax.f32 %v7954_v19, %v8012_v44  ;;  %v10340_v53 = vld [vmem:[#allocation73_spill] sm:$0xff]  ;;  %v10341_v40 = vld [vmem:[#allocation74_spill] sm:$0xff] }
 0x2e8   : > { %3498 = vmatprep.subr.bf16.mxu0 %v3125_v5  ;;  %v3116_v61 = vpack.c.bf16 %v3028_v23, %v3020_v11  ;;  %v2997_v15 = vmax.f32 %v7928_v35, %v7982_v56  ;;  %v3014_v60 = vmax.f32 %v8055_v13, %v2886_v24  ;;  %v3118_v7 = vpack.c.bf16 %v3030_v37, %v3022_v31  ;;  %v10331_v35 = vld [vmem:[#allocation9_spill] sm:$0xff]  ;;  %v10332_v56 = vld [vmem:[#allocation66_spill] sm:$0xff]  ;;  %v10344_v10 = vld [vmem:[#allocation83_spill] sm:$0xff] }
 0x2e9   : > { %3345 = vmatmul.mubr.bf16.gmra.mxu0 %v8063_v14  ;;  %3611 = vmatprep.subr.bf16.mxu1 %v3127_v49  ;;  %v3109_v17 = vpack.c.bf16 %v3013_v4, %v3005_v28  ;;  %v2860_v19 = vmul.f32 0.02, %v7941_v27  ;;  %v2999_v44 = vmax.f32 %v7931_v57, %v7985_v63  ;;  %v3004_v41 = vmax.f32 %v7990_v8, %v2876_v30  ;;  %v10342_v49 = vld [vmem:[#allocation39_spill] sm:$0xff]  ;;  %v10345_v24 = vld [vmem:[#allocation61_spill] sm:$0xff] }
 0x2ea   : > { %3458 = vmatmul.mubr.bf16.gmra.mxu1 %v8063_v14  ;;  %3499 = vmatpush1.bf16.msra.mxu0 %v3124_v29  ;;  %v3111_v6 = vpack.c.bf16 %v3015_v26, %v3007_v22  ;;  %v2852_v43 = vmul.f32 0.02, %v10329_v46  ;;  %v2862_v39 = vmul.f32 0.02, %v10330_v47  ;;  %v2989_v62 = vmax.f32 %v10332_v56, %v10331_v35  ;;  %v8135_v11 = vld [vmem:[%s9521_s6 + $0x30] sm:$0xff]   ;;  %v10358_v56 = vld [vmem:[#allocation75_spill] sm:$0xff] }
 0x2eb   : > { %3612 = vmatpush1.bf16.msra.mxu1 %v3126_v0  ;;  %3500 = vmatprep.subr.bf16.mxu0 %v3117_v9  ;;  %v3006_v38 = vmax.f32 %v7994_v16, %v2878_v52  ;;  %v2854_v51 = vmul.f32 0.02, %v10333_v34  ;;  %v2991_v57 = vmax.f32 %v10335_v45, %v10334_v1  ;;  %v2996_v8 = vmax.f32 %v7965_v18, %v2868_v55  ;;  %v10346_v0 = vld [vmem:[#allocation64_spill] sm:$0xff]  ;;  %v10350_v22 = vld [vmem:[#allocation70_spill] sm:$0xff] }
 0x2ec   : > { %3613 = vmatprep.subr.bf16.mxu1 %v3119_v54  ;;  %3354 = vmatprep.mubr.bf16.mxu0 %v10279_v48  ;;  %v3108_v63 = vpack.c.bf16 %v3012_v32, %v3004_v41  ;;  %v2981_v12 = vmax.f32 %v10337_v59, %v10336_v21  ;;  %v2998_v13 = vmax.f32 %v7979_v50, %v2870_v25  ;;  %v2844_v2 = vmul.f32 0.02, %v10338_v33  ;;  %v10343_v50 = vld [vmem:[#allocation14_spill] sm:$0xff]  ;;  %v10347_v9 = vld [vmem:[#allocation16_spill] sm:$0xff]  ;;  %v10348_v54 = vld [vmem:[#allocation45_spill] sm:$0xff] }
 0x2ed   : > { %3467 = vmatprep.mubr.bf16.mxu1 %v10279_v48  ;;  %v3110_v58 = vpack.c.bf16 %v3014_v60, %v3006_v38  ;;  %v3101_v16 = vpack.c.bf16 %v2997_v15, %v2989_v62  ;;  %v2983_v42 = vmax.f32 %v10340_v53, %v10339_v3  ;;  %v2988_v18 = vmax.f32 %v7941_v27, %v2860_v19  ;;  %v10349_v55 = vld [vmem:[#allocation84_spill] sm:$0xff]  ;;  %v10352_v15 = vld [vmem:[#allocation57_spill] sm:$0xff]  ;;  %v10353_v19 = vld [vmem:[#allocation50_spill] sm:$0xff] }
 0x2ee   : > { %3501 = vmatpush1.bf16.msra.mxu0 %v3116_v61  ;;  %v3103_v20 = vpack.c.bf16 %v2999_v44, %v2991_v57  ;;  %v2831_v5 = vmul.f32 0.02, %v10341_v40  ;;  %v2846_v4 = vmul.f32 0.02, %v10342_v49  ;;  %v2973_v23 = vmax.f32 %v10344_v10, %v10343_v50  ;;  %v10351_v61 = vld [vmem:[#allocation17_spill] sm:$0xff]  ;;  %v10354_v44 = vld [vmem:[#allocation86_spill] sm:$0xff] }
 0x2ef   : > { %3614 = vmatpush1.bf16.msra.mxu1 %v3118_v7  ;;  %3502 = vmatprep.subr.bf16.mxu0 %v3109_v17  ;;  %v2990_v29 = vmax.f32 %v10330_v47, %v2862_v39  ;;  %v2836_v37 = vmul.f32 0.02, %v10345_v24  ;;  %v2975_v27 = vmax.f32 %v10347_v9, %v10346_v0  ;;  %v2980_v30 = vmax.f32 %v10329_v46, %v2852_v43  ;;  %v10356_v43 = vld [vmem:[#allocation67_spill] sm:$0xff]  ;;  %v10357_v47 = vld [vmem:[#allocation53_spill] sm:$0xff]  ;;  %v10359_v1 = vld [vmem:[#allocation78_spill] sm:$0xff] }
 0x2f0   : > { %3615 = vmatprep.subr.bf16.mxu1 %v3111_v6  ;;  %v3100_v26 = vpack.c.bf16 %v2996_v8, %v2988_v18  ;;  %v2965_v52 = vmax.f32 %v10349_v55, %v10348_v54  ;;  %v2982_v28 = vmax.f32 %v10333_v34, %v2854_v51  ;;  %v3093_v25 = vpack.c.bf16 %v2981_v12, %v2973_v23  ;;  %v10355_v6 = vld [vmem:[#allocation49_spill] sm:$0xff]  ;;  %v10361_v8 = vld [vmem:[#allocation71_spill] sm:$0xff]  ;;  %v10365_v53 = vld [vmem:[#allocation56_spill] sm:$0xff] }
 0x2f1   : > { %3355 = vmatmul.mubr.bf16.gmra.mxu0 %v8093_v36  ;;  %v3102_v31 = vpack.c.bf16 %v2998_v13, %v2990_v29  ;;  %v2828_v32 = vmul.f32 0.02, %v10350_v22  ;;  %v2967_v60 = vmax.f32 %v10352_v15, %v10351_v61  ;;  %v2972_v7 = vmax.f32 %v10338_v33, %v2844_v2  ;;  %v10360_v57 = vld [vmem:[#allocation81_spill] sm:$0xff]  ;;  %v10367_v9 = vld [vmem:[#allocation76_spill] sm:$0xff]  ;;  %v10370_v54 = vld [vmem:[#allocation82_spill] sm:$0xff] }
 0x2f2   : > { %3364 = vmatprep.mubr.bf16.mxu0 %v10279_v48  ;;  %3468 = vmatmul.mubr.bf16.gmra.mxu1 %v8093_v36  ;;  %v3095_v17 = vpack.c.bf16 %v2983_v42, %v2975_v27  ;;  %v2716_v41 = vadd.f32 %v10354_v44, %v10353_v19  ;;  %v2813_v46 = vmul.f32 0.02, %v10355_v6  ;;  %v2957_v39 = vmax.f32 %v10357_v47, %v10356_v43  ;;  %v10362_v12 = vld [vmem:[#allocation69_spill] sm:$0xff]  ;;  %v10371_v55 = vld [vmem:[#allocation80_spill] sm:$0xff] }
 0x2f3   : > { %3503 = vmatpush1.bf16.msra.mxu0 %v3108_v63  ;;  %3616 = vmatpush1.bf16.msra.mxu1 %v3110_v58  ;;  %v2974_v35 = vmax.f32 %v10342_v49, %v2846_v4  ;;  %v2815_v62 = vmul.f32 0.02, %v10358_v56  ;;  %v2959_v38 = vmax.f32 %v10341_v40, %v2831_v5  ;;  %v2964_v34 = vmax.f32 %v10345_v24, %v2836_v37  ;;  %v10363_v58 = vld [vmem:[#allocation18_spill] sm:$0xff]  ;;  %v10366_v24 = vld [vmem:[#allocation40_spill] sm:$0xff] }
 0x2f4   : > { %3504 = vmatprep.subr.bf16.mxu0 %v3101_v16  ;;  %3617 = vmatprep.subr.bf16.mxu1 %v3103_v20  ;;  %v3092_v51 = vpack.c.bf16 %v2980_v30, %v2972_v7  ;;  %v2805_v45 = vmul.f32 0.02, %v10359_v1  ;;  %v2949_v63 = vmax.f32 %v10361_v8, %v10360_v57  ;;  %v3085_v59 = vpack.c.bf16 %v2965_v52, %v2957_v39  ;;  %v10364_v16 = vld [vmem:[#allocation30_spill] sm:$0xff]  ;;  %v10368_v30 = vld [vmem:[#allocation59_spill] sm:$0xff]  ;;  %v10372_v52 = vld [vmem:[#allocation77_spill] sm:$0xff] }
 0x2f5   : > { %3477 = vmatprep.mubr.bf16.mxu1 %v10279_v48  ;;  %v3094_v21 = vpack.c.bf16 %v2982_v28, %v2974_v35  ;;  %v2807_v13 = vmul.f32 0.02, %v10362_v12  ;;  %v2951_v33 = vmax.f32 %v10364_v16, %v10363_v58  ;;  %v2956_v2 = vmax.f32 %v10350_v22, %v2828_v32  ;;  %v5513_v49 = vld [vmem:[%s9521_s6 + $0x38] sm:$0xff]  }
 0x2f6   : > { %v3087_v3 = vpack.c.bf16 %v2967_v60, %v2959_v38  ;;  %v2797_v42 = vmul.f32 0.02, %v10365_v53  ;;  %v2941_v18 = vmax.f32 %v10355_v6, %v2813_v46  ;;  %v2799_v20 = vmul.f32 0.02, %v2716_v41  ;;  %v10373_v28 = vld [vmem:[#allocation46_spill] sm:$0xff] }
 0x2f7   : > { %3505 = vmatpush1.bf16.msra.mxu0 %v3100_v26  ;;  %3618 = vmatpush1.bf16.msra.mxu1 %v3102_v31  ;;  %v2943_v40 = vmax.f32 %v10358_v56, %v2815_v62  ;;  %v3084_v5 = vpack.c.bf16 %v2964_v34, %v2956_v2  ;;  %v2933_v4 = vmax.f32 %v10359_v1, %v2805_v45  ;;  %v10369_v26 = vld [vmem:[#allocation87_spill] sm:$0xff]  ;;  %v10374_v31 = vld [vmem:[#allocation60_spill] sm:$0xff] }
 0x2f8   : > { %3506 = vmatprep.subr.bf16.mxu0 %v3093_v25  ;;  %3619 = vmatprep.subr.bf16.mxu1 %v3095_v17  ;;  %v3077_v50 = vpack.c.bf16 %v2949_v63, %v2941_v18  ;;  %v2935_v10 = vmax.f32 %v10362_v12, %v2807_v13  ;;  %v2925_v29 = vmax.f32 %v10365_v53, %v2797_v42 }
 0x2f9   : > { %3365 = vmatmul.mubr.bf16.gmra.mxu0 %v8135_v11  ;;  %v3079_v23 = vpack.c.bf16 %v2951_v33, %v2943_v40  ;;  %v2927_v37 = vmax.f32 %v2716_v41, %v2799_v20 }
 0x2fa   : > { %3374 = vmatprep.mubr.bf16.mxu0 %v10279_v48  ;;  %3478 = vmatmul.mubr.bf16.gmra.mxu1 %v8135_v11  ;;  %v3069_v0 = vpack.c.bf16 %v2933_v4, %v2925_v29 }
 0x2fb   : > { %3507 = vmatpush1.bf16.msra.mxu0 %v3092_v51  ;;  %3620 = vmatpush1.bf16.msra.mxu1 %v3094_v21  ;;  %v3071_v27 = vpack.c.bf16 %v2935_v10, %v2927_v37 }
 0x2fc   : > { %3508 = vmatprep.subr.bf16.mxu0 %v3085_v59  ;;  %3621 = vmatprep.subr.bf16.mxu1 %v3087_v3 }
 0x2fd   : > { %3487 = vmatprep.mubr.bf16.mxu1 %v10279_v48 }
 0x2ff   : > { %3509 = vmatpush1.bf16.msra.mxu0 %v3084_v5  ;;  %3622 = vmatpush1.bf16.msra.mxu1 %v10366_v24 }
 0x300   : > { %3510 = vmatprep.subr.bf16.mxu0 %v3077_v50  ;;  %3623 = vmatprep.subr.bf16.mxu1 %v3079_v23 }
 0x301   : > { %3375 = vmatmul.mubr.bf16.gmra.mxu0 %v5513_v49 }
 0x302   : > { %3530 = vmatprep.mubr.bf16.mxu0 %v10279_v48  ;;  %3488 = vmatmul.mubr.bf16.gmra.mxu1 %v5513_v49 }
 0x303   : > { %3511 = vmatpush1.bf16.msra.mxu0 %v10367_v9  ;;  %3624 = vmatpush1.bf16.msra.mxu1 %v10368_v30 }
 0x304   : > { %3512 = vmatprep.subr.bf16.mxu0 %v3069_v0  ;;  %3625 = vmatprep.subr.bf16.mxu1 %v3071_v27 }
 0x305   : > { %3643 = vmatprep.mubr.bf16.mxu1 %v10279_v48 }
 0x307   : > { %3513 = vmatpush1.bf16.msra.mxu0 %v10369_v26  ;;  %3626 = vmatpush1.bf16.msra.mxu1 %v10370_v54 }
 0x30a   : > { %3531 = vmatmul.mubr.bf16.vlgmr.msra.gmra.mxu0 %v10371_v55  ;;  %3644 = vmatmul.mubr.bf16.vlgmr.msra.gmra.mxu1 %v10371_v55 }
 0x30b   : > { %3540 = vmatprep.mubr.bf16.mxu0 %v10279_v48  ;;  %3653 = vmatprep.mubr.bf16.mxu1 %v10279_v48 }
 0x312   : > { %3541 = vmatmul.mubr.bf16.gmra.mxu0 %v10372_v52  ;;  %3654 = vmatmul.mubr.bf16.gmra.mxu1 %v10372_v52 }
 0x313   : > { %3550 = vmatprep.mubr.bf16.mxu0 %v10279_v48  ;;  %3663 = vmatprep.mubr.bf16.mxu1 %v10279_v48 }
 0x31a   : > { %3551 = vmatmul.mubr.bf16.gmra.mxu0 %v10373_v28  ;;  %3664 = vmatmul.mubr.bf16.gmra.mxu1 %v10373_v28 }
 0x31b   : > { %3560 = vmatprep.mubr.bf16.mxu0 %v10279_v48  ;;  %3673 = vmatprep.mubr.bf16.mxu1 %v10279_v48 }
 0x322   : > { %3561 = vmatmul.mubr.bf16.gmra.mxu0 %v10374_v31  ;;  %3674 = vmatmul.mubr.bf16.gmra.mxu1 %v10374_v31 }
 0x323   : > { %3570 = vmatprep.mubr.bf16.mxu0 %v10279_v48  ;;  %3683 = vmatprep.mubr.bf16.mxu1 %v10279_v48 }
 0x32a   : > { %3571 = vmatmul.mubr.bf16.gmra.mxu0 %v8063_v14  ;;  %3684 = vmatmul.mubr.bf16.gmra.mxu1 %v8063_v14  ;;  %v8210_v14 = vpop.permute.xlu0 %3216 }
 0x32b   : > { %3580 = vmatprep.mubr.bf16.mxu0 %v10279_v48  ;;  %3693 = vmatprep.mubr.bf16.mxu1 %v10279_v48  ;;  %10375 = vst [vmem:[#allocation6_spill] sm:$0xff] %v8210_v14 }
 0x32e   : > { %v8214_v25 = vpop.permute.xlu0 %3206 }
 0x32f   : > { %10377 = vst [vmem:[#allocation33_spill] sm:$0xff] %v8214_v25 }
 0x332   : > { %3581 = vmatmul.mubr.bf16.gmra.mxu0 %v8093_v36  ;;  %3694 = vmatmul.mubr.bf16.gmra.mxu1 %v8093_v36  ;;  %v8212_v36 = vpop.permute.xlu1 %3221  ;;  %v8218_v32 = vpop.permute.xlu0 %3196 }
 0x333   : > { %3590 = vmatprep.mubr.bf16.mxu0 %v10279_v48  ;;  %3703 = vmatprep.mubr.bf16.mxu1 %v10279_v48  ;;  %10376 = vst [vmem:[#allocation72_spill] sm:$0xff] %v8212_v36  ;;  %10379 = vst [vmem:[#allocation54_spill] sm:$0xff] %v8218_v32 }
 0x336   : > { %v8216_v22 = vpop.permute.xlu1 %3211  ;;  %v8222_v61 = vpop.permute.xlu0 %3186 }
 0x337   : > { %10378 = vst [vmem:[#allocation11_spill] sm:$0xff] %v8216_v22  ;;  %10381 = vst [vmem:[#allocation42_spill] sm:$0xff] %v8222_v61 }
 0x33a   : > { %3591 = vmatmul.mubr.bf16.gmra.mxu0 %v8135_v11  ;;  %3704 = vmatmul.mubr.bf16.gmra.mxu1 %v8135_v11  ;;  %v8220_v11 = vpop.permute.xlu1 %3201  ;;  %v8226_v60 = vpop.permute.xlu0 %3176 }
 0x33b   : > { %3600 = vmatprep.mubr.bf16.mxu0 %v10279_v48  ;;  %3713 = vmatprep.mubr.bf16.mxu1 %v10279_v48  ;;  %10380 = vst [vmem:[#allocation20_spill] sm:$0xff] %v8220_v11  ;;  %10383 = vst [vmem:[#allocation34_spill] sm:$0xff] %v8226_v60 }
 0x33e   : > { %v8224_v15 = vpop.permute.xlu1 %3191  ;;  %v8230_v17 = vpop.permute.xlu0 %3166 }
 0x33f   : > { %10382 = vst [vmem:[#allocation13_spill] sm:$0xff] %v8224_v15  ;;  %10385 = vst [vmem:[#allocation25_spill] sm:$0xff] %v8230_v17 }
 0x342   : > { %3601 = vmatmul.mubr.bf16.gmra.mxu0 %v5513_v49  ;;  %3714 = vmatmul.mubr.bf16.gmra.mxu1 %v5513_v49  ;;  %v8228_v7 = vpop.permute.xlu1 %3181  ;;  %v8234_v44 = vpop.permute.xlu0 %3156 }
 0x343   : > { %4156 = vmatprep.mubr.bf16.mxu0 %v10279_v48  ;;  %4229 = vmatprep.mubr.bf16.mxu1 %v10279_v48  ;;  %10384 = vst [vmem:[#allocation7_spill] sm:$0xff] %v8228_v7 }
 0x346   : > { %v8232_v19 = vpop.permute.xlu1 %3171  ;;  %v8238_v46 = vpop.permute.xlu0 %3146 }
 0x347   : > { %10386 = vst [vmem:[#allocation63_spill] sm:$0xff] %v8232_v19 }
 0x34a   : > { %v8236_v41 = vpop.permute.xlu1 %3161 }
 0x34e   : > { %v8246_v38 = vpop.permute.xlu1 %3151 }
 0x389   : > { %v3306_v6 = vpop.f32.mrf.mxu0 }
 0x38a   : > { %v3307_v43 = vadd.f32 %v3306_v6, %v8238_v46  ;;  %v3419_v47 = vpop.f32.mrf.mxu1 }
 0x38b   : > { %v8241_v39 = vpop.f32.mrf.mxu0  ;;  %v3420_v35 = vadd.f32 %v3419_v47, %v8238_v46 }
 0x38c   : > { %v8244_v56 = vpop.f32.mrf.mxu1  ;;  %v3724_v34 = vmul.f32 0.02, %v3307_v43 }
 0x38d   : > { %v3310_v62 = vpop.f32.mrf.mxu0  ;;  %v3726_v57 = vmul.f32 0.02, %v3420_v35 }
 0x38e   : > { %v3311_v51 = vadd.f32 %v3310_v62, %v8246_v38  ;;  %v3423_v1 = vpop.f32.mrf.mxu1  ;;  %v3852_v13 = vmax.f32 %v3307_v43, %v3724_v34 }
 0x38f   : > { %v3312_v45 = vpop.f32.mrf.mxu0  ;;  %v3424_v8 = vadd.f32 %v3423_v1, %v8246_v38  ;;  %v3854_v3 = vmax.f32 %v3420_v35, %v3726_v57 }
 0x390   : > { %v3732_v63 = vmul.f32 0.02, %v3311_v51  ;;  %v3425_v21 = vpop.f32.mrf.mxu1 }
 0x391   : > { %v3316_v59 = vpop.f32.mrf.mxu0  ;;  %v3734_v12 = vmul.f32 0.02, %v3424_v8 }
 0x392   : > { %v3860_v58 = vmax.f32 %v3311_v51, %v3732_v63  ;;  %v3317_v16 = vadd.f32 %v3316_v59, %v8234_v44  ;;  %v3429_v33 = vpop.f32.mrf.mxu1  ;;  %v8263_v63 = vadd.f32 %v3312_v45, %v8246_v38  ;;  %v8282_v45 = vadd.f32 %v8241_v39, %v8238_v46 }
 0x393   : > { %v3318_v2 = vpop.f32.mrf.mxu0  ;;  %v3862_v53 = vmax.f32 %v3424_v8, %v3734_v12  ;;  %v3430_v42 = vadd.f32 %v3429_v33, %v8234_v44 }
 0x394   : > { %v8252_v18 = vpack.c.bf16 %v3860_v58, %v3852_v13  ;;  %v3431_v20 = vpop.f32.mrf.mxu1  ;;  %v3740_v49 = vmul.f32 0.02, %v3317_v16  ;;  %10391 = vst [vmem:[#allocation28_spill] sm:$0xff] %v8263_v63  ;;  %v8266_v59 = vadd.f32 %v3318_v2, %v8234_v44  ;;  %10397 = vst [vmem:[#allocation38_spill] sm:$0xff] %v8282_v45 }
 0x395   : > { %v3320_v40 = vpop.f32.mrf.mxu0  ;;  %v8254_v5 = vpack.c.bf16 %v3862_v53, %v3854_v3  ;;  %v3742_v23 = vmul.f32 0.02, %v3430_v42  ;;  %v8269_v12 = vadd.f32 %v3431_v20, %v8234_v44 }
 0x396   : > { %10387 = vst [vmem:[#allocation85_spill] sm:$0xff] %v8252_v18  ;;  %v3321_v4 = vadd.f32 %v3320_v40, %v8236_v41  ;;  %v3433_v50 = vpop.f32.mrf.mxu1  ;;  %v3868_v27 = vmax.f32 %v3317_v16, %v3740_v49  ;;  %10392 = vst [vmem:[#allocation19_spill] sm:$0xff] %v8266_v59  ;;  %v8292_v40 = vadd.f32 %v8244_v56, %v8238_v46  ;;  %v8295_v49 = vmul.f32 0.02, %v8263_v63 }
 0x397   : > { %10388 = vst [vmem:[#allocation21_spill] sm:$0xff] %v8254_v5  ;;  %v3322_v10 = vpop.f32.mrf.mxu0  ;;  %v3434_v29 = vadd.f32 %v3433_v50, %v8236_v41  ;;  %v3870_v55 = vmax.f32 %v3430_v42, %v3742_v23  ;;  %10393 = vst [vmem:[#allocation22_spill] sm:$0xff] %v8269_v12  ;;  %v8301_v39 = vmul.f32 0.02, %v8266_v59  ;;  %v8304_v50 = vmul.f32 0.02, %v8269_v12 }
 0x398   : > { %v3748_v24 = vmul.f32 0.02, %v3321_v4  ;;  %v3435_v37 = vpop.f32.mrf.mxu1  ;;  %v8272_v13 = vadd.f32 %v3322_v10, %v8236_v41  ;;  %10400 = vst [vmem:[#allocation31_spill] sm:$0xff] %v8292_v40  ;;  %10401 = vst [vmem:[#allocation43_spill] sm:$0xff] %v8295_v49 }
 0x399   : > { %v3326_v0 = vpop.f32.mrf.mxu0  ;;  %v3750_v9 = vmul.f32 0.02, %v3434_v29  ;;  %v8275_v33 = vadd.f32 %v3435_v37, %v8236_v41  ;;  %10403 = vst [vmem:[#allocation35_spill] sm:$0xff] %v8301_v39  ;;  %10404 = vst [vmem:[#allocation26_spill] sm:$0xff] %v8304_v50 }
 0x39a   : > { %v3876_v30 = vmax.f32 %v3321_v4, %v3748_v24  ;;  %v3439_v26 = vpop.f32.mrf.mxu1  ;;  %10394 = vst [vmem:[#allocation15_spill] sm:$0xff] %v8272_v13  ;;  %v8285_v2 = vadd.f32 %v3326_v0, %v8230_v17  ;;  %v8298_v4 = vadd.f32 %v3425_v21, %v8246_v38  ;;  %v8307_v10 = vmul.f32 0.02, %v8272_v13 }
 0x39b   : > { %v3328_v54 = vpop.f32.mrf.mxu0  ;;  %v3878_v52 = vmax.f32 %v3434_v29, %v3750_v9  ;;  %10395 = vst [vmem:[#allocation24_spill] sm:$0xff] %v8275_v33  ;;  %v8316_v21 = vmul.f32 0.02, %v8275_v33 }
 0x39c   : > { %v8258_v28 = vpack.c.bf16 %v3876_v30, %v3868_v27  ;;  %v3441_v31 = vpop.f32.mrf.mxu1  ;;  %10398 = vst [vmem:[#allocation27_spill] sm:$0xff] %v8285_v2  ;;  %10402 = vst [vmem:[#allocation29_spill] sm:$0xff] %v8298_v4  ;;  %v8310_v23 = vadd.f32 %v3328_v54, %v8230_v17  ;;  %v8328_v27 = vmul.f32 0.02, %v8285_v2 }
 0x39d   : > { %v3330_v6 = vpop.f32.mrf.mxu0  ;;  %v8260_v43 = vpack.c.bf16 %v3878_v52, %v3870_v55  ;;  %10405 = vst [vmem:[#allocation37_spill] sm:$0xff] %v8307_v10  ;;  %v8313_v56 = vadd.f32 %v3441_v31, %v8230_v17  ;;  %10408 = vst [vmem:[#allocation47_spill] sm:$0xff] %v8316_v21 }
 0x39e   : > { %10389 = vst [vmem:[#allocation8_spill] sm:$0xff] %v8258_v28  ;;  %v3443_v47 = vpop.f32.mrf.mxu1  ;;  %10406 = vst [vmem:[#allocation51_spill] sm:$0xff] %v8310_v23  ;;  %v8319_v37 = vadd.f32 %v3330_v6, %v8232_v19  ;;  %v8340_v6 = vadd.f32 %v3439_v26, %v8230_v17 }
 0x39f   : > { %10390 = vst [vmem:[#allocation23_spill] sm:$0xff] %v8260_v43  ;;  %v3332_v35 = vpop.f32.mrf.mxu0  ;;  %10407 = vst [vmem:[#allocation62_spill] sm:$0xff] %v8313_v56  ;;  %v8322_v0 = vadd.f32 %v3443_v47, %v8232_v19 }
 0x3a0   : > { %v3445_v62 = vpop.f32.mrf.mxu1  ;;  %v8278_v3 = vadd.f32 %v3332_v35, %v8232_v19  ;;  %10409 = vst [vmem:[#allocation58_spill] sm:$0xff] %v8319_v37  ;;  %10412 = vst [vmem:[#allocation52_spill] sm:$0xff] %v8328_v27  ;;  %v8362_v48 = vmul.f32 0.02, %v8319_v37 }
 0x3a1   : > { %v3336_v34 = vpop.f32.mrf.mxu0  ;;  %v8288_v53 = vadd.f32 %v3445_v62, %v8232_v19  ;;  %10410 = vst [vmem:[#allocation44_spill] sm:$0xff] %v8322_v0  ;;  %10415 = vst [vmem:[#allocation65_spill] sm:$0xff] %v8340_v6  ;;  %v8350_v19 = vmul.f32 0.02, %v8310_v23 }
 0x3a2   : > { %v3449_v51 = vpop.f32.mrf.mxu1  ;;  %10396 = vst [vmem:[#allocation32_spill] sm:$0xff] %v8278_v3  ;;  %v8325_v9 = vmul.f32 0.02, %v8278_v3  ;;  %v8334_v54 = vadd.f32 %v3336_v34, %v8226_v60  ;;  %v8353_v34 = vmul.f32 0.02, %v8313_v56  ;;  %10422 = vst [vmem:[#allocation73_spill] sm:$0xff] %v8362_v48 }
 0x3a3   : > { %v3338_v1 = vpop.f32.mrf.mxu0  ;;  %10399 = vst [vmem:[#allocation36_spill] sm:$0xff] %v8288_v53  ;;  %v8331_v30 = vmul.f32 0.02, %v8288_v53  ;;  %10418 = vst [vmem:[#allocation41_spill] sm:$0xff] %v8350_v19 }
 0x3a4   : > { %v3451_v57 = vpop.f32.mrf.mxu1  ;;  %10411 = vst [vmem:[#allocation55_spill] sm:$0xff] %v8325_v9  ;;  %10414 = vst [vmem:[#allocation66_spill] sm:$0xff] %v8334_v54  ;;  %v8337_v55 = vadd.f32 %v3338_v1, %v8226_v60 }
 0x3a5   : > { %v3340_v8 = vpop.f32.mrf.mxu0  ;;  %10413 = vst [vmem:[#allocation9_spill] sm:$0xff] %v8331_v30  ;;  %v8343_v47 = vadd.f32 %v3451_v57, %v8226_v60  ;;  %10419 = vst [vmem:[#allocation48_spill] sm:$0xff] %v8353_v34 }
 0x3a6   : > { %v3453_v58 = vpop.f32.mrf.mxu1  ;;  %v8346_v35 = vadd.f32 %v3340_v8, %v8228_v7  ;;  %v8365_v8 = vmul.f32 0.02, %v8322_v0  ;;  %v3773_v18 = vmul.f32 0.02, %v8337_v55 }
 0x3a7   : > { %v3342_v16 = vpop.f32.mrf.mxu0  ;;  %10416 = vst [vmem:[#allocation79_spill] sm:$0xff] %v8343_v47  ;;  %v8356_v1 = vadd.f32 %v3453_v58, %v8228_v7  ;;  %v8382_v63 = vmul.f32 0.02, %v8343_v47 }
 0x3a8   : > { %v3455_v42 = vpop.f32.mrf.mxu1  ;;  %10417 = vst [vmem:[#allocation12_spill] sm:$0xff] %v8346_v35  ;;  %v3343_v62 = vadd.f32 %v3342_v16, %v8228_v7  ;;  %10423 = vst [vmem:[#allocation74_spill] sm:$0xff] %v8365_v8  ;;  %v8385_v16 = vmul.f32 0.02, %v8346_v35 }
 0x3a9   : > { %v3346_v20 = vpop.f32.mrf.mxu0  ;;  %10420 = vst [vmem:[#allocation68_spill] sm:$0xff] %v8356_v1  ;;  %v8359_v26 = vadd.f32 %v3455_v42, %v8228_v7  ;;  %v8375_v42 = vmul.f32 0.02, %v8334_v54  ;;  %v8378_v7 = vadd.f32 %v3449_v51, %v8226_v60  ;;  %10426 = vst [vmem:[#allocation83_spill] sm:$0xff] %v8382_v63  ;;  %v8391_v58 = vmul.f32 0.02, %v8356_v1 }
 0x3aa   : > { %v3459_v29 = vpop.f32.mrf.mxu1  ;;  %v8370_v5 = vadd.f32 %v3346_v20, %v8222_v61  ;;  %10427 = vst [vmem:[#allocation61_spill] sm:$0xff] %v8385_v16  ;;  %v3781_v20 = vmul.f32 0.02, %v3343_v62 }
 0x3ab   : > { %v3348_v24 = vpop.f32.mrf.mxu0  ;;  %10421 = vst [vmem:[#allocation10_spill] sm:$0xff] %v8359_v26  ;;  %10424 = vst [vmem:[#allocation39_spill] sm:$0xff] %v8375_v42  ;;  %v8394_v51 = vmul.f32 0.02, %v8359_v26  ;;  %v8397_v60 = vadd.f32 %v3459_v29, %v8222_v61 }
 0x3ac   : > { %v3461_v52 = vpop.f32.mrf.mxu1  ;;  %10425 = vst [vmem:[#allocation14_spill] sm:$0xff] %v8378_v7  ;;  %v8388_v49 = vadd.f32 %v3348_v24, %v8222_v61  ;;  %10428 = vst [vmem:[#allocation64_spill] sm:$0xff] %v8391_v58  ;;  %v8403_v59 = vmul.f32 0.02, %v8370_v5  ;;  %v3909_v2 = vmax.f32 %v3343_v62, %v3781_v20 }
 0x3ad   : > { %v3350_v31 = vpop.f32.mrf.mxu0  ;;  %10429 = vst [vmem:[#allocation16_spill] sm:$0xff] %v8394_v51  ;;  %v8400_v12 = vadd.f32 %v3461_v52, %v8222_v61  ;;  %v8417_v52 = vmul.f32 0.02, %v8378_v7  ;;  %v3901_v61 = vmax.f32 %v8337_v55, %v3773_v18 }
 0x3ae   : > { %v3463_v17 = vpop.f32.mrf.mxu1  ;;  %v8406_v24 = vadd.f32 %v3350_v31, %v8224_v15  ;;  %v3789_v27 = vmul.f32 0.02, %v8388_v49 }
 0x3af   : > { %v3352_v57 = vpop.f32.mrf.mxu0  ;;  %v8409_v39 = vadd.f32 %v3463_v17, %v8224_v15  ;;  %10431 = vst [vmem:[#allocation84_spill] sm:$0xff] %v8417_v52  ;;  %v8436_v55 = vmul.f32 0.02, %v8400_v12  ;;  %v8462_v0 = vpack.c.bf16 %v3909_v2, %v3901_v61 }
 0x3b0   : > { %v3465_v43 = vpop.f32.mrf.mxu1  ;;  %v8412_v45 = vadd.f32 %v3352_v57, %v8224_v15  ;;  %v8441_v62 = vmul.f32 0.02, %v8406_v24  ;;  %v3917_v3 = vmax.f32 %v8388_v49, %v3789_v27 }
 0x3b1   : > { %v3356_v28 = vpop.f32.mrf.mxu0  ;;  %10430 = vst [vmem:[#allocation45_spill] sm:$0xff] %v8409_v39  ;;  %v8421_v30 = vadd.f32 %v3465_v43, %v8224_v15  ;;  %v8433_v43 = vmul.f32 0.02, %v8397_v60  ;;  %v8444_v20 = vmul.f32 0.02, %v8409_v39  ;;  %10433 = vst [vmem:[#allocation17_spill] sm:$0xff] %v8462_v0 }
 0x3b2   : > { %v3469_v50 = vpop.f32.mrf.mxu1  ;;  %v3797_v29 = vmul.f32 0.02, %v8412_v45  ;;  %v8451_v33 = vadd.f32 %v3356_v28, %v8218_v32 }
 0x3b3   : > { %v3358_v40 = vpop.f32.mrf.mxu0  ;;  %10432 = vst [vmem:[#allocation70_spill] sm:$0xff] %v8444_v20  ;;  %v8448_v18 = vmul.f32 0.02, %v8421_v30  ;;  %v8454_v21 = vadd.f32 %v3469_v50, %v8218_v32 }
 0x3b4   : > { %v3471_v53 = vpop.f32.mrf.mxu1  ;;  %v3359_v58 = vadd.f32 %v3358_v40, %v8218_v32  ;;  %v3925_v2 = vmax.f32 %v8412_v45, %v3797_v29  ;;  %v8482_v27 = vmul.f32 0.02, %v8451_v33 }
 0x3b5   : > { %v3360_v31 = vpop.f32.mrf.mxu0  ;;  %v3472_v8 = vadd.f32 %v3471_v53, %v8218_v32 }
 0x3b6   : > { %v3473_v15 = vpop.f32.mrf.mxu1  ;;  %v8468_v50 = vadd.f32 %v3360_v31, %v8220_v11  ;;  %v3805_v28 = vmul.f32 0.02, %v3359_v58 }
 0x3b7   : > { %v3362_v17 = vpop.f32.mrf.mxu0 }
 0x3b8   : > { %v8457_v4 = vadd.f32 %v3362_v17, %v8220_v11  ;;  %v3475_v57 = vpop.f32.mrf.mxu1  ;;  %v8471_v17 = vadd.f32 %v3473_v15, %v8220_v11  ;;  %v8485_v15 = vmul.f32 0.02, %v8454_v21  ;;  %v8495_v29 = vmul.f32 0.02, %v8468_v50 }
 0x3b9   : > { %v3366_v9 = vpop.f32.mrf.mxu0  ;;  %v3476_v1 = vadd.f32 %v3475_v57, %v8220_v11  ;;  %v3933_v7 = vmax.f32 %v3359_v58, %v3805_v28 }
 0x3ba   : > { %v3479_v13 = vpop.f32.mrf.mxu1  ;;  %v3367_v49 = vadd.f32 %v3366_v9, %v8214_v25  ;;  %v3813_v31 = vmul.f32 0.02, %v8457_v4  ;;  %v3807_v9 = vmul.f32 0.02, %v3472_v8  ;;  %v8498_v53 = vmul.f32 0.02, %v8471_v17 }
 0x3bb   : > { %v3368_v10 = vpop.f32.mrf.mxu0  ;;  %v3815_v11 = vmul.f32 0.02, %v3476_v1  ;;  %v8489_v61 = vadd.f32 %v3479_v13, %v8214_v25 }
 0x3bc   : > { %v3481_v57 = vpop.f32.mrf.mxu1  ;;  %v8492_v45 = vadd.f32 %v3368_v10, %v8214_v25  ;;  %v3820_v42 = vmul.f32 0.02, %v3367_v49  ;;  %v3941_v48 = vmax.f32 %v8457_v4, %v3813_v31 }
 0x3bd   : > { %v3370_v40 = vpop.f32.mrf.mxu0  ;;  %v8502_v54 = vadd.f32 %v3481_v57, %v8214_v25  ;;  %v3943_v52 = vmax.f32 %v3476_v1, %v3815_v11  ;;  %v3822_v57 = vmul.f32 0.02, %v8489_v61 }
 0x3be   : > { %v3371_v32 = vadd.f32 %v3370_v40, %v8216_v22  ;;  %v3483_v16 = vpop.f32.mrf.mxu1  ;;  %v8511_v40 = vpack.c.bf16 %v3925_v2, %v3917_v3  ;;  %v3821_v25 = vmul.f32 0.02, %v8492_v45  ;;  %v3948_v2 = vmax.f32 %v3367_v49, %v3820_v42 }
 0x3bf   : > { %v3372_v35 = vpop.f32.mrf.mxu0  ;;  %v3484_v13 = vadd.f32 %v3483_v16, %v8216_v22  ;;  %v3935_v16 = vmax.f32 %v3472_v8, %v3807_v9  ;;  %v8523_v11 = vmul.f32 0.02, %v8502_v54 }
 0x3c0   : > { %v8506_v10 = vadd.f32 %v3372_v35, %v8216_v22  ;;  %v3828_v56 = vmul.f32 0.02, %v3371_v32  ;;  %v3485_v34 = vpop.f32.mrf.mxu1  ;;  %v3949_v19 = vmax.f32 %v8492_v45, %v3821_v25 }
 0x3c1   : > { %v3376_v0 = vpop.f32.mrf.mxu0  ;;  %v3830_v23 = vmul.f32 0.02, %v3484_v13  ;;  %v8518_v37 = vadd.f32 %v3485_v34, %v8216_v22  ;;  %v8528_v34 = vpack.c.bf16 %v3941_v48, %v3933_v7  ;;  %v3950_v22 = vmax.f32 %v8489_v61, %v3822_v57 }
 0x3c2   : > { %v3489_v4 = vpop.f32.mrf.mxu1  ;;  %v3829_v1 = vmul.f32 0.02, %v8506_v10  ;;  %v3956_v58 = vmax.f32 %v3371_v32, %v3828_v56  ;;  %v3377_v8 = vadd.f32 %v3376_v0, %v8210_v14  ;;  %v8533_v49 = vpack.c.bf16 %v3943_v52, %v3935_v16 }
 0x3c3   : > { %v3378_v31 = vpop.f32.mrf.mxu0  ;;  %v3958_v3 = vmax.f32 %v3484_v13, %v3830_v23  ;;  %v3831_v6 = vmul.f32 0.02, %v8518_v37  ;;  %v3490_v32 = vadd.f32 %v3489_v4, %v8210_v14  ;;  %v3951_v48 = vmax.f32 %v8502_v54, %v8523_v11 }
 0x3c4   : > { %v3379_v28 = vadd.f32 %v3378_v31, %v8210_v14  ;;  %v3491_v9 = vpop.f32.mrf.mxu1  ;;  %v3957_v7 = vmax.f32 %v8506_v10, %v3829_v1  ;;  %v8543_v52 = vpack.c.bf16 %v3956_v58, %v3948_v2  ;;  %v3836_v23 = vmul.f32 0.02, %v3377_v8 }
 0x3c5   : > { %v3380_v35 = vpop.f32.mrf.mxu0  ;;  %v3492_v42 = vadd.f32 %v3491_v9, %v8210_v14  ;;  %v8546_v51 = vpack.c.bf16 %v3958_v3, %v3950_v22  ;;  %v3959_v54 = vmax.f32 %v8518_v37, %v3831_v6  ;;  %v3838_v10 = vmul.f32 0.02, %v3490_v32 }
 0x3c6   : > { %v3381_v56 = vadd.f32 %v3380_v35, %v8212_v36  ;;  %v3493_v0 = vpop.f32.mrf.mxu1  ;;  %v3837_v45 = vmul.f32 0.02, %v3379_v28  ;;  %v3964_v63 = vmax.f32 %v3377_v8, %v3836_v23 }
 0x3c7   : > { %v3382_v31 = vpop.f32.mrf.mxu0  ;;  %v3494_v25 = vadd.f32 %v3493_v0, %v8212_v36  ;;  %v3839_v16 = vmul.f32 0.02, %v3492_v42  ;;  %v3966_v39 = vmax.f32 %v3490_v32, %v3838_v10 }
 0x3c8   : > { %v3383_v61 = vadd.f32 %v3382_v31, %v8212_v36  ;;  %v3844_v13 = vmul.f32 0.02, %v3381_v56  ;;  %v3495_v57 = vpop.f32.mrf.mxu1  ;;  %v3965_v47 = vmax.f32 %v3379_v28, %v3837_v45 }
 0x3c9   : > { %v3846_v4 = vmul.f32 0.02, %v3494_v25  ;;  %v3496_v9 = vadd.f32 %v3495_v57, %v8212_v36  ;;  %v3967_v22 = vmax.f32 %v3492_v42, %v3839_v16 }
 0x3ca   : > { %v3845_v35 = vmul.f32 0.02, %v3383_v61  ;;  %v3532_v14 = vpop.f32.mrf.mxu0  ;;  %v3645_v1 = vpop.f32.mrf.mxu1  ;;  %v3972_v2 = vmax.f32 %v3381_v56, %v3844_v13 }
 0x3cb   : > { %v3533_v11 = vadd.f32 %v3532_v14, %v8238_v46  ;;  %v3847_v0 = vmul.f32 0.02, %v3496_v9  ;;  %v3646_v31 = vadd.f32 %v3645_v1, %v8238_v46  ;;  %v3974_v20 = vmax.f32 %v3494_v25, %v3846_v4 }
 0x3cc   : > { %v3973_v58 = vmax.f32 %v3383_v61, %v3845_v35  ;;  %v3534_v26 = vpop.f32.mrf.mxu0  ;;  %v3647_v36 = vpop.f32.mrf.mxu1  ;;  %v4037_v14 = vpack.c.bf16 %v3957_v7, %v3949_v19  ;;  %v4044_v1 = vpack.c.bf16 %v3972_v2, %v3964_v63  ;;  %v4039_v63 = vpack.c.bf16 %v3959_v54, %v3951_v48 }
 0x3cd   : > { %v3535_v57 = vadd.f32 %v3534_v26, %v8238_v46  ;;  %v3975_v3 = vmax.f32 %v3496_v9, %v3847_v0  ;;  %v8553_v37 = vadd.f32 %v3647_v36, %v8238_v46  ;;  %v3728_v56 = vmul.f32 0.02, %v3533_v11 }
 0x3ce   : > { %v3536_v6 = vpop.f32.mrf.mxu0  ;;  %v3649_v13 = vpop.f32.mrf.mxu1  ;;  %v4045_v35 = vpack.c.bf16 %v3973_v58, %v3965_v47  ;;  %v3730_v8 = vmul.f32 0.02, %v3646_v31  ;;  %v4046_v23 = vpack.c.bf16 %v3974_v20, %v3966_v39 }
 0x3cf   : > { %v3537_v61 = vadd.f32 %v3536_v6, %v8246_v38  ;;  %v3650_v28 = vadd.f32 %v3649_v13, %v8246_v38  ;;  %v4047_v26 = vpack.c.bf16 %v3975_v3, %v3967_v22  ;;  %v3729_v42 = vmul.f32 0.02, %v3535_v57 }
 0x3d0   : > { %v3538_v25 = vpop.f32.mrf.mxu0  ;;  %v3651_v46 = vpop.f32.mrf.mxu1  ;;  %4124 = vmatprep.subr.bf16.mxu0 %v4045_v35  ;;  %v3731_v19 = vmul.f32 0.02, %v8553_v37  ;;  %v3856_v16 = vmax.f32 %v3533_v11, %v3728_v56  ;;  %v3858_v10 = vmax.f32 %v3646_v31, %v3730_v8  ;;  %v10438_v8 = vmax.f32 %v8468_v50, %v8495_v29 }
 0x3d1   : > { %v3736_v45 = vmul.f32 0.02, %v3537_v61  ;;  %v3539_v36 = vadd.f32 %v3538_v25, %v8246_v38  ;;  %v3738_v32 = vmul.f32 0.02, %v3650_v28  ;;  %v3652_v7 = vadd.f32 %v3651_v46, %v8246_v38  ;;  %4197 = vmatprep.subr.bf16.mxu1 %v4047_v26  ;;  %4125 = vmatpush1.bf16.msra.mxu0 %v4044_v1 }
 0x3d2   : > { %v3542_v47 = vpop.f32.mrf.mxu0  ;;  %v3655_v20 = vpop.f32.mrf.mxu1  ;;  %4198 = vmatpush1.bf16.msra.mxu1 %v4046_v23  ;;  %4126 = vmatprep.subr.bf16.mxu0 %v4037_v14  ;;  %v3857_v38 = vmax.f32 %v3535_v57, %v3729_v42  ;;  %v3859_v11 = vmax.f32 %v8553_v37, %v3731_v19  ;;  %v3934_v57 = vmax.f32 %v8454_v21, %v8485_v15 }
 0x3d3   : > { %v3864_v4 = vmax.f32 %v3537_v61, %v3736_v45  ;;  %v3737_v9 = vmul.f32 0.02, %v3539_v36  ;;  %v3543_v39 = vadd.f32 %v3542_v47, %v8234_v44  ;;  %v3866_v2 = vmax.f32 %v3650_v28, %v3738_v32  ;;  %4199 = vmatprep.subr.bf16.mxu1 %v4039_v63  ;;  %v10446_v63 = vld [vmem:[#allocation70_spill] sm:$0xff] }
 0x3d4   : > { %v3739_v58 = vmul.f32 0.02, %v3652_v7  ;;  %v3656_v0 = vadd.f32 %v3655_v20, %v8234_v44  ;;  %v3544_v22 = vpop.f32.mrf.mxu0  ;;  %v3657_v54 = vpop.f32.mrf.mxu1 }
 0x3d5   : > { %v8562_v3 = vpack.c.bf16 %v3864_v4, %v3856_v16  ;;  %v3865_v6 = vmax.f32 %v3539_v36, %v3737_v9  ;;  %v8565_v48 = vadd.f32 %v3544_v22, %v8234_v44  ;;  %v8568_v56 = vpack.c.bf16 %v3866_v2, %v3858_v10  ;;  %4127 = vmatpush1.bf16.msra.mxu0 %v8543_v52  ;;  %v10450_v10 = vld [vmem:[#allocation79_spill] sm:$0xff]  ;;  %v10454_v22 = vld [vmem:[#allocation16_spill] sm:$0xff] }
 0x3d6   : > { %v3867_v14 = vmax.f32 %v3652_v7, %v3739_v58  ;;  %v8571_v31 = vadd.f32 %v3657_v54, %v8234_v44  ;;  %v3546_v61 = vpop.f32.mrf.mxu0  ;;  %v3744_v13 = vmul.f32 0.02, %v3543_v39  ;;  %v3659_v1 = vpop.f32.mrf.mxu1  ;;  %4200 = vmatpush1.bf16.msra.mxu1 %v8546_v51  ;;  %4128 = vmatprep.subr.bf16.mxu0 %v8528_v34  ;;  %v10437_v44 = vmax.f32 %v8451_v33, %v8482_v27  ;;  %v10451_v2 = vld [vmem:[#allocation83_spill] sm:$0xff] }
 0x3d7   : > { %10434 = vst [vmem:[#allocation57_spill] sm:$0xff] %v8562_v3  ;;  %10435 = vst [vmem:[#allocation50_spill] sm:$0xff] %v8568_v56  ;;  %v3547_v35 = vadd.f32 %v3546_v61, %v8236_v41  ;;  %v8579_v37 = vpack.c.bf16 %v3865_v6, %v3857_v38  ;;  %v3746_v28 = vmul.f32 0.02, %v3656_v0  ;;  %v3660_v21 = vadd.f32 %v3659_v1, %v8236_v41  ;;  %v10461_v1 = vld [vmem:[#allocation17_spill] sm:$0xff]  ;;  %v10545_v3 = vld [vmem:[#allocation20_spill] sm:$0xff] }
 0x3d8   : > { %v4028_v52 = vpack.c.bf16 %v10438_v8, %v10437_v44  ;;  %4201 = vmatprep.subr.bf16.mxu1 %v8533_v49  ;;  %v3548_v15 = vpop.f32.mrf.mxu0  ;;  %v8589_v25 = vpack.c.bf16 %v3867_v14, %v3859_v11  ;;  %v10440_v51 = vmax.f32 %v8471_v17, %v8498_v53  ;;  %v3745_v26 = vmul.f32 0.02, %v8565_v48  ;;  %v3661_v27 = vpop.f32.mrf.mxu1  ;;  %v10457_v11 = vld [vmem:[#allocation41_spill] sm:$0xff]  ;;  %v10458_v14 = vld [vmem:[#allocation51_spill] sm:$0xff]  ;;  %v10463_v8 = vld [vmem:[#allocation48_spill] sm:$0xff] }
 0x3d9   : > { %10436 = vst [vmem:[#allocation86_spill] sm:$0xff] %v8579_v37  ;;  %v3752_v23 = vmul.f32 0.02, %v3547_v35  ;;  %v3549_v33 = vadd.f32 %v3548_v15, %v8236_v41  ;;  %v3747_v50 = vmul.f32 0.02, %v8571_v31  ;;  %v3662_v42 = vadd.f32 %v3661_v27, %v8236_v41  ;;  %v10466_v15 = vld [vmem:[#allocation58_spill] sm:$0xff] }
 0x3da   : > { %10439 = vst [vmem:[#allocation49_spill] sm:$0xff] %v8589_v25  ;;  %v4030_v34 = vpack.c.bf16 %v10440_v51, %v3934_v57  ;;  %v3754_v29 = vmul.f32 0.02, %v3660_v21  ;;  %v8598_v45 = vpop.f32.mrf.mxu0  ;;  %4129 = vmatpush1.bf16.msra.mxu0 %v4028_v52  ;;  %v10441_v49 = vmax.f32 %v8400_v12, %v8436_v55  ;;  %v10442_v17 = vmax.f32 %v8421_v30, %v8448_v18  ;;  %v8608_v7 = vpop.f32.mrf.mxu1  ;;  %v10459_v57 = vld [vmem:[#allocation84_spill] sm:$0xff]  ;;  %v10464_v52 = vld [vmem:[#allocation62_spill] sm:$0xff]  ;;  %v10471_v27 = vld [vmem:[#allocation61_spill] sm:$0xff] }
 0x3db   : > { %v3918_v36 = vmax.f32 %v8397_v60, %v8433_v43  ;;  %v3872_v46 = vmax.f32 %v3543_v39, %v3744_v13  ;;  %v3880_v19 = vmax.f32 %v3547_v35, %v3752_v23  ;;  %v3753_v32 = vmul.f32 0.02, %v3549_v33  ;;  %4130 = vmatprep.subr.bf16.mxu0 %v8511_v40  ;;  %v10445_v43 = vld [vmem:[#allocation45_spill] sm:$0xff] }
 0x3dc   : > { %v4023_v53 = vpack.c.bf16 %v10442_v17, %v10441_v49  ;;  %4202 = vmatpush1.bf16.msra.mxu1 %v4030_v34  ;;  %v10443_v41 = vmax.f32 %v8370_v5, %v8403_v59  ;;  %v10444_v12 = vmax.f32 %v8406_v24, %v8441_v62  ;;  %v3874_v30 = vmax.f32 %v3656_v0, %v3746_v28  ;;  %v8617_v60 = vpop.f32.mrf.mxu0  ;;  %v8625_v5 = vpop.f32.mrf.mxu1  ;;  %v10453_v0 = vld [vmem:[#allocation10_spill] sm:$0xff]  ;;  %v10474_v17 = vld [vmem:[#allocation37_spill] sm:$0xff] }
 0x3dd   : > { %v3882_v18 = vmax.f32 %v3660_v21, %v3754_v29  ;;  %v3755_v47 = vmul.f32 0.02, %v3662_v42  ;;  %v10447_v16 = vmax.f32 %v10445_v43, %v10446_v63  ;;  %v3873_v9 = vmax.f32 %v8565_v48, %v3745_v26  ;;  %v10456_v48 = vld [vmem:[#allocation65_spill] sm:$0xff]  ;;  %v10467_v34 = vld [vmem:[#allocation66_spill] sm:$0xff]  ;;  %v10468_v26 = vld [vmem:[#allocation39_spill] sm:$0xff] }
 0x3de   : > { %v4020_v55 = vpack.c.bf16 %v10444_v12, %v10443_v41  ;;  %4203 = vmatprep.subr.bf16.mxu1 %v4023_v53  ;;  %v8623_v40 = vpack.c.bf16 %v3880_v19, %v3872_v46  ;;  %v3881_v39 = vmax.f32 %v3549_v33, %v3753_v32  ;;  %v3875_v59 = vmax.f32 %v8571_v31, %v3747_v50  ;;  %v8630_v20 = vpop.f32.mrf.mxu0  ;;  %v10460_v31 = vld [vmem:[#allocation14_spill] sm:$0xff]  ;;  %v8643_v35 = vpop.f32.mrf.mxu1  ;;  %v10465_v21 = vld [vmem:[#allocation73_spill] sm:$0xff]  ;;  %v10470_v33 = vld [vmem:[#allocation12_spill] sm:$0xff] }
 0x3df   : > { %v4022_v4 = vpack.c.bf16 %v10447_v16, %v3918_v36  ;;  %v8628_v24 = vpack.c.bf16 %v3882_v18, %v3874_v30  ;;  %v3883_v62 = vmax.f32 %v3662_v42, %v3755_v47  ;;  %v10452_v58 = vmax.f32 %v10450_v10, %v10451_v2  ;;  %v10475_v53 = vld [vmem:[#allocation15_spill] sm:$0xff]  ;;  %v10476_v46 = vld [vmem:[#allocation74_spill] sm:$0xff]  ;;  %v10477_v19 = vld [vmem:[#allocation44_spill] sm:$0xff] }
 0x3e0   : > { %10448 = vst [vmem:[#allocation67_spill] sm:$0xff] %v8623_v40  ;;  %4131 = vmatpush1.bf16.msra.mxu0 %v4020_v55  ;;  %v10455_v38 = vmax.f32 %v10453_v0, %v10454_v22  ;;  %v3758_v54 = vmul.f32 0.02, %v10456_v48  ;;  %v3885_v61 = vmax.f32 %v10458_v14, %v10457_v11  ;;  %v3902_v13 = vmax.f32 %v10460_v31, %v10459_v57  ;;  %v8658_v42 = vpop.f32.mrf.mxu0  ;;  %v10478_v41 = vld [vmem:[#allocation68_spill] sm:$0xff]  ;;  %v8669_v18 = vpop.f32.mrf.mxu1  ;;  %v10482_v43 = vld [vmem:[#allocation55_spill] sm:$0xff]  ;;  %v10492_v14 = vld [vmem:[#allocation38_spill] sm:$0xff] }
 0x3e1   : > { %10449 = vst [vmem:[#allocation53_spill] sm:$0xff] %v8628_v24  ;;  %4204 = vmatpush1.bf16.msra.mxu1 %v4022_v4  ;;  %4132 = vmatprep.subr.bf16.mxu0 %v10461_v1  ;;  %v8646_v44 = vpack.c.bf16 %v3881_v39, %v3873_v9  ;;  %v3887_v28 = vmax.f32 %v10464_v52, %v10463_v8  ;;  %v10479_v12 = vld [vmem:[#allocation64_spill] sm:$0xff]  ;;  %v10484_v4 = vld [vmem:[#allocation29_spill] sm:$0xff]  ;;  %v10485_v39 = vld [vmem:[#allocation47_spill] sm:$0xff]  ;;  %v3725_v57 = vmul.f32 0.02, %v10492_v14 }
 0x3e2   : > { %v4015_v6 = vpack.c.bf16 %v10455_v38, %v10452_v58  ;;  %v3892_v51 = vmax.f32 %v10466_v15, %v10465_v21  ;;  %v10469_v23 = vmax.f32 %v10467_v34, %v10468_v26  ;;  %v10472_v50 = vmax.f32 %v10470_v33, %v10471_v27  ;;  %v10481_v47 = vld [vmem:[#allocation32_spill] sm:$0xff]  ;;  %v10488_v2 = vld [vmem:[#allocation27_spill] sm:$0xff]  ;;  %v8679_v0 = vpop.f32.mrf.mxu0  ;;  %v10490_v38 = vld [vmem:[#allocation9_spill] sm:$0xff]  ;;  %v8688_v8 = vpop.f32.mrf.mxu1 }
 0x3e3   : > { %10462 = vst [vmem:[#allocation75_spill] sm:$0xff] %v8646_v44  ;;  %v8660_v49 = vpack.c.bf16 %v3883_v62, %v3875_v59  ;;  %v3877_v36 = vmax.f32 %v10475_v53, %v10474_v17  ;;  %v3894_v32 = vmax.f32 %v10477_v19, %v10476_v46  ;;  %v10480_v55 = vmax.f32 %v10478_v41, %v10479_v12  ;;  %v10486_v59 = vld [vmem:[#allocation24_spill] sm:$0xff]  ;;  %v10493_v31 = vld [vmem:[#allocation35_spill] sm:$0xff]  ;;  %v10496_v15 = vld [vmem:[#allocation26_spill] sm:$0xff] }
 0x3e4   : > { %v4012_v29 = vpack.c.bf16 %v10472_v50, %v10469_v23  ;;  %4205 = vmatprep.subr.bf16.mxu1 %v4015_v6  ;;  %v10483_v63 = vmax.f32 %v10481_v47, %v10482_v43  ;;  %v3735_v9 = vmul.f32 0.02, %v10484_v4  ;;  %v3879_v62 = vmax.f32 %v10486_v59, %v10485_v39  ;;  %v10487_v10 = vld [vmem:[#allocation52_spill] sm:$0xff]  ;;  %v10495_v52 = vld [vmem:[#allocation31_spill] sm:$0xff]  ;;  %v10497_v34 = vld [vmem:[#allocation22_spill] sm:$0xff]  ;;  %v3564_v33 = vpop.f32.mrf.mxu0  ;;  %v3677_v17 = vpop.f32.mrf.mxu1 }
 0x3e5   : > { %10473 = vst [vmem:[#allocation78_spill] sm:$0xff] %v8660_v49  ;;  %v4014_v30 = vpack.c.bf16 %v10480_v55, %v3902_v13  ;;  %v3884_v58 = vmax.f32 %v10488_v2, %v10487_v10  ;;  %v10489_v22 = vld [vmem:[#allocation36_spill] sm:$0xff]  ;;  %v10494_v13 = vld [vmem:[#allocation19_spill] sm:$0xff]  ;;  %v3886_v1 = vmax.f32 %v10456_v48, %v3758_v54  ;;  %v3727_v21 = vmul.f32 0.02, %v10495_v52  ;;  %v10503_v59 = vld [vmem:[#allocation85_spill] sm:$0xff] }
 0x3e6   : > { %v4005_v16 = vpack.c.bf16 %v10483_v63, %v3885_v61  ;;  %4133 = vmatpush1.bf16.msra.mxu0 %v4012_v29  ;;  %v10491_v6 = vmax.f32 %v10489_v22, %v10490_v38  ;;  %v3869_v61 = vmax.f32 %v10494_v13, %v10493_v31  ;;  %v3871_v26 = vmax.f32 %v10497_v34, %v10496_v15  ;;  %v10499_v27 = vld [vmem:[#allocation28_spill] sm:$0xff]  ;;  %v8696_v54 = vpop.f32.mrf.mxu0  ;;  %v8699_v41 = vpop.f32.mrf.mxu1  ;;  %v10501_v63 = vld [vmem:[#allocation23_spill] sm:$0xff]  ;;  %v10504_v10 = vld [vmem:[#allocation21_spill] sm:$0xff] }
 0x3e7   : > { %4206 = vmatpush1.bf16.msra.mxu1 %v4014_v30  ;;  %v4004_v23 = vpack.c.bf16 %v3892_v51, %v3884_v58  ;;  %v4006_v29 = vpack.c.bf16 %v3894_v32, %v3886_v1  ;;  %v3863_v48 = vmax.f32 %v10484_v4, %v3735_v9  ;;  %v3853_v19 = vmax.f32 %v10492_v14, %v3725_v57  ;;  %v8711_v9 = vld [vmem:[%s9523_s8] sm:$0xff]   ;;  %v8730_v57 = vld [vmem:[%s9523_s8 + $0x8] sm:$0xff]  }
 0x3e8   : > { %v4007_v11 = vpack.c.bf16 %v10491_v6, %v3887_v28  ;;  %4134 = vmatprep.subr.bf16.mxu0 %v4005_v16  ;;  %v10498_v28 = vld [vmem:[#allocation43_spill] sm:$0xff]  ;;  %v3997_v53 = vpack.c.bf16 %v3877_v36, %v3869_v61  ;;  %v3999_v46 = vpack.c.bf16 %v3879_v62, %v3871_v26  ;;  %v3855_v51 = vmax.f32 %v10495_v52, %v3727_v21  ;;  %v3568_v12 = vpop.f32.mrf.mxu0  ;;  %v3681_v55 = vpop.f32.mrf.mxu1  ;;  %v10500_v36 = vld [vmem:[#allocation8_spill] sm:$0xff]  ;;  %v10507_v31 = vld [vmem:[#allocation25_spill] sm:$0xff] }
 0x3e9   : > { %v3861_v50 = vmax.f32 %v10499_v27, %v10498_v28  ;;  %10502 = vst [vmem:[#allocation81_spill] sm:$0xff] %v8711_v9  ;;  %v10505_v38 = vmov 0   ;;  %10506 = vst [vmem:[#allocation71_spill] sm:$0xff] %v8730_v57  ;;  %v8734_v13 = vadd.f32 %v8617_v60, %v10507_v31  ;;  %v8738_v1 = vadd.f32 %v8625_v5, %v10507_v31  ;;  %v10510_v21 = vld [vmem:[#allocation63_spill] sm:$0xff]  ;;  %v10514_v60 = vld [vmem:[#allocation34_spill] sm:$0xff] }
 0x3ea   : > { %4207 = vmatprep.subr.bf16.mxu1 %v4007_v11  ;;  %4135 = vmatpush1.bf16.msra.mxu0 %v4004_v23  ;;  %v8702_v30 = vpop.f32.mrf.mxu0  ;;  %v3991_v47 = vpack.c.bf16 %v3863_v48, %v3855_v51  ;;  %v8705_v43 = vpop.f32.mrf.mxu1  ;;  %v8742_v15 = vadd.f32 %v8658_v42, %v10510_v21  ;;  %v8746_v34 = vadd.f32 %v8669_v18, %v10510_v21  ;;  %v10528_v51 = vld [vmem:[#allocation42_spill] sm:$0xff] }
 0x3eb   : > { %4208 = vmatpush1.bf16.msra.mxu1 %v4006_v29  ;;  %4136 = vmatprep.subr.bf16.mxu0 %v3997_v53  ;;  %v3989_v32 = vpack.c.bf16 %v3861_v50, %v3853_v19  ;;  %10508 = vst [vmem:[#allocation69_spill] sm:$0xff] %v8734_v13  ;;  %10509 = vst [vmem:[#allocation18_spill] sm:$0xff] %v8738_v1  ;;  %v8750_v23 = vadd.f32 %v8598_v45, %v10507_v31  ;;  %v8761_v42 = vmul.f32 0.02, %v8734_v13  ;;  %v10519_v50 = vld [vmem:[#allocation7_spill] sm:$0xff] }
 0x3ec   : > { %4209 = vmatprep.subr.bf16.mxu1 %v3999_v46  ;;  %v3574_v16 = vpop.f32.mrf.mxu0  ;;  %v3687_v4 = vpop.f32.mrf.mxu1  ;;  %10511 = vst [vmem:[#allocation30_spill] sm:$0xff] %v8742_v15  ;;  %10512 = vst [vmem:[#allocation56_spill] sm:$0xff] %v8746_v34  ;;  %v8753_v28 = vadd.f32 %v3564_v33, %v10514_v60  ;;  %v8758_v5 = vadd.f32 %v8608_v7, %v10507_v31  ;;  %v8764_v18 = vadd.f32 %v3677_v17, %v10514_v60 }
 0x3ed   : > { %10513 = vst [vmem:[#allocation40_spill] sm:$0xff] %v8750_v23  ;;  %10517 = vst [vmem:[#allocation87_spill] sm:$0xff] %v8761_v42  ;;  %v8767_v29 = vadd.f32 %v3568_v12, %v10519_v50  ;;  %v8772_v33 = vmul.f32 0.02, %v8738_v1  ;;  %v8776_v7 = vadd.f32 %v8630_v20, %v10510_v21  ;;  %v8780_v53 = vadd.f32 %v8643_v35, %v10510_v21 }
 0x3ee   : > { %4137 = vmatpush1.bf16.msra.mxu0 %v10500_v36  ;;  %v8713_v39 = vpop.f32.mrf.mxu0  ;;  %v8716_v62 = vpop.f32.mrf.mxu1  ;;  %10515 = vst [vmem:[#allocation76_spill] sm:$0xff] %v8753_v28  ;;  %10516 = vst [vmem:[#allocation59_spill] sm:$0xff] %v8758_v5  ;;  %v8783_v17 = vadd.f32 %v3681_v55, %v10519_v50  ;;  %v8789_v46 = vmul.f32 0.02, %v8742_v15  ;;  %v8792_v19 = vmul.f32 0.02, %v8746_v34  ;;  %v8796_v20 = vadd.f32 %v8679_v0, %v10514_v60 }
 0x3ef   : > { %4210 = vmatpush1.bf16.msra.mxu1 %v10501_v63  ;;  %4138 = vmatprep.subr.bf16.mxu0 %v3989_v32  ;;  %10518 = vst [vmem:[#allocation82_spill] sm:$0xff] %v8764_v18  ;;  %10520 = vst [vmem:[#allocation80_spill] sm:$0xff] %v8767_v29  ;;  %v8799_v35 = vadd.f32 %v3574_v16, %v10528_v51  ;;  %v8803_v55 = vadd.f32 %v8688_v8, %v10514_v60  ;;  %v8806_v32 = vmul.f32 0.02, %v8753_v28  ;;  %v8818_v63 = vld [vmem:[%s9523_s8 + $0x10] sm:$0xff]   ;;  %v8928_v5 = vld [vmem:[%s9523_s8 + $0x18] sm:$0xff]  }
 0x3f0   : > { %4211 = vmatprep.subr.bf16.mxu1 %v3991_v47  ;;  %v3578_v2 = vpop.f32.mrf.mxu0  ;;  %v3691_v58 = vpop.f32.mrf.mxu1  ;;  %10521 = vst [vmem:[#allocation77_spill] sm:$0xff] %v8772_v33  ;;  %10522 = vst [vmem:[#allocation46_spill] sm:$0xff] %v8776_v7  ;;  %v8810_v36 = vadd.f32 %v8696_v54, %v10519_v50  ;;  %v8813_v47 = vadd.f32 %v3687_v4, %v10528_v51  ;;  %v8821_v16 = vmul.f32 0.02, %v8764_v18  ;;  %v10538_v54 = vld [vmem:[#allocation13_spill] sm:$0xff]  ;;  %v10550_v33 = vld [vmem:[#allocation6_spill] sm:$0xff] }
 0x3f1   : > { %10523 = vst [vmem:[#allocation60_spill] sm:$0xff] %v8780_v53  ;;  %10524 = vst [vmem:[#allocation45_spill] sm:$0xff] %v8783_v17  ;;  %v8825_v8 = vadd.f32 %v8699_v41, %v10519_v50  ;;  %v8834_v31 = vmul.f32 0.02, %v8783_v17  ;;  %v8838_v21 = vadd.f32 %v8702_v30, %v10528_v51  ;;  %v8842_v60 = vadd.f32 %v8705_v43, %v10528_v51  ;;  %v10552_v18 = vld [vmem:[#allocation72_spill] sm:$0xff] }
 0x3f2   : > { %4139 = vmatpush1.bf16.msra.mxu0 %v10503_v59  ;;  %v8721_v22 = vpop.f32.mrf.mxu0  ;;  %v8724_v6 = vpop.f32.mrf.mxu1  ;;  %10525 = vst [vmem:[#allocation70_spill] sm:$0xff] %v8789_v46  ;;  %10526 = vst [vmem:[#allocation79_spill] sm:$0xff] %v8792_v19  ;;  %v8828_v59 = vmul.f32 0.02, %v8767_v29  ;;  %v8845_v41 = vadd.f32 %v3691_v58, %v10538_v54  ;;  %v8860_v43 = vmul.f32 0.02, %v8813_v47  ;;  %v8864_v58 = vadd.f32 %v8713_v39, %v10538_v54 }
 0x3f3   : > { %4212 = vmatpush1.bf16.msra.mxu1 %v10504_v10  ;;  %10527 = vst [vmem:[#allocation83_spill] sm:$0xff] %v8796_v20  ;;  %10529 = vst [vmem:[#allocation10_spill] sm:$0xff] %v8799_v35  ;;  %v8831_v10 = vadd.f32 %v3578_v2, %v10538_v54  ;;  %v10544_v2 = vld [vmem:[#allocation54_spill] sm:$0xff]  ;;  %v10547_v39 = vld [vmem:[#allocation33_spill] sm:$0xff] }
 0x3f4   : > { %v3584_v11 = vpop.f32.mrf.mxu0  ;;  %v3697_v14 = vpop.f32.mrf.mxu1  ;;  %10530 = vst [vmem:[#allocation16_spill] sm:$0xff] %v8803_v55  ;;  %10531 = vst [vmem:[#allocation65_spill] sm:$0xff] %v8806_v32 }
 0x3f5   : > { %4157 = vmatmul.mubr.bf16.vlgmr.msra.gmra.mxu0 %v8711_v9  ;;  %10532 = vst [vmem:[#allocation41_spill] sm:$0xff] %v8810_v36  ;;  %10533 = vst [vmem:[#allocation51_spill] sm:$0xff] %v8813_v47  ;;  %v8854_v56 = vadd.f32 %v3697_v14, %v10544_v2  ;;  %v8875_v14 = vadd.f32 %v8716_v62, %v10538_v54  ;;  %v8893_v62 = vadd.f32 %v8721_v22, %v10544_v2  ;;  %v10549_v22 = vld [vmem:[#allocation11_spill] sm:$0xff] }
 0x3f6   : > { %4230 = vmatmul.mubr.bf16.vlgmr.msra.gmra.mxu1 %v8711_v9  ;;  %4166 = vmatprep.mubr.bf16.mxu0 %v10505_v38  ;;  %v3586_v61 = vpop.f32.mrf.mxu0  ;;  %v3699_v52 = vpop.f32.mrf.mxu1  ;;  %10534 = vst [vmem:[#allocation84_spill] sm:$0xff] %v8818_v63  ;;  %10535 = vst [vmem:[#allocation14_spill] sm:$0xff] %v8821_v16  ;;  %v8851_v9 = vadd.f32 %v3584_v11, %v10544_v2  ;;  %v8897_v54 = vadd.f32 %v8724_v6, %v10544_v2 }
 0x3f7   : > { %4239 = vmatprep.mubr.bf16.mxu1 %v10505_v38  ;;  %10536 = vst [vmem:[#allocation17_spill] sm:$0xff] %v8825_v8  ;;  %10537 = vst [vmem:[#allocation48_spill] sm:$0xff] %v8828_v59  ;;  %v8857_v30 = vadd.f32 %v3586_v61, %v10545_v3  ;;  %v8867_v51 = vadd.f32 %v3699_v52, %v10545_v3  ;;  %v8878_v61 = vmul.f32 0.02, %v8831_v10 }
 0x3f8   : > { %v3588_v26 = vpop.f32.mrf.mxu0  ;;  %v3701_v27 = vpop.f32.mrf.mxu1  ;;  %10539 = vst [vmem:[#allocation62_spill] sm:$0xff] %v8834_v31  ;;  %10540 = vst [vmem:[#allocation73_spill] sm:$0xff] %v8838_v21 }
 0x3f9   : > { %10541 = vst [vmem:[#allocation58_spill] sm:$0xff] %v8842_v60  ;;  %10542 = vst [vmem:[#allocation66_spill] sm:$0xff] %v8845_v41  ;;  %v8870_v11 = vadd.f32 %v3588_v26, %v10545_v3  ;;  %v8881_v24 = vadd.f32 %v3701_v27, %v10545_v3  ;;  %v8889_v26 = vmul.f32 0.02, %v8845_v41  ;;  %v8910_v49 = vmul.f32 0.02, %v8857_v30 }
 0x3fa   : > { %v3592_v45 = vpop.f32.mrf.mxu0  ;;  %v8785_v48 = vpop.f32.mrf.mxu1  ;;  %10546 = vst [vmem:[#allocation12_spill] sm:$0xff] %v8860_v43  ;;  %v8916_v2 = vmul.f32 0.02, %v8867_v51  ;;  %10551 = vst [vmem:[#allocation37_spill] sm:$0xff] %v8928_v5 }
 0x3fb   : > { %v8884_v40 = vadd.f32 %v3592_v45, %v10547_v39  ;;  %10548 = vst [vmem:[#allocation61_spill] sm:$0xff] %v8889_v26  ;;  %v8904_v45 = vmul.f32 0.02, %v8851_v9 }
 0x3fc   : > { %v3594_v12 = vpop.f32.mrf.mxu0  ;;  %v3707_v0 = vpop.f32.mrf.mxu1 }
 0x3fd   : > { %4167 = vmatmul.mubr.bf16.gmra.mxu0 %v8730_v57  ;;  %v8900_v3 = vadd.f32 %v3594_v12, %v10547_v39  ;;  %v8919_v12 = vmul.f32 0.02, %v8870_v11  ;;  %v8934_v34 = vmul.f32 0.02, %v8884_v40 }
 0x3fe   : > { %4240 = vmatmul.mubr.bf16.gmra.mxu1 %v8730_v57  ;;  %4176 = vmatprep.mubr.bf16.mxu0 %v10505_v38  ;;  %v3596_v4 = vpop.f32.mrf.mxu0  ;;  %v3709_v50 = vpop.f32.mrf.mxu1  ;;  %v8848_v57 = vmul.f32 0.02, %v8799_v35 }
 0x3ff   : > { %4249 = vmatprep.mubr.bf16.mxu1 %v10505_v38  ;;  %v3825_v15 = vmul.f32 0.02, %v8900_v3  ;;  %v8943_v28 = vadd.f32 %v3596_v4, %v10549_v22  ;;  %v8946_v32 = vadd.f32 %v3709_v50, %v10549_v22 }
 0x400   : > { %10543 = vst [vmem:[#allocation39_spill] sm:$0xff] %v8848_v57  ;;  %v3598_v25 = vpop.f32.mrf.mxu0  ;;  %v3711_v37 = vpop.f32.mrf.mxu1 }
 0x401   : > { %v8913_v44 = vadd.f32 %v3598_v25, %v10549_v22  ;;  %v8922_v1 = vadd.f32 %v3711_v37, %v10549_v22  ;;  %v8931_v25 = vmul.f32 0.02, %v8881_v24  ;;  %v3834_v59 = vmul.f32 0.02, %v8946_v32 }
 0x402   : > { %v3602_v52 = vpop.f32.mrf.mxu0  ;;  %v3715_v27 = vpop.f32.mrf.mxu1  ;;  %v3953_v36 = vmax.f32 %v8900_v3, %v3825_v15 }
 0x403   : > { %v3603_v19 = vadd.f32 %v3602_v52, %v10550_v33  ;;  %v3716_v46 = vadd.f32 %v3715_v27, %v10550_v33  ;;  %v3833_v52 = vmul.f32 0.02, %v8913_v44  ;;  %v3835_v7 = vmul.f32 0.02, %v8922_v1 }
 0x404   : > { %v3604_v6 = vpop.f32.mrf.mxu0  ;;  %v3717_v42 = vpop.f32.mrf.mxu1  ;;  %v3947_v15 = vmax.f32 %v8881_v24, %v8931_v25 }
 0x405   : > { %4177 = vmatmul.mubr.bf16.gmra.mxu0 %v8818_v63  ;;  %v3605_v13 = vadd.f32 %v3604_v6, %v10550_v33  ;;  %v3718_v23 = vadd.f32 %v3717_v42, %v10550_v33  ;;  %v3708_v6 = vadd.f32 %v3707_v0, %v10547_v39  ;;  %v3842_v20 = vmul.f32 0.02, %v3716_v46 }
 0x406   : > { %4250 = vmatmul.mubr.bf16.gmra.mxu1 %v8818_v63  ;;  %4186 = vmatprep.mubr.bf16.mxu0 %v10505_v38  ;;  %v8907_v63 = vmul.f32 0.02, %v8854_v56  ;;  %v3606_v37 = vpop.f32.mrf.mxu0  ;;  %v3719_v53 = vpop.f32.mrf.mxu1  ;;  %v3963_v35 = vmax.f32 %v8922_v1, %v3835_v7  ;;  %v3952_v7 = vmax.f32 %v8884_v40, %v8934_v34  ;;  %v3944_v40 = vmax.f32 %v8857_v30, %v8910_v49  ;;  %v10556_v49 = vld [vmem:[#allocation41_spill] sm:$0xff] }
 0x407   : > { %4259 = vmatprep.mubr.bf16.mxu1 %v10505_v38  ;;  %v3607_v16 = vadd.f32 %v3606_v37, %v10552_v18  ;;  %v3720_v42 = vadd.f32 %v3719_v53, %v10552_v18  ;;  %v3841_v17 = vmul.f32 0.02, %v3605_v13  ;;  %v3840_v37 = vmul.f32 0.02, %v3603_v19 }
 0x408   : > { %v3608_v55 = vpop.f32.mrf.mxu0  ;;  %v3721_v27 = vpop.f32.mrf.mxu1  ;;  %v3843_v4 = vmul.f32 0.02, %v3718_v23  ;;  %v3706_v53 = vadd.f32 %v8785_v48, %v10547_v39  ;;  %v3827_v22 = vmul.f32 0.02, %v3708_v6  ;;  %v3939_v24 = vmax.f32 %v8854_v56, %v8907_v63 }
 0x409   : > { %v3848_v0 = vmul.f32 0.02, %v3607_v16  ;;  %v3609_v33 = vadd.f32 %v3608_v55, %v10552_v18  ;;  %v3850_v31 = vmul.f32 0.02, %v3720_v42  ;;  %v3722_v50 = vadd.f32 %v3721_v27, %v10552_v18 }
 0x40a   : > { %v3832_v55 = vmul.f32 0.02, %v8943_v28  ;;  %v3961_v18 = vmax.f32 %v8913_v44, %v3833_v52  ;;  %v3969_v27 = vmax.f32 %v3605_v13, %v3841_v17  ;;  %v3968_v57 = vmax.f32 %v3603_v19, %v3840_v37  ;;  %v10566_v37 = vld [vmem:[#allocation62_spill] sm:$0xff] }
 0x40b   : > { %v3849_v29 = vmul.f32 0.02, %v3609_v33  ;;  %v3976_v47 = vmax.f32 %v3607_v16, %v3848_v0  ;;  %v3851_v43 = vmul.f32 0.02, %v3722_v50  ;;  %v3971_v48 = vmax.f32 %v3718_v23, %v3843_v4  ;;  %v10567_v4 = vld [vmem:[#allocation45_spill] sm:$0xff] }
 0x40c   : > { %v3826_v60 = vmul.f32 0.02, %v3706_v53  ;;  %v3955_v26 = vmax.f32 %v3708_v6, %v3827_v22  ;;  %v3960_v21 = vmax.f32 %v8943_v28, %v3832_v55  ;;  %v3945_v44 = vmax.f32 %v8870_v11, %v8919_v12  ;;  %v10564_v12 = vld [vmem:[#allocation80_spill] sm:$0xff]  ;;  %v10568_v55 = vld [vmem:[#allocation46_spill] sm:$0xff] }
 0x40d   : > { %4187 = vmatmul.mubr.bf16.gmra.mxu0 %v8928_v5  ;;  %v3977_v8 = vmax.f32 %v3609_v33, %v3849_v29  ;;  %v3979_v39 = vmax.f32 %v3722_v50, %v3851_v43  ;;  %v4048_v16 = vpack.c.bf16 %v3976_v47, %v3968_v57  ;;  %v3962_v13 = vmax.f32 %v8946_v32, %v3834_v59  ;;  %v10553_v32 = vld [vmem:[#allocation73_spill] sm:$0xff]  ;;  %v10565_v33 = vld [vmem:[#allocation83_spill] sm:$0xff] }
 0x40e   : > { %4260 = vmatmul.mubr.bf16.gmra.mxu1 %v8928_v5  ;;  %4302 = vmatprep.mubr.bf16.mxu0 %v10505_v38  ;;  %v3978_v5 = vmax.f32 %v3720_v42, %v3850_v31  ;;  %v4041_v1 = vpack.c.bf16 %v3961_v18, %v3953_v36  ;;  %v3808_v23 = vmul.f32 0.02, %v8893_v62  ;;  %v4043_v57 = vpack.c.bf16 %v3963_v35, %v3955_v26  ;;  %v10554_v47 = vld [vmem:[#allocation61_spill] sm:$0xff]  ;;  %v10562_v26 = vld [vmem:[#allocation51_spill] sm:$0xff]  ;;  %v10569_v18 = vld [vmem:[#allocation16_spill] sm:$0xff] }
 0x40f   : > { %4375 = vmatprep.mubr.bf16.mxu1 %v10505_v38  ;;  %v3970_v38 = vmax.f32 %v3716_v46, %v3842_v20  ;;  %v4049_v41 = vpack.c.bf16 %v3977_v8, %v3969_v27  ;;  %v4051_v0 = vpack.c.bf16 %v3979_v39, %v3971_v48  ;;  %v3800_v28 = vmul.f32 0.02, %v8864_v58  ;;  %v10555_v8 = vld [vmem:[#allocation66_spill] sm:$0xff]  ;;  %v10570_v48 = vld [vmem:[#allocation65_spill] sm:$0xff]  ;;  %v10571_v39 = vld [vmem:[#allocation76_spill] sm:$0xff] }
 0x410   : > { %v3810_v17 = vmul.f32 0.02, %v8897_v54  ;;  %v3802_v46 = vmul.f32 0.02, %v8875_v14  ;;  %v4040_v34 = vpack.c.bf16 %v3960_v21, %v3952_v7  ;;  %v3929_v19 = vmax.f32 %v8831_v10, %v8878_v61  ;;  %v10557_v21 = vld [vmem:[#allocation58_spill] sm:$0xff]  ;;  %v10561_v61 = vld [vmem:[#allocation12_spill] sm:$0xff] }
 0x411   : > { %v4050_v29 = vpack.c.bf16 %v3978_v5, %v3970_v38  ;;  %4270 = vmatprep.subr.bf16.mxu0 %v4049_v41  ;;  %4343 = vmatprep.subr.bf16.mxu1 %v4051_v0  ;;  %v3937_v38 = vmax.f32 %v8851_v9, %v8904_v45  ;;  %v3954_v5 = vmax.f32 %v3706_v53, %v3826_v60  ;;  %v3792_v36 = vmul.f32 0.02, %v10553_v32  ;;  %v10558_v41 = vld [vmem:[#allocation39_spill] sm:$0xff]  ;;  %v10559_v10 = vld [vmem:[#allocation10_spill] sm:$0xff]  ;;  %v10572_v0 = vld [vmem:[#allocation60_spill] sm:$0xff] }
 0x412   : > { %4271 = vmatpush1.bf16.msra.mxu0 %v4048_v16  ;;  %v3946_v20 = vmax.f32 %v8867_v51, %v8916_v2  ;;  %v3931_v59 = vmax.f32 %v10555_v8, %v10554_v47  ;;  %v3936_v56 = vmax.f32 %v8893_v62, %v3808_v23  ;;  %v4035_v63 = vpack.c.bf16 %v3947_v15, %v3939_v24  ;;  %v10560_v51 = vld [vmem:[#allocation17_spill] sm:$0xff]  ;;  %v10563_v2 = vld [vmem:[#allocation48_spill] sm:$0xff]  ;;  %v10575_v7 = vld [vmem:[#allocation70_spill] sm:$0xff] }
 0x413   : > { %4344 = vmatpush1.bf16.msra.mxu1 %v4050_v29  ;;  %4272 = vmatprep.subr.bf16.mxu0 %v4041_v1  ;;  %v4042_v9 = vpack.c.bf16 %v3962_v13, %v3954_v5  ;;  %v4033_v35 = vpack.c.bf16 %v3945_v44, %v3937_v38  ;;  %v3784_v31 = vmul.f32 0.02, %v10556_v49  ;;  %v3794_v60 = vmul.f32 0.02, %v10557_v21  ;;  %v10573_v13 = vld [vmem:[#allocation14_spill] sm:$0xff]  ;;  %v10582_v47 = vld [vmem:[#allocation69_spill] sm:$0xff] }
 0x414   : > { %4345 = vmatprep.subr.bf16.mxu1 %v4043_v57  ;;  %v3921_v30 = vmax.f32 %v10559_v10, %v10558_v41  ;;  %v3938_v43 = vmax.f32 %v8897_v54, %v3810_v17  ;;  %v3786_v11 = vmul.f32 0.02, %v10560_v51  ;;  %v3923_v3 = vmax.f32 %v10562_v26, %v10561_v61  ;;  %v10574_v29 = vld [vmem:[#allocation82_spill] sm:$0xff]  ;;  %v10585_v26 = vld [vmem:[#allocation75_spill] sm:$0xff] }
 0x415   : > { %v3928_v62 = vmax.f32 %v8864_v58, %v3800_v28  ;;  %v4032_v45 = vpack.c.bf16 %v3944_v40, %v3936_v56  ;;  %v3913_v25 = vmax.f32 %v10564_v12, %v10563_v2  ;;  %v3930_v6 = vmax.f32 %v8875_v14, %v3802_v46  ;;  %v10576_v57 = vld [vmem:[#allocation30_spill] sm:$0xff]  ;;  %v10577_v46 = vld [vmem:[#allocation40_spill] sm:$0xff]  ;;  %v10578_v40 = vld [vmem:[#allocation79_spill] sm:$0xff] }
 0x416   : > { %4273 = vmatpush1.bf16.msra.mxu0 %v4040_v34  ;;  %v4034_v52 = vpack.c.bf16 %v3946_v20, %v3938_v43  ;;  %v4025_v42 = vpack.c.bf16 %v3929_v19, %v3921_v30  ;;  %v3776_v54 = vmul.f32 0.02, %v10565_v33  ;;  %v3915_v50 = vmax.f32 %v10567_v4, %v10566_v37  ;;  %v10579_v34 = vld [vmem:[#allocation56_spill] sm:$0xff]  ;;  %v10583_v56 = vld [vmem:[#allocation77_spill] sm:$0xff]  ;;  %v10589_v2 = vld [vmem:[#allocation86_spill] sm:$0xff]  ;;  %v9056_v4 = vpop.permute.xlu0 %4092 }
 0x417   : > { %4346 = vmatpush1.bf16.msra.mxu1 %v4042_v9  ;;  %4274 = vmatprep.subr.bf16.mxu0 %v4033_v35  ;;  %v3920_v53 = vmax.f32 %v10553_v32, %v3792_v36  ;;  %v4027_v22 = vpack.c.bf16 %v3931_v59, %v3923_v3  ;;  %v3768_v58 = vmul.f32 0.02, %v10568_v55  ;;  %v3778_v27 = vmul.f32 0.02, %v10569_v18  ;;  %v10580_v35 = vld [vmem:[#allocation59_spill] sm:$0xff]  ;;  %v10586_v3 = vld [vmem:[#allocation78_spill] sm:$0xff] }
 0x418   : > { %4347 = vmatprep.subr.bf16.mxu1 %v4035_v63  ;;  %v3905_v16 = vmax.f32 %v10571_v39, %v10570_v48  ;;  %v3922_v14 = vmax.f32 %v10557_v21, %v3794_v60  ;;  %v3770_v44 = vmul.f32 0.02, %v10572_v0  ;;  %v3907_v1 = vmax.f32 %v10574_v29, %v10573_v13  ;;  %v10581_v36 = vld [vmem:[#allocation87_spill] sm:$0xff]  ;;  %v10584_v63 = vld [vmem:[#allocation18_spill] sm:$0xff]  ;;  %v10590_v12 = vld [vmem:[#allocation49_spill] sm:$0xff]  ;;  %10598 = vst [vmem:[#allocation15_spill] sm:$0xff] %v9056_v4 }
 0x419   : > { %v3912_v23 = vmax.f32 %v10556_v49, %v3784_v31  ;;  %v4024_v15 = vpack.c.bf16 %v3928_v62, %v3920_v53  ;;  %v3897_v28 = vmax.f32 %v10576_v57, %v10575_v7  ;;  %v3914_v17 = vmax.f32 %v10560_v51, %v3786_v11  ;;  %v10587_v62 = vld [vmem:[#allocation67_spill] sm:$0xff]  ;;  %v10597_v37 = vld [vmem:[#allocation37_spill] sm:$0xff]  ;;  %v9058_v53 = vpop.permute.xlu1 %4097 }
 0x41a   : > { %4275 = vmatpush1.bf16.msra.mxu0 %v4032_v45  ;;  %v4026_v38 = vpack.c.bf16 %v3930_v6, %v3922_v14  ;;  %v4017_v5 = vpack.c.bf16 %v3913_v25, %v3905_v16  ;;  %v3760_v24 = vmul.f32 0.02, %v10577_v46  ;;  %v3899_v19 = vmax.f32 %v10579_v34, %v10578_v40  ;;  %v10588_v45 = vld [vmem:[#allocation53_spill] sm:$0xff]  ;;  %v10592_v6 = vld [vmem:[#allocation50_spill] sm:$0xff]  ;;  %10599 = vst [vmem:[#allocation74_spill] sm:$0xff] %v9058_v53 }
 0x41b   : > { %4348 = vmatpush1.bf16.msra.mxu1 %v4034_v52  ;;  %4276 = vmatprep.subr.bf16.mxu0 %v4025_v42  ;;  %v3904_v20 = vmax.f32 %v10565_v33, %v3776_v54  ;;  %v4019_v9 = vpack.c.bf16 %v3915_v50, %v3907_v1  ;;  %v3762_v32 = vmul.f32 0.02, %v10580_v35  ;;  %v3889_v8 = vmax.f32 %v10582_v47, %v10581_v36  ;;  %v10591_v25 = vld [vmem:[#allocation57_spill] sm:$0xff]  ;;  %v10595_v33 = vld [vmem:[#allocation71_spill] sm:$0xff]  ;;  %v10596_v54 = vld [vmem:[#allocation84_spill] sm:$0xff] }
 0x41c   : > { %4349 = vmatprep.subr.bf16.mxu1 %v4027_v22  ;;  %v3906_v59 = vmax.f32 %v10569_v18, %v3778_v27  ;;  %v3891_v49 = vmax.f32 %v10584_v63, %v10583_v56  ;;  %v3896_v31 = vmax.f32 %v10568_v55, %v3768_v58  ;;  %v3898_v60 = vmax.f32 %v10572_v0, %v3770_v44  ;;  %v10593_v52 = vld [vmem:[#allocation81_spill] sm:$0xff]  ;;  %v9060_v27 = vpop.permute.xlu0 %4082 }
 0x41d   : > { %v4016_v21 = vpack.c.bf16 %v3912_v23, %v3904_v20  ;;  %v4009_v10 = vpack.c.bf16 %v3897_v28, %v3889_v8  ;;  %v3888_v30 = vmax.f32 %v10577_v46, %v3760_v24  ;;  %v3890_v51 = vmax.f32 %v10580_v35, %v3762_v32  ;;  %10600 = vst [vmem:[#allocation44_spill] sm:$0xff] %v9060_v27  ;;  %v9062_v16 = vpop.permute.xlu1 %4087 }
 0x41e   : > { %4277 = vmatpush1.bf16.msra.mxu0 %v4024_v15  ;;  %v4018_v41 = vpack.c.bf16 %v3914_v17, %v3906_v59  ;;  %v4011_v43 = vpack.c.bf16 %v3899_v19, %v3891_v49  ;;  %v10594_v42 = vmov 0   ;;  %10601 = vst [vmem:[#allocation68_spill] sm:$0xff] %v9062_v16 }
 0x41f   : > { %4350 = vmatpush1.bf16.msra.mxu1 %v4026_v38  ;;  %4278 = vmatprep.subr.bf16.mxu0 %v4017_v5  ;;  %v4008_v11 = vpack.c.bf16 %v3896_v31, %v3888_v30  ;;  %v4010_v61 = vpack.c.bf16 %v3898_v60, %v3890_v51 }
 0x420   : > { %4351 = vmatprep.subr.bf16.mxu1 %v4019_v9  ;;  %v9064_v29 = vpop.permute.xlu0 %4072 }
 0x421   : > { %10602 = vst [vmem:[#allocation64_spill] sm:$0xff] %v9064_v29  ;;  %v9066_v15 = vpop.permute.xlu1 %4077 }
 0x422   : > { %4279 = vmatpush1.bf16.msra.mxu0 %v4016_v21  ;;  %10603 = vst [vmem:[#allocation32_spill] sm:$0xff] %v9066_v15 }
 0x423   : > { %4352 = vmatpush1.bf16.msra.mxu1 %v4018_v41  ;;  %4280 = vmatprep.subr.bf16.mxu0 %v4009_v10 }
 0x424   : > { %4353 = vmatprep.subr.bf16.mxu1 %v4011_v43  ;;  %v9068_v38 = vpop.permute.xlu0 %4062 }
 0x425   : > { %10604 = vst [vmem:[#allocation55_spill] sm:$0xff] %v9068_v38  ;;  %v9075_v40 = vpop.permute.xlu1 %4067 }
 0x426   : > { %4281 = vmatpush1.bf16.msra.mxu0 %v4008_v11  ;;  %10606 = vst [vmem:[#allocation47_spill] sm:$0xff] %v9075_v40 }
 0x427   : > { %4354 = vmatpush1.bf16.msra.mxu1 %v4010_v61  ;;  %4282 = vmatprep.subr.bf16.mxu0 %v10585_v26 }
 0x428   : > { %4355 = vmatprep.subr.bf16.mxu1 %v10586_v3 }
 0x42a   : > { %4283 = vmatpush1.bf16.msra.mxu0 %v10587_v62 }
 0x42b   : > { %4356 = vmatpush1.bf16.msra.mxu1 %v10588_v45  ;;  %4284 = vmatprep.subr.bf16.mxu0 %v10589_v2 }
 0x42c   : > { %4357 = vmatprep.subr.bf16.mxu1 %v10590_v12 }
 0x42e   : > { %4285 = vmatpush1.bf16.msra.mxu0 %v10591_v25 }
 0x42f   : > { %4358 = vmatpush1.bf16.msra.mxu1 %v10592_v6 }
 0x431   : > { %4303 = vmatmul.mubr.bf16.vlgmr.msra.gmra.mxu0 %v10593_v52 }
 0x432   : > { %4376 = vmatmul.mubr.bf16.vlgmr.msra.gmra.mxu1 %v10593_v52  ;;  %4312 = vmatprep.mubr.bf16.mxu0 %v10594_v42 }
 0x433   : > { %4385 = vmatprep.mubr.bf16.mxu1 %v10594_v42 }
 0x439   : > { %4313 = vmatmul.mubr.bf16.gmra.mxu0 %v10595_v33 }
 0x43a   : > { %4386 = vmatmul.mubr.bf16.gmra.mxu1 %v10595_v33  ;;  %4322 = vmatprep.mubr.bf16.mxu0 %v10594_v42 }
 0x43b   : > { %4395 = vmatprep.mubr.bf16.mxu1 %v10594_v42 }
 0x441   : > { %4323 = vmatmul.mubr.bf16.gmra.mxu0 %v10596_v54 }
 0x442   : > { %4396 = vmatmul.mubr.bf16.gmra.mxu1 %v10596_v54  ;;  %4332 = vmatprep.mubr.bf16.mxu0 %v10594_v42 }
 0x443   : > { %4405 = vmatprep.mubr.bf16.mxu1 %v10594_v42 }
 0x449   : > { %4333 = vmatmul.mubr.bf16.gmra.mxu0 %v10597_v37 }
 0x44a   : > { %4406 = vmatmul.mubr.bf16.gmra.mxu1 %v10597_v37  ;;  %4653 = vmatprep.mubr.bf16.mxu0 %v10594_v42 }
 0x44b   : > { %4706 = vmatprep.mubr.bf16.mxu1 %v10594_v42 }
 0x4b5   : > { %v4158_v50 = vpop.f32.mrf.mxu0 }
 0x4b6   : > { %v4231_v22 = vpop.f32.mrf.mxu1  ;;  %v9084_v35 = vadd.f32 %v4158_v50, %v9068_v38 }
 0x4b7   : > { %v4160_v55 = vpop.f32.mrf.mxu0  ;;  %v9087_v32 = vadd.f32 %v4231_v22, %v9068_v38 }
 0x4b8   : > { %v4233_v58 = vpop.f32.mrf.mxu1  ;;  %v9073_v46 = vadd.f32 %v4160_v55, %v9068_v38  ;;  %10608 = vst [vmem:[#allocation52_spill] sm:$0xff] %v9084_v35 }
 0x4b9   : > { %v4162_v18 = vpop.f32.mrf.mxu0  ;;  %v9078_v34 = vadd.f32 %v4233_v58, %v9068_v38  ;;  %10609 = vst [vmem:[#allocation27_spill] sm:$0xff] %v9087_v32 }
 0x4ba   : > { %v4235_v48 = vpop.f32.mrf.mxu1  ;;  %10605 = vst [vmem:[#allocation29_spill] sm:$0xff] %v9073_v46  ;;  %v9093_v8 = vmul.f32 0.02, %v9073_v46  ;;  %v9108_v21 = vadd.f32 %v4162_v18, %v9075_v40 }
 0x4bb   : > { %v4164_v39 = vpop.f32.mrf.mxu0  ;;  %10607 = vst [vmem:[#allocation24_spill] sm:$0xff] %v9078_v34  ;;  %v9105_v31 = vmul.f32 0.02, %v9078_v34  ;;  %v9117_v30 = vadd.f32 %v4235_v48, %v9075_v40 }
 0x4bc   : > { %v4237_v14 = vpop.f32.mrf.mxu1  ;;  %v9081_v20 = vadd.f32 %v4164_v39, %v9075_v40  ;;  %10611 = vst [vmem:[#allocation9_spill] sm:$0xff] %v9093_v8 }
 0x4bd   : > { %v4168_v0 = vpop.f32.mrf.mxu0  ;;  %v9090_v36 = vadd.f32 %v4237_v14, %v9075_v40  ;;  %10612 = vst [vmem:[#allocation38_spill] sm:$0xff] %v9105_v31 }
 0x4be   : > { %v4241_v44 = vpop.f32.mrf.mxu1  ;;  %v9120_v43 = vmul.f32 0.02, %v9081_v20  ;;  %v9132_v3 = vadd.f32 %v4168_v0, %v9064_v29 }
 0x4bf   : > { %v4170_v13 = vpop.f32.mrf.mxu0  ;;  %10610 = vst [vmem:[#allocation36_spill] sm:$0xff] %v9090_v36  ;;  %v9129_v26 = vmul.f32 0.02, %v9090_v36  ;;  %v9135_v62 = vadd.f32 %v4241_v44, %v9064_v29 }
 0x4c0   : > { %v4243_v1 = vpop.f32.mrf.mxu1  ;;  %v9096_v59 = vadd.f32 %v4170_v13, %v9064_v29 }
 0x4c1   : > { %v4172_v23 = vpop.f32.mrf.mxu0  ;;  %v9099_v56 = vadd.f32 %v4243_v1, %v9064_v29  ;;  %10614 = vst [vmem:[#allocation19_spill] sm:$0xff] %v9129_v26 }
 0x4c2   : > { %v4245_v7 = vpop.f32.mrf.mxu1  ;;  %v9102_v63 = vadd.f32 %v4172_v23, %v9066_v15  ;;  %v9141_v12 = vmul.f32 0.02, %v9096_v59 }
 0x4c3   : > { %v4174_v57 = vpop.f32.mrf.mxu0  ;;  %v9111_v60 = vadd.f32 %v4245_v7, %v9066_v15  ;;  %v9144_v25 = vmul.f32 0.02, %v9099_v56 }
 0x4c4   : > { %v4247_v28 = vpop.f32.mrf.mxu1  ;;  %v9114_v41 = vadd.f32 %v4174_v57, %v9066_v15  ;;  %v9147_v6 = vmul.f32 0.02, %v9102_v63 }
 0x4c5   : > { %v4178_v17 = vpop.f32.mrf.mxu0  ;;  %10613 = vst [vmem:[#allocation35_spill] sm:$0xff] %v9111_v60  ;;  %v9123_v51 = vadd.f32 %v4247_v28, %v9066_v15  ;;  %v9151_v54 = vmul.f32 0.02, %v9111_v60 }
 0x4c6   : > { %v9070_v5 = vpop.f32.mrf.mxu1  ;;  %v9126_v11 = vadd.f32 %v4178_v17, %v9060_v27  ;;  %v9154_v37 = vmul.f32 0.02, %v9114_v41 }
 0x4c7   : > { %v4180_v24 = vpop.f32.mrf.mxu0  ;;  %10615 = vst [vmem:[#allocation31_spill] sm:$0xff] %v9151_v54  ;;  %v9159_v58 = vmul.f32 0.02, %v9123_v51 }
 0x4c8   : > { %v4253_v19 = vpop.f32.mrf.mxu1  ;;  %v9138_v45 = vadd.f32 %v4180_v24, %v9060_v27  ;;  %v9162_v18 = vmul.f32 0.02, %v9126_v11 }
 0x4c9   : > { %v4182_v9 = vpop.f32.mrf.mxu0  ;;  %v4254_v44 = vadd.f32 %v4253_v19, %v9060_v27 }
 0x4ca   : > { %v4255_v47 = vpop.f32.mrf.mxu1  ;;  %v4449_v0 = vmul.f32 0.02, %v9138_v45  ;;  %v4183_v7 = vadd.f32 %v4182_v9, %v9062_v16  ;;  %v4252_v9 = vadd.f32 %v9070_v5, %v9060_v27 }
 0x4cb   : > { %v4184_v49 = vpop.f32.mrf.mxu0  ;;  %v4256_v57 = vadd.f32 %v4255_v47, %v9062_v16 }
 0x4cc   : > { %v4257_v10 = vpop.f32.mrf.mxu1  ;;  %v4185_v52 = vadd.f32 %v4184_v49, %v9062_v16  ;;  %v4456_v29 = vmul.f32 0.02, %v4183_v7  ;;  %v4450_v26 = vmul.f32 0.02, %v4252_v9 }
 0x4cd   : > { %v4188_v61 = vpop.f32.mrf.mxu0  ;;  %v4258_v50 = vadd.f32 %v4257_v10, %v9062_v16 }
 0x4ce   : > { %v4261_v2 = vpop.f32.mrf.mxu1  ;;  %v4189_v48 = vadd.f32 %v4188_v61, %v9056_v4  ;;  %v4457_v28 = vmul.f32 0.02, %v4185_v52  ;;  %v4520_v35 = vmax.f32 %v4183_v7, %v4456_v29  ;;  %v4424_v29 = vmul.f32 0.02, %v9108_v21 }
 0x4cf   : > { %v4190_v33 = vpop.f32.mrf.mxu0  ;;  %v4262_v13 = vadd.f32 %v4261_v2, %v9056_v4  ;;  %v4459_v49 = vmul.f32 0.02, %v4258_v50 }
 0x4d0   : > { %v4191_v22 = vadd.f32 %v4190_v33, %v9056_v4  ;;  %v4263_v55 = vpop.f32.mrf.mxu1  ;;  %v4464_v19 = vmul.f32 0.02, %v4189_v48  ;;  %v4521_v42 = vmax.f32 %v4185_v52, %v4457_v28 }
 0x4d1   : > { %v4264_v39 = vadd.f32 %v4263_v55, %v9056_v4  ;;  %v4192_v14 = vpop.f32.mrf.mxu0  ;;  %v4451_v4 = vmul.f32 0.02, %v4254_v44  ;;  %v4466_v47 = vmul.f32 0.02, %v4262_v13  ;;  %v4523_v46 = vmax.f32 %v4258_v50, %v4459_v49 }
 0x4d2   : > { %v4193_v1 = vadd.f32 %v4192_v14, %v9058_v53  ;;  %v4265_v23 = vpop.f32.mrf.mxu1  ;;  %v4465_v10 = vmul.f32 0.02, %v4191_v22  ;;  %v4528_v8 = vmax.f32 %v4189_v48, %v4464_v19  ;;  %v4432_v50 = vmul.f32 0.02, %v9132_v3 }
 0x4d3   : > { %v4266_v17 = vadd.f32 %v4265_v23, %v9058_v53  ;;  %v4194_v24 = vpop.f32.mrf.mxu0  ;;  %v4467_v15 = vmul.f32 0.02, %v4264_v39  ;;  %v4458_v23 = vmul.f32 0.02, %v4256_v57  ;;  %v4515_v27 = vmax.f32 %v4254_v44, %v4451_v4 }
 0x4d4   : > { %v4472_v61 = vmul.f32 0.02, %v4193_v1  ;;  %v4195_v33 = vadd.f32 %v4194_v24, %v9058_v53  ;;  %v4267_v55 = vpop.f32.mrf.mxu1  ;;  %v4529_v34 = vmax.f32 %v4191_v22, %v4465_v10  ;;  %v4488_v48 = vmax.f32 %v9108_v21, %v4424_v29  ;;  %v9215_v21 = vld [vmem:[%s9525_s10] sm:$0xff]  }
 0x4d5   : > { %v4474_v2 = vmul.f32 0.02, %v4266_v17  ;;  %v4268_v14 = vadd.f32 %v4267_v55, %v9058_v53  ;;  %v4531_v32 = vmax.f32 %v4264_v39, %v4467_v15  ;;  %v4513_v55 = vmax.f32 %v9138_v45, %v4449_v0  ;;  %v10620_v45 = vld [vmem:[#allocation36_spill] sm:$0xff]  ;;  %10626 = vst [vmem:[#allocation26_spill] sm:$0xff] %v9215_v21 }
 0x4d6   : > { %v4473_v16 = vmul.f32 0.02, %v4195_v33  ;;  %v4536_v40 = vmax.f32 %v4193_v1, %v4472_v61  ;;  %v4530_v53 = vmax.f32 %v4262_v13, %v4466_v47  ;;  %v4505_v1 = vmax.f32 %v9114_v41, %v9154_v37 }
 0x4d7   : > { %v4475_v38 = vmul.f32 0.02, %v4268_v14  ;;  %v4538_v31 = vmax.f32 %v4266_v17, %v4474_v2  ;;  %v4522_v52 = vmax.f32 %v4256_v57, %v4458_v23  ;;  %v4507_v15 = vmax.f32 %v9123_v51, %v9159_v58  ;;  %v10618_v51 = vld [vmem:[#allocation52_spill] sm:$0xff] }
 0x4d8   : > { %v4537_v24 = vmax.f32 %v4195_v33, %v4473_v16  ;;  %v4572_v60 = vpack.c.bf16 %v4536_v40, %v4528_v8  ;;  %v4565_v16 = vpack.c.bf16 %v4521_v42, %v4513_v55  ;;  %v4567_v4 = vpack.c.bf16 %v4523_v46, %v4515_v27  ;;  %v10616_v46 = vld [vmem:[#allocation31_spill] sm:$0xff]  ;;  %v10625_v58 = vld [vmem:[#allocation24_spill] sm:$0xff] }
 0x4d9   : > { %v4539_v36 = vmax.f32 %v4268_v14, %v4475_v38  ;;  %v4574_v22 = vpack.c.bf16 %v4538_v31, %v4530_v53  ;;  %v4512_v38 = vmax.f32 %v9126_v11, %v9162_v18  ;;  %v4434_v40 = vmul.f32 0.02, %v9135_v62  ;;  %v10617_v31 = vld [vmem:[#allocation35_spill] sm:$0xff]  ;;  %v9226_v17 = vld [vmem:[%s9525_s10 + $0x8] sm:$0xff]  }
 0x4da   : > { %v4573_v5 = vpack.c.bf16 %v4537_v24, %v4529_v34  ;;  %v4497_v53 = vmax.f32 %v9096_v59, %v9141_v12  ;;  %v4514_v34 = vmax.f32 %v4252_v9, %v4450_v26  ;;  %v4426_v42 = vmul.f32 0.02, %v9117_v30  ;;  %v10619_v26 = vld [vmem:[#allocation19_spill] sm:$0xff]  ;;  %10628 = vst [vmem:[#allocation22_spill] sm:$0xff] %v9226_v17 }
 0x4db   : > { %v4575_v54 = vpack.c.bf16 %v4539_v36, %v4531_v32  ;;  %v4499_v32 = vmax.f32 %v9099_v56, %v9144_v25  ;;  %v4504_v36 = vmax.f32 %v9102_v63, %v9147_v6  ;;  %v4564_v8 = vpack.c.bf16 %v4520_v35, %v4512_v38  ;;  %v10621_v63 = vld [vmem:[#allocation27_spill] sm:$0xff]  ;;  %v10622_v6 = vld [vmem:[#allocation9_spill] sm:$0xff] }
 0x4dc   : > { %4629 = vmatprep.subr.bf16.mxu0 %v4573_v5  ;;  %v4489_v27 = vmax.f32 %v9081_v20, %v9120_v43  ;;  %v4566_v59 = vpack.c.bf16 %v4522_v52, %v4514_v34  ;;  %v4557_v41 = vpack.c.bf16 %v4505_v1, %v4497_v53  ;;  %v4416_v11 = vmul.f32 0.02, %v10618_v51  ;;  %v10624_v43 = vld [vmem:[#allocation38_spill] sm:$0xff]  ;;  %v10632_v53 = vld [vmem:[#allocation47_spill] sm:$0xff] }
 0x4dd   : > { %4682 = vmatprep.subr.bf16.mxu1 %v4575_v54  ;;  %4630 = vmatpush1.bf16.msra.mxu0 %v4572_v60  ;;  %v4506_v60 = vmax.f32 %v10617_v31, %v10616_v46  ;;  %v4491_v12 = vmax.f32 %v10620_v45, %v10619_v26  ;;  %v4496_v56 = vmax.f32 %v9132_v3, %v4432_v50  ;;  %v4418_v35 = vmul.f32 0.02, %v10621_v63  ;;  %v10623_v54 = vld [vmem:[#allocation29_spill] sm:$0xff]  ;;  %v10637_v31 = vld [vmem:[#allocation64_spill] sm:$0xff] }
 0x4de   : > { %4683 = vmatpush1.bf16.msra.mxu1 %v4574_v22  ;;  %4631 = vmatprep.subr.bf16.mxu0 %v4565_v16  ;;  %v4559_v25 = vpack.c.bf16 %v4507_v15, %v4499_v32  ;;  %v4481_v37 = vmax.f32 %v10623_v54, %v10622_v6  ;;  %v4498_v20 = vmax.f32 %v9135_v62, %v4434_v40  ;;  %v10629_v15 = vld [vmem:[#allocation55_spill] sm:$0xff]  ;;  %v10641_v54 = vld [vmem:[#allocation44_spill] sm:$0xff] }
 0x4df   : > { %4684 = vmatprep.subr.bf16.mxu1 %v4567_v4  ;;  %v4483_v18 = vmax.f32 %v10625_v58, %v10624_v43  ;;  %v4556_v39 = vpack.c.bf16 %v4504_v36, %v4496_v56  ;;  %v4490_v3 = vmax.f32 %v9117_v30, %v4426_v42  ;;  %v4480_v13 = vmax.f32 %v10618_v51, %v4416_v11 }
 0x4e0   : > { %v4558_v0 = vpack.c.bf16 %v4506_v60, %v4498_v20  ;;  %v4549_v44 = vpack.c.bf16 %v4489_v27, %v4481_v37  ;;  %v4482_v57 = vmax.f32 %v10621_v63, %v4418_v35  ;;  %v10627_v30 = vmov 0  }
 0x4e1   : > { %4632 = vmatpush1.bf16.msra.mxu0 %v4564_v8  ;;  %v4551_v7 = vpack.c.bf16 %v4491_v12, %v4483_v18  ;;  %v4548_v62 = vpack.c.bf16 %v4488_v48, %v4480_v13  ;;  %v10643_v13 = vld [vmem:[#allocation68_spill] sm:$0xff] }
 0x4e2   : > { %4685 = vmatpush1.bf16.msra.mxu1 %v4566_v59  ;;  %4633 = vmatprep.subr.bf16.mxu0 %v4557_v41  ;;  %v4550_v28 = vpack.c.bf16 %v4490_v3, %v4482_v57  ;;  %v10638_v41 = vld [vmem:[#allocation32_spill] sm:$0xff] }
 0x4e3   : > { %4686 = vmatprep.subr.bf16.mxu1 %v4559_v25 }
 0x4e5   : > { %4634 = vmatpush1.bf16.msra.mxu0 %v4556_v39 }
 0x4e6   : > { %4687 = vmatpush1.bf16.msra.mxu1 %v4558_v0  ;;  %4635 = vmatprep.subr.bf16.mxu0 %v4549_v44 }
 0x4e7   : > { %4688 = vmatprep.subr.bf16.mxu1 %v4551_v7 }
 0x4e9   : > { %4636 = vmatpush1.bf16.msra.mxu0 %v4548_v62 }
 0x4ea   : > { %4689 = vmatpush1.bf16.msra.mxu1 %v4550_v28 }
 0x4ec   : > { %5446 = vmatmul.mubr.msk.bf16.vlgmr.msra.gmra.mxu0 %vm4614_vm0, %v9215_v21 }
 0x4ed   : > { %5448 = vmatmul.mubr.msk.bf16.vlgmr.msra.gmra.mxu1 %vm4614_vm0, %v9215_v21  ;;  %4663 = vmatprep.mubr.bf16.mxu0 %v10627_v30 }
 0x4ee   : > { %4716 = vmatprep.mubr.bf16.mxu1 %v10627_v30 }
 0x4f1   : > { %v4304_v49 = vpop.f32.mrf.mxu0 }
 0x4f2   : > { %v4377_v10 = vpop.f32.mrf.mxu1  ;;  %v9246_v32 = vadd.f32 %v4304_v49, %v10629_v15 }
 0x4f3   : > { %v4306_v61 = vpop.f32.mrf.mxu0  ;;  %v9249_v36 = vadd.f32 %v4377_v10, %v10629_v15  ;;  %v10645_v10 = vld [vmem:[#allocation15_spill] sm:$0xff] }
 0x4f4   : > { %5447 = vmatmul.mubr.msk.bf16.gmra.mxu0 %vm4614_vm0, %v9226_v17  ;;  %v4379_v33 = vpop.f32.mrf.mxu1  ;;  %v9237_v38 = vadd.f32 %v4306_v61, %v10629_v15  ;;  %10633 = vst [vmem:[#allocation8_spill] sm:$0xff] %v9246_v32 }
 0x4f5   : > { %5449 = vmatmul.mubr.msk.bf16.gmra.mxu1 %vm4614_vm0, %v9226_v17  ;;  %4759 = vmatprep.mubr.bf16.mxu0 %v10627_v30  ;;  %v4308_v19 = vpop.f32.mrf.mxu0  ;;  %v9240_v29 = vadd.f32 %v4379_v33, %v10629_v15  ;;  %10634 = vst [vmem:[#allocation23_spill] sm:$0xff] %v9249_v36 }
 0x4f6   : > { %4812 = vmatprep.mubr.bf16.mxu1 %v10627_v30  ;;  %v4381_v2 = vpop.f32.mrf.mxu1  ;;  %10630 = vst [vmem:[#allocation43_spill] sm:$0xff] %v9237_v38  ;;  %v9255_v46 = vmul.f32 0.02, %v9237_v38  ;;  %v9270_v45 = vadd.f32 %v4308_v19, %v10632_v53 }
 0x4f7   : > { %v4310_v14 = vpop.f32.mrf.mxu0  ;;  %10631 = vst [vmem:[#allocation28_spill] sm:$0xff] %v9240_v29  ;;  %v9267_v26 = vmul.f32 0.02, %v9240_v29  ;;  %v9279_v63 = vadd.f32 %v4381_v2, %v10632_v53 }
 0x4f8   : > { %v4383_v9 = vpop.f32.mrf.mxu1  ;;  %v9243_v34 = vadd.f32 %v4310_v14, %v10632_v53  ;;  %10636 = vst [vmem:[#allocation21_spill] sm:$0xff] %v9255_v46 }
 0x4f9   : > { %v4314_v47 = vpop.f32.mrf.mxu0  ;;  %v9252_v8 = vadd.f32 %v4383_v9, %v10632_v53  ;;  %10639 = vst [vmem:[#allocation25_spill] sm:$0xff] %v9267_v26 }
 0x4fa   : > { %v4387_v23 = vpop.f32.mrf.mxu1  ;;  %v9282_v35 = vmul.f32 0.02, %v9243_v34  ;;  %v9294_v58 = vadd.f32 %v4314_v47, %v10637_v31 }
 0x4fb   : > { %v4316_v24 = vpop.f32.mrf.mxu0  ;;  %10635 = vst [vmem:[#allocation85_spill] sm:$0xff] %v9252_v8  ;;  %v9291_v43 = vmul.f32 0.02, %v9252_v8  ;;  %v9297_v18 = vadd.f32 %v4387_v23, %v10637_v31 }
 0x4fc   : > { %v4389_v55 = vpop.f32.mrf.mxu1  ;;  %v9258_v60 = vadd.f32 %v4316_v24, %v10637_v31 }
 0x4fd   : > { %v4318_v5 = vpop.f32.mrf.mxu0  ;;  %v9261_v59 = vadd.f32 %v4389_v55, %v10637_v31  ;;  %10642 = vst [vmem:[#allocation34_spill] sm:$0xff] %v9291_v43 }
 0x4fe   : > { %v4391_v1 = vpop.f32.mrf.mxu1  ;;  %v9264_v51 = vadd.f32 %v4318_v5, %v10638_v41  ;;  %v9303_v3 = vmul.f32 0.02, %v9258_v60  ;;  %v10646_v5 = vld [vmem:[#allocation74_spill] sm:$0xff] }
 0x4ff   : > { %v4320_v52 = vpop.f32.mrf.mxu0  ;;  %v9273_v12 = vadd.f32 %v4391_v1, %v10638_v41  ;;  %v9306_v0 = vmul.f32 0.02, %v9261_v59 }
 0x500   : > { %v4393_v22 = vpop.f32.mrf.mxu1  ;;  %v9276_v56 = vadd.f32 %v4320_v52, %v10638_v41  ;;  %v9309_v44 = vmul.f32 0.02, %v9264_v51 }
 0x501   : > { %v4324_v16 = vpop.f32.mrf.mxu0  ;;  %10640 = vst [vmem:[#allocation63_spill] sm:$0xff] %v9273_v12  ;;  %v9285_v6 = vadd.f32 %v4393_v22, %v10638_v41  ;;  %v9313_v62 = vmul.f32 0.02, %v9273_v12 }
 0x502   : > { %v9234_v50 = vpop.f32.mrf.mxu1  ;;  %v9288_v37 = vadd.f32 %v4324_v16, %v10641_v54  ;;  %v9316_v28 = vmul.f32 0.02, %v9276_v56 }
 0x503   : > { %v4326_v4 = vpop.f32.mrf.mxu0  ;;  %10644 = vst [vmem:[#allocation7_spill] sm:$0xff] %v9313_v62  ;;  %v9321_v19 = vmul.f32 0.02, %v9285_v6 }
 0x504   : > { %v4399_v40 = vpop.f32.mrf.mxu1  ;;  %v9300_v48 = vadd.f32 %v4326_v4, %v10641_v54  ;;  %v9324_v2 = vmul.f32 0.02, %v9288_v37 }
 0x505   : > { %v4328_v42 = vpop.f32.mrf.mxu0  ;;  %v4400_v24 = vadd.f32 %v4399_v40, %v10641_v54 }
 0x506   : > { %v4401_v27 = vpop.f32.mrf.mxu1  ;;  %v4453_v23 = vmul.f32 0.02, %v9300_v48  ;;  %v4329_v22 = vadd.f32 %v4328_v42, %v10643_v13  ;;  %v4398_v42 = vadd.f32 %v9234_v50, %v10641_v54 }
 0x507   : > { %v4330_v11 = vpop.f32.mrf.mxu0  ;;  %v4402_v16 = vadd.f32 %v4401_v27, %v10643_v13 }
 0x508   : > { %v4403_v25 = vpop.f32.mrf.mxu1  ;;  %v4331_v7 = vadd.f32 %v4330_v11, %v10643_v13  ;;  %v4454_v43 = vmul.f32 0.02, %v4398_v42 }
 0x509   : > { %v4334_v20 = vpop.f32.mrf.mxu0  ;;  %v4404_v49 = vadd.f32 %v4403_v25, %v10643_v13 }
 0x50a   : > { %v4407_v39 = vpop.f32.mrf.mxu1  ;;  %v4335_v14 = vadd.f32 %v4334_v20, %v10645_v10  ;;  %v4461_v15 = vmul.f32 0.02, %v4331_v7 }
 0x50b   : > { %v4336_v57 = vpop.f32.mrf.mxu0  ;;  %v4408_v55 = vadd.f32 %v4407_v39, %v10645_v10  ;;  %v4463_v31 = vmul.f32 0.02, %v4404_v49 }
 0x50c   : > { %v4337_v61 = vadd.f32 %v4336_v57, %v10645_v10  ;;  %v4409_v33 = vpop.f32.mrf.mxu1  ;;  %v4468_v40 = vmul.f32 0.02, %v4335_v14  ;;  %v4525_v21 = vmax.f32 %v4331_v7, %v4461_v15 }
 0x50d   : > { %v4410_v9 = vadd.f32 %v4409_v33, %v10645_v10  ;;  %v4338_v47 = vpop.f32.mrf.mxu0  ;;  %v4455_v33 = vmul.f32 0.02, %v4400_v24  ;;  %v4470_v27 = vmul.f32 0.02, %v4408_v55  ;;  %v4527_v38 = vmax.f32 %v4404_v49, %v4463_v31 }
 0x50e   : > { %v4339_v1 = vadd.f32 %v4338_v47, %v10646_v5  ;;  %v4411_v52 = vpop.f32.mrf.mxu1  ;;  %v4469_v41 = vmul.f32 0.02, %v4337_v61  ;;  %v4460_v47 = vmul.f32 0.02, %v4329_v22  ;;  %v4532_v46 = vmax.f32 %v4335_v14, %v4468_v40 }
 0x50f   : > { %v4412_v4 = vadd.f32 %v4411_v52, %v10646_v5  ;;  %v4340_v53 = vpop.f32.mrf.mxu0  ;;  %v4471_v57 = vmul.f32 0.02, %v4410_v9  ;;  %v4462_v52 = vmul.f32 0.02, %v4402_v16  ;;  %v4519_v54 = vmax.f32 %v4400_v24, %v4455_v33  ;;  %v10656_v24 = vld [vmem:[#allocation28_spill] sm:$0xff] }
 0x510   : > { %v4476_v11 = vmul.f32 0.02, %v4339_v1  ;;  %v4341_v25 = vadd.f32 %v4340_v53, %v10646_v5  ;;  %v4413_v20 = vpop.f32.mrf.mxu1  ;;  %v4533_v29 = vmax.f32 %v4337_v61, %v4469_v41  ;;  %v4524_v32 = vmax.f32 %v4329_v22, %v4460_v47 }
 0x511   : > { %v4478_v39 = vmul.f32 0.02, %v4412_v4  ;;  %v4414_v10 = vadd.f32 %v4413_v20, %v10646_v5  ;;  %v4535_v36 = vmax.f32 %v4410_v9, %v4471_v57  ;;  %v4517_v5 = vmax.f32 %v9300_v48, %v4453_v23  ;;  %v10654_v9 = vld [vmem:[#allocation43_spill] sm:$0xff]  ;;  %v10659_v57 = vld [vmem:[#allocation22_spill] sm:$0xff] }
 0x512   : > { %v4477_v13 = vmul.f32 0.02, %v4341_v25  ;;  %v4540_v17 = vmax.f32 %v4339_v1, %v4476_v11  ;;  %v4534_v20 = vmax.f32 %v4408_v55, %v4470_v27  ;;  %v4509_v1 = vmax.f32 %v9276_v56, %v9316_v28  ;;  %v9388_v27 = vpop.permute.xlu1 %4601 }
 0x513   : > { %v4479_v30 = vmul.f32 0.02, %v4414_v10  ;;  %v4542_v26 = vmax.f32 %v4412_v4, %v4478_v39  ;;  %v4526_v7 = vmax.f32 %v4402_v16, %v4462_v52  ;;  %v4569_v15 = vpack.c.bf16 %v4525_v21, %v4517_v5 }
 0x514   : > { %v4541_v53 = vmax.f32 %v4341_v25, %v4477_v13  ;;  %v4576_v12 = vpack.c.bf16 %v4540_v17, %v4532_v46  ;;  %v4436_v49 = vmul.f32 0.02, %v9294_v58  ;;  %v4516_v48 = vmax.f32 %v9288_v37, %v9324_v2  ;;  %v10648_v37 = vld [vmem:[#allocation63_spill] sm:$0xff]  ;;  %v10651_v2 = vld [vmem:[#allocation85_spill] sm:$0xff] }
 0x515   : > { %v4543_v8 = vmax.f32 %v4414_v10, %v4479_v30  ;;  %v4578_v61 = vpack.c.bf16 %v4542_v26, %v4534_v20  ;;  %v4511_v30 = vmax.f32 %v9285_v6, %v9321_v19  ;;  %v4428_v17 = vmul.f32 0.02, %v9270_v45  ;;  %v10647_v6 = vld [vmem:[#allocation7_spill] sm:$0xff]  ;;  %v10650_v19 = vld [vmem:[#allocation34_spill] sm:$0xff]  ;;  %v9386_v10 = vpop.permute.xlu0 %4596 }
 0x516   : > { %v4577_v50 = vpack.c.bf16 %v4541_v53, %v4533_v29  ;;  %v4571_v29 = vpack.c.bf16 %v4527_v38, %v4519_v54  ;;  %v4518_v46 = vmax.f32 %v4398_v42, %v4454_v43  ;;  %v4430_v21 = vmul.f32 0.02, %v9279_v63 }
 0x517   : > { %v4579_v62 = vpack.c.bf16 %v4543_v8, %v4535_v36  ;;  %v4438_v36 = vmul.f32 0.02, %v9297_v18  ;;  %v4501_v8 = vmax.f32 %v9258_v60, %v9303_v3  ;;  %v4503_v26 = vmax.f32 %v9261_v59, %v9306_v0  ;;  %v10649_v3 = vld [vmem:[#allocation8_spill] sm:$0xff] }
 0x518   : > { %4735 = vmatprep.subr.bf16.mxu0 %v4577_v50  ;;  %v4508_v56 = vmax.f32 %v9264_v51, %v9309_v44  ;;  %v4493_v38 = vmax.f32 %v9243_v34, %v9282_v35  ;;  %v4570_v60 = vpack.c.bf16 %v4526_v7, %v4518_v46  ;;  %v4420_v28 = vmul.f32 0.02, %v10649_v3  ;;  %v10652_v51 = vld [vmem:[#allocation23_spill] sm:$0xff]  ;;  %v10653_v44 = vld [vmem:[#allocation21_spill] sm:$0xff] }
 0x519   : > { %4788 = vmatprep.subr.bf16.mxu1 %v4579_v62  ;;  %4736 = vmatpush1.bf16.msra.mxu0 %v4576_v12  ;;  %v4568_v12 = vpack.c.bf16 %v4524_v32, %v4516_v48  ;;  %v4510_v62 = vmax.f32 %v10648_v37, %v10647_v6  ;;  %v4561_v43 = vpack.c.bf16 %v4509_v1, %v4501_v8  ;;  %v4422_v32 = vmul.f32 0.02, %v10652_v51  ;;  %v10655_v35 = vld [vmem:[#allocation25_spill] sm:$0xff]  ;;  %v9390_v5 = vpop.permute.xlu0 %4586  ;;  %v9395_v1 = vpop.permute.xlu1 %4591 }
 0x51a   : > { %4789 = vmatpush1.bf16.msra.mxu1 %v4578_v61  ;;  %4737 = vmatprep.subr.bf16.mxu0 %v4569_v15  ;;  %v4495_v14 = vmax.f32 %v10651_v2, %v10650_v19  ;;  %v4500_v59 = vmax.f32 %v9294_v58, %v4436_v49  ;;  %v4563_v0 = vpack.c.bf16 %v4511_v30, %v4503_v26 }
 0x51b   : > { %4790 = vmatprep.subr.bf16.mxu1 %v4571_v29  ;;  %v4485_v23 = vmax.f32 %v10654_v9, %v10653_v44  ;;  %v4502_v34 = vmax.f32 %v9297_v18, %v4438_v36  ;;  %v4487_v55 = vmax.f32 %v10656_v24, %v10655_v35  ;;  %v4492_v22 = vmax.f32 %v9270_v45, %v4428_v17  ;;  %v10657_v45 = vld [vmem:[#allocation26_spill] sm:$0xff] }
 0x51c   : > { %v4560_v16 = vpack.c.bf16 %v4508_v56, %v4500_v59  ;;  %v4494_v58 = vmax.f32 %v9279_v63, %v4430_v21  ;;  %v4484_v41 = vmax.f32 %v10649_v3, %v4420_v28  ;;  %v4486_v25 = vmax.f32 %v10652_v51, %v4422_v32 }
 0x51d   : > { %4738 = vmatpush1.bf16.msra.mxu0 %v4568_v12  ;;  %v4562_v4 = vpack.c.bf16 %v4510_v62, %v4502_v34  ;;  %v4553_v31 = vpack.c.bf16 %v4493_v38, %v4485_v23  ;;  %v4555_v11 = vpack.c.bf16 %v4495_v14, %v4487_v55  ;;  %v10658_v63 = vmov 0  }
 0x51e   : > { %4791 = vmatpush1.bf16.msra.mxu1 %v4570_v60  ;;  %4739 = vmatprep.subr.bf16.mxu0 %v4561_v43  ;;  %v4552_v18 = vpack.c.bf16 %v4492_v22, %v4484_v41  ;;  %v4554_v40 = vpack.c.bf16 %v4494_v58, %v4486_v25 }
 0x51f   : > { %4792 = vmatprep.subr.bf16.mxu1 %v4563_v0 }
 0x521   : > { %4740 = vmatpush1.bf16.msra.mxu0 %v4560_v16 }
 0x522   : > { %4793 = vmatpush1.bf16.msra.mxu1 %v4562_v4  ;;  %4741 = vmatprep.subr.bf16.mxu0 %v4553_v31 }
 0x523   : > { %4794 = vmatprep.subr.bf16.mxu1 %v4555_v11 }
 0x525   : > { %4742 = vmatpush1.bf16.msra.mxu0 %v4552_v18 }
 0x526   : > { %4795 = vmatpush1.bf16.msra.mxu1 %v4554_v40 }
 0x528   : > { %5450 = vmatmul.mubr.msk.bf16.vlgmr.msra.gmra.mxu0 %vm4614_vm0, %v10657_v45 }
 0x529   : > { %5452 = vmatmul.mubr.msk.bf16.vlgmr.msra.gmra.mxu1 %vm4614_vm0, %v10657_v45  ;;  %4769 = vmatprep.mubr.bf16.mxu0 %v10658_v63 }
 0x52a   : > { %4822 = vmatprep.mubr.bf16.mxu1 %v10658_v63 }
 0x530   : > { %5451 = vmatmul.mubr.msk.bf16.gmra.mxu0 %vm4614_vm0, %v10659_v57 }
 0x531   : > { %5453 = vmatmul.mubr.msk.bf16.gmra.mxu1 %vm4614_vm0, %v10659_v57  ;;  %4968 = vmatprep.mubr.bf16.mxu0 %v10658_v63 }
 0x532   : > { %5011 = vmatprep.mubr.bf16.mxu1 %v10658_v63 }
 0x5ac   : > { %v4655_v39 = vpop.f32.mrf.mxu0 }
 0x5ad   : > { %v4708_v42 = vpop.f32.mrf.mxu1  ;;  %v9393_v50 = vadd.f32 %v4655_v39, %v9390_v5 }
 0x5ae   : > { %v4657_v33 = vpop.f32.mrf.mxu0  ;;  %v4709_v44 = vadd.f32 %v4708_v42, %v9390_v5 }
 0x5af   : > { %v4710_v13 = vpop.f32.mrf.mxu1  ;;  %v4658_v7 = vadd.f32 %v4657_v33, %v9390_v5  ;;  %v4833_v17 = vmul.f32 0.02, %v9393_v50 }
 0x5b0   : > { %v4659_v47 = vpop.f32.mrf.mxu0  ;;  %v4711_v26 = vadd.f32 %v4710_v13, %v9390_v5  ;;  %v4835_v40 = vmul.f32 0.02, %v4709_v44 }
 0x5b1   : > { %v4712_v52 = vpop.f32.mrf.mxu1  ;;  %v4834_v21 = vmul.f32 0.02, %v4658_v7  ;;  %v4660_v6 = vadd.f32 %v4659_v47, %v9395_v1 }
 0x5b2   : > { %v4661_v53 = vpop.f32.mrf.mxu0  ;;  %v4713_v37 = vadd.f32 %v4712_v52, %v9395_v1  ;;  %v4836_v9 = vmul.f32 0.02, %v4711_v26 }
 0x5b3   : > { %v4714_v20 = vpop.f32.mrf.mxu1  ;;  %v4662_v15 = vadd.f32 %v4661_v53, %v9395_v1  ;;  %v4841_v35 = vmul.f32 0.02, %v4660_v6  ;;  %v4866_v45 = vmax.f32 %v4658_v7, %v4834_v21 }
 0x5b4   : > { %v4665_v54 = vpop.f32.mrf.mxu0  ;;  %v4715_v30 = vadd.f32 %v4714_v20, %v9395_v1  ;;  %v4843_v24 = vmul.f32 0.02, %v4713_v37  ;;  %v4868_v42 = vmax.f32 %v4711_v26, %v4836_v9 }
 0x5b5   : > { %v4718_v61 = vpop.f32.mrf.mxu1  ;;  %v4666_v36 = vadd.f32 %v4665_v54, %v9386_v10  ;;  %v4842_v62 = vmul.f32 0.02, %v4662_v15  ;;  %v4873_v33 = vmax.f32 %v4660_v6, %v4841_v35  ;;  %v4865_v54 = vmax.f32 %v9393_v50, %v4833_v17 }
 0x5b6   : > { %v4667_v49 = vpop.f32.mrf.mxu0  ;;  %v4719_v56 = vadd.f32 %v4718_v61, %v9386_v10  ;;  %v4844_v3 = vmul.f32 0.02, %v4715_v30  ;;  %v4875_v52 = vmax.f32 %v4713_v37, %v4843_v24 }
 0x5b7   : > { %v4668_v48 = vadd.f32 %v4667_v49, %v9386_v10  ;;  %v4720_v29 = vpop.f32.mrf.mxu1  ;;  %v4849_v59 = vmul.f32 0.02, %v4666_v36  ;;  %v4874_v16 = vmax.f32 %v4662_v15, %v4842_v62  ;;  %v4867_v15 = vmax.f32 %v4709_v44, %v4835_v40 }
 0x5b8   : > { %v4721_v8 = vadd.f32 %v4720_v29, %v9386_v10  ;;  %v4669_v46 = vpop.f32.mrf.mxu0  ;;  %v4851_v23 = vmul.f32 0.02, %v4719_v56  ;;  %v4876_v41 = vmax.f32 %v4715_v30, %v4844_v3  ;;  %v4899_v49 = vpack.c.bf16 %v4873_v33, %v4865_v54  ;;  %v9417_v30 = vld [vmem:[%s9527_s12] sm:$0xff]  }
 0x5b9   : > { %v4670_v12 = vadd.f32 %v4669_v46, %v9388_v27  ;;  %v4722_v38 = vpop.f32.mrf.mxu1  ;;  %v4850_v28 = vmul.f32 0.02, %v4668_v48  ;;  %v4881_v11 = vmax.f32 %v4666_v36, %v4849_v59  ;;  %v4900_v20 = vpack.c.bf16 %v4874_v16, %v4866_v45 }
 0x5ba   : > { %v4723_v60 = vadd.f32 %v4722_v38, %v9388_v27  ;;  %v4671_v43 = vpop.f32.mrf.mxu0  ;;  %v4852_v0 = vmul.f32 0.02, %v4721_v8  ;;  %v4883_v57 = vmax.f32 %v4719_v56, %v4851_v23  ;;  %v4902_v61 = vpack.c.bf16 %v4876_v41, %v4868_v42 }
 0x5bb   : > { %v4857_v19 = vmul.f32 0.02, %v4670_v12  ;;  %v4672_v2 = vadd.f32 %v4671_v43, %v9388_v27  ;;  %v4724_v14 = vpop.f32.mrf.mxu1  ;;  %v4882_v58 = vmax.f32 %v4668_v48, %v4850_v28  ;;  %v4901_v7 = vpack.c.bf16 %v4875_v52, %v4867_v15 }
 0x5bc   : > { %v4859_v51 = vmul.f32 0.02, %v4723_v60  ;;  %v4725_v32 = vadd.f32 %v4724_v14, %v9388_v27  ;;  %v4884_v25 = vmax.f32 %v4721_v8, %v4852_v0 }
 0x5bd   : > { %v4858_v34 = vmul.f32 0.02, %v4672_v2  ;;  %v4889_v55 = vmax.f32 %v4670_v12, %v4857_v19 }
 0x5be   : > { %v4860_v22 = vmul.f32 0.02, %v4725_v32  ;;  %v4891_v4 = vmax.f32 %v4723_v60, %v4859_v51 }
 0x5bf   : > { %v4890_v31 = vmax.f32 %v4672_v2, %v4858_v34  ;;  %v4907_v13 = vpack.c.bf16 %v4889_v55, %v4881_v11 }
 0x5c0   : > { %v4892_v18 = vmax.f32 %v4725_v32, %v4860_v22  ;;  %v4909_v53 = vpack.c.bf16 %v4891_v4, %v4883_v57 }
 0x5c1   : > { %v4908_v39 = vpack.c.bf16 %v4890_v31, %v4882_v58 }
 0x5c2   : > { %v4910_v47 = vpack.c.bf16 %v4892_v18, %v4884_v25 }
 0x5c3   : > { %4948 = vmatprep.subr.bf16.mxu0 %v4908_v39 }
 0x5c4   : > { %4991 = vmatprep.subr.bf16.mxu1 %v4910_v47  ;;  %4949 = vmatpush1.bf16.msra.mxu0 %v4907_v13 }
 0x5c5   : > { %4992 = vmatpush1.bf16.msra.mxu1 %v4909_v53  ;;  %4950 = vmatprep.subr.bf16.mxu0 %v4900_v20 }
 0x5c6   : > { %4993 = vmatprep.subr.bf16.mxu1 %v4902_v61 }
 0x5c8   : > { %4951 = vmatpush1.bf16.msra.mxu0 %v4899_v49 }
 0x5c9   : > { %4994 = vmatpush1.bf16.msra.mxu1 %v4901_v7 }
 0x5cb   : > { %5455 = vmatmul.mubr.msk.bf16.vlgmr.msra.gmra.mxu0 %vm4932_vm1, %v9417_v30 }
 0x5cc   : > { %5456 = vmatmul.mubr.msk.bf16.vlgmr.msra.gmra.mxu1 %vm4932_vm1, %v9417_v30  ;;  %5054 = vmatprep.mubr.bf16.mxu0 %v10658_v63 }
 0x5cd   : > { %5097 = vmatprep.mubr.bf16.mxu1 %v10658_v63 }
 0x5e8   : > { %v4761_v50 = vpop.f32.mrf.mxu0 }
 0x5e9   : > { %v4814_v48 = vpop.f32.mrf.mxu1  ;;  %v9426_v26 = vadd.f32 %v4761_v50, %v9390_v5 }
 0x5ea   : > { %v4763_v29 = vpop.f32.mrf.mxu0  ;;  %v4815_v41 = vadd.f32 %v4814_v48, %v9390_v5 }
 0x5eb   : > { %v4816_v17 = vpop.f32.mrf.mxu1  ;;  %v4764_v12 = vadd.f32 %v4763_v29, %v9390_v5  ;;  %v4837_v43 = vmul.f32 0.02, %v9426_v26 }
 0x5ec   : > { %v4765_v36 = vpop.f32.mrf.mxu0  ;;  %v4817_v14 = vadd.f32 %v4816_v17, %v9390_v5  ;;  %v4839_v54 = vmul.f32 0.02, %v4815_v41 }
 0x5ed   : > { %v4818_v8 = vpop.f32.mrf.mxu1  ;;  %v4838_v2 = vmul.f32 0.02, %v4764_v12  ;;  %v4766_v32 = vadd.f32 %v4765_v36, %v9395_v1  ;;  %v4869_v36 = vmax.f32 %v9426_v26, %v4837_v43  ;;  %v9449_v43 = vpop.permute.xlu1 %4924 }
 0x5ee   : > { %v4767_v46 = vpop.f32.mrf.mxu0  ;;  %v4819_v44 = vadd.f32 %v4818_v8, %v9395_v1  ;;  %v4840_v11 = vmul.f32 0.02, %v4817_v14 }
 0x5ef   : > { %v4820_v21 = vpop.f32.mrf.mxu1  ;;  %v4768_v6 = vadd.f32 %v4767_v46, %v9395_v1  ;;  %v4845_v18 = vmul.f32 0.02, %v4766_v32  ;;  %v4870_v61 = vmax.f32 %v4764_v12, %v4838_v2  ;;  %v4871_v46 = vmax.f32 %v4815_v41, %v4839_v54 }
 0x5f0   : > { %v4771_v56 = vpop.f32.mrf.mxu0  ;;  %v4821_v63 = vadd.f32 %v4820_v21, %v9395_v1  ;;  %v4847_v40 = vmul.f32 0.02, %v4819_v44  ;;  %v4872_v5 = vmax.f32 %v4817_v14, %v4840_v11 }
 0x5f1   : > { %v4824_v38 = vpop.f32.mrf.mxu1  ;;  %v4772_v3 = vadd.f32 %v4771_v56, %v9386_v10  ;;  %v4846_v9 = vmul.f32 0.02, %v4768_v6  ;;  %v4877_v49 = vmax.f32 %v4766_v32, %v4845_v18 }
 0x5f2   : > { %v4773_v37 = vpop.f32.mrf.mxu0  ;;  %v4825_v59 = vadd.f32 %v4824_v38, %v9386_v10  ;;  %v4848_v35 = vmul.f32 0.02, %v4821_v63  ;;  %v4879_v48 = vmax.f32 %v4819_v44, %v4847_v40 }
 0x5f3   : > { %v4774_v62 = vadd.f32 %v4773_v37, %v9386_v10  ;;  %v4826_v60 = vpop.f32.mrf.mxu1  ;;  %v4853_v58 = vmul.f32 0.02, %v4772_v3  ;;  %v4878_v39 = vmax.f32 %v4768_v6, %v4846_v9  ;;  %v4903_v21 = vpack.c.bf16 %v4877_v49, %v4869_v36 }
 0x5f4   : > { %v4827_v28 = vadd.f32 %v4826_v60, %v9386_v10  ;;  %v4775_v19 = vpop.f32.mrf.mxu0  ;;  %v4855_v25 = vmul.f32 0.02, %v4825_v59  ;;  %v4880_v47 = vmax.f32 %v4821_v63, %v4848_v35  ;;  %v4905_v56 = vpack.c.bf16 %v4879_v48, %v4871_v46 }
 0x5f5   : > { %v4776_v0 = vadd.f32 %v4775_v19, %v9388_v27  ;;  %v4828_v51 = vpop.f32.mrf.mxu1  ;;  %v4854_v24 = vmul.f32 0.02, %v4774_v62  ;;  %v4885_v52 = vmax.f32 %v4772_v3, %v4853_v58  ;;  %v4904_v17 = vpack.c.bf16 %v4878_v39, %v4870_v61 }
 0x5f6   : > { %v4829_v23 = vadd.f32 %v4828_v51, %v9388_v27  ;;  %v4777_v34 = vpop.f32.mrf.mxu0  ;;  %v4856_v4 = vmul.f32 0.02, %v4827_v28  ;;  %v4906_v8 = vpack.c.bf16 %v4880_v47, %v4872_v5 }
 0x5f7   : > { %v4861_v55 = vmul.f32 0.02, %v4776_v0  ;;  %v4778_v22 = vadd.f32 %v4777_v34, %v9388_v27  ;;  %v4830_v16 = vpop.f32.mrf.mxu1  ;;  %v4886_v42 = vmax.f32 %v4774_v62, %v4854_v24 }
 0x5f8   : > { %v4863_v10 = vmul.f32 0.02, %v4829_v23  ;;  %v4831_v31 = vadd.f32 %v4830_v16, %v9388_v27  ;;  %v4888_v53 = vmax.f32 %v4827_v28, %v4856_v4  ;;  %v4887_v27 = vmax.f32 %v4825_v59, %v4855_v25  ;;  %v9452_v28 = vpop.permute.xlu0 %4919 }
 0x5f9   : > { %v4862_v1 = vmul.f32 0.02, %v4778_v22  ;;  %v4893_v45 = vmax.f32 %v4776_v0, %v4861_v55 }
 0x5fa   : > { %v4864_v57 = vmul.f32 0.02, %v4831_v31  ;;  %v4895_v33 = vmax.f32 %v4829_v23, %v4863_v10  ;;  %v9461_v10 = vpop.permute.xlu1 %5149 }
 0x5fb   : > { %v4894_v13 = vmax.f32 %v4778_v22, %v4862_v1  ;;  %v4911_v7 = vpack.c.bf16 %v4893_v45, %v4885_v52 }
 0x5fc   : > { %v4896_v20 = vmax.f32 %v4831_v31, %v4864_v57  ;;  %v4913_v29 = vpack.c.bf16 %v4895_v33, %v4887_v27  ;;  %v9464_v1 = vpop.permute.xlu0 %5144 }
 0x5fd   : > { %v4912_v15 = vpack.c.bf16 %v4894_v13, %v4886_v42 }
 0x5fe   : > { %v4914_v50 = vpack.c.bf16 %v4896_v20, %v4888_v53 }
 0x5ff   : > { %5034 = vmatprep.subr.bf16.mxu0 %v4912_v15 }
 0x600   : > { %5077 = vmatprep.subr.bf16.mxu1 %v4914_v50  ;;  %5035 = vmatpush1.bf16.msra.mxu0 %v4911_v7 }
 0x601   : > { %5078 = vmatpush1.bf16.msra.mxu1 %v4913_v29  ;;  %5036 = vmatprep.subr.bf16.mxu0 %v4904_v17 }
 0x602   : > { %5079 = vmatprep.subr.bf16.mxu1 %v4906_v8 }
 0x604   : > { %5037 = vmatpush1.bf16.msra.mxu0 %v4903_v21 }
 0x605   : > { %5080 = vmatpush1.bf16.msra.mxu1 %v4905_v56 }
 0x607   : > { %5457 = vmatmul.mubr.msk.bf16.vlgmr.msra.gmra.mxu0 %vm4932_vm1, %v9417_v30 }
 0x608   : > { %5458 = vmatmul.mubr.msk.bf16.vlgmr.msra.gmra.mxu1 %vm4932_vm1, %v9417_v30 }
 0x68b   : > { %v4970_v12 = vpop.f32.mrf.mxu0 }
 0x68c   : > { %v5013_v38 = vpop.f32.mrf.mxu1  ;;  %v4971_v0 = vadd.f32 %v4970_v12, %v9452_v28 }
 0x68d   : > { %v4972_v26 = vpop.f32.mrf.mxu0  ;;  %v5014_v32 = vadd.f32 %v5013_v38, %v9452_v28 }
 0x68e   : > { %v5015_v6 = vpop.f32.mrf.mxu1  ;;  %v4973_v2 = vadd.f32 %v4972_v26, %v9452_v28  ;;  %v5108_v24 = vmul.f32 0.02, %v4971_v0 }
 0x68f   : > { %v4974_v37 = vpop.f32.mrf.mxu0  ;;  %v5016_v14 = vadd.f32 %v5015_v6, %v9452_v28  ;;  %v5110_v22 = vmul.f32 0.02, %v5014_v32  ;;  %v5228_v6 = vpop.permute.xlu0 %5227 }
 0x690   : > { %v5017_v63 = vpop.f32.mrf.mxu1  ;;  %v4975_v30 = vadd.f32 %v4974_v37, %v9449_v43  ;;  %v5109_v9 = vmul.f32 0.02, %v4973_v2  ;;  %v5124_v11 = vmax.f32 %v4971_v0, %v5108_v24 }
 0x691   : > { %v4976_v62 = vpop.f32.mrf.mxu0  ;;  %v5018_v59 = vadd.f32 %v5017_v63, %v9449_v43  ;;  %v5111_v34 = vmul.f32 0.02, %v5016_v14  ;;  %v5126_v18 = vmax.f32 %v5014_v32, %v5110_v22  ;;  %v10660_v32 = vld [vmem:[#allocation5_spill] sm:$0xff] }
 0x692   : > { %v5019_v60 = vpop.f32.mrf.mxu1  ;;  %v4977_v3 = vadd.f32 %v4976_v62, %v9449_v43  ;;  %v5116_v23 = vmul.f32 0.02, %v4975_v30  ;;  %v5125_v58 = vmax.f32 %v4973_v2, %v5109_v9  ;;  %v5152_v33 = vmul.f32 %v9464_v1, %v5124_v11 }
 0x693   : > { %v5020_v19 = vadd.f32 %v5019_v60, %v9449_v43  ;;  %v5118_v35 = vmul.f32 0.02, %v5018_v59  ;;  %v5127_v31 = vmax.f32 %v5016_v14, %v5111_v34  ;;  %v5154_v47 = vmul.f32 %v9464_v1, %v5126_v18 }
 0x694   : > { %v5117_v51 = vmul.f32 0.02, %v4977_v3  ;;  %v5132_v4 = vmax.f32 %v4975_v30, %v5116_v23  ;;  %v5153_v45 = vmul.f32 %v9464_v1, %v5125_v58 }
 0x695   : > { %v5119_v44 = vmul.f32 0.02, %v5020_v19  ;;  %v5134_v41 = vmax.f32 %v5018_v59, %v5118_v35  ;;  %v5155_v39 = vmul.f32 %v9464_v1, %v5127_v31 }
 0x696   : > { %v5133_v55 = vmax.f32 %v4977_v3, %v5117_v51  ;;  %v5160_v57 = vmul.f32 %v9461_v10, %v5132_v4 }
 0x697   : > { %v5135_v16 = vmax.f32 %v5020_v19, %v5119_v44  ;;  %v5162_v42 = vmul.f32 %v9461_v10, %v5134_v41  ;;  %v9479_v44 = vrot.slane %v5228_v6, %v10660_v32 }
 0x698   : > { %v5161_v25 = vmul.f32 %v9461_v10, %v5133_v55  ;;  %v5168_v53 = vadd.f32 %v5160_v57, %v5152_v33 }
 0x699   : > { %v5163_v40 = vmul.f32 %v9461_v10, %v5135_v16  ;;  %v5182_v20 = vadd.f32 %v5162_v42, %v5154_v47 }
 0x69a   : > { %v5175_v13 = vadd.f32 %v5161_v25, %v5153_v45  ;;  %v5169_v27 = vrot.slane %v5168_v53, 4 }
 0x69b   : > { %v5189_v52 = vadd.f32 %v5163_v40, %v5155_v39  ;;  %v5183_v15 = vrot.slane %v5182_v20, 4 }
 0x69c   : > { %v5176_v54 = vrot.slane %v5175_v13, 4  ;;  %v5170_v7 = vadd.f32 %v5169_v27, %v5168_v53 }
 0x69d   : > { %v5190_v61 = vrot.slane %v5189_v52, 4  ;;  %v5184_v50 = vadd.f32 %v5183_v15, %v5182_v20 }
 0x69e   : > { %v5177_v5 = vadd.f32 %v5176_v54, %v5175_v13  ;;  %v5171_v17 = vrot.slane %v5170_v7, 2 }
 0x69f   : > { %v5191_v49 = vadd.f32 %v5190_v61, %v5189_v52  ;;  %v5185_v36 = vrot.slane %v5184_v50, 2 }
 0x6a0   : > { %v5178_v48 = vrot.slane %v5177_v5, 2  ;;  %v5172_v37 = vadd.f32 %v5171_v17, %v5170_v7 }
 0x6a1   : > { %v5192_v29 = vrot.slane %v5191_v49, 2  ;;  %v5186_v3 = vadd.f32 %v5185_v36, %v5184_v50 }
 0x6a2   : > { %v5179_v46 = vadd.f32 %v5178_v48, %v5177_v5  ;;  %v5173_v24 = vrot.slane %v5172_v37, 1 }
 0x6a3   : > { %v5193_v12 = vadd.f32 %v5192_v29, %v5191_v49  ;;  %v5187_v58 = vrot.slane %v5186_v3, 1 }
 0x6a4   : > { %v5180_v14 = vrot.slane %v5179_v46, 1  ;;  %v5174_v33 = vadd.f32 %v5173_v24, %v5172_v37  ;;  %v5546_v24 = vmov 1966171168  }
 0x6a5   : > { %v5194_v9 = vrot.slane %v5193_v12, 1  ;;  %v5188_v53 = vadd.f32 %v5187_v58, %v5186_v3 }
 0x6a6   : > { %v5181_v11 = vadd.f32 %v5180_v14, %v5179_v46  ;;  %v5234_v36 = vadd.f32 %v9479_v44, %v5174_v33 }
 0x6a7   : > { %v5195_v45 = vadd.f32 %v5194_v9, %v5193_v12 }
 0x6a8   : > { %v5235_v61 = vadd.f32 %v9479_v44, %v5181_v11 }
 0x6a9   : > { %v5237_v49 = vadd.f32 %v9479_v44, %v5195_v45 }
 0x6c7   : > { %v5056_v8 = vpop.f32.mrf.mxu0 }
 0x6c8   : > { %v5057_v21 = vadd.f32 %v5056_v8, %v9452_v28  ;;  %v5099_v56 = vpop.f32.mrf.mxu1  ;;  %v5236_v8 = vadd.f32 %v9479_v44, %v5188_v53 }
 0x6c9   : > { %v5100_v38 = vadd.f32 %v5099_v56, %v9452_v28  ;;  %v5058_v26 = vpop.f32.mrf.mxu0 }
 0x6ca   : > { %v5112_v63 = vmul.f32 0.02, %v5057_v21  ;;  %v5059_v62 = vadd.f32 %v5058_v26, %v9452_v28  ;;  %v5101_v60 = vpop.f32.mrf.mxu1  ;;  %v5245_v26 = vmul.f32 0.01, %v5237_v49 }
 0x6cb   : > { %v5114_v19 = vmul.f32 0.02, %v5100_v38  ;;  %v5102_v2 = vadd.f32 %v5101_v60, %v9452_v28  ;;  %v5060_v30 = vpop.f32.mrf.mxu0  ;;  %v5244_v60 = vmul.f32 0.01, %v5236_v8 }
 0x6cc   : > { %v5113_v59 = vmul.f32 0.02, %v5059_v62  ;;  %v5061_v0 = vadd.f32 %v5060_v30, %v9449_v43  ;;  %v5103_v51 = vpop.f32.mrf.mxu1  ;;  %v5128_v55 = vmax.f32 %v5057_v21, %v5112_v63  ;;  %v5253_v14 = vadd.f32 0.99, %v5245_v26 }
 0x6cd   : > { %v5115_v23 = vmul.f32 0.02, %v5102_v2  ;;  %v5104_v34 = vadd.f32 %v5103_v51, %v9449_v43  ;;  %v5062_v35 = vpop.f32.mrf.mxu0  ;;  %v5130_v4 = vmax.f32 %v5100_v38, %v5114_v19  ;;  %v5243_v38 = vmul.f32 0.01, %v5235_v61 }
 0x6ce   : > { %v5120_v22 = vmul.f32 0.02, %v5061_v0  ;;  %v5063_v16 = vadd.f32 %v5062_v35, %v9449_v43  ;;  %v5105_v28 = vpop.f32.mrf.mxu1  ;;  %v5129_v25 = vmax.f32 %v5059_v62, %v5113_v59  ;;  %v5156_v13 = vmul.f32 %v9464_v1, %v5128_v55 }
 0x6cf   : > { %v5122_v31 = vmul.f32 0.02, %v5104_v34  ;;  %v5106_v41 = vadd.f32 %v5105_v28, %v9449_v43  ;;  %v5131_v57 = vmax.f32 %v5102_v2, %v5115_v23  ;;  %v5158_v20 = vmul.f32 %v9464_v1, %v5130_v4 }
 0x6d0   : > { %v5136_v18 = vmax.f32 %v5061_v0, %v5120_v22  ;;  %v5121_v40 = vmul.f32 0.02, %v5063_v16  ;;  %v5157_v27 = vmul.f32 %v9464_v1, %v5129_v25  ;;  %v5251_v30 = vadd.f32 0.99, %v5243_v38 }
 0x6d1   : > { %v5138_v39 = vmax.f32 %v5104_v34, %v5122_v31  ;;  %v5123_v42 = vmul.f32 0.02, %v5106_v41  ;;  %v5159_v7 = vmul.f32 %v9464_v1, %v5131_v57  ;;  %v5242_v1 = vmul.f32 0.01, %v5234_v36 }
 0x6d2   : > { %v5164_v47 = vmul.f32 %v9461_v10, %v5136_v18  ;;  %v5137_v52 = vmax.f32 %v5063_v16, %v5121_v40  ;;  %v5252_v23 = vadd.f32 0.99, %v5244_v60  ;;  %v5287_v55 = vunpack.c.l.s4 %v5546_v24 }
 0x6d3   : > { %v5166_v54 = vmul.f32 %v9461_v10, %v5138_v39  ;;  %v5139_v43 = vmax.f32 %v5106_v41, %v5123_v42  ;;  %v5250_v9 = vadd.f32 0.99, %v5242_v1  ;;  %v5259_v28 = vmin.f32 %v5235_v61, %v5251_v30 }
 0x6d4   : > { %v5196_v15 = vadd.f32 %v5164_v47, %v5156_v13  ;;  %v5165_v5 = vmul.f32 %v9461_v10, %v5137_v52  ;;  %v5261_v58 = vmin.f32 %v5237_v49, %v5253_v14  ;;  %v5260_v18 = vmin.f32 %v5236_v8, %v5252_v23 }
 0x6d5   : > { %v5210_v50 = vadd.f32 %v5166_v54, %v5158_v20  ;;  %v5167_v48 = vmul.f32 %v9461_v10, %v5139_v43  ;;  %v5258_v25 = vmin.f32 %v5234_v36, %v5250_v9  ;;  %v5288_v57 = vunpack.c.0.s8 %v5287_v55 }
 0x6d6   : > { %v5197_v29 = vrot.slane %v5196_v15, 4  ;;  %v5203_v17 = vadd.f32 %v5165_v5, %v5157_v27  ;;  %v5267_v33 = vmax.f32 %v5259_v28, %v5243_v38  ;;  %v5269_v13 = vmax.f32 %v5261_v58, %v5245_v26 }
 0x6d7   : > { %v5211_v46 = vrot.slane %v5210_v50, 4  ;;  %v5217_v21 = vadd.f32 %v5167_v48, %v5159_v7  ;;  %v5266_v54 = vmax.f32 %v5258_v25, %v5242_v1  ;;  %v5268_v43 = vmax.f32 %v5260_v18, %v5244_v60 }
 0x6d8   : > { %v5198_v56 = vadd.f32 %v5197_v29, %v5196_v15  ;;  %v5204_v12 = vrot.slane %v5203_v17, 4  ;;  %v10661_v15 = vld [vmem:[#allocation4_spill] sm:$0xff] }
 0x6d9   : > { %v5212_v6 = vadd.f32 %v5211_v46, %v5210_v50  ;;  %v5218_v37 = vrot.slane %v5217_v21, 4  ;;  %v5291_v5 = vsub.s32 %v5288_v57, %v10661_v15  ;;  %v5282_v50 = vcombine.low %v5266_v54, %v5267_v33 }
 0x6da   : > { %v5199_v63 = vrot.slane %v5198_v56, 2  ;;  %v5205_v62 = vadd.f32 %v5204_v12, %v5203_v17  ;;  %v5283_v48 = vcombine.low %v5268_v43, %v5269_v13 }
 0x6db   : > { %v5213_v3 = vrot.slane %v5212_v6, 2  ;;  %v5219_v10 = vadd.f32 %v5218_v37, %v5217_v21 }
 0x6dc   : > { %v5200_v19 = vadd.f32 %v5199_v63, %v5198_v56  ;;  %v5206_v2 = vrot.slane %v5205_v62, 2  ;;  %v5299_v56 = vrot.slane %v5283_v48, %v5291_v5 }
 0x6dd   : > { %v5214_v59 = vadd.f32 %v5213_v3, %v5212_v6  ;;  %v5220_v0 = vrot.slane %v5219_v10, 2 }
 0x6de   : > { %v5201_v51 = vrot.slane %v5200_v19, 1  ;;  %v5207_v32 = vadd.f32 %v5206_v2, %v5205_v62 }
 0x6df   : > { %v5215_v34 = vrot.slane %v5214_v59, 1  ;;  %v5221_v35 = vadd.f32 %v5220_v0, %v5219_v10 }
 0x6e0   : > { %v5202_v22 = vadd.f32 %v5201_v51, %v5200_v19  ;;  %v5208_v16 = vrot.slane %v5207_v32, 1 }
 0x6e1   : > { %v5216_v4 = vadd.f32 %v5215_v34, %v5214_v59  ;;  %v5222_v31 = vrot.slane %v5221_v35, 1 }
 0x6e2   : > { %v5238_v41 = vadd.f32 %v9479_v44, %v5202_v22  ;;  %v5209_v11 = vadd.f32 %v5208_v16, %v5207_v32 }
 0x6e3   : > { %v5240_v40 = vadd.f32 %v9479_v44, %v5216_v4  ;;  %v5223_v45 = vadd.f32 %v5222_v31, %v5221_v35 }
 0x6e4   : > { %v5246_v39 = vmul.f32 0.01, %v5238_v41  ;;  %v5239_v42 = vadd.f32 %v9479_v44, %v5209_v11 }
 0x6e5   : > { %v5248_v47 = vmul.f32 0.01, %v5240_v40  ;;  %v5241_v52 = vadd.f32 %v9479_v44, %v5223_v45  ;;  %v5292_v44 = vrot.slane %v5282_v50, %v5291_v5 }
 0x6e6   : > { %v5254_v53 = vadd.f32 0.99, %v5246_v39  ;;  %v5247_v20 = vmul.f32 0.01, %v5239_v42 }
 0x6e7   : > { %v5256_v61 = vadd.f32 0.99, %v5248_v47  ;;  %v5249_v27 = vmul.f32 0.01, %v5241_v52  ;;  %v5314_v63 = vcombine.low %v5292_v44, %v5299_v56 }
 0x6e8   : > { %v5262_v49 = vmin.f32 %v5238_v41, %v5254_v53  ;;  %v5255_v7 = vadd.f32 0.99, %v5247_v20 }
 0x6e9   : > { %v5264_v29 = vmin.f32 %v5240_v40, %v5256_v61  ;;  %v5257_v17 = vadd.f32 0.99, %v5249_v27  ;;  %v5322_v60 = vrot.slane %v5314_v63, %v5291_v5 }
 0x6ea   : > { %v5263_v36 = vmin.f32 %v5239_v42, %v5255_v7  ;;  %v5270_v46 = vmax.f32 %v5262_v49, %v5246_v39 }
 0x6eb   : > { %v5265_v8 = vmin.f32 %v5241_v52, %v5257_v17  ;;  %v5272_v12 = vmax.f32 %v5264_v29, %v5248_v47 }
 0x6ec   : > { %v5271_v21 = vmax.f32 %v5263_v36, %v5247_v20 }
 0x6ed   : > { %v5273_v38 = vmax.f32 %v5265_v8, %v5249_v27 }
 0x6ee   : > { %v5284_v26 = vcombine.low %v5270_v46, %v5271_v21 }
 0x6ef   : > { %v5285_v6 = vcombine.low %v5272_v12, %v5273_v38 }
 0x6f0   : > { %v5306_v37 = vrot.slane %v5284_v26, %v5291_v5 }
 0x6f1   : > { %v5313_v62 = vrot.slane %v5285_v6, %v5291_v5 }
 0x6f3   : > { %v5315_v1 = vcombine.low %v5306_v37, %v5313_v62 }
 0x6f5   : > { %v5329_v3 = vrot.slane %v5315_v1, %v5291_v5 }
 0x6f7   : > { %v5330_v10 = vcombine.low %v5322_v60, %v5329_v3 }
 0x6f9   : > { %5332 = vst [vmem:[%s690_s23] sm:$0xff] %v5330_v10 }
 0x6fa PF: > { %p25_p9 = scmp.ge.s32.totalorder %s5652_s26, 4   ;;  %s10662_s23 = smov %s5539_s24 }
 0x6fb   : > { %s10663_s24 = smov %s5661_s29  ;;  %s10664_s25 = smov %s5652_s26 }
 0x6fc   :  { %27 = sbr.rel (!%p25_p9) target bundleno = 5 (0x5), region = 148 }

</bundles_post_ra>
